<compile_context>
chip_gen: v7x
topology: tpu7x:2x2x1
jax: 0.10.0
libtpu: 0.0.40
codegen_flags: <defaults>
</compile_context>

<pallas_src>
import functools

import jax
import jax.numpy as jnp
import numpy as np
from jax import lax
from jax.experimental import pallas as pl
from jax.experimental.pallas import tpu as pltpu

EPS = 1e-5  # PyTorch GroupNorm default eps


# ----------------------------------------------------------------------------
# Fused kernel: one (direction, time-chunk) grid step.
# ----------------------------------------------------------------------------
def _bcrnn_chunk_kernel(x_ref, w_ref, gamma_ref, beta_ref, mask_ref,
                        out_ref, h_ref, *, nb, nx, ny, k, t_chunk):
    """
    x_ref   : (t_chunk, nc_p, L)      input chunk, batch folded into lanes
    w_ref   : (2*nh, k*k*(nh+nc_p))   block-diagonal fused conv weights
    gamma_ref, beta_ref : (2*nh, 1)   stacked GN affine [i2h ; h2h]
    mask_ref: (k*k, 1, L)             zero-padding border masks per tap
    out_ref : (t_chunk, nh, L)        hidden states for this chunk
    h_ref   : (nh, L)                 recurrent state (VMEM scratch, persists)
    """
    npix = nx * ny
    L = nb * npix
    nh = h_ref.shape[0]
    r = k // 2
    d = pl.program_id(0)                      # 0 = forward, 1 = backward sweep

    # Reset the recurrent state at the first time-chunk of each direction.
    @pl.when(pl.program_id(1) == 0)
    def _():
        h_ref[...] = jnp.zeros_like(h_ref)

    # Grid-invariant operands: load once per grid step, reuse for all steps.
    w = w_ref[...]
    gamma = gamma_ref[...]
    beta = beta_ref[...]
    inv_n = 1.0 / float(npix)

    def step(tau):
        # ---- stacked, shifted conv RHS: 9 rolls of [h ; x_pad] -------------
        xh = jnp.concatenate([h_ref[...], x_ref[tau]], axis=0)   # (cin_p, L)
        pieces = []
        for dy in range(k):
            for dx in range(k):
                s = (dy - r) * ny + (dx - r)          # flat-pixel tap offset
                shift = (-s) % L
                xs = pltpu.roll(xh, shift, 1) if shift else xh
                if not (dy == r and dx == r):         # center tap: no mask
                    # mask on the INPUT stack: zeroes wrapped-around pixels
                    # (also makes the batch fold safe across image seams)
                    xs = xs * mask_ref[dy * k + dx]
                pieces.append(xs)
        stack = jnp.concatenate(pieces, axis=0)       # (k*k*cin_p, L)

        # ---- ONE MXU matmul for both convolutions --------------------------
        # rows [0, nh) -> conv_i2h,  rows [nh, 2nh) -> conv_h2h
        conv = jnp.dot(w, stack, preferred_element_type=jnp.float32)

        # ---- GroupNorm (groups == channels) + fused affine + ReLU ----------
        # Stats per (batch, channel) over that image's pixels: batch segments
        # are aligned static lane slices of width npix.  Single-pass stats;
        # the conv bias cancels under the mean subtraction, so it is dropped.
        h_pieces = []
        for b in range(nb):
            seg = conv[:, b * npix:(b + 1) * npix]    # (2nh, npix) aligned
            mean = jnp.sum(seg, axis=1, keepdims=True) * inv_n
            ex2 = jnp.sum(seg * seg, axis=1, keepdims=True) * inv_n
            var = ex2 - mean * mean
            scale = gamma * lax.rsqrt(var + EPS)
            y = seg * scale + (beta - mean * scale)
            h_pieces.append(jnp.maximum(y[:nh] + y[nh:], 0.0))
        h_new = h_pieces[0] if nb == 1 else jnp.concatenate(h_pieces, axis=1)

        h_ref[...] = h_new          # carry to next timestep / next chunk
        out_ref[tau] = h_new        # lane-dense full-width store

    # Static in-chunk time order per direction (all ref indices stay static).
    @pl.when(d == 0)
    def _fwd():
        for tau in range(t_chunk):
            step(tau)

    @pl.when(d == 1)
    def _bwd():
        for tau in range(t_chunk - 1, -1, -1):
            step(tau)


# ----------------------------------------------------------------------------
# Wrapper: layout plumbing only (one transpose/pad of x, static masks/weights).
# ----------------------------------------------------------------------------
def _border_masks(nx, ny, k, nb):
    """(k*k, 1, nb*nx*ny) f32: 1 where the tap's source pixel lies inside the
    image (zero padding), tiled over the batch images folded into lanes."""
    npix = nx * ny
    p = np.arange(npix)
    px, py = p // ny, p % ny
    r = k // 2
    rows = []
    for dy in range(k):
        for dx in range(k):
            ox, oy = dy - r, dx - r
            ok = (px + ox >= 0) & (px + ox < nx) & (py + oy >= 0) & (py + oy < ny)
            rows.append(ok.astype(np.float32))
    m = np.stack(rows)[:, None, :]                    # (k*k, 1, npix)
    return jnp.asarray(np.tile(m, (1, 1, nb)))        # (k*k, 1, nb*npix)


def bcrnn_forward(x, params, hidden_size, t_chunk_cap=4):
    nt, nb, nc, nx, ny = x.shape
    nh = hidden_size
    npix = nx * ny
    L = nb * npix
    k = params["k"]
    nc_p = params["nc_p"]

    # Fold batch into lanes; zero-pad x channels to a sublane multiple so all
    # in-kernel concatenates stay 8-row aligned.
    x_r = jnp.transpose(x, (0, 2, 1, 3, 4)).reshape(nt, nc, L).astype(jnp.float32)
    if nc_p > nc:
        x_r = jnp.pad(x_r, ((0, 0), (0, nc_p - nc), (0, 0)))
    masks = _border_masks(nx, ny, k, nb)

    # Time chunk: largest divisor of nt not above the cap (amortizes per-grid-
    # step overhead).  Size the cap against VMEM (double-buffered x + out
    # chunks) at large nx*ny — v7x's 64 MiB ceiling wants a smaller chunk.
    t_chunk = 1
    for c in range(min(nt, t_chunk_cap), 0, -1):
        if nt % c == 0:
            t_chunk = c
            break
    ntc = nt // t_chunk

    kern = functools.partial(_bcrnn_chunk_kernel, nb=nb, nx=nx, ny=ny, k=k,
                             t_chunk=t_chunk)

    def x_map(dd, cc):
        return (cc + dd * (ntc - 1 - 2 * cc), 0, 0)   # fwd: cc, bwd: ntc-1-cc

    def o_map(dd, cc):
        return (dd, cc + dd * (ntc - 1 - 2 * cc), 0, 0)

    const2 = lambda dd, cc: (0, 0)
    const3 = lambda dd, cc: (0, 0, 0)

    out = pl.pallas_call(
        kern,
        out_shape=jax.ShapeDtypeStruct((2, nt, nh, L), jnp.float32),
        grid=(2, ntc),
        in_specs=[
            pl.BlockSpec((t_chunk, nc_p, L), x_map),              # x chunk
            pl.BlockSpec((2 * nh, k * k * (nh + nc_p)), const2),  # fused W
            pl.BlockSpec((2 * nh, 1), const2),                    # GN gamma
            pl.BlockSpec((2 * nh, 1), const2),                    # GN beta
            pl.BlockSpec((k * k, 1, L), const3),                  # border masks
        ],
        out_specs=pl.BlockSpec((None, t_chunk, nh, L), o_map),
        scratch_shapes=[pltpu.VMEM((nh, L), jnp.float32)],        # hidden state
        compiler_params=pltpu.CompilerParams(
            dimension_semantics=("parallel", "arbitrary")),
    )(x_r, params["w_lhs"], params["gamma2"], params["beta2"], masks)

    # TODO(synk): fuse this directional sum in-kernel when nt*nh*L fits VMEM.
    o = out[0] + out[1]                                           # (nt, nh, L)
    o = o.reshape(nt, nh, nb, nx, ny).transpose(0, 2, 1, 3, 4)
    o = o.reshape(nt * nb, nh, nx, ny)
    if nb == 1:
        o = o.reshape(nt, 1, nh, nx, ny)
    return o


# ----------------------------------------------------------------------------
# Pure-JAX reference (lax.conv, with conv bias) for correctness checking.
# ----------------------------------------------------------------------------
def _conv2d_ref(x, w_oihw, b, pad):
    y = jax.lax.conv_general_dilated(
        x, w_oihw, window_strides=(1, 1),
        padding=[(pad, pad), (pad, pad)],
        dimension_numbers=("NCHW", "OIHW", "NCHW"))
    return y + b[None, :, None, None]


def _group_norm_ref(x, gamma, beta):
    mean = x.mean(axis=(2, 3), keepdims=True)
    var = ((x - mean) ** 2).mean(axis=(2, 3), keepdims=True)
    return (x - mean) * jax.lax.rsqrt(var + EPS) * gamma[None, :, None, None] \
        + beta[None, :, None, None]


def _cell_ref(x, h, params, k):
    p = k // 2
    i2h = _group_norm_ref(_conv2d_ref(x, params["wi_oihw"], params["bi"], p),
                          params["gi_w"], params["gi_b"])
    h2h = _group_norm_ref(_conv2d_ref(h, params["wh_oihw"], params["bh"], p),
                          params["gh_w"], params["gh_b"])
    return jnp.maximum(i2h + h2h, 0.0)


def bcrnn_forward_ref(x, params, hidden_size, k):
    nt, nb, nc, nx, ny = x.shape
    h0 = jnp.zeros((nb, hidden_size, nx, ny), jnp.float32)
    out_f, h = [], h0
    for t in range(nt):
        h = _cell_ref(x[t], h, params, k)
        out_f.append(h)
    out_b, h = [None] * nt, h0
    for i in range(nt):
        t = nt - 1 - i
        h = _cell_ref(x[t], h, params, k)
        out_b[t] = h
    out = jnp.concatenate(out_f, 0) + jnp.concatenate(out_b, 0)
    if nb == 1:
        out = out.reshape(nt, 1, hidden_size, nx, ny)
    return out


# ----------------------------------------------------------------------------
# Deterministic parameter construction (shapes from BCRNNlayer.__init__).
# ----------------------------------------------------------------------------
def make_params(key, input_size, hidden_size, kernel_size):
    nc, nh, kk = input_size, hidden_size, kernel_size
    k1, k2, k3, k4, k5, k6 = jax.random.split(key, 6)
    wi = 0.1 * jax.random.normal(k1, (nh, nc, kk, kk), jnp.float32)
    bi = 0.1 * jax.random.normal(k2, (nh,), jnp.float32)
    wh = 0.1 * jax.random.normal(k3, (nh, nh, kk, kk), jnp.float32)
    bh = 0.1 * jax.random.normal(k4, (nh,), jnp.float32)
    # Perturb GN affine params so the affine path is actually exercised.
    gi_w = 1.0 + 0.1 * jax.random.normal(k5, (nh,), jnp.float32)
    gi_b = 0.1 * jax.random.normal(k6, (nh,), jnp.float32)
    gh_w = 1.0 - 0.1 * jax.random.normal(k5, (nh,), jnp.float32)
    gh_b = -0.1 * jax.random.normal(k6, (nh,), jnp.float32)

    # Kernel-side fused weight: block-diagonal LHS (2*nh, k*k*(nh+nc_p)).
    # Per-tap K-block column order: [h channels (nh) | x channels (nc_p)],
    # rows [0,nh) = i2h (Wi in the x columns), rows [nh,2nh) = h2h (Wh in the
    # h columns); zeros elsewhere (free under MXU padding).
    nc_p = ((nc + 7) // 8) * 8                      # x channels padded to 8k
    kk2 = kk * kk
    wi_t = jnp.transpose(wi, (2, 3, 0, 1)).reshape(kk2, nh, nc)
    wh_t = jnp.transpose(wh, (2, 3, 0, 1)).reshape(kk2, nh, nh)
    top = jnp.concatenate(
        [jnp.zeros((kk2, nh, nh)), wi_t, jnp.zeros((kk2, nh, nc_p - nc))],
        axis=2)                                     # (kk2, nh, nh+nc_p)
    bot = jnp.concatenate([wh_t, jnp.zeros((kk2, nh, nc_p))], axis=2)
    blk = jnp.concatenate([top, bot], axis=1)       # (kk2, 2nh, nh+nc_p)
    w_lhs = jnp.transpose(blk, (1, 0, 2)).reshape(2 * nh, kk2 * (nh + nc_p))

    return dict(
        k=kk, nc_p=nc_p,
        # canonical (OIHW) layouts + biases for the reference
        wi_oihw=wi, bi=bi, wh_oihw=wh, bh=bh,
        gi_w=gi_w, gi_b=gi_b, gh_w=gh_w, gh_b=gh_b,
        # kernel layouts
        w_lhs=w_lhs,
        gamma2=jnp.concatenate([gi_w, gh_w])[:, None],
        beta2=jnp.concatenate([gi_b, gh_b])[:, None],
    )


if __name__ == "__main__":
    # Small shapes consistent with BCRNNlayer input (nt, nb, nc, nx, ny).
    nt, nb, nc, nx, ny = 8, 2, 2, 16, 16
    hidden_size, kernel_size = 8, 3

    key = jax.random.PRNGKey(0)
    kx, kp = jax.random.split(key)
    x = jax.random.normal(kx, (nt, nb, nc, nx, ny), jnp.float32)
    params = make_params(kp, nc, hidden_size, kernel_size)

    out = jax.block_until_ready(bcrnn_forward(x, params, hidden_size,
                                              t_chunk_cap=4))
    ref = jax.block_until_ready(
        bcrnn_forward_ref(x, params, hidden_size, kernel_size))

    assert out.shape == ref.shape, (out.shape, ref.shape)
    err = float(jnp.max(jnp.abs(out - ref)))
    assert jnp.allclose(out, ref, atol=2e-3, rtol=2e-3), err

    print("KERNEL_OK")
</pallas_src>

<mosaic_0001>
module attributes {stable_mosaic.version = 11 : i64} {
  func.func @_bcrnn_chunk_kernel(%arg0: i32, %arg1: i32, %arg2: memref<4x8x512xf32, #tpu.memory_space<vmem>>, %arg3: memref<16x144xf32, #tpu.memory_space<vmem>>, %arg4: memref<16x1xf32, #tpu.memory_space<vmem>>, %arg5: memref<16x1xf32, #tpu.memory_space<vmem>>, %arg6: memref<9x1x512xf32, #tpu.memory_space<vmem>>, %arg7: memref<1x4x8x512xf32, #tpu.memory_space<vmem>>, %arg8: memref<8x512xf32, #tpu.memory_space<vmem>>) attributes {dimension_semantics = [#tpu.dimension_semantics<parallel>, #tpu.dimension_semantics<arbitrary>], iteration_bounds = array<i64: 2, 2>, scalar_prefetch = 0 : i64, scratch_operands = 1 : i64, tpu.core_type = #tpu.core_type<tc>, window_params = [{transform_indices = @transform_0, window_bounds = array<i64: 4, 8, 512>}, {pipeline_mode = #tpu.pipeline_mode<synchronous>, transform_indices = @transform_1, window_bounds = array<i64: 16, 144>}, {pipeline_mode = #tpu.pipeline_mode<synchronous>, transform_indices = @transform_2, window_bounds = array<i64: 16, 1>}, {pipeline_mode = #tpu.pipeline_mode<synchronous>, transform_indices = @transform_3, window_bounds = array<i64: 16, 1>}, {pipeline_mode = #tpu.pipeline_mode<synchronous>, transform_indices = @transform_4, window_bounds = array<i64: 9, 1, 512>}, {transform_indices = @transform_5, window_bounds = array<i64: 1, 4, 8, 512>}]} {
    %c0_i32 = arith.constant 0 : i32
    %0 = arith.cmpi eq, %arg1, %c0_i32 : i32
    %1 = arith.extui %0 : i1 to i32
    %c0_i32_0 = arith.constant 0 : i32
    %2 = arith.cmpi ne, %1, %c0_i32_0 : i32
    scf.if %2 {
      %cst = arith.constant 0.000000e+00 : f32
      %12 = vector.broadcast %cst : f32 to vector<8x512xf32>
      %c0_9 = arith.constant 0 : index
      %c0_10 = arith.constant 0 : index
      %13 = vector.load %arg8[%c0_9, %c0_10] : memref<8x512xf32, #tpu.memory_space<vmem>>, vector<8x512xf32>
      tpu.vector_store %arg8[%c0_9, %c0_10], %12 {strides = array<i32>} : memref<8x512xf32, #tpu.memory_space<vmem>>, vector<8x512xf32>,
    } else {
    }
    %c0 = arith.constant 0 : index
    %c0_1 = arith.constant 0 : index
    %3 = vector.load %arg3[%c0, %c0_1] : memref<16x144xf32, #tpu.memory_space<vmem>>, vector<16x144xf32>
    %c0_2 = arith.constant 0 : index
    %c0_3 = arith.constant 0 : index
    %4 = vector.load %arg4[%c0_2, %c0_3] : memref<16x1xf32, #tpu.memory_space<vmem>>, vector<16x1xf32>
    %c0_4 = arith.constant 0 : index
    %c0_5 = arith.constant 0 : index
    %5 = vector.load %arg5[%c0_4, %c0_5] : memref<16x1xf32, #tpu.memory_space<vmem>>, vector<16x1xf32>
    %c0_i32_6 = arith.constant 0 : i32
    %6 = arith.cmpi eq, %arg0, %c0_i32_6 : i32
    %7 = arith.extui %6 : i1 to i32
    %c0_i32_7 = arith.constant 0 : i32
    %8 = arith.cmpi ne, %7, %c0_i32_7 : i32
    scf.if %8 {
      %c0_9 = arith.constant 0 : index
      %c0_10 = arith.constant 0 : index
      %12 = vector.load %arg8[%c0_9, %c0_10] : memref<8x512xf32, #tpu.memory_space<vmem>>, vector<8x512xf32>
      %c0_11 = arith.constant 0 : index
      %c0_12 = arith.constant 0 : index
      %c0_13 = arith.constant 0 : index
      %13 = vector.load %arg2[%c0_11, %c0_12, %c0_13] : memref<4x8x512xf32, #tpu.memory_space<vmem>>, vector<1x8x512xf32>
      %14 = vector.shape_cast %13 : vector<1x8x512xf32> to vector<8x512xf32>
      %15 = tpu.concatenate %12, %14 in 0 : vector<8x512xf32>, vector<8x512xf32> -> vector<16x512xf32>
      %c17_i32 = arith.constant 17 : i32
      %16 = tpu.dynamic_rotate %15 by %c17_i32 dim 1 : vector<16x512xf32>, i32 -> vector<16x512xf32>
      %c0_14 = arith.constant 0 : index
      %c0_15 = arith.constant 0 : index
      %c0_16 = arith.constant 0 : index
      %17 = vector.load %arg6[%c0_14, %c0_15, %c0_16] : memref<9x1x512xf32, #tpu.memory_space<vmem>>, vector<1x1x512xf32>
      %18 = vector.shape_cast %17 : vector<1x1x512xf32> to vector<1x512xf32>
      %19 = vector.broadcast %18 : vector<1x512xf32> to vector<16x512xf32>
      %20 = arith.mulf %16, %19 : vector<16x512xf32>
      %c16_i32 = arith.constant 16 : i32
      %21 = tpu.dynamic_rotate %15 by %c16_i32 dim 1 : vector<16x512xf32>, i32 -> vector<16x512xf32>
      %c1 = arith.constant 1 : index
      %c0_17 = arith.constant 0 : index
      %c0_18 = arith.constant 0 : index
      %22 = vector.load %arg6[%c1, %c0_17, %c0_18] : memref<9x1x512xf32, #tpu.memory_space<vmem>>, vector<1x1x512xf32>
      %23 = vector.shape_cast %22 : vector<1x1x512xf32> to vector<1x512xf32>
      %24 = vector.broadcast %23 : vector<1x512xf32> to vector<16x512xf32>
      %25 = arith.mulf %21, %24 : vector<16x512xf32>
      %c15_i32 = arith.constant 15 : i32
      %26 = tpu.dynamic_rotate %15 by %c15_i32 dim 1 : vector<16x512xf32>, i32 -> vector<16x512xf32>
      %c2 = arith.constant 2 : index
      %c0_19 = arith.constant 0 : index
      %c0_20 = arith.constant 0 : index
      %27 = vector.load %arg6[%c2, %c0_19, %c0_20] : memref<9x1x512xf32, #tpu.memory_space<vmem>>, vector<1x1x512xf32>
      %28 = vector.shape_cast %27 : vector<1x1x512xf32> to vector<1x512xf32>
      %29 = vector.broadcast %28 : vector<1x512xf32> to vector<16x512xf32>
      %30 = arith.mulf %26, %29 : vector<16x512xf32>
      %c1_i32_21 = arith.constant 1 : i32
      %31 = tpu.dynamic_rotate %15 by %c1_i32_21 dim 1 : vector<16x512xf32>, i32 -> vector<16x512xf32>
      %c3 = arith.constant 3 : index
      %c0_22 = arith.constant 0 : index
      %c0_23 = arith.constant 0 : index
      %32 = vector.load %arg6[%c3, %c0_22, %c0_23] : memref<9x1x512xf32, #tpu.memory_space<vmem>>, vector<1x1x512xf32>
      %33 = vector.shape_cast %32 : vector<1x1x512xf32> to vector<1x512xf32>
      %34 = vector.broadcast %33 : vector<1x512xf32> to vector<16x512xf32>
      %35 = arith.mulf %31, %34 : vector<16x512xf32>
      %c511_i32 = arith.constant 511 : i32
      %36 = tpu.dynamic_rotate %15 by %c511_i32 dim 1 : vector<16x512xf32>, i32 -> vector<16x512xf32>
      %c5 = arith.constant 5 : index
      %c0_24 = arith.constant 0 : index
      %c0_25 = arith.constant 0 : index
      %37 = vector.load %arg6[%c5, %c0_24, %c0_25] : memref<9x1x512xf32, #tpu.memory_space<vmem>>, vector<1x1x512xf32>
      %38 = vector.shape_cast %37 : vector<1x1x512xf32> to vector<1x512xf32>
      %39 = vector.broadcast %38 : vector<1x512xf32> to vector<16x512xf32>
      %40 = arith.mulf %36, %39 : vector<16x512xf32>
      %c497_i32 = arith.constant 497 : i32
      %41 = tpu.dynamic_rotate %15 by %c497_i32 dim 1 : vector<16x512xf32>, i32 -> vector<16x512xf32>
      %c6 = arith.constant 6 : index
      %c0_26 = arith.constant 0 : index
      %c0_27 = arith.constant 0 : index
      %42 = vector.load %arg6[%c6, %c0_26, %c0_27] : memref<9x1x512xf32, #tpu.memory_space<vmem>>, vector<1x1x512xf32>
      %43 = vector.shape_cast %42 : vector<1x1x512xf32> to vector<1x512xf32>
      %44 = vector.broadcast %43 : vector<1x512xf32> to vector<16x512xf32>
      %45 = arith.mulf %41, %44 : vector<16x512xf32>
      %c496_i32 = arith.constant 496 : i32
      %46 = tpu.dynamic_rotate %15 by %c496_i32 dim 1 : vector<16x512xf32>, i32 -> vector<16x512xf32>
      %c7 = arith.constant 7 : index
      %c0_28 = arith.constant 0 : index
      %c0_29 = arith.constant 0 : index
      %47 = vector.load %arg6[%c7, %c0_28, %c0_29] : memref<9x1x512xf32, #tpu.memory_space<vmem>>, vector<1x1x512xf32>
      %48 = vector.shape_cast %47 : vector<1x1x512xf32> to vector<1x512xf32>
      %49 = vector.broadcast %48 : vector<1x512xf32> to vector<16x512xf32>
      %50 = arith.mulf %46, %49 : vector<16x512xf32>
      %c495_i32 = arith.constant 495 : i32
      %51 = tpu.dynamic_rotate %15 by %c495_i32 dim 1 : vector<16x512xf32>, i32 -> vector<16x512xf32>
      %c8 = arith.constant 8 : index
      %c0_30 = arith.constant 0 : index
      %c0_31 = arith.constant 0 : index
      %52 = vector.load %arg6[%c8, %c0_30, %c0_31] : memref<9x1x512xf32, #tpu.memory_space<vmem>>, vector<1x1x512xf32>
      %53 = vector.shape_cast %52 : vector<1x1x512xf32> to vector<1x512xf32>
      %54 = vector.broadcast %53 : vector<1x512xf32> to vector<16x512xf32>
      %55 = arith.mulf %51, %54 : vector<16x512xf32>
      %56 = tpu.concatenate %20, %25, %30, %35, %15, %40, %45, %50, %55 in 0 : vector<16x512xf32>, vector<16x512xf32>, vector<16x512xf32>, vector<16x512xf32>, vector<16x512xf32>, vector<16x512xf32>, vector<16x512xf32>, vector<16x512xf32>, vector<16x512xf32> -> vector<144x512xf32>
      %cst = arith.constant dense<0.000000e+00> : vector<16x512xf32>
      %57 = tpu.matmul %3, %56, %cst {dimension_numbers = #tpu.dot_dimension_numbers<[1], [0], [0], [1], [0, 0, 1, 1], [], []>} : vector<16x144xf32>, vector<144x512xf32>, vector<16x512xf32> -> vector<16x512xf32>
      %58 = vector.extract_strided_slice %57 {offsets = [0, 0], sizes = [16, 256], strides = [1, 1]} : vector<16x512xf32> to vector<16x256xf32>
      %cst_32 = arith.constant dense<0.000000e+00> : vector<16xf32>
      %59 = vector.multi_reduction <add>, %58, %cst_32 [1] : vector<16x256xf32> to vector<16xf32>
      %60 = vector.shape_cast %59 : vector<16xf32> to vector<16x1xf32>
      %cst_33 = arith.constant 3.906250e-03 : f32
      %61 = vector.broadcast %cst_33 : f32 to vector<16x1xf32>
      %62 = arith.mulf %60, %61 : vector<16x1xf32>
      %63 = arith.mulf %58, %58 : vector<16x256xf32>
      %cst_34 = arith.constant dense<0.000000e+00> : vector<16xf32>
      %64 = vector.multi_reduction <add>, %63, %cst_34 [1] : vector<16x256xf32> to vector<16xf32>
      %65 = vector.shape_cast %64 : vector<16xf32> to vector<16x1xf32>
      %cst_35 = arith.constant 3.906250e-03 : f32
      %66 = vector.broadcast %cst_35 : f32 to vector<16x1xf32>
      %67 = arith.mulf %65, %66 : vector<16x1xf32>
      %68 = arith.mulf %62, %62 : vector<16x1xf32>
      %69 = arith.subf %67, %68 : vector<16x1xf32>
      %cst_36 = arith.constant 9.99999974E-6 : f32
      %70 = vector.broadcast %cst_36 : f32 to vector<16x1xf32>
      %71 = arith.addf %69, %70 : vector<16x1xf32>
      %72 = math.rsqrt %71 : vector<16x1xf32>
      %73 = arith.mulf %4, %72 : vector<16x1xf32>
      %74 = vector.broadcast %73 : vector<16x1xf32> to vector<16x256xf32>
      %75 = arith.mulf %58, %74 : vector<16x256xf32>
      %76 = arith.mulf %62, %73 : vector<16x1xf32>
      %77 = arith.subf %5, %76 : vector<16x1xf32>
      %78 = vector.broadcast %77 : vector<16x1xf32> to vector<16x256xf32>
      %79 = arith.addf %75, %78 : vector<16x256xf32>
      %80 = vector.extract_strided_slice %79 {offsets = [0, 0], sizes = [8, 256], strides = [1, 1]} : vector<16x256xf32> to vector<8x256xf32>
      %81 = vector.extract_strided_slice %79 {offsets = [8, 0], sizes = [8, 256], strides = [1, 1]} : vector<16x256xf32> to vector<8x256xf32>
      %82 = arith.addf %80, %81 : vector<8x256xf32>
      %cst_37 = arith.constant 0.000000e+00 : f32
      %83 = vector.broadcast %cst_37 : f32 to vector<8x256xf32>
      %84 = arith.maximumf %82, %83 : vector<8x256xf32>
      %85 = vector.extract_strided_slice %57 {offsets = [0, 256], sizes = [16, 256], strides = [1, 1]} : vector<16x512xf32> to vector<16x256xf32>
      %cst_38 = arith.constant dense<0.000000e+00> : vector<16xf32>
      %86 = vector.multi_reduction <add>, %85, %cst_38 [1] : vector<16x256xf32> to vector<16xf32>
      %87 = vector.shape_cast %86 : vector<16xf32> to vector<16x1xf32>
      %cst_39 = arith.constant 3.906250e-03 : f32
      %88 = vector.broadcast %cst_39 : f32 to vector<16x1xf32>
      %89 = arith.mulf %87, %88 : vector<16x1xf32>
      %90 = arith.mulf %85, %85 : vector<16x256xf32>
      %cst_40 = arith.constant dense<0.000000e+00> : vector<16xf32>
      %91 = vector.multi_reduction <add>, %90, %cst_40 [1] : vector<16x256xf32> to vector<16xf32>
      %92 = vector.shape_cast %91 : vector<16xf32> to vector<16x1xf32>
      %cst_41 = arith.constant 3.906250e-03 : f32
      %93 = vector.broadcast %cst_41 : f32 to vector<16x1xf32>
      %94 = arith.mulf %92, %93 : vector<16x1xf32>
      %95 = arith.mulf %89, %89 : vector<16x1xf32>
      %96 = arith.subf %94, %95 : vector<16x1xf32>
      %cst_42 = arith.constant 9.99999974E-6 : f32
      %97 = vector.broadcast %cst_42 : f32 to vector<16x1xf32>
      %98 = arith.addf %96, %97 : vector<16x1xf32>
      %99 = math.rsqrt %98 : vector<16x1xf32>
      %100 = arith.mulf %4, %99 : vector<16x1xf32>
      %101 = vector.broadcast %100 : vector<16x1xf32> to vector<16x256xf32>
      %102 = arith.mulf %85, %101 : vector<16x256xf32>
      %103 = arith.mulf %89, %100 : vector<16x1xf32>
      %104 = arith.subf %5, %103 : vector<16x1xf32>
      %105 = vector.broadcast %104 : vector<16x1xf32> to vector<16x256xf32>
      %106 = arith.addf %102, %105 : vector<16x256xf32>
      %107 = vector.extract_strided_slice %106 {offsets = [0, 0], sizes = [8, 256], strides = [1, 1]} : vector<16x256xf32> to vector<8x256xf32>
      %108 = vector.extract_strided_slice %106 {offsets = [8, 0], sizes = [8, 256], strides = [1, 1]} : vector<16x256xf32> to vector<8x256xf32>
      %109 = arith.addf %107, %108 : vector<8x256xf32>
      %cst_43 = arith.constant 0.000000e+00 : f32
      %110 = vector.broadcast %cst_43 : f32 to vector<8x256xf32>
      %111 = arith.maximumf %109, %110 : vector<8x256xf32>
      %112 = tpu.concatenate %84, %111 in 1 : vector<8x256xf32>, vector<8x256xf32> -> vector<8x512xf32>
      %c0_44 = arith.constant 0 : index
      %c0_45 = arith.constant 0 : index
      %113 = vector.load %arg8[%c0_44, %c0_45] : memref<8x512xf32, #tpu.memory_space<vmem>>, vector<8x512xf32>
      tpu.vector_store %arg8[%c0_44, %c0_45], %112 {strides = array<i32>} : memref<8x512xf32, #tpu.memory_space<vmem>>, vector<8x512xf32>,
      %c0_46 = arith.constant 0 : index
      %c0_47 = arith.constant 0 : index
      %c0_48 = arith.constant 0 : index
      %c0_49 = arith.constant 0 : index
      %114 = vector.load %arg7[%c0_46, %c0_47, %c0_48, %c0_49] : memref<1x4x8x512xf32, #tpu.memory_space<vmem>>, vector<1x1x8x512xf32>
      %115 = vector.shape_cast %114 : vector<1x1x8x512xf32> to vector<8x512xf32>
      %116 = vector.shape_cast %112 : vector<8x512xf32> to vector<1x1x8x512xf32>
      tpu.vector_store %arg7[%c0_46, %c0_47, %c0_48, %c0_49], %116 {strides = array<i32>} : memref<1x4x8x512xf32, #tpu.memory_space<vmem>>, vector<1x1x8x512xf32>,
      %c0_50 = arith.constant 0 : index
      %c0_51 = arith.constant 0 : index
      %117 = vector.load %arg8[%c0_50, %c0_51] : memref<8x512xf32, #tpu.memory_space<vmem>>, vector<8x512xf32>
      %c1_52 = arith.constant 1 : index
      %c0_53 = arith.constant 0 : index
      %c0_54 = arith.constant 0 : index
      %118 = vector.load %arg2[%c1_52, %c0_53, %c0_54] : memref<4x8x512xf32, #tpu.memory_space<vmem>>, vector<1x8x512xf32>
      %119 = vector.shape_cast %118 : vector<1x8x512xf32> to vector<8x512xf32>
      %120 = tpu.concatenate %117, %119 in 0 : vector<8x512xf32>, vector<8x512xf32> -> vector<16x512xf32>
      %c17_i32_55 = arith.constant 17 : i32
      %121 = tpu.dynamic_rotate %120 by %c17_i32_55 dim 1 : vector<16x512xf32>, i32 -> vector<16x512xf32>
      %c0_56 = arith.constant 0 : index
      %c0_57 = arith.constant 0 : index
      %c0_58 = arith.constant 0 : index
      %122 = vector.load %arg6[%c0_56, %c0_57, %c0_58] : memref<9x1x512xf32, #tpu.memory_space<vmem>>, vector<1x1x512xf32>
      %123 = vector.shape_cast %122 : vector<1x1x512xf32> to vector<1x512xf32>
      %124 = vector.broadcast %123 : vector<1x512xf32> to vector<16x512xf32>
      %125 = arith.mulf %121, %124 : vector<16x512xf32>
      %c16_i32_59 = arith.constant 16 : i32
      %126 = tpu.dynamic_rotate %120 by %c16_i32_59 dim 1 : vector<16x512xf32>, i32 -> vector<16x512xf32>
      %c1_60 = arith.constant 1 : index
      %c0_61 = arith.constant 0 : index
      %c0_62 = arith.constant 0 : index
      %127 = vector.load %arg6[%c1_60, %c0_61, %c0_62] : memref<9x1x512xf32, #tpu.memory_space<vmem>>, vector<1x1x512xf32>
      %128 = vector.shape_cast %127 : vector<1x1x512xf32> to vector<1x512xf32>
      %129 = vector.broadcast %128 : vector<1x512xf32> to vector<16x512xf32>
      %130 = arith.mulf %126, %129 : vector<16x512xf32>
      %c15_i32_63 = arith.constant 15 : i32
      %131 = tpu.dynamic_rotate %120 by %c15_i32_63 dim 1 : vector<16x512xf32>, i32 -> vector<16x512xf32>
      %c2_64 = arith.constant 2 : index
      %c0_65 = arith.constant 0 : index
      %c0_66 = arith.constant 0 : index
      %132 = vector.load %arg6[%c2_64, %c0_65, %c0_66] : memref<9x1x512xf32, #tpu.memory_space<vmem>>, vector<1x1x512xf32>
      %133 = vector.shape_cast %132 : vector<1x1x512xf32> to vector<1x512xf32>
      %134 = vector.broadcast %133 : vector<1x512xf32> to vector<16x512xf32>
      %135 = arith.mulf %131, %134 : vector<16x512xf32>
      %c1_i32_67 = arith.constant 1 : i32
      %136 = tpu.dynamic_rotate %120 by %c1_i32_67 dim 1 : vector<16x512xf32>, i32 -> vector<16x512xf32>
      %c3_68 = arith.constant 3 : index
      %c0_69 = arith.constant 0 : index
      %c0_70 = arith.constant 0 : index
      %137 = vector.load %arg6[%c3_68, %c0_69, %c0_70] : memref<9x1x512xf32, #tpu.memory_space<vmem>>, vector<1x1x512xf32>
      %138 = vector.shape_cast %137 : vector<1x1x512xf32> to vector<1x512xf32>
      %139 = vector.broadcast %138 : vector<1x512xf32> to vector<16x512xf32>
      %140 = arith.mulf %136, %139 : vector<16x512xf32>
      %c511_i32_71 = arith.constant 511 : i32
      %141 = tpu.dynamic_rotate %120 by %c511_i32_71 dim 1 : vector<16x512xf32>, i32 -> vector<16x512xf32>
      %c5_72 = arith.constant 5 : index
      %c0_73 = arith.constant 0 : index
      %c0_74 = arith.constant 0 : index
      %142 = vector.load %arg6[%c5_72, %c0_73, %c0_74] : memref<9x1x512xf32, #tpu.memory_space<vmem>>, vector<1x1x512xf32>
      %143 = vector.shape_cast %142 : vector<1x1x512xf32> to vector<1x512xf32>
      %144 = vector.broadcast %143 : vector<1x512xf32> to vector<16x512xf32>
      %145 = arith.mulf %141, %144 : vector<16x512xf32>
      %c497_i32_75 = arith.constant 497 : i32
      %146 = tpu.dynamic_rotate %120 by %c497_i32_75 dim 1 : vector<16x512xf32>, i32 -> vector<16x512xf32>
      %c6_76 = arith.constant 6 : index
      %c0_77 = arith.constant 0 : index
      %c0_78 = arith.constant 0 : index
      %147 = vector.load %arg6[%c6_76, %c0_77, %c0_78] : memref<9x1x512xf32, #tpu.memory_space<vmem>>, vector<1x1x512xf32>
      %148 = vector.shape_cast %147 : vector<1x1x512xf32> to vector<1x512xf32>
      %149 = vector.broadcast %148 : vector<1x512xf32> to vector<16x512xf32>
      %150 = arith.mulf %146, %149 : vector<16x512xf32>
      %c496_i32_79 = arith.constant 496 : i32
      %151 = tpu.dynamic_rotate %120 by %c496_i32_79 dim 1 : vector<16x512xf32>, i32 -> vector<16x512xf32>
      %c7_80 = arith.constant 7 : index
      %c0_81 = arith.constant 0 : index
      %c0_82 = arith.constant 0 : index
      %152 = vector.load %arg6[%c7_80, %c0_81, %c0_82] : memref<9x1x512xf32, #tpu.memory_space<vmem>>, vector<1x1x512xf32>
      %153 = vector.shape_cast %152 : vector<1x1x512xf32> to vector<1x512xf32>
      %154 = vector.broadcast %153 : vector<1x512xf32> to vector<16x512xf32>
      %155 = arith.mulf %151, %154 : vector<16x512xf32>
      %c495_i32_83 = arith.constant 495 : i32
      %156 = tpu.dynamic_rotate %120 by %c495_i32_83 dim 1 : vector<16x512xf32>, i32 -> vector<16x512xf32>
      %c8_84 = arith.constant 8 : index
      %c0_85 = arith.constant 0 : index
      %c0_86 = arith.constant 0 : index
      %157 = vector.load %arg6[%c8_84, %c0_85, %c0_86] : memref<9x1x512xf32, #tpu.memory_space<vmem>>, vector<1x1x512xf32>
      %158 = vector.shape_cast %157 : vector<1x1x512xf32> to vector<1x512xf32>
      %159 = vector.broadcast %158 : vector<1x512xf32> to vector<16x512xf32>
      %160 = arith.mulf %156, %159 : vector<16x512xf32>
      %161 = tpu.concatenate %125, %130, %135, %140, %120, %145, %150, %155, %160 in 0 : vector<16x512xf32>, vector<16x512xf32>, vector<16x512xf32>, vector<16x512xf32>, vector<16x512xf32>, vector<16x512xf32>, vector<16x512xf32>, vector<16x512xf32>, vector<16x512xf32> -> vector<144x512xf32>
      %cst_87 = arith.constant dense<0.000000e+00> : vector<16x512xf32>
      %162 = tpu.matmul %3, %161, %cst_87 {dimension_numbers = #tpu.dot_dimension_numbers<[1], [0], [0], [1], [0, 0, 1, 1], [], []>} : vector<16x144xf32>, vector<144x512xf32>, vector<16x512xf32> -> vector<16x512xf32>
      %163 = vector.extract_strided_slice %162 {offsets = [0, 0], sizes = [16, 256], strides = [1, 1]} : vector<16x512xf32> to vector<16x256xf32>
      %cst_88 = arith.constant dense<0.000000e+00> : vector<16xf32>
      %164 = vector.multi_reduction <add>, %163, %cst_88 [1] : vector<16x256xf32> to vector<16xf32>
      %165 = vector.shape_cast %164 : vector<16xf32> to vector<16x1xf32>
      %cst_89 = arith.constant 3.906250e-03 : f32
      %166 = vector.broadcast %cst_89 : f32 to vector<16x1xf32>
      %167 = arith.mulf %165, %166 : vector<16x1xf32>
      %168 = arith.mulf %163, %163 : vector<16x256xf32>
      %cst_90 = arith.constant dense<0.000000e+00> : vector<16xf32>
      %169 = vector.multi_reduction <add>, %168, %cst_90 [1] : vector<16x256xf32> to vector<16xf32>
      %170 = vector.shape_cast %169 : vector<16xf32> to vector<16x1xf32>
      %cst_91 = arith.constant 3.906250e-03 : f32
      %171 = vector.broadcast %cst_91 : f32 to vector<16x1xf32>
      %172 = arith.mulf %170, %171 : vector<16x1xf32>
      %173 = arith.mulf %167, %167 : vector<16x1xf32>
      %174 = arith.subf %172, %173 : vector<16x1xf32>
      %cst_92 = arith.constant 9.99999974E-6 : f32
      %175 = vector.broadcast %cst_92 : f32 to vector<16x1xf32>
      %176 = arith.addf %174, %175 : vector<16x1xf32>
      %177 = math.rsqrt %176 : vector<16x1xf32>
      %178 = arith.mulf %4, %177 : vector<16x1xf32>
      %179 = vector.broadcast %178 : vector<16x1xf32> to vector<16x256xf32>
      %180 = arith.mulf %163, %179 : vector<16x256xf32>
      %181 = arith.mulf %167, %178 : vector<16x1xf32>
      %182 = arith.subf %5, %181 : vector<16x1xf32>
      %183 = vector.broadcast %182 : vector<16x1xf32> to vector<16x256xf32>
      %184 = arith.addf %180, %183 : vector<16x256xf32>
      %185 = vector.extract_strided_slice %184 {offsets = [0, 0], sizes = [8, 256], strides = [1, 1]} : vector<16x256xf32> to vector<8x256xf32>
      %186 = vector.extract_strided_slice %184 {offsets = [8, 0], sizes = [8, 256], strides = [1, 1]} : vector<16x256xf32> to vector<8x256xf32>
      %187 = arith.addf %185, %186 : vector<8x256xf32>
      %cst_93 = arith.constant 0.000000e+00 : f32
      %188 = vector.broadcast %cst_93 : f32 to vector<8x256xf32>
      %189 = arith.maximumf %187, %188 : vector<8x256xf32>
      %190 = vector.extract_strided_slice %162 {offsets = [0, 256], sizes = [16, 256], strides = [1, 1]} : vector<16x512xf32> to vector<16x256xf32>
      %cst_94 = arith.constant dense<0.000000e+00> : vector<16xf32>
      %191 = vector.multi_reduction <add>, %190, %cst_94 [1] : vector<16x256xf32> to vector<16xf32>
      %192 = vector.shape_cast %191 : vector<16xf32> to vector<16x1xf32>
      %cst_95 = arith.constant 3.906250e-03 : f32
      %193 = vector.broadcast %cst_95 : f32 to vector<16x1xf32>
      %194 = arith.mulf %192, %193 : vector<16x1xf32>
      %195 = arith.mulf %190, %190 : vector<16x256xf32>
      %cst_96 = arith.constant dense<0.000000e+00> : vector<16xf32>
      %196 = vector.multi_reduction <add>, %195, %cst_96 [1] : vector<16x256xf32> to vector<16xf32>
      %197 = vector.shape_cast %196 : vector<16xf32> to vector<16x1xf32>
      %cst_97 = arith.constant 3.906250e-03 : f32
      %198 = vector.broadcast %cst_97 : f32 to vector<16x1xf32>
      %199 = arith.mulf %197, %198 : vector<16x1xf32>
      %200 = arith.mulf %194, %194 : vector<16x1xf32>
      %201 = arith.subf %199, %200 : vector<16x1xf32>
      %cst_98 = arith.constant 9.99999974E-6 : f32
      %202 = vector.broadcast %cst_98 : f32 to vector<16x1xf32>
      %203 = arith.addf %201, %202 : vector<16x1xf32>
      %204 = math.rsqrt %203 : vector<16x1xf32>
      %205 = arith.mulf %4, %204 : vector<16x1xf32>
      %206 = vector.broadcast %205 : vector<16x1xf32> to vector<16x256xf32>
      %207 = arith.mulf %190, %206 : vector<16x256xf32>
      %208 = arith.mulf %194, %205 : vector<16x1xf32>
      %209 = arith.subf %5, %208 : vector<16x1xf32>
      %210 = vector.broadcast %209 : vector<16x1xf32> to vector<16x256xf32>
      %211 = arith.addf %207, %210 : vector<16x256xf32>
      %212 = vector.extract_strided_slice %211 {offsets = [0, 0], sizes = [8, 256], strides = [1, 1]} : vector<16x256xf32> to vector<8x256xf32>
      %213 = vector.extract_strided_slice %211 {offsets = [8, 0], sizes = [8, 256], strides = [1, 1]} : vector<16x256xf32> to vector<8x256xf32>
      %214 = arith.addf %212, %213 : vector<8x256xf32>
      %cst_99 = arith.constant 0.000000e+00 : f32
      %215 = vector.broadcast %cst_99 : f32 to vector<8x256xf32>
      %216 = arith.maximumf %214, %215 : vector<8x256xf32>
      %217 = tpu.concatenate %189, %216 in 1 : vector<8x256xf32>, vector<8x256xf32> -> vector<8x512xf32>
      %c0_100 = arith.constant 0 : index
      %c0_101 = arith.constant 0 : index
      %218 = vector.load %arg8[%c0_100, %c0_101] : memref<8x512xf32, #tpu.memory_space<vmem>>, vector<8x512xf32>
      tpu.vector_store %arg8[%c0_100, %c0_101], %217 {strides = array<i32>} : memref<8x512xf32, #tpu.memory_space<vmem>>, vector<8x512xf32>,
      %c0_102 = arith.constant 0 : index
      %c1_103 = arith.constant 1 : index
      %c0_104 = arith.constant 0 : index
      %c0_105 = arith.constant 0 : index
      %219 = vector.load %arg7[%c0_102, %c1_103, %c0_104, %c0_105] : memref<1x4x8x512xf32, #tpu.memory_space<vmem>>, vector<1x1x8x512xf32>
      %220 = vector.shape_cast %219 : vector<1x1x8x512xf32> to vector<8x512xf32>
      %221 = vector.shape_cast %217 : vector<8x512xf32> to vector<1x1x8x512xf32>
      tpu.vector_store %arg7[%c0_102, %c1_103, %c0_104, %c0_105], %221 {strides = array<i32>} : memref<1x4x8x512xf32, #tpu.memory_space<vmem>>, vector<1x1x8x512xf32>,
      %c0_106 = arith.constant 0 : index
      %c0_107 = arith.constant 0 : index
      %222 = vector.load %arg8[%c0_106, %c0_107] : memref<8x512xf32, #tpu.memory_space<vmem>>, vector<8x512xf32>
      %c2_108 = arith.constant 2 : index
      %c0_109 = arith.constant 0 : index
      %c0_110 = arith.constant 0 : index
      %223 = vector.load %arg2[%c2_108, %c0_109, %c0_110] : memref<4x8x512xf32, #tpu.memory_space<vmem>>, vector<1x8x512xf32>
      %224 = vector.shape_cast %223 : vector<1x8x512xf32> to vector<8x512xf32>
      %225 = tpu.concatenate %222, %224 in 0 : vector<8x512xf32>, vector<8x512xf32> -> vector<16x512xf32>
      %c17_i32_111 = arith.constant 17 : i32
      %226 = tpu.dynamic_rotate %225 by %c17_i32_111 dim 1 : vector<16x512xf32>, i32 -> vector<16x512xf32>
      %c0_112 = arith.constant 0 : index
      %c0_113 = arith.constant 0 : index
      %c0_114 = arith.constant 0 : index
      %227 = vector.load %arg6[%c0_112, %c0_113, %c0_114] : memref<9x1x512xf32, #tpu.memory_space<vmem>>, vector<1x1x512xf32>
      %228 = vector.shape_cast %227 : vector<1x1x512xf32> to vector<1x512xf32>
      %229 = vector.broadcast %228 : vector<1x512xf32> to vector<16x512xf32>
      %230 = arith.mulf %226, %229 : vector<16x512xf32>
      %c16_i32_115 = arith.constant 16 : i32
      %231 = tpu.dynamic_rotate %225 by %c16_i32_115 dim 1 : vector<16x512xf32>, i32 -> vector<16x512xf32>
      %c1_116 = arith.constant 1 : index
      %c0_117 = arith.constant 0 : index
      %c0_118 = arith.constant 0 : index
      %232 = vector.load %arg6[%c1_116, %c0_117, %c0_118] : memref<9x1x512xf32, #tpu.memory_space<vmem>>, vector<1x1x512xf32>
      %233 = vector.shape_cast %232 : vector<1x1x512xf32> to vector<1x512xf32>
      %234 = vector.broadcast %233 : vector<1x512xf32> to vector<16x512xf32>
      %235 = arith.mulf %231, %234 : vector<16x512xf32>
      %c15_i32_119 = arith.constant 15 : i32
      %236 = tpu.dynamic_rotate %225 by %c15_i32_119 dim 1 : vector<16x512xf32>, i32 -> vector<16x512xf32>
      %c2_120 = arith.constant 2 : index
      %c0_121 = arith.constant 0 : index
      %c0_122 = arith.constant 0 : index
      %237 = vector.load %arg6[%c2_120, %c0_121, %c0_122] : memref<9x1x512xf32, #tpu.memory_space<vmem>>, vector<1x1x512xf32>
      %238 = vector.shape_cast %237 : vector<1x1x512xf32> to vector<1x512xf32>
      %239 = vector.broadcast %238 : vector<1x512xf32> to vector<16x512xf32>
      %240 = arith.mulf %236, %239 : vector<16x512xf32>
      %c1_i32_123 = arith.constant 1 : i32
      %241 = tpu.dynamic_rotate %225 by %c1_i32_123 dim 1 : vector<16x512xf32>, i32 -> vector<16x512xf32>
      %c3_124 = arith.constant 3 : index
      %c0_125 = arith.constant 0 : index
      %c0_126 = arith.constant 0 : index
      %242 = vector.load %arg6[%c3_124, %c0_125, %c0_126] : memref<9x1x512xf32, #tpu.memory_space<vmem>>, vector<1x1x512xf32>
      %243 = vector.shape_cast %242 : vector<1x1x512xf32> to vector<1x512xf32>
      %244 = vector.broadcast %243 : vector<1x512xf32> to vector<16x512xf32>
      %245 = arith.mulf %241, %244 : vector<16x512xf32>
      %c511_i32_127 = arith.constant 511 : i32
      %246 = tpu.dynamic_rotate %225 by %c511_i32_127 dim 1 : vector<16x512xf32>, i32 -> vector<16x512xf32>
      %c5_128 = arith.constant 5 : index
      %c0_129 = arith.constant 0 : index
      %c0_130 = arith.constant 0 : index
      %247 = vector.load %arg6[%c5_128, %c0_129, %c0_130] : memref<9x1x512xf32, #tpu.memory_space<vmem>>, vector<1x1x512xf32>
      %248 = vector.shape_cast %247 : vector<1x1x512xf32> to vector<1x512xf32>
      %249 = vector.broadcast %248 : vector<1x512xf32> to vector<16x512xf32>
      %250 = arith.mulf %246, %249 : vector<16x512xf32>
      %c497_i32_131 = arith.constant 497 : i32
      %251 = tpu.dynamic_rotate %225 by %c497_i32_131 dim 1 : vector<16x512xf32>, i32 -> vector<16x512xf32>
      %c6_132 = arith.constant 6 : index
      %c0_133 = arith.constant 0 : index
      %c0_134 = arith.constant 0 : index
      %252 = vector.load %arg6[%c6_132, %c0_133, %c0_134] : memref<9x1x512xf32, #tpu.memory_space<vmem>>, vector<1x1x512xf32>
      %253 = vector.shape_cast %252 : vector<1x1x512xf32> to vector<1x512xf32>
      %254 = vector.broadcast %253 : vector<1x512xf32> to vector<16x512xf32>
      %255 = arith.mulf %251, %254 : vector<16x512xf32>
      %c496_i32_135 = arith.constant 496 : i32
      %256 = tpu.dynamic_rotate %225 by %c496_i32_135 dim 1 : vector<16x512xf32>, i32 -> vector<16x512xf32>
      %c7_136 = arith.constant 7 : index
      %c0_137 = arith.constant 0 : index
      %c0_138 = arith.constant 0 : index
      %257 = vector.load %arg6[%c7_136, %c0_137, %c0_138] : memref<9x1x512xf32, #tpu.memory_space<vmem>>, vector<1x1x512xf32>
      %258 = vector.shape_cast %257 : vector<1x1x512xf32> to vector<1x512xf32>
      %259 = vector.broadcast %258 : vector<1x512xf32> to vector<16x512xf32>
      %260 = arith.mulf %256, %259 : vector<16x512xf32>
      %c495_i32_139 = arith.constant 495 : i32
      %261 = tpu.dynamic_rotate %225 by %c495_i32_139 dim 1 : vector<16x512xf32>, i32 -> vector<16x512xf32>
      %c8_140 = arith.constant 8 : index
      %c0_141 = arith.constant 0 : index
      %c0_142 = arith.constant 0 : index
      %262 = vector.load %arg6[%c8_140, %c0_141, %c0_142] : memref<9x1x512xf32, #tpu.memory_space<vmem>>, vector<1x1x512xf32>
      %263 = vector.shape_cast %262 : vector<1x1x512xf32> to vector<1x512xf32>
      %264 = vector.broadcast %263 : vector<1x512xf32> to vector<16x512xf32>
      %265 = arith.mulf %261, %264 : vector<16x512xf32>
      %266 = tpu.concatenate %230, %235, %240, %245, %225, %250, %255, %260, %265 in 0 : vector<16x512xf32>, vector<16x512xf32>, vector<16x512xf32>, vector<16x512xf32>, vector<16x512xf32>, vector<16x512xf32>, vector<16x512xf32>, vector<16x512xf32>, vector<16x512xf32> -> vector<144x512xf32>
      %cst_143 = arith.constant dense<0.000000e+00> : vector<16x512xf32>
      %267 = tpu.matmul %3, %266, %cst_143 {dimension_numbers = #tpu.dot_dimension_numbers<[1], [0], [0], [1], [0, 0, 1, 1], [], []>} : vector<16x144xf32>, vector<144x512xf32>, vector<16x512xf32> -> vector<16x512xf32>
      %268 = vector.extract_strided_slice %267 {offsets = [0, 0], sizes = [16, 256], strides = [1, 1]} : vector<16x512xf32> to vector<16x256xf32>
      %cst_144 = arith.constant dense<0.000000e+00> : vector<16xf32>
      %269 = vector.multi_reduction <add>, %268, %cst_144 [1] : vector<16x256xf32> to vector<16xf32>
      %270 = vector.shape_cast %269 : vector<16xf32> to vector<16x1xf32>
      %cst_145 = arith.constant 3.906250e-03 : f32
      %271 = vector.broadcast %cst_145 : f32 to vector<16x1xf32>
      %272 = arith.mulf %270, %271 : vector<16x1xf32>
      %273 = arith.mulf %268, %268 : vector<16x256xf32>
      %cst_146 = arith.constant dense<0.000000e+00> : vector<16xf32>
      %274 = vector.multi_reduction <add>, %273, %cst_146 [1] : vector<16x256xf32> to vector<16xf32>
      %275 = vector.shape_cast %274 : vector<16xf32> to vector<16x1xf32>
      %cst_147 = arith.constant 3.906250e-03 : f32
      %276 = vector.broadcast %cst_147 : f32 to vector<16x1xf32>
      %277 = arith.mulf %275, %276 : vector<16x1xf32>
      %278 = arith.mulf %272, %272 : vector<16x1xf32>
      %279 = arith.subf %277, %278 : vector<16x1xf32>
      %cst_148 = arith.constant 9.99999974E-6 : f32
      %280 = vector.broadcast %cst_148 : f32 to vector<16x1xf32>
      %281 = arith.addf %279, %280 : vector<16x1xf32>
      %282 = math.rsqrt %281 : vector<16x1xf32>
      %283 = arith.mulf %4, %282 : vector<16x1xf32>
      %284 = vector.broadcast %283 : vector<16x1xf32> to vector<16x256xf32>
      %285 = arith.mulf %268, %284 : vector<16x256xf32>
      %286 = arith.mulf %272, %283 : vector<16x1xf32>
      %287 = arith.subf %5, %286 : vector<16x1xf32>
      %288 = vector.broadcast %287 : vector<16x1xf32> to vector<16x256xf32>
      %289 = arith.addf %285, %288 : vector<16x256xf32>
      %290 = vector.extract_strided_slice %289 {offsets = [0, 0], sizes = [8, 256], strides = [1, 1]} : vector<16x256xf32> to vector<8x256xf32>
      %291 = vector.extract_strided_slice %289 {offsets = [8, 0], sizes = [8, 256], strides = [1, 1]} : vector<16x256xf32> to vector<8x256xf32>
      %292 = arith.addf %290, %291 : vector<8x256xf32>
      %cst_149 = arith.constant 0.000000e+00 : f32
      %293 = vector.broadcast %cst_149 : f32 to vector<8x256xf32>
      %294 = arith.maximumf %292, %293 : vector<8x256xf32>
      %295 = vector.extract_strided_slice %267 {offsets = [0, 256], sizes = [16, 256], strides = [1, 1]} : vector<16x512xf32> to vector<16x256xf32>
      %cst_150 = arith.constant dense<0.000000e+00> : vector<16xf32>
      %296 = vector.multi_reduction <add>, %295, %cst_150 [1] : vector<16x256xf32> to vector<16xf32>
      %297 = vector.shape_cast %296 : vector<16xf32> to vector<16x1xf32>
      %cst_151 = arith.constant 3.906250e-03 : f32
      %298 = vector.broadcast %cst_151 : f32 to vector<16x1xf32>
      %299 = arith.mulf %297, %298 : vector<16x1xf32>
      %300 = arith.mulf %295, %295 : vector<16x256xf32>
      %cst_152 = arith.constant dense<0.000000e+00> : vector<16xf32>
      %301 = vector.multi_reduction <add>, %300, %cst_152 [1] : vector<16x256xf32> to vector<16xf32>
      %302 = vector.shape_cast %301 : vector<16xf32> to vector<16x1xf32>
      %cst_153 = arith.constant 3.906250e-03 : f32
      %303 = vector.broadcast %cst_153 : f32 to vector<16x1xf32>
      %304 = arith.mulf %302, %303 : vector<16x1xf32>
      %305 = arith.mulf %299, %299 : vector<16x1xf32>
      %306 = arith.subf %304, %305 : vector<16x1xf32>
      %cst_154 = arith.constant 9.99999974E-6 : f32
      %307 = vector.broadcast %cst_154 : f32 to vector<16x1xf32>
      %308 = arith.addf %306, %307 : vector<16x1xf32>
      %309 = math.rsqrt %308 : vector<16x1xf32>
      %310 = arith.mulf %4, %309 : vector<16x1xf32>
      %311 = vector.broadcast %310 : vector<16x1xf32> to vector<16x256xf32>
      %312 = arith.mulf %295, %311 : vector<16x256xf32>
      %313 = arith.mulf %299, %310 : vector<16x1xf32>
      %314 = arith.subf %5, %313 : vector<16x1xf32>
      %315 = vector.broadcast %314 : vector<16x1xf32> to vector<16x256xf32>
      %316 = arith.addf %312, %315 : vector<16x256xf32>
      %317 = vector.extract_strided_slice %316 {offsets = [0, 0], sizes = [8, 256], strides = [1, 1]} : vector<16x256xf32> to vector<8x256xf32>
      %318 = vector.extract_strided_slice %316 {offsets = [8, 0], sizes = [8, 256], strides = [1, 1]} : vector<16x256xf32> to vector<8x256xf32>
      %319 = arith.addf %317, %318 : vector<8x256xf32>
      %cst_155 = arith.constant 0.000000e+00 : f32
      %320 = vector.broadcast %cst_155 : f32 to vector<8x256xf32>
      %321 = arith.maximumf %319, %320 : vector<8x256xf32>
      %322 = tpu.concatenate %294, %321 in 1 : vector<8x256xf32>, vector<8x256xf32> -> vector<8x512xf32>
      %c0_156 = arith.constant 0 : index
      %c0_157 = arith.constant 0 : index
      %323 = vector.load %arg8[%c0_156, %c0_157] : memref<8x512xf32, #tpu.memory_space<vmem>>, vector<8x512xf32>
      tpu.vector_store %arg8[%c0_156, %c0_157], %322 {strides = array<i32>} : memref<8x512xf32, #tpu.memory_space<vmem>>, vector<8x512xf32>,
      %c0_158 = arith.constant 0 : index
      %c2_159 = arith.constant 2 : index
      %c0_160 = arith.constant 0 : index
      %c0_161 = arith.constant 0 : index
      %324 = vector.load %arg7[%c0_158, %c2_159, %c0_160, %c0_161] : memref<1x4x8x512xf32, #tpu.memory_space<vmem>>, vector<1x1x8x512xf32>
      %325 = vector.shape_cast %324 : vector<1x1x8x512xf32> to vector<8x512xf32>
      %326 = vector.shape_cast %322 : vector<8x512xf32> to vector<1x1x8x512xf32>
      tpu.vector_store %arg7[%c0_158, %c2_159, %c0_160, %c0_161], %326 {strides = array<i32>} : memref<1x4x8x512xf32, #tpu.memory_space<vmem>>, vector<1x1x8x512xf32>,
      %c0_162 = arith.constant 0 : index
      %c0_163 = arith.constant 0 : index
      %327 = vector.load %arg8[%c0_162, %c0_163] : memref<8x512xf32, #tpu.memory_space<vmem>>, vector<8x512xf32>
      %c3_164 = arith.constant 3 : index
      %c0_165 = arith.constant 0 : index
      %c0_166 = arith.constant 0 : index
      %328 = vector.load %arg2[%c3_164, %c0_165, %c0_166] : memref<4x8x512xf32, #tpu.memory_space<vmem>>, vector<1x8x512xf32>
      %329 = vector.shape_cast %328 : vector<1x8x512xf32> to vector<8x512xf32>
      %330 = tpu.concatenate %327, %329 in 0 : vector<8x512xf32>, vector<8x512xf32> -> vector<16x512xf32>
      %c17_i32_167 = arith.constant 17 : i32
      %331 = tpu.dynamic_rotate %330 by %c17_i32_167 dim 1 : vector<16x512xf32>, i32 -> vector<16x512xf32>
      %c0_168 = arith.constant 0 : index
      %c0_169 = arith.constant 0 : index
      %c0_170 = arith.constant 0 : index
      %332 = vector.load %arg6[%c0_168, %c0_169, %c0_170] : memref<9x1x512xf32, #tpu.memory_space<vmem>>, vector<1x1x512xf32>
      %333 = vector.shape_cast %332 : vector<1x1x512xf32> to vector<1x512xf32>
      %334 = vector.broadcast %333 : vector<1x512xf32> to vector<16x512xf32>
      %335 = arith.mulf %331, %334 : vector<16x512xf32>
      %c16_i32_171 = arith.constant 16 : i32
      %336 = tpu.dynamic_rotate %330 by %c16_i32_171 dim 1 : vector<16x512xf32>, i32 -> vector<16x512xf32>
      %c1_172 = arith.constant 1 : index
      %c0_173 = arith.constant 0 : index
      %c0_174 = arith.constant 0 : index
      %337 = vector.load %arg6[%c1_172, %c0_173, %c0_174] : memref<9x1x512xf32, #tpu.memory_space<vmem>>, vector<1x1x512xf32>
      %338 = vector.shape_cast %337 : vector<1x1x512xf32> to vector<1x512xf32>
      %339 = vector.broadcast %338 : vector<1x512xf32> to vector<16x512xf32>
      %340 = arith.mulf %336, %339 : vector<16x512xf32>
      %c15_i32_175 = arith.constant 15 : i32
      %341 = tpu.dynamic_rotate %330 by %c15_i32_175 dim 1 : vector<16x512xf32>, i32 -> vector<16x512xf32>
      %c2_176 = arith.constant 2 : index
      %c0_177 = arith.constant 0 : index
      %c0_178 = arith.constant 0 : index
      %342 = vector.load %arg6[%c2_176, %c0_177, %c0_178] : memref<9x1x512xf32, #tpu.memory_space<vmem>>, vector<1x1x512xf32>
      %343 = vector.shape_cast %342 : vector<1x1x512xf32> to vector<1x512xf32>
      %344 = vector.broadcast %343 : vector<1x512xf32> to vector<16x512xf32>
      %345 = arith.mulf %341, %344 : vector<16x512xf32>
      %c1_i32_179 = arith.constant 1 : i32
      %346 = tpu.dynamic_rotate %330 by %c1_i32_179 dim 1 : vector<16x512xf32>, i32 -> vector<16x512xf32>
      %c3_180 = arith.constant 3 : index
      %c0_181 = arith.constant 0 : index
      %c0_182 = arith.constant 0 : index
      %347 = vector.load %arg6[%c3_180, %c0_181, %c0_182] : memref<9x1x512xf32, #tpu.memory_space<vmem>>, vector<1x1x512xf32>
      %348 = vector.shape_cast %347 : vector<1x1x512xf32> to vector<1x512xf32>
      %349 = vector.broadcast %348 : vector<1x512xf32> to vector<16x512xf32>
      %350 = arith.mulf %346, %349 : vector<16x512xf32>
      %c511_i32_183 = arith.constant 511 : i32
      %351 = tpu.dynamic_rotate %330 by %c511_i32_183 dim 1 : vector<16x512xf32>, i32 -> vector<16x512xf32>
      %c5_184 = arith.constant 5 : index
      %c0_185 = arith.constant 0 : index
      %c0_186 = arith.constant 0 : index
      %352 = vector.load %arg6[%c5_184, %c0_185, %c0_186] : memref<9x1x512xf32, #tpu.memory_space<vmem>>, vector<1x1x512xf32>
      %353 = vector.shape_cast %352 : vector<1x1x512xf32> to vector<1x512xf32>
      %354 = vector.broadcast %353 : vector<1x512xf32> to vector<16x512xf32>
      %355 = arith.mulf %351, %354 : vector<16x512xf32>
      %c497_i32_187 = arith.constant 497 : i32
      %356 = tpu.dynamic_rotate %330 by %c497_i32_187 dim 1 : vector<16x512xf32>, i32 -> vector<16x512xf32>
      %c6_188 = arith.constant 6 : index
      %c0_189 = arith.constant 0 : index
      %c0_190 = arith.constant 0 : index
      %357 = vector.load %arg6[%c6_188, %c0_189, %c0_190] : memref<9x1x512xf32, #tpu.memory_space<vmem>>, vector<1x1x512xf32>
      %358 = vector.shape_cast %357 : vector<1x1x512xf32> to vector<1x512xf32>
      %359 = vector.broadcast %358 : vector<1x512xf32> to vector<16x512xf32>
      %360 = arith.mulf %356, %359 : vector<16x512xf32>
      %c496_i32_191 = arith.constant 496 : i32
      %361 = tpu.dynamic_rotate %330 by %c496_i32_191 dim 1 : vector<16x512xf32>, i32 -> vector<16x512xf32>
      %c7_192 = arith.constant 7 : index
      %c0_193 = arith.constant 0 : index
      %c0_194 = arith.constant 0 : index
      %362 = vector.load %arg6[%c7_192, %c0_193, %c0_194] : memref<9x1x512xf32, #tpu.memory_space<vmem>>, vector<1x1x512xf32>
      %363 = vector.shape_cast %362 : vector<1x1x512xf32> to vector<1x512xf32>
      %364 = vector.broadcast %363 : vector<1x512xf32> to vector<16x512xf32>
      %365 = arith.mulf %361, %364 : vector<16x512xf32>
      %c495_i32_195 = arith.constant 495 : i32
      %366 = tpu.dynamic_rotate %330 by %c495_i32_195 dim 1 : vector<16x512xf32>, i32 -> vector<16x512xf32>
      %c8_196 = arith.constant 8 : index
      %c0_197 = arith.constant 0 : index
      %c0_198 = arith.constant 0 : index
      %367 = vector.load %arg6[%c8_196, %c0_197, %c0_198] : memref<9x1x512xf32, #tpu.memory_space<vmem>>, vector<1x1x512xf32>
      %368 = vector.shape_cast %367 : vector<1x1x512xf32> to vector<1x512xf32>
      %369 = vector.broadcast %368 : vector<1x512xf32> to vector<16x512xf32>
      %370 = arith.mulf %366, %369 : vector<16x512xf32>
      %371 = tpu.concatenate %335, %340, %345, %350, %330, %355, %360, %365, %370 in 0 : vector<16x512xf32>, vector<16x512xf32>, vector<16x512xf32>, vector<16x512xf32>, vector<16x512xf32>, vector<16x512xf32>, vector<16x512xf32>, vector<16x512xf32>, vector<16x512xf32> -> vector<144x512xf32>
      %cst_199 = arith.constant dense<0.000000e+00> : vector<16x512xf32>
      %372 = tpu.matmul %3, %371, %cst_199 {dimension_numbers = #tpu.dot_dimension_numbers<[1], [0], [0], [1], [0, 0, 1, 1], [], []>} : vector<16x144xf32>, vector<144x512xf32>, vector<16x512xf32> -> vector<16x512xf32>
      %373 = vector.extract_strided_slice %372 {offsets = [0, 0], sizes = [16, 256], strides = [1, 1]} : vector<16x512xf32> to vector<16x256xf32>
      %cst_200 = arith.constant dense<0.000000e+00> : vector<16xf32>
      %374 = vector.multi_reduction <add>, %373, %cst_200 [1] : vector<16x256xf32> to vector<16xf32>
      %375 = vector.shape_cast %374 : vector<16xf32> to vector<16x1xf32>
      %cst_201 = arith.constant 3.906250e-03 : f32
      %376 = vector.broadcast %cst_201 : f32 to vector<16x1xf32>
      %377 = arith.mulf %375, %376 : vector<16x1xf32>
      %378 = arith.mulf %373, %373 : vector<16x256xf32>
      %cst_202 = arith.constant dense<0.000000e+00> : vector<16xf32>
      %379 = vector.multi_reduction <add>, %378, %cst_202 [1] : vector<16x256xf32> to vector<16xf32>
      %380 = vector.shape_cast %379 : vector<16xf32> to vector<16x1xf32>
      %cst_203 = arith.constant 3.906250e-03 : f32
      %381 = vector.broadcast %cst_203 : f32 to vector<16x1xf32>
      %382 = arith.mulf %380, %381 : vector<16x1xf32>
      %383 = arith.mulf %377, %377 : vector<16x1xf32>
      %384 = arith.subf %382, %383 : vector<16x1xf32>
      %cst_204 = arith.constant 9.99999974E-6 : f32
      %385 = vector.broadcast %cst_204 : f32 to vector<16x1xf32>
      %386 = arith.addf %384, %385 : vector<16x1xf32>
      %387 = math.rsqrt %386 : vector<16x1xf32>
      %388 = arith.mulf %4, %387 : vector<16x1xf32>
      %389 = vector.broadcast %388 : vector<16x1xf32> to vector<16x256xf32>
      %390 = arith.mulf %373, %389 : vector<16x256xf32>
      %391 = arith.mulf %377, %388 : vector<16x1xf32>
      %392 = arith.subf %5, %391 : vector<16x1xf32>
      %393 = vector.broadcast %392 : vector<16x1xf32> to vector<16x256xf32>
      %394 = arith.addf %390, %393 : vector<16x256xf32>
      %395 = vector.extract_strided_slice %394 {offsets = [0, 0], sizes = [8, 256], strides = [1, 1]} : vector<16x256xf32> to vector<8x256xf32>
      %396 = vector.extract_strided_slice %394 {offsets = [8, 0], sizes = [8, 256], strides = [1, 1]} : vector<16x256xf32> to vector<8x256xf32>
      %397 = arith.addf %395, %396 : vector<8x256xf32>
      %cst_205 = arith.constant 0.000000e+00 : f32
      %398 = vector.broadcast %cst_205 : f32 to vector<8x256xf32>
      %399 = arith.maximumf %397, %398 : vector<8x256xf32>
      %400 = vector.extract_strided_slice %372 {offsets = [0, 256], sizes = [16, 256], strides = [1, 1]} : vector<16x512xf32> to vector<16x256xf32>
      %cst_206 = arith.constant dense<0.000000e+00> : vector<16xf32>
      %401 = vector.multi_reduction <add>, %400, %cst_206 [1] : vector<16x256xf32> to vector<16xf32>
      %402 = vector.shape_cast %401 : vector<16xf32> to vector<16x1xf32>
      %cst_207 = arith.constant 3.906250e-03 : f32
      %403 = vector.broadcast %cst_207 : f32 to vector<16x1xf32>
      %404 = arith.mulf %402, %403 : vector<16x1xf32>
      %405 = arith.mulf %400, %400 : vector<16x256xf32>
      %cst_208 = arith.constant dense<0.000000e+00> : vector<16xf32>
      %406 = vector.multi_reduction <add>, %405, %cst_208 [1] : vector<16x256xf32> to vector<16xf32>
      %407 = vector.shape_cast %406 : vector<16xf32> to vector<16x1xf32>
      %cst_209 = arith.constant 3.906250e-03 : f32
      %408 = vector.broadcast %cst_209 : f32 to vector<16x1xf32>
      %409 = arith.mulf %407, %408 : vector<16x1xf32>
      %410 = arith.mulf %404, %404 : vector<16x1xf32>
      %411 = arith.subf %409, %410 : vector<16x1xf32>
      %cst_210 = arith.constant 9.99999974E-6 : f32
      %412 = vector.broadcast %cst_210 : f32 to vector<16x1xf32>
      %413 = arith.addf %411, %412 : vector<16x1xf32>
      %414 = math.rsqrt %413 : vector<16x1xf32>
      %415 = arith.mulf %4, %414 : vector<16x1xf32>
      %416 = vector.broadcast %415 : vector<16x1xf32> to vector<16x256xf32>
      %417 = arith.mulf %400, %416 : vector<16x256xf32>
      %418 = arith.mulf %404, %415 : vector<16x1xf32>
      %419 = arith.subf %5, %418 : vector<16x1xf32>
      %420 = vector.broadcast %419 : vector<16x1xf32> to vector<16x256xf32>
      %421 = arith.addf %417, %420 : vector<16x256xf32>
      %422 = vector.extract_strided_slice %421 {offsets = [0, 0], sizes = [8, 256], strides = [1, 1]} : vector<16x256xf32> to vector<8x256xf32>
      %423 = vector.extract_strided_slice %421 {offsets = [8, 0], sizes = [8, 256], strides = [1, 1]} : vector<16x256xf32> to vector<8x256xf32>
      %424 = arith.addf %422, %423 : vector<8x256xf32>
      %cst_211 = arith.constant 0.000000e+00 : f32
      %425 = vector.broadcast %cst_211 : f32 to vector<8x256xf32>
      %426 = arith.maximumf %424, %425 : vector<8x256xf32>
      %427 = tpu.concatenate %399, %426 in 1 : vector<8x256xf32>, vector<8x256xf32> -> vector<8x512xf32>
      %c0_212 = arith.constant 0 : index
      %c0_213 = arith.constant 0 : index
      %428 = vector.load %arg8[%c0_212, %c0_213] : memref<8x512xf32, #tpu.memory_space<vmem>>, vector<8x512xf32>
      tpu.vector_store %arg8[%c0_212, %c0_213], %427 {strides = array<i32>} : memref<8x512xf32, #tpu.memory_space<vmem>>, vector<8x512xf32>,
      %c0_214 = arith.constant 0 : index
      %c3_215 = arith.constant 3 : index
      %c0_216 = arith.constant 0 : index
      %c0_217 = arith.constant 0 : index
      %429 = vector.load %arg7[%c0_214, %c3_215, %c0_216, %c0_217] : memref<1x4x8x512xf32, #tpu.memory_space<vmem>>, vector<1x1x8x512xf32>
      %430 = vector.shape_cast %429 : vector<1x1x8x512xf32> to vector<8x512xf32>
      %431 = vector.shape_cast %427 : vector<8x512xf32> to vector<1x1x8x512xf32>
      tpu.vector_store %arg7[%c0_214, %c3_215, %c0_216, %c0_217], %431 {strides = array<i32>} : memref<1x4x8x512xf32, #tpu.memory_space<vmem>>, vector<1x1x8x512xf32>,
    } else {
    }
    %c1_i32 = arith.constant 1 : i32
    %9 = arith.cmpi eq, %arg0, %c1_i32 : i32
    %10 = arith.extui %9 : i1 to i32
    %c0_i32_8 = arith.constant 0 : i32
    %11 = arith.cmpi ne, %10, %c0_i32_8 : i32
    scf.if %11 {
      %c0_9 = arith.constant 0 : index
      %c0_10 = arith.constant 0 : index
      %12 = vector.load %arg8[%c0_9, %c0_10] : memref<8x512xf32, #tpu.memory_space<vmem>>, vector<8x512xf32>
      %c3 = arith.constant 3 : index
      %c0_11 = arith.constant 0 : index
      %c0_12 = arith.constant 0 : index
      %13 = vector.load %arg2[%c3, %c0_11, %c0_12] : memref<4x8x512xf32, #tpu.memory_space<vmem>>, vector<1x8x512xf32>
      %14 = vector.shape_cast %13 : vector<1x8x512xf32> to vector<8x512xf32>
      %15 = tpu.concatenate %12, %14 in 0 : vector<8x512xf32>, vector<8x512xf32> -> vector<16x512xf32>
      %c17_i32 = arith.constant 17 : i32
      %16 = tpu.dynamic_rotate %15 by %c17_i32 dim 1 : vector<16x512xf32>, i32 -> vector<16x512xf32>
      %c0_13 = arith.constant 0 : index
      %c0_14 = arith.constant 0 : index
      %c0_15 = arith.constant 0 : index
      %17 = vector.load %arg6[%c0_13, %c0_14, %c0_15] : memref<9x1x512xf32, #tpu.memory_space<vmem>>, vector<1x1x512xf32>
      %18 = vector.shape_cast %17 : vector<1x1x512xf32> to vector<1x512xf32>
      %19 = vector.broadcast %18 : vector<1x512xf32> to vector<16x512xf32>
      %20 = arith.mulf %16, %19 : vector<16x512xf32>
      %c16_i32 = arith.constant 16 : i32
      %21 = tpu.dynamic_rotate %15 by %c16_i32 dim 1 : vector<16x512xf32>, i32 -> vector<16x512xf32>
      %c1 = arith.constant 1 : index
      %c0_16 = arith.constant 0 : index
      %c0_17 = arith.constant 0 : index
      %22 = vector.load %arg6[%c1, %c0_16, %c0_17] : memref<9x1x512xf32, #tpu.memory_space<vmem>>, vector<1x1x512xf32>
      %23 = vector.shape_cast %22 : vector<1x1x512xf32> to vector<1x512xf32>
      %24 = vector.broadcast %23 : vector<1x512xf32> to vector<16x512xf32>
      %25 = arith.mulf %21, %24 : vector<16x512xf32>
      %c15_i32 = arith.constant 15 : i32
      %26 = tpu.dynamic_rotate %15 by %c15_i32 dim 1 : vector<16x512xf32>, i32 -> vector<16x512xf32>
      %c2 = arith.constant 2 : index
      %c0_18 = arith.constant 0 : index
      %c0_19 = arith.constant 0 : index
      %27 = vector.load %arg6[%c2, %c0_18, %c0_19] : memref<9x1x512xf32, #tpu.memory_space<vmem>>, vector<1x1x512xf32>
      %28 = vector.shape_cast %27 : vector<1x1x512xf32> to vector<1x512xf32>
      %29 = vector.broadcast %28 : vector<1x512xf32> to vector<16x512xf32>
      %30 = arith.mulf %26, %29 : vector<16x512xf32>
      %c1_i32_20 = arith.constant 1 : i32
      %31 = tpu.dynamic_rotate %15 by %c1_i32_20 dim 1 : vector<16x512xf32>, i32 -> vector<16x512xf32>
      %c3_21 = arith.constant 3 : index
      %c0_22 = arith.constant 0 : index
      %c0_23 = arith.constant 0 : index
      %32 = vector.load %arg6[%c3_21, %c0_22, %c0_23] : memref<9x1x512xf32, #tpu.memory_space<vmem>>, vector<1x1x512xf32>
      %33 = vector.shape_cast %32 : vector<1x1x512xf32> to vector<1x512xf32>
      %34 = vector.broadcast %33 : vector<1x512xf32> to vector<16x512xf32>
      %35 = arith.mulf %31, %34 : vector<16x512xf32>
      %c511_i32 = arith.constant 511 : i32
      %36 = tpu.dynamic_rotate %15 by %c511_i32 dim 1 : vector<16x512xf32>, i32 -> vector<16x512xf32>
      %c5 = arith.constant 5 : index
      %c0_24 = arith.constant 0 : index
      %c0_25 = arith.constant 0 : index
      %37 = vector.load %arg6[%c5, %c0_24, %c0_25] : memref<9x1x512xf32, #tpu.memory_space<vmem>>, vector<1x1x512xf32>
      %38 = vector.shape_cast %37 : vector<1x1x512xf32> to vector<1x512xf32>
      %39 = vector.broadcast %38 : vector<1x512xf32> to vector<16x512xf32>
      %40 = arith.mulf %36, %39 : vector<16x512xf32>
      %c497_i32 = arith.constant 497 : i32
      %41 = tpu.dynamic_rotate %15 by %c497_i32 dim 1 : vector<16x512xf32>, i32 -> vector<16x512xf32>
      %c6 = arith.constant 6 : index
      %c0_26 = arith.constant 0 : index
      %c0_27 = arith.constant 0 : index
      %42 = vector.load %arg6[%c6, %c0_26, %c0_27] : memref<9x1x512xf32, #tpu.memory_space<vmem>>, vector<1x1x512xf32>
      %43 = vector.shape_cast %42 : vector<1x1x512xf32> to vector<1x512xf32>
      %44 = vector.broadcast %43 : vector<1x512xf32> to vector<16x512xf32>
      %45 = arith.mulf %41, %44 : vector<16x512xf32>
      %c496_i32 = arith.constant 496 : i32
      %46 = tpu.dynamic_rotate %15 by %c496_i32 dim 1 : vector<16x512xf32>, i32 -> vector<16x512xf32>
      %c7 = arith.constant 7 : index
      %c0_28 = arith.constant 0 : index
      %c0_29 = arith.constant 0 : index
      %47 = vector.load %arg6[%c7, %c0_28, %c0_29] : memref<9x1x512xf32, #tpu.memory_space<vmem>>, vector<1x1x512xf32>
      %48 = vector.shape_cast %47 : vector<1x1x512xf32> to vector<1x512xf32>
      %49 = vector.broadcast %48 : vector<1x512xf32> to vector<16x512xf32>
      %50 = arith.mulf %46, %49 : vector<16x512xf32>
      %c495_i32 = arith.constant 495 : i32
      %51 = tpu.dynamic_rotate %15 by %c495_i32 dim 1 : vector<16x512xf32>, i32 -> vector<16x512xf32>
      %c8 = arith.constant 8 : index
      %c0_30 = arith.constant 0 : index
      %c0_31 = arith.constant 0 : index
      %52 = vector.load %arg6[%c8, %c0_30, %c0_31] : memref<9x1x512xf32, #tpu.memory_space<vmem>>, vector<1x1x512xf32>
      %53 = vector.shape_cast %52 : vector<1x1x512xf32> to vector<1x512xf32>
      %54 = vector.broadcast %53 : vector<1x512xf32> to vector<16x512xf32>
      %55 = arith.mulf %51, %54 : vector<16x512xf32>
      %56 = tpu.concatenate %20, %25, %30, %35, %15, %40, %45, %50, %55 in 0 : vector<16x512xf32>, vector<16x512xf32>, vector<16x512xf32>, vector<16x512xf32>, vector<16x512xf32>, vector<16x512xf32>, vector<16x512xf32>, vector<16x512xf32>, vector<16x512xf32> -> vector<144x512xf32>
      %cst = arith.constant dense<0.000000e+00> : vector<16x512xf32>
      %57 = tpu.matmul %3, %56, %cst {dimension_numbers = #tpu.dot_dimension_numbers<[1], [0], [0], [1], [0, 0, 1, 1], [], []>} : vector<16x144xf32>, vector<144x512xf32>, vector<16x512xf32> -> vector<16x512xf32>
      %58 = vector.extract_strided_slice %57 {offsets = [0, 0], sizes = [16, 256], strides = [1, 1]} : vector<16x512xf32> to vector<16x256xf32>
      %cst_32 = arith.constant dense<0.000000e+00> : vector<16xf32>
      %59 = vector.multi_reduction <add>, %58, %cst_32 [1] : vector<16x256xf32> to vector<16xf32>
      %60 = vector.shape_cast %59 : vector<16xf32> to vector<16x1xf32>
      %cst_33 = arith.constant 3.906250e-03 : f32
      %61 = vector.broadcast %cst_33 : f32 to vector<16x1xf32>
      %62 = arith.mulf %60, %61 : vector<16x1xf32>
      %63 = arith.mulf %58, %58 : vector<16x256xf32>
      %cst_34 = arith.constant dense<0.000000e+00> : vector<16xf32>
      %64 = vector.multi_reduction <add>, %63, %cst_34 [1] : vector<16x256xf32> to vector<16xf32>
      %65 = vector.shape_cast %64 : vector<16xf32> to vector<16x1xf32>
      %cst_35 = arith.constant 3.906250e-03 : f32
      %66 = vector.broadcast %cst_35 : f32 to vector<16x1xf32>
      %67 = arith.mulf %65, %66 : vector<16x1xf32>
      %68 = arith.mulf %62, %62 : vector<16x1xf32>
      %69 = arith.subf %67, %68 : vector<16x1xf32>
      %cst_36 = arith.constant 9.99999974E-6 : f32
      %70 = vector.broadcast %cst_36 : f32 to vector<16x1xf32>
      %71 = arith.addf %69, %70 : vector<16x1xf32>
      %72 = math.rsqrt %71 : vector<16x1xf32>
      %73 = arith.mulf %4, %72 : vector<16x1xf32>
      %74 = vector.broadcast %73 : vector<16x1xf32> to vector<16x256xf32>
      %75 = arith.mulf %58, %74 : vector<16x256xf32>
      %76 = arith.mulf %62, %73 : vector<16x1xf32>
      %77 = arith.subf %5, %76 : vector<16x1xf32>
      %78 = vector.broadcast %77 : vector<16x1xf32> to vector<16x256xf32>
      %79 = arith.addf %75, %78 : vector<16x256xf32>
      %80 = vector.extract_strided_slice %79 {offsets = [0, 0], sizes = [8, 256], strides = [1, 1]} : vector<16x256xf32> to vector<8x256xf32>
      %81 = vector.extract_strided_slice %79 {offsets = [8, 0], sizes = [8, 256], strides = [1, 1]} : vector<16x256xf32> to vector<8x256xf32>
      %82 = arith.addf %80, %81 : vector<8x256xf32>
      %cst_37 = arith.constant 0.000000e+00 : f32
      %83 = vector.broadcast %cst_37 : f32 to vector<8x256xf32>
      %84 = arith.maximumf %82, %83 : vector<8x256xf32>
      %85 = vector.extract_strided_slice %57 {offsets = [0, 256], sizes = [16, 256], strides = [1, 1]} : vector<16x512xf32> to vector<16x256xf32>
      %cst_38 = arith.constant dense<0.000000e+00> : vector<16xf32>
      %86 = vector.multi_reduction <add>, %85, %cst_38 [1] : vector<16x256xf32> to vector<16xf32>
      %87 = vector.shape_cast %86 : vector<16xf32> to vector<16x1xf32>
      %cst_39 = arith.constant 3.906250e-03 : f32
      %88 = vector.broadcast %cst_39 : f32 to vector<16x1xf32>
      %89 = arith.mulf %87, %88 : vector<16x1xf32>
      %90 = arith.mulf %85, %85 : vector<16x256xf32>
      %cst_40 = arith.constant dense<0.000000e+00> : vector<16xf32>
      %91 = vector.multi_reduction <add>, %90, %cst_40 [1] : vector<16x256xf32> to vector<16xf32>
      %92 = vector.shape_cast %91 : vector<16xf32> to vector<16x1xf32>
      %cst_41 = arith.constant 3.906250e-03 : f32
      %93 = vector.broadcast %cst_41 : f32 to vector<16x1xf32>
      %94 = arith.mulf %92, %93 : vector<16x1xf32>
      %95 = arith.mulf %89, %89 : vector<16x1xf32>
      %96 = arith.subf %94, %95 : vector<16x1xf32>
      %cst_42 = arith.constant 9.99999974E-6 : f32
      %97 = vector.broadcast %cst_42 : f32 to vector<16x1xf32>
      %98 = arith.addf %96, %97 : vector<16x1xf32>
      %99 = math.rsqrt %98 : vector<16x1xf32>
      %100 = arith.mulf %4, %99 : vector<16x1xf32>
      %101 = vector.broadcast %100 : vector<16x1xf32> to vector<16x256xf32>
      %102 = arith.mulf %85, %101 : vector<16x256xf32>
      %103 = arith.mulf %89, %100 : vector<16x1xf32>
      %104 = arith.subf %5, %103 : vector<16x1xf32>
      %105 = vector.broadcast %104 : vector<16x1xf32> to vector<16x256xf32>
      %106 = arith.addf %102, %105 : vector<16x256xf32>
      %107 = vector.extract_strided_slice %106 {offsets = [0, 0], sizes = [8, 256], strides = [1, 1]} : vector<16x256xf32> to vector<8x256xf32>
      %108 = vector.extract_strided_slice %106 {offsets = [8, 0], sizes = [8, 256], strides = [1, 1]} : vector<16x256xf32> to vector<8x256xf32>
      %109 = arith.addf %107, %108 : vector<8x256xf32>
      %cst_43 = arith.constant 0.000000e+00 : f32
      %110 = vector.broadcast %cst_43 : f32 to vector<8x256xf32>
      %111 = arith.maximumf %109, %110 : vector<8x256xf32>
      %112 = tpu.concatenate %84, %111 in 1 : vector<8x256xf32>, vector<8x256xf32> -> vector<8x512xf32>
      %c0_44 = arith.constant 0 : index
      %c0_45 = arith.constant 0 : index
      %113 = vector.load %arg8[%c0_44, %c0_45] : memref<8x512xf32, #tpu.memory_space<vmem>>, vector<8x512xf32>
      tpu.vector_store %arg8[%c0_44, %c0_45], %112 {strides = array<i32>} : memref<8x512xf32, #tpu.memory_space<vmem>>, vector<8x512xf32>,
      %c0_46 = arith.constant 0 : index
      %c3_47 = arith.constant 3 : index
      %c0_48 = arith.constant 0 : index
      %c0_49 = arith.constant 0 : index
      %114 = vector.load %arg7[%c0_46, %c3_47, %c0_48, %c0_49] : memref<1x4x8x512xf32, #tpu.memory_space<vmem>>, vector<1x1x8x512xf32>
      %115 = vector.shape_cast %114 : vector<1x1x8x512xf32> to vector<8x512xf32>
      %116 = vector.shape_cast %112 : vector<8x512xf32> to vector<1x1x8x512xf32>
      tpu.vector_store %arg7[%c0_46, %c3_47, %c0_48, %c0_49], %116 {strides = array<i32>} : memref<1x4x8x512xf32, #tpu.memory_space<vmem>>, vector<1x1x8x512xf32>,
      %c0_50 = arith.constant 0 : index
      %c0_51 = arith.constant 0 : index
      %117 = vector.load %arg8[%c0_50, %c0_51] : memref<8x512xf32, #tpu.memory_space<vmem>>, vector<8x512xf32>
      %c2_52 = arith.constant 2 : index
      %c0_53 = arith.constant 0 : index
      %c0_54 = arith.constant 0 : index
      %118 = vector.load %arg2[%c2_52, %c0_53, %c0_54] : memref<4x8x512xf32, #tpu.memory_space<vmem>>, vector<1x8x512xf32>
      %119 = vector.shape_cast %118 : vector<1x8x512xf32> to vector<8x512xf32>
      %120 = tpu.concatenate %117, %119 in 0 : vector<8x512xf32>, vector<8x512xf32> -> vector<16x512xf32>
      %c17_i32_55 = arith.constant 17 : i32
      %121 = tpu.dynamic_rotate %120 by %c17_i32_55 dim 1 : vector<16x512xf32>, i32 -> vector<16x512xf32>
      %c0_56 = arith.constant 0 : index
      %c0_57 = arith.constant 0 : index
      %c0_58 = arith.constant 0 : index
      %122 = vector.load %arg6[%c0_56, %c0_57, %c0_58] : memref<9x1x512xf32, #tpu.memory_space<vmem>>, vector<1x1x512xf32>
      %123 = vector.shape_cast %122 : vector<1x1x512xf32> to vector<1x512xf32>
      %124 = vector.broadcast %123 : vector<1x512xf32> to vector<16x512xf32>
      %125 = arith.mulf %121, %124 : vector<16x512xf32>
      %c16_i32_59 = arith.constant 16 : i32
      %126 = tpu.dynamic_rotate %120 by %c16_i32_59 dim 1 : vector<16x512xf32>, i32 -> vector<16x512xf32>
      %c1_60 = arith.constant 1 : index
      %c0_61 = arith.constant 0 : index
      %c0_62 = arith.constant 0 : index
      %127 = vector.load %arg6[%c1_60, %c0_61, %c0_62] : memref<9x1x512xf32, #tpu.memory_space<vmem>>, vector<1x1x512xf32>
      %128 = vector.shape_cast %127 : vector<1x1x512xf32> to vector<1x512xf32>
      %129 = vector.broadcast %128 : vector<1x512xf32> to vector<16x512xf32>
      %130 = arith.mulf %126, %129 : vector<16x512xf32>
      %c15_i32_63 = arith.constant 15 : i32
      %131 = tpu.dynamic_rotate %120 by %c15_i32_63 dim 1 : vector<16x512xf32>, i32 -> vector<16x512xf32>
      %c2_64 = arith.constant 2 : index
      %c0_65 = arith.constant 0 : index
      %c0_66 = arith.constant 0 : index
      %132 = vector.load %arg6[%c2_64, %c0_65, %c0_66] : memref<9x1x512xf32, #tpu.memory_space<vmem>>, vector<1x1x512xf32>
      %133 = vector.shape_cast %132 : vector<1x1x512xf32> to vector<1x512xf32>
      %134 = vector.broadcast %133 : vector<1x512xf32> to vector<16x512xf32>
      %135 = arith.mulf %131, %134 : vector<16x512xf32>
      %c1_i32_67 = arith.constant 1 : i32
      %136 = tpu.dynamic_rotate %120 by %c1_i32_67 dim 1 : vector<16x512xf32>, i32 -> vector<16x512xf32>
      %c3_68 = arith.constant 3 : index
      %c0_69 = arith.constant 0 : index
      %c0_70 = arith.constant 0 : index
      %137 = vector.load %arg6[%c3_68, %c0_69, %c0_70] : memref<9x1x512xf32, #tpu.memory_space<vmem>>, vector<1x1x512xf32>
      %138 = vector.shape_cast %137 : vector<1x1x512xf32> to vector<1x512xf32>
      %139 = vector.broadcast %138 : vector<1x512xf32> to vector<16x512xf32>
      %140 = arith.mulf %136, %139 : vector<16x512xf32>
      %c511_i32_71 = arith.constant 511 : i32
      %141 = tpu.dynamic_rotate %120 by %c511_i32_71 dim 1 : vector<16x512xf32>, i32 -> vector<16x512xf32>
      %c5_72 = arith.constant 5 : index
      %c0_73 = arith.constant 0 : index
      %c0_74 = arith.constant 0 : index
      %142 = vector.load %arg6[%c5_72, %c0_73, %c0_74] : memref<9x1x512xf32, #tpu.memory_space<vmem>>, vector<1x1x512xf32>
      %143 = vector.shape_cast %142 : vector<1x1x512xf32> to vector<1x512xf32>
      %144 = vector.broadcast %143 : vector<1x512xf32> to vector<16x512xf32>
      %145 = arith.mulf %141, %144 : vector<16x512xf32>
      %c497_i32_75 = arith.constant 497 : i32
      %146 = tpu.dynamic_rotate %120 by %c497_i32_75 dim 1 : vector<16x512xf32>, i32 -> vector<16x512xf32>
      %c6_76 = arith.constant 6 : index
      %c0_77 = arith.constant 0 : index
      %c0_78 = arith.constant 0 : index
      %147 = vector.load %arg6[%c6_76, %c0_77, %c0_78] : memref<9x1x512xf32, #tpu.memory_space<vmem>>, vector<1x1x512xf32>
      %148 = vector.shape_cast %147 : vector<1x1x512xf32> to vector<1x512xf32>
      %149 = vector.broadcast %148 : vector<1x512xf32> to vector<16x512xf32>
      %150 = arith.mulf %146, %149 : vector<16x512xf32>
      %c496_i32_79 = arith.constant 496 : i32
      %151 = tpu.dynamic_rotate %120 by %c496_i32_79 dim 1 : vector<16x512xf32>, i32 -> vector<16x512xf32>
      %c7_80 = arith.constant 7 : index
      %c0_81 = arith.constant 0 : index
      %c0_82 = arith.constant 0 : index
      %152 = vector.load %arg6[%c7_80, %c0_81, %c0_82] : memref<9x1x512xf32, #tpu.memory_space<vmem>>, vector<1x1x512xf32>
      %153 = vector.shape_cast %152 : vector<1x1x512xf32> to vector<1x512xf32>
      %154 = vector.broadcast %153 : vector<1x512xf32> to vector<16x512xf32>
      %155 = arith.mulf %151, %154 : vector<16x512xf32>
      %c495_i32_83 = arith.constant 495 : i32
      %156 = tpu.dynamic_rotate %120 by %c495_i32_83 dim 1 : vector<16x512xf32>, i32 -> vector<16x512xf32>
      %c8_84 = arith.constant 8 : index
      %c0_85 = arith.constant 0 : index
      %c0_86 = arith.constant 0 : index
      %157 = vector.load %arg6[%c8_84, %c0_85, %c0_86] : memref<9x1x512xf32, #tpu.memory_space<vmem>>, vector<1x1x512xf32>
      %158 = vector.shape_cast %157 : vector<1x1x512xf32> to vector<1x512xf32>
      %159 = vector.broadcast %158 : vector<1x512xf32> to vector<16x512xf32>
      %160 = arith.mulf %156, %159 : vector<16x512xf32>
      %161 = tpu.concatenate %125, %130, %135, %140, %120, %145, %150, %155, %160 in 0 : vector<16x512xf32>, vector<16x512xf32>, vector<16x512xf32>, vector<16x512xf32>, vector<16x512xf32>, vector<16x512xf32>, vector<16x512xf32>, vector<16x512xf32>, vector<16x512xf32> -> vector<144x512xf32>
      %cst_87 = arith.constant dense<0.000000e+00> : vector<16x512xf32>
      %162 = tpu.matmul %3, %161, %cst_87 {dimension_numbers = #tpu.dot_dimension_numbers<[1], [0], [0], [1], [0, 0, 1, 1], [], []>} : vector<16x144xf32>, vector<144x512xf32>, vector<16x512xf32> -> vector<16x512xf32>
      %163 = vector.extract_strided_slice %162 {offsets = [0, 0], sizes = [16, 256], strides = [1, 1]} : vector<16x512xf32> to vector<16x256xf32>
      %cst_88 = arith.constant dense<0.000000e+00> : vector<16xf32>
      %164 = vector.multi_reduction <add>, %163, %cst_88 [1] : vector<16x256xf32> to vector<16xf32>
      %165 = vector.shape_cast %164 : vector<16xf32> to vector<16x1xf32>
      %cst_89 = arith.constant 3.906250e-03 : f32
      %166 = vector.broadcast %cst_89 : f32 to vector<16x1xf32>
      %167 = arith.mulf %165, %166 : vector<16x1xf32>
      %168 = arith.mulf %163, %163 : vector<16x256xf32>
      %cst_90 = arith.constant dense<0.000000e+00> : vector<16xf32>
      %169 = vector.multi_reduction <add>, %168, %cst_90 [1] : vector<16x256xf32> to vector<16xf32>
      %170 = vector.shape_cast %169 : vector<16xf32> to vector<16x1xf32>
      %cst_91 = arith.constant 3.906250e-03 : f32
      %171 = vector.broadcast %cst_91 : f32 to vector<16x1xf32>
      %172 = arith.mulf %170, %171 : vector<16x1xf32>
      %173 = arith.mulf %167, %167 : vector<16x1xf32>
      %174 = arith.subf %172, %173 : vector<16x1xf32>
      %cst_92 = arith.constant 9.99999974E-6 : f32
      %175 = vector.broadcast %cst_92 : f32 to vector<16x1xf32>
      %176 = arith.addf %174, %175 : vector<16x1xf32>
      %177 = math.rsqrt %176 : vector<16x1xf32>
      %178 = arith.mulf %4, %177 : vector<16x1xf32>
      %179 = vector.broadcast %178 : vector<16x1xf32> to vector<16x256xf32>
      %180 = arith.mulf %163, %179 : vector<16x256xf32>
      %181 = arith.mulf %167, %178 : vector<16x1xf32>
      %182 = arith.subf %5, %181 : vector<16x1xf32>
      %183 = vector.broadcast %182 : vector<16x1xf32> to vector<16x256xf32>
      %184 = arith.addf %180, %183 : vector<16x256xf32>
      %185 = vector.extract_strided_slice %184 {offsets = [0, 0], sizes = [8, 256], strides = [1, 1]} : vector<16x256xf32> to vector<8x256xf32>
      %186 = vector.extract_strided_slice %184 {offsets = [8, 0], sizes = [8, 256], strides = [1, 1]} : vector<16x256xf32> to vector<8x256xf32>
      %187 = arith.addf %185, %186 : vector<8x256xf32>
      %cst_93 = arith.constant 0.000000e+00 : f32
      %188 = vector.broadcast %cst_93 : f32 to vector<8x256xf32>
      %189 = arith.maximumf %187, %188 : vector<8x256xf32>
      %190 = vector.extract_strided_slice %162 {offsets = [0, 256], sizes = [16, 256], strides = [1, 1]} : vector<16x512xf32> to vector<16x256xf32>
      %cst_94 = arith.constant dense<0.000000e+00> : vector<16xf32>
      %191 = vector.multi_reduction <add>, %190, %cst_94 [1] : vector<16x256xf32> to vector<16xf32>
      %192 = vector.shape_cast %191 : vector<16xf32> to vector<16x1xf32>
      %cst_95 = arith.constant 3.906250e-03 : f32
      %193 = vector.broadcast %cst_95 : f32 to vector<16x1xf32>
      %194 = arith.mulf %192, %193 : vector<16x1xf32>
      %195 = arith.mulf %190, %190 : vector<16x256xf32>
      %cst_96 = arith.constant dense<0.000000e+00> : vector<16xf32>
      %196 = vector.multi_reduction <add>, %195, %cst_96 [1] : vector<16x256xf32> to vector<16xf32>
      %197 = vector.shape_cast %196 : vector<16xf32> to vector<16x1xf32>
      %cst_97 = arith.constant 3.906250e-03 : f32
      %198 = vector.broadcast %cst_97 : f32 to vector<16x1xf32>
      %199 = arith.mulf %197, %198 : vector<16x1xf32>
      %200 = arith.mulf %194, %194 : vector<16x1xf32>
      %201 = arith.subf %199, %200 : vector<16x1xf32>
      %cst_98 = arith.constant 9.99999974E-6 : f32
      %202 = vector.broadcast %cst_98 : f32 to vector<16x1xf32>
      %203 = arith.addf %201, %202 : vector<16x1xf32>
      %204 = math.rsqrt %203 : vector<16x1xf32>
      %205 = arith.mulf %4, %204 : vector<16x1xf32>
      %206 = vector.broadcast %205 : vector<16x1xf32> to vector<16x256xf32>
      %207 = arith.mulf %190, %206 : vector<16x256xf32>
      %208 = arith.mulf %194, %205 : vector<16x1xf32>
      %209 = arith.subf %5, %208 : vector<16x1xf32>
      %210 = vector.broadcast %209 : vector<16x1xf32> to vector<16x256xf32>
      %211 = arith.addf %207, %210 : vector<16x256xf32>
      %212 = vector.extract_strided_slice %211 {offsets = [0, 0], sizes = [8, 256], strides = [1, 1]} : vector<16x256xf32> to vector<8x256xf32>
      %213 = vector.extract_strided_slice %211 {offsets = [8, 0], sizes = [8, 256], strides = [1, 1]} : vector<16x256xf32> to vector<8x256xf32>
      %214 = arith.addf %212, %213 : vector<8x256xf32>
      %cst_99 = arith.constant 0.000000e+00 : f32
      %215 = vector.broadcast %cst_99 : f32 to vector<8x256xf32>
      %216 = arith.maximumf %214, %215 : vector<8x256xf32>
      %217 = tpu.concatenate %189, %216 in 1 : vector<8x256xf32>, vector<8x256xf32> -> vector<8x512xf32>
      %c0_100 = arith.constant 0 : index
      %c0_101 = arith.constant 0 : index
      %218 = vector.load %arg8[%c0_100, %c0_101] : memref<8x512xf32, #tpu.memory_space<vmem>>, vector<8x512xf32>
      tpu.vector_store %arg8[%c0_100, %c0_101], %217 {strides = array<i32>} : memref<8x512xf32, #tpu.memory_space<vmem>>, vector<8x512xf32>,
      %c0_102 = arith.constant 0 : index
      %c2_103 = arith.constant 2 : index
      %c0_104 = arith.constant 0 : index
      %c0_105 = arith.constant 0 : index
      %219 = vector.load %arg7[%c0_102, %c2_103, %c0_104, %c0_105] : memref<1x4x8x512xf32, #tpu.memory_space<vmem>>, vector<1x1x8x512xf32>
      %220 = vector.shape_cast %219 : vector<1x1x8x512xf32> to vector<8x512xf32>
      %221 = vector.shape_cast %217 : vector<8x512xf32> to vector<1x1x8x512xf32>
      tpu.vector_store %arg7[%c0_102, %c2_103, %c0_104, %c0_105], %221 {strides = array<i32>} : memref<1x4x8x512xf32, #tpu.memory_space<vmem>>, vector<1x1x8x512xf32>,
      %c0_106 = arith.constant 0 : index
      %c0_107 = arith.constant 0 : index
      %222 = vector.load %arg8[%c0_106, %c0_107] : memref<8x512xf32, #tpu.memory_space<vmem>>, vector<8x512xf32>
      %c1_108 = arith.constant 1 : index
      %c0_109 = arith.constant 0 : index
      %c0_110 = arith.constant 0 : index
      %223 = vector.load %arg2[%c1_108, %c0_109, %c0_110] : memref<4x8x512xf32, #tpu.memory_space<vmem>>, vector<1x8x512xf32>
      %224 = vector.shape_cast %223 : vector<1x8x512xf32> to vector<8x512xf32>
      %225 = tpu.concatenate %222, %224 in 0 : vector<8x512xf32>, vector<8x512xf32> -> vector<16x512xf32>
      %c17_i32_111 = arith.constant 17 : i32
      %226 = tpu.dynamic_rotate %225 by %c17_i32_111 dim 1 : vector<16x512xf32>, i32 -> vector<16x512xf32>
      %c0_112 = arith.constant 0 : index
      %c0_113 = arith.constant 0 : index
      %c0_114 = arith.constant 0 : index
      %227 = vector.load %arg6[%c0_112, %c0_113, %c0_114] : memref<9x1x512xf32, #tpu.memory_space<vmem>>, vector<1x1x512xf32>
      %228 = vector.shape_cast %227 : vector<1x1x512xf32> to vector<1x512xf32>
      %229 = vector.broadcast %228 : vector<1x512xf32> to vector<16x512xf32>
      %230 = arith.mulf %226, %229 : vector<16x512xf32>
      %c16_i32_115 = arith.constant 16 : i32
      %231 = tpu.dynamic_rotate %225 by %c16_i32_115 dim 1 : vector<16x512xf32>, i32 -> vector<16x512xf32>
      %c1_116 = arith.constant 1 : index
      %c0_117 = arith.constant 0 : index
      %c0_118 = arith.constant 0 : index
      %232 = vector.load %arg6[%c1_116, %c0_117, %c0_118] : memref<9x1x512xf32, #tpu.memory_space<vmem>>, vector<1x1x512xf32>
      %233 = vector.shape_cast %232 : vector<1x1x512xf32> to vector<1x512xf32>
      %234 = vector.broadcast %233 : vector<1x512xf32> to vector<16x512xf32>
      %235 = arith.mulf %231, %234 : vector<16x512xf32>
      %c15_i32_119 = arith.constant 15 : i32
      %236 = tpu.dynamic_rotate %225 by %c15_i32_119 dim 1 : vector<16x512xf32>, i32 -> vector<16x512xf32>
      %c2_120 = arith.constant 2 : index
      %c0_121 = arith.constant 0 : index
      %c0_122 = arith.constant 0 : index
      %237 = vector.load %arg6[%c2_120, %c0_121, %c0_122] : memref<9x1x512xf32, #tpu.memory_space<vmem>>, vector<1x1x512xf32>
      %238 = vector.shape_cast %237 : vector<1x1x512xf32> to vector<1x512xf32>
      %239 = vector.broadcast %238 : vector<1x512xf32> to vector<16x512xf32>
      %240 = arith.mulf %236, %239 : vector<16x512xf32>
      %c1_i32_123 = arith.constant 1 : i32
      %241 = tpu.dynamic_rotate %225 by %c1_i32_123 dim 1 : vector<16x512xf32>, i32 -> vector<16x512xf32>
      %c3_124 = arith.constant 3 : index
      %c0_125 = arith.constant 0 : index
      %c0_126 = arith.constant 0 : index
      %242 = vector.load %arg6[%c3_124, %c0_125, %c0_126] : memref<9x1x512xf32, #tpu.memory_space<vmem>>, vector<1x1x512xf32>
      %243 = vector.shape_cast %242 : vector<1x1x512xf32> to vector<1x512xf32>
      %244 = vector.broadcast %243 : vector<1x512xf32> to vector<16x512xf32>
      %245 = arith.mulf %241, %244 : vector<16x512xf32>
      %c511_i32_127 = arith.constant 511 : i32
      %246 = tpu.dynamic_rotate %225 by %c511_i32_127 dim 1 : vector<16x512xf32>, i32 -> vector<16x512xf32>
      %c5_128 = arith.constant 5 : index
      %c0_129 = arith.constant 0 : index
      %c0_130 = arith.constant 0 : index
      %247 = vector.load %arg6[%c5_128, %c0_129, %c0_130] : memref<9x1x512xf32, #tpu.memory_space<vmem>>, vector<1x1x512xf32>
      %248 = vector.shape_cast %247 : vector<1x1x512xf32> to vector<1x512xf32>
      %249 = vector.broadcast %248 : vector<1x512xf32> to vector<16x512xf32>
      %250 = arith.mulf %246, %249 : vector<16x512xf32>
      %c497_i32_131 = arith.constant 497 : i32
      %251 = tpu.dynamic_rotate %225 by %c497_i32_131 dim 1 : vector<16x512xf32>, i32 -> vector<16x512xf32>
      %c6_132 = arith.constant 6 : index
      %c0_133 = arith.constant 0 : index
      %c0_134 = arith.constant 0 : index
      %252 = vector.load %arg6[%c6_132, %c0_133, %c0_134] : memref<9x1x512xf32, #tpu.memory_space<vmem>>, vector<1x1x512xf32>
      %253 = vector.shape_cast %252 : vector<1x1x512xf32> to vector<1x512xf32>
      %254 = vector.broadcast %253 : vector<1x512xf32> to vector<16x512xf32>
      %255 = arith.mulf %251, %254 : vector<16x512xf32>
      %c496_i32_135 = arith.constant 496 : i32
      %256 = tpu.dynamic_rotate %225 by %c496_i32_135 dim 1 : vector<16x512xf32>, i32 -> vector<16x512xf32>
      %c7_136 = arith.constant 7 : index
      %c0_137 = arith.constant 0 : index
      %c0_138 = arith.constant 0 : index
      %257 = vector.load %arg6[%c7_136, %c0_137, %c0_138] : memref<9x1x512xf32, #tpu.memory_space<vmem>>, vector<1x1x512xf32>
      %258 = vector.shape_cast %257 : vector<1x1x512xf32> to vector<1x512xf32>
      %259 = vector.broadcast %258 : vector<1x512xf32> to vector<16x512xf32>
      %260 = arith.mulf %256, %259 : vector<16x512xf32>
      %c495_i32_139 = arith.constant 495 : i32
      %261 = tpu.dynamic_rotate %225 by %c495_i32_139 dim 1 : vector<16x512xf32>, i32 -> vector<16x512xf32>
      %c8_140 = arith.constant 8 : index
      %c0_141 = arith.constant 0 : index
      %c0_142 = arith.constant 0 : index
      %262 = vector.load %arg6[%c8_140, %c0_141, %c0_142] : memref<9x1x512xf32, #tpu.memory_space<vmem>>, vector<1x1x512xf32>
      %263 = vector.shape_cast %262 : vector<1x1x512xf32> to vector<1x512xf32>
      %264 = vector.broadcast %263 : vector<1x512xf32> to vector<16x512xf32>
      %265 = arith.mulf %261, %264 : vector<16x512xf32>
      %266 = tpu.concatenate %230, %235, %240, %245, %225, %250, %255, %260, %265 in 0 : vector<16x512xf32>, vector<16x512xf32>, vector<16x512xf32>, vector<16x512xf32>, vector<16x512xf32>, vector<16x512xf32>, vector<16x512xf32>, vector<16x512xf32>, vector<16x512xf32> -> vector<144x512xf32>
      %cst_143 = arith.constant dense<0.000000e+00> : vector<16x512xf32>
      %267 = tpu.matmul %3, %266, %cst_143 {dimension_numbers = #tpu.dot_dimension_numbers<[1], [0], [0], [1], [0, 0, 1, 1], [], []>} : vector<16x144xf32>, vector<144x512xf32>, vector<16x512xf32> -> vector<16x512xf32>
      %268 = vector.extract_strided_slice %267 {offsets = [0, 0], sizes = [16, 256], strides = [1, 1]} : vector<16x512xf32> to vector<16x256xf32>
      %cst_144 = arith.constant dense<0.000000e+00> : vector<16xf32>
      %269 = vector.multi_reduction <add>, %268, %cst_144 [1] : vector<16x256xf32> to vector<16xf32>
      %270 = vector.shape_cast %269 : vector<16xf32> to vector<16x1xf32>
      %cst_145 = arith.constant 3.906250e-03 : f32
      %271 = vector.broadcast %cst_145 : f32 to vector<16x1xf32>
      %272 = arith.mulf %270, %271 : vector<16x1xf32>
      %273 = arith.mulf %268, %268 : vector<16x256xf32>
      %cst_146 = arith.constant dense<0.000000e+00> : vector<16xf32>
      %274 = vector.multi_reduction <add>, %273, %cst_146 [1] : vector<16x256xf32> to vector<16xf32>
      %275 = vector.shape_cast %274 : vector<16xf32> to vector<16x1xf32>
      %cst_147 = arith.constant 3.906250e-03 : f32
      %276 = vector.broadcast %cst_147 : f32 to vector<16x1xf32>
      %277 = arith.mulf %275, %276 : vector<16x1xf32>
      %278 = arith.mulf %272, %272 : vector<16x1xf32>
      %279 = arith.subf %277, %278 : vector<16x1xf32>
      %cst_148 = arith.constant 9.99999974E-6 : f32
      %280 = vector.broadcast %cst_148 : f32 to vector<16x1xf32>
      %281 = arith.addf %279, %280 : vector<16x1xf32>
      %282 = math.rsqrt %281 : vector<16x1xf32>
      %283 = arith.mulf %4, %282 : vector<16x1xf32>
      %284 = vector.broadcast %283 : vector<16x1xf32> to vector<16x256xf32>
      %285 = arith.mulf %268, %284 : vector<16x256xf32>
      %286 = arith.mulf %272, %283 : vector<16x1xf32>
      %287 = arith.subf %5, %286 : vector<16x1xf32>
      %288 = vector.broadcast %287 : vector<16x1xf32> to vector<16x256xf32>
      %289 = arith.addf %285, %288 : vector<16x256xf32>
      %290 = vector.extract_strided_slice %289 {offsets = [0, 0], sizes = [8, 256], strides = [1, 1]} : vector<16x256xf32> to vector<8x256xf32>
      %291 = vector.extract_strided_slice %289 {offsets = [8, 0], sizes = [8, 256], strides = [1, 1]} : vector<16x256xf32> to vector<8x256xf32>
      %292 = arith.addf %290, %291 : vector<8x256xf32>
      %cst_149 = arith.constant 0.000000e+00 : f32
      %293 = vector.broadcast %cst_149 : f32 to vector<8x256xf32>
      %294 = arith.maximumf %292, %293 : vector<8x256xf32>
      %295 = vector.extract_strided_slice %267 {offsets = [0, 256], sizes = [16, 256], strides = [1, 1]} : vector<16x512xf32> to vector<16x256xf32>
      %cst_150 = arith.constant dense<0.000000e+00> : vector<16xf32>
      %296 = vector.multi_reduction <add>, %295, %cst_150 [1] : vector<16x256xf32> to vector<16xf32>
      %297 = vector.shape_cast %296 : vector<16xf32> to vector<16x1xf32>
      %cst_151 = arith.constant 3.906250e-03 : f32
      %298 = vector.broadcast %cst_151 : f32 to vector<16x1xf32>
      %299 = arith.mulf %297, %298 : vector<16x1xf32>
      %300 = arith.mulf %295, %295 : vector<16x256xf32>
      %cst_152 = arith.constant dense<0.000000e+00> : vector<16xf32>
      %301 = vector.multi_reduction <add>, %300, %cst_152 [1] : vector<16x256xf32> to vector<16xf32>
      %302 = vector.shape_cast %301 : vector<16xf32> to vector<16x1xf32>
      %cst_153 = arith.constant 3.906250e-03 : f32
      %303 = vector.broadcast %cst_153 : f32 to vector<16x1xf32>
      %304 = arith.mulf %302, %303 : vector<16x1xf32>
      %305 = arith.mulf %299, %299 : vector<16x1xf32>
      %306 = arith.subf %304, %305 : vector<16x1xf32>
      %cst_154 = arith.constant 9.99999974E-6 : f32
      %307 = vector.broadcast %cst_154 : f32 to vector<16x1xf32>
      %308 = arith.addf %306, %307 : vector<16x1xf32>
      %309 = math.rsqrt %308 : vector<16x1xf32>
      %310 = arith.mulf %4, %309 : vector<16x1xf32>
      %311 = vector.broadcast %310 : vector<16x1xf32> to vector<16x256xf32>
      %312 = arith.mulf %295, %311 : vector<16x256xf32>
      %313 = arith.mulf %299, %310 : vector<16x1xf32>
      %314 = arith.subf %5, %313 : vector<16x1xf32>
      %315 = vector.broadcast %314 : vector<16x1xf32> to vector<16x256xf32>
      %316 = arith.addf %312, %315 : vector<16x256xf32>
      %317 = vector.extract_strided_slice %316 {offsets = [0, 0], sizes = [8, 256], strides = [1, 1]} : vector<16x256xf32> to vector<8x256xf32>
      %318 = vector.extract_strided_slice %316 {offsets = [8, 0], sizes = [8, 256], strides = [1, 1]} : vector<16x256xf32> to vector<8x256xf32>
      %319 = arith.addf %317, %318 : vector<8x256xf32>
      %cst_155 = arith.constant 0.000000e+00 : f32
      %320 = vector.broadcast %cst_155 : f32 to vector<8x256xf32>
      %321 = arith.maximumf %319, %320 : vector<8x256xf32>
      %322 = tpu.concatenate %294, %321 in 1 : vector<8x256xf32>, vector<8x256xf32> -> vector<8x512xf32>
      %c0_156 = arith.constant 0 : index
      %c0_157 = arith.constant 0 : index
      %323 = vector.load %arg8[%c0_156, %c0_157] : memref<8x512xf32, #tpu.memory_space<vmem>>, vector<8x512xf32>
      tpu.vector_store %arg8[%c0_156, %c0_157], %322 {strides = array<i32>} : memref<8x512xf32, #tpu.memory_space<vmem>>, vector<8x512xf32>,
      %c0_158 = arith.constant 0 : index
      %c1_159 = arith.constant 1 : index
      %c0_160 = arith.constant 0 : index
      %c0_161 = arith.constant 0 : index
      %324 = vector.load %arg7[%c0_158, %c1_159, %c0_160, %c0_161] : memref<1x4x8x512xf32, #tpu.memory_space<vmem>>, vector<1x1x8x512xf32>
      %325 = vector.shape_cast %324 : vector<1x1x8x512xf32> to vector<8x512xf32>
      %326 = vector.shape_cast %322 : vector<8x512xf32> to vector<1x1x8x512xf32>
      tpu.vector_store %arg7[%c0_158, %c1_159, %c0_160, %c0_161], %326 {strides = array<i32>} : memref<1x4x8x512xf32, #tpu.memory_space<vmem>>, vector<1x1x8x512xf32>,
      %c0_162 = arith.constant 0 : index
      %c0_163 = arith.constant 0 : index
      %327 = vector.load %arg8[%c0_162, %c0_163] : memref<8x512xf32, #tpu.memory_space<vmem>>, vector<8x512xf32>
      %c0_164 = arith.constant 0 : index
      %c0_165 = arith.constant 0 : index
      %c0_166 = arith.constant 0 : index
      %328 = vector.load %arg2[%c0_164, %c0_165, %c0_166] : memref<4x8x512xf32, #tpu.memory_space<vmem>>, vector<1x8x512xf32>
      %329 = vector.shape_cast %328 : vector<1x8x512xf32> to vector<8x512xf32>
      %330 = tpu.concatenate %327, %329 in 0 : vector<8x512xf32>, vector<8x512xf32> -> vector<16x512xf32>
      %c17_i32_167 = arith.constant 17 : i32
      %331 = tpu.dynamic_rotate %330 by %c17_i32_167 dim 1 : vector<16x512xf32>, i32 -> vector<16x512xf32>
      %c0_168 = arith.constant 0 : index
      %c0_169 = arith.constant 0 : index
      %c0_170 = arith.constant 0 : index
      %332 = vector.load %arg6[%c0_168, %c0_169, %c0_170] : memref<9x1x512xf32, #tpu.memory_space<vmem>>, vector<1x1x512xf32>
      %333 = vector.shape_cast %332 : vector<1x1x512xf32> to vector<1x512xf32>
      %334 = vector.broadcast %333 : vector<1x512xf32> to vector<16x512xf32>
      %335 = arith.mulf %331, %334 : vector<16x512xf32>
      %c16_i32_171 = arith.constant 16 : i32
      %336 = tpu.dynamic_rotate %330 by %c16_i32_171 dim 1 : vector<16x512xf32>, i32 -> vector<16x512xf32>
      %c1_172 = arith.constant 1 : index
      %c0_173 = arith.constant 0 : index
      %c0_174 = arith.constant 0 : index
      %337 = vector.load %arg6[%c1_172, %c0_173, %c0_174] : memref<9x1x512xf32, #tpu.memory_space<vmem>>, vector<1x1x512xf32>
      %338 = vector.shape_cast %337 : vector<1x1x512xf32> to vector<1x512xf32>
      %339 = vector.broadcast %338 : vector<1x512xf32> to vector<16x512xf32>
      %340 = arith.mulf %336, %339 : vector<16x512xf32>
      %c15_i32_175 = arith.constant 15 : i32
      %341 = tpu.dynamic_rotate %330 by %c15_i32_175 dim 1 : vector<16x512xf32>, i32 -> vector<16x512xf32>
      %c2_176 = arith.constant 2 : index
      %c0_177 = arith.constant 0 : index
      %c0_178 = arith.constant 0 : index
      %342 = vector.load %arg6[%c2_176, %c0_177, %c0_178] : memref<9x1x512xf32, #tpu.memory_space<vmem>>, vector<1x1x512xf32>
      %343 = vector.shape_cast %342 : vector<1x1x512xf32> to vector<1x512xf32>
      %344 = vector.broadcast %343 : vector<1x512xf32> to vector<16x512xf32>
      %345 = arith.mulf %341, %344 : vector<16x512xf32>
      %c1_i32_179 = arith.constant 1 : i32
      %346 = tpu.dynamic_rotate %330 by %c1_i32_179 dim 1 : vector<16x512xf32>, i32 -> vector<16x512xf32>
      %c3_180 = arith.constant 3 : index
      %c0_181 = arith.constant 0 : index
      %c0_182 = arith.constant 0 : index
      %347 = vector.load %arg6[%c3_180, %c0_181, %c0_182] : memref<9x1x512xf32, #tpu.memory_space<vmem>>, vector<1x1x512xf32>
      %348 = vector.shape_cast %347 : vector<1x1x512xf32> to vector<1x512xf32>
      %349 = vector.broadcast %348 : vector<1x512xf32> to vector<16x512xf32>
      %350 = arith.mulf %346, %349 : vector<16x512xf32>
      %c511_i32_183 = arith.constant 511 : i32
      %351 = tpu.dynamic_rotate %330 by %c511_i32_183 dim 1 : vector<16x512xf32>, i32 -> vector<16x512xf32>
      %c5_184 = arith.constant 5 : index
      %c0_185 = arith.constant 0 : index
      %c0_186 = arith.constant 0 : index
      %352 = vector.load %arg6[%c5_184, %c0_185, %c0_186] : memref<9x1x512xf32, #tpu.memory_space<vmem>>, vector<1x1x512xf32>
      %353 = vector.shape_cast %352 : vector<1x1x512xf32> to vector<1x512xf32>
      %354 = vector.broadcast %353 : vector<1x512xf32> to vector<16x512xf32>
      %355 = arith.mulf %351, %354 : vector<16x512xf32>
      %c497_i32_187 = arith.constant 497 : i32
      %356 = tpu.dynamic_rotate %330 by %c497_i32_187 dim 1 : vector<16x512xf32>, i32 -> vector<16x512xf32>
      %c6_188 = arith.constant 6 : index
      %c0_189 = arith.constant 0 : index
      %c0_190 = arith.constant 0 : index
      %357 = vector.load %arg6[%c6_188, %c0_189, %c0_190] : memref<9x1x512xf32, #tpu.memory_space<vmem>>, vector<1x1x512xf32>
      %358 = vector.shape_cast %357 : vector<1x1x512xf32> to vector<1x512xf32>
      %359 = vector.broadcast %358 : vector<1x512xf32> to vector<16x512xf32>
      %360 = arith.mulf %356, %359 : vector<16x512xf32>
      %c496_i32_191 = arith.constant 496 : i32
      %361 = tpu.dynamic_rotate %330 by %c496_i32_191 dim 1 : vector<16x512xf32>, i32 -> vector<16x512xf32>
      %c7_192 = arith.constant 7 : index
      %c0_193 = arith.constant 0 : index
      %c0_194 = arith.constant 0 : index
      %362 = vector.load %arg6[%c7_192, %c0_193, %c0_194] : memref<9x1x512xf32, #tpu.memory_space<vmem>>, vector<1x1x512xf32>
      %363 = vector.shape_cast %362 : vector<1x1x512xf32> to vector<1x512xf32>
      %364 = vector.broadcast %363 : vector<1x512xf32> to vector<16x512xf32>
      %365 = arith.mulf %361, %364 : vector<16x512xf32>
      %c495_i32_195 = arith.constant 495 : i32
      %366 = tpu.dynamic_rotate %330 by %c495_i32_195 dim 1 : vector<16x512xf32>, i32 -> vector<16x512xf32>
      %c8_196 = arith.constant 8 : index
      %c0_197 = arith.constant 0 : index
      %c0_198 = arith.constant 0 : index
      %367 = vector.load %arg6[%c8_196, %c0_197, %c0_198] : memref<9x1x512xf32, #tpu.memory_space<vmem>>, vector<1x1x512xf32>
      %368 = vector.shape_cast %367 : vector<1x1x512xf32> to vector<1x512xf32>
      %369 = vector.broadcast %368 : vector<1x512xf32> to vector<16x512xf32>
      %370 = arith.mulf %366, %369 : vector<16x512xf32>
      %371 = tpu.concatenate %335, %340, %345, %350, %330, %355, %360, %365, %370 in 0 : vector<16x512xf32>, vector<16x512xf32>, vector<16x512xf32>, vector<16x512xf32>, vector<16x512xf32>, vector<16x512xf32>, vector<16x512xf32>, vector<16x512xf32>, vector<16x512xf32> -> vector<144x512xf32>
      %cst_199 = arith.constant dense<0.000000e+00> : vector<16x512xf32>
      %372 = tpu.matmul %3, %371, %cst_199 {dimension_numbers = #tpu.dot_dimension_numbers<[1], [0], [0], [1], [0, 0, 1, 1], [], []>} : vector<16x144xf32>, vector<144x512xf32>, vector<16x512xf32> -> vector<16x512xf32>
      %373 = vector.extract_strided_slice %372 {offsets = [0, 0], sizes = [16, 256], strides = [1, 1]} : vector<16x512xf32> to vector<16x256xf32>
      %cst_200 = arith.constant dense<0.000000e+00> : vector<16xf32>
      %374 = vector.multi_reduction <add>, %373, %cst_200 [1] : vector<16x256xf32> to vector<16xf32>
      %375 = vector.shape_cast %374 : vector<16xf32> to vector<16x1xf32>
      %cst_201 = arith.constant 3.906250e-03 : f32
      %376 = vector.broadcast %cst_201 : f32 to vector<16x1xf32>
      %377 = arith.mulf %375, %376 : vector<16x1xf32>
      %378 = arith.mulf %373, %373 : vector<16x256xf32>
      %cst_202 = arith.constant dense<0.000000e+00> : vector<16xf32>
      %379 = vector.multi_reduction <add>, %378, %cst_202 [1] : vector<16x256xf32> to vector<16xf32>
      %380 = vector.shape_cast %379 : vector<16xf32> to vector<16x1xf32>
      %cst_203 = arith.constant 3.906250e-03 : f32
      %381 = vector.broadcast %cst_203 : f32 to vector<16x1xf32>
      %382 = arith.mulf %380, %381 : vector<16x1xf32>
      %383 = arith.mulf %377, %377 : vector<16x1xf32>
      %384 = arith.subf %382, %383 : vector<16x1xf32>
      %cst_204 = arith.constant 9.99999974E-6 : f32
      %385 = vector.broadcast %cst_204 : f32 to vector<16x1xf32>
      %386 = arith.addf %384, %385 : vector<16x1xf32>
      %387 = math.rsqrt %386 : vector<16x1xf32>
      %388 = arith.mulf %4, %387 : vector<16x1xf32>
      %389 = vector.broadcast %388 : vector<16x1xf32> to vector<16x256xf32>
      %390 = arith.mulf %373, %389 : vector<16x256xf32>
      %391 = arith.mulf %377, %388 : vector<16x1xf32>
      %392 = arith.subf %5, %391 : vector<16x1xf32>
      %393 = vector.broadcast %392 : vector<16x1xf32> to vector<16x256xf32>
      %394 = arith.addf %390, %393 : vector<16x256xf32>
      %395 = vector.extract_strided_slice %394 {offsets = [0, 0], sizes = [8, 256], strides = [1, 1]} : vector<16x256xf32> to vector<8x256xf32>
      %396 = vector.extract_strided_slice %394 {offsets = [8, 0], sizes = [8, 256], strides = [1, 1]} : vector<16x256xf32> to vector<8x256xf32>
      %397 = arith.addf %395, %396 : vector<8x256xf32>
      %cst_205 = arith.constant 0.000000e+00 : f32
      %398 = vector.broadcast %cst_205 : f32 to vector<8x256xf32>
      %399 = arith.maximumf %397, %398 : vector<8x256xf32>
      %400 = vector.extract_strided_slice %372 {offsets = [0, 256], sizes = [16, 256], strides = [1, 1]} : vector<16x512xf32> to vector<16x256xf32>
      %cst_206 = arith.constant dense<0.000000e+00> : vector<16xf32>
      %401 = vector.multi_reduction <add>, %400, %cst_206 [1] : vector<16x256xf32> to vector<16xf32>
      %402 = vector.shape_cast %401 : vector<16xf32> to vector<16x1xf32>
      %cst_207 = arith.constant 3.906250e-03 : f32
      %403 = vector.broadcast %cst_207 : f32 to vector<16x1xf32>
      %404 = arith.mulf %402, %403 : vector<16x1xf32>
      %405 = arith.mulf %400, %400 : vector<16x256xf32>
      %cst_208 = arith.constant dense<0.000000e+00> : vector<16xf32>
      %406 = vector.multi_reduction <add>, %405, %cst_208 [1] : vector<16x256xf32> to vector<16xf32>
      %407 = vector.shape_cast %406 : vector<16xf32> to vector<16x1xf32>
      %cst_209 = arith.constant 3.906250e-03 : f32
      %408 = vector.broadcast %cst_209 : f32 to vector<16x1xf32>
      %409 = arith.mulf %407, %408 : vector<16x1xf32>
      %410 = arith.mulf %404, %404 : vector<16x1xf32>
      %411 = arith.subf %409, %410 : vector<16x1xf32>
      %cst_210 = arith.constant 9.99999974E-6 : f32
      %412 = vector.broadcast %cst_210 : f32 to vector<16x1xf32>
      %413 = arith.addf %411, %412 : vector<16x1xf32>
      %414 = math.rsqrt %413 : vector<16x1xf32>
      %415 = arith.mulf %4, %414 : vector<16x1xf32>
      %416 = vector.broadcast %415 : vector<16x1xf32> to vector<16x256xf32>
      %417 = arith.mulf %400, %416 : vector<16x256xf32>
      %418 = arith.mulf %404, %415 : vector<16x1xf32>
      %419 = arith.subf %5, %418 : vector<16x1xf32>
      %420 = vector.broadcast %419 : vector<16x1xf32> to vector<16x256xf32>
      %421 = arith.addf %417, %420 : vector<16x256xf32>
      %422 = vector.extract_strided_slice %421 {offsets = [0, 0], sizes = [8, 256], strides = [1, 1]} : vector<16x256xf32> to vector<8x256xf32>
      %423 = vector.extract_strided_slice %421 {offsets = [8, 0], sizes = [8, 256], strides = [1, 1]} : vector<16x256xf32> to vector<8x256xf32>
      %424 = arith.addf %422, %423 : vector<8x256xf32>
      %cst_211 = arith.constant 0.000000e+00 : f32
      %425 = vector.broadcast %cst_211 : f32 to vector<8x256xf32>
      %426 = arith.maximumf %424, %425 : vector<8x256xf32>
      %427 = tpu.concatenate %399, %426 in 1 : vector<8x256xf32>, vector<8x256xf32> -> vector<8x512xf32>
      %c0_212 = arith.constant 0 : index
      %c0_213 = arith.constant 0 : index
      %428 = vector.load %arg8[%c0_212, %c0_213] : memref<8x512xf32, #tpu.memory_space<vmem>>, vector<8x512xf32>
      tpu.vector_store %arg8[%c0_212, %c0_213], %427 {strides = array<i32>} : memref<8x512xf32, #tpu.memory_space<vmem>>, vector<8x512xf32>,
      %c0_214 = arith.constant 0 : index
      %c0_215 = arith.constant 0 : index
      %c0_216 = arith.constant 0 : index
      %c0_217 = arith.constant 0 : index
      %429 = vector.load %arg7[%c0_214, %c0_215, %c0_216, %c0_217] : memref<1x4x8x512xf32, #tpu.memory_space<vmem>>, vector<1x1x8x512xf32>
      %430 = vector.shape_cast %429 : vector<1x1x8x512xf32> to vector<8x512xf32>
      %431 = vector.shape_cast %427 : vector<8x512xf32> to vector<1x1x8x512xf32>
      tpu.vector_store %arg7[%c0_214, %c0_215, %c0_216, %c0_217], %431 {strides = array<i32>} : memref<1x4x8x512xf32, #tpu.memory_space<vmem>>, vector<1x1x8x512xf32>,
    } else {
    }
    return
  }
  func.func @transform_0(%arg0: i32, %arg1: i32) -> (i32, i32, i32) {
    %c2_i32 = arith.constant 2 : i32
    %0 = arith.muli %c2_i32, %arg1 : i32
    %c1_i32 = arith.constant 1 : i32
    %1 = arith.subi %c1_i32, %0 : i32
    %2 = arith.muli %arg0, %1 : i32
    %3 = arith.addi %arg1, %2 : i32
    %c0_i32 = arith.constant 0 : i32
    %c0_i32_0 = arith.constant 0 : i32
    %c0_i32_1 = arith.constant 0 : i32
    return %3, %c0_i32, %c0_i32_0 : i32, i32, i32
  }
  func.func @transform_1(%arg0: i32, %arg1: i32) -> (i32, i32) {
    %c0_i32 = arith.constant 0 : i32
    %c0_i32_0 = arith.constant 0 : i32
    %c0_i32_1 = arith.constant 0 : i32
    return %c0_i32, %c0_i32_0 : i32, i32
  }
  func.func @transform_2(%arg0: i32, %arg1: i32) -> (i32, i32) {
    %c0_i32 = arith.constant 0 : i32
    %c0_i32_0 = arith.constant 0 : i32
    %c0_i32_1 = arith.constant 0 : i32
    return %c0_i32, %c0_i32_0 : i32, i32
  }
  func.func @transform_3(%arg0: i32, %arg1: i32) -> (i32, i32) {
    %c0_i32 = arith.constant 0 : i32
    %c0_i32_0 = arith.constant 0 : i32
    %c0_i32_1 = arith.constant 0 : i32
    return %c0_i32, %c0_i32_0 : i32, i32
  }
  func.func @transform_4(%arg0: i32, %arg1: i32) -> (i32, i32, i32) {
    %c0_i32 = arith.constant 0 : i32
    %c0_i32_0 = arith.constant 0 : i32
    %c0_i32_1 = arith.constant 0 : i32
    %c0_i32_2 = arith.constant 0 : i32
    return %c0_i32, %c0_i32_0, %c0_i32_1 : i32, i32, i32
  }
  func.func @transform_5(%arg0: i32, %arg1: i32) -> (i32, i32, i32, i32) {
    %c2_i32 = arith.constant 2 : i32
    %0 = arith.muli %c2_i32, %arg1 : i32
    %c1_i32 = arith.constant 1 : i32
    %1 = arith.subi %c1_i32, %0 : i32
    %2 = arith.muli %arg0, %1 : i32
    %3 = arith.addi %arg1, %2 : i32
    %c0_i32 = arith.constant 0 : i32
    %c0_i32_0 = arith.constant 0 : i32
    %c0_i32_1 = arith.constant 0 : i32
    return %arg0, %3, %c0_i32, %c0_i32_0 : i32, i32, i32, i32
  }
}

</mosaic_0001>

<bundles_post_ra>
// kernel: tpu_custom_call.1
= control target key start
LH: loop header
LB: loop body
LE: loop exit
PB: predicated region body
PF: predicated region fallthrough
CT: control target
= control target key end

     0   :  { %s11784_s0 = inlined_call_operand.hbm [shape: f32[8,8,512], index: 0, kind: input, shape index: {}]   ;;  %s11785_s1 = inlined_call_operand.hbm [shape: f32[16,144], index: 1, kind: input, shape index: {}]   ;;  %s11786_s2 = inlined_call_operand.vmem [shape: f32[16,1], index: 2, kind: input, shape index: {}]   ;;  %s11787_s3 = inlined_call_operand.vmem [shape: f32[16,1], index: 3, kind: input, shape index: {}]   ;;  %s11788_s4 = inlined_call_operand.vmem [shape: f32[9,1,512], index: 4, kind: input, shape index: {}]   ;;  %s11789_s5 = inlined_call_operand.hbm [shape: f32[2,8,8,512], index: 5, kind: output, shape index: {}]  }
   0x1   :  { %11805 = sst [smem:[#allocation18_spill]] %s11785_s1 }
   0x2   :  { %11806 = sst [smem:[#allocation19_spill]] %s11788_s4 }
   0x3   :  { %11807 = sst [smem:[#allocation20_spill]] %s11789_s5 }
   0x4   :  { %10 = vsyncpa [#allocation4], 0 }
   0x5   :  { %12 = vsyncpa [#allocation4 + $0x1], 0 }
   0x6   :  { %13 = vsyncpa [#allocation7], 0 }
   0x7   :  { %14 = vsyncpa [#allocation5], 0 }
   0x8   :  { %16 = vsyncpa [#allocation5 + $0x1], 0  ;;  %s7573_s18 = smov 0   ;;  %s7575_s19 = smov 0  }
   0x9   :  { %s7577_s20 = smov 0   ;;  %s7579_s21 = smov 0  }
   0xa   :  { %s7581_s22 = smov 0   ;;  %s7583_s23 = smov 0  }
   0xb   :  { %s7585_s24 = smov 0   ;;  %s7587_s25 = smov 0  }
   0xc   :  { %s7589_s26 = smov 0   ;;  %s7591_s27 = smov 0  }
   0xd   :  { %s7593_s28 = smov 0  }
   0xe LB: > { %11808 = sst [smem:[#allocation12_spill]] %s7473_s18  ;;  %s6379_s29 = sadd.s32 4294967295, %s7513_s28   ;;  %s7513_s28 = sphi %s7593_s28, %s22_s28   ;;  %s7509_s27 = sphi %s7591_s27, %s11837_s27   ;;  %s7505_s26 = sphi %s7589_s26, %s11844_s26   ;;  %s7501_s25 = sphi %s7587_s25, %s11835_s25   ;;  %s7497_s24 = sphi %s7585_s24, %s11834_s24   ;;  %s7493_s23 = sphi %s7583_s23, %s11843_s23   ;;  %s7489_s22 = sphi %s7581_s22, %s11842_s22   ;;  %s7485_s21 = sphi %s7579_s21, %s11841_s21   ;;  %s7481_s20 = sphi %s7577_s20, %s11840_s20   ;;  %s7477_s19 = sphi %s7575_s19, %s11839_s19   ;;  %s7473_s18 = sphi %s7573_s18, %s11838_s18  }
   0xf   : > { %11809 = sst [smem:[#allocation13_spill]] %s7505_s26  ;;  %s6380_s30 = sadd.s32 4294967294, %s7513_s28  }
  0x10   : > { %11810 = sst [smem:[#allocation14_spill]] %s7509_s27  ;;  %p62_p0 = scmp.ne.s32.totalorder %s7489_s22, %s7485_s21 }
  0x11   : > { %p7629_p1 = scmp.eq.s32.totalorder %s6379_s29, 0  ;;  %p179_p2 = scmp.ne.s32.totalorder %s7481_s20, %s7477_s19 }
  0x12   : > { %p180_p3 = scmp.eq.s32.totalorder %s6379_s29, 3  ;;  %p185_p5 = scmp.ne.s32.totalorder %s7477_s19, %s7473_s18 }
  0x13   : > { %s11811_s6 = scalar_select %p7629_p1, 1, 0 }
  0x14   : > { %p7637_p4 = por %p7629_p1, %p62_p0  ;;  %p7643_p6 = por %p180_p3, %p179_p2 }
  0x15   : > { %p186_p7 = scmp.eq.s32.totalorder %s6380_s30, 3  ;;  %p6385_p8 = scmp.ge.s32.totalorder %s7513_s28, 1 }
  0x16   : > { %s11812_s7 = scalar_select %p7637_p4, 1, 0 }
  0x17   : > { %s11813_s8 = scalar_select %p7643_p6, 1, 0 }
  0x18   : > { %p193_p9 = scmp.lt.s32.totalorder %s7513_s28, 5  ;;  %p7649_p10 = por %p186_p7, %p185_p5 }
  0x19   : > { %11814 = sst [smem:[#allocation15_spill]] %s11813_s8  ;;  %s7515_s11 = smov [#allocation6]  }
  0x1a   : > { %s11815_s9 = scalar_select %p7649_p10, 1, 0 }
  0x1b   : > { %p7653_p11 = pnand %p6385_p8, %p193_p9  ;;  %s205_s12 = sshll.u32 %s7515_s11, 4  ;;  %s206_s12 = int_to_ptr.vmem [resolvable:$true] %s205_s12 }
  0x1c   : > { %11816 = sst [smem:[#allocation16_spill]] %s11815_s9 }
  0x1d   : > { %s11817_s10 = scalar_select %p7653_p11, 1, 0 }
  0x1e   : > { %p7131_p12 = pneg %p7653_p11  ;;  %s11819_s1 = sld [smem:[#allocation18_spill]] }
  0x20   : > { %p7661_p13 = pnand %p7131_p12, %p7629_p1 }
  0x22   : > { %p7331_p2 = pneg %p7661_p13 }
  0x24   : > { %s7329_s16 = scalar_lea.hbm %s11819_s1, 512 }
  0x25   : > { %p7330_p0 = scmp.ne.s32.totalorder %s11819_s1, %s7329_s16  ;;  %p7336_p7 = scmp.lt.u32.totalorder %s7329_s16, %s11819_s1 }
  0x27   : > { %p7332_p3 = pnand %p7331_p2, %p7330_p0 }
  0x29   : > { %p7333_p5 = pneg %p7332_p3 }
  0x2b   : > { %p7338_p8 = pnand %p7336_p7, %p7333_p5 }
  0x2d   : > { %7341 = shalt.err (!%p7338_p8)
}
  0x2e   : > { %s7342_s11 = scalar_lea.vmem %s206_s12, 512  ;;  %p7350_p6 = scmp.lt.s32.totalorder %s206_s12, %s206_s12 }
  0x2f   : > { %p7343_p9 = scmp.ne.s32.totalorder %s206_s12, %s7342_s11  ;;  %p7351_p1 = scmp.lt.s32.totalorder %s7342_s11, %s7342_s11 }
  0x31   : > { %p7345_p12 = pnand %p7343_p9, %p7331_p2  ;;  %p7352_p4 = por %p7351_p1, %p7350_p6 }
  0x33   : > { %p7346_p10 = pneg %p7345_p12 }
  0x35   : > { %p7353_p11 = pnand %p7352_p4, %p7346_p10 }
  0x37   : > { %7356 = shalt.err (!%p7353_p11)
}
  0x38   : > { %s7516_s14 = smov 256   ;;  %s7517_s15 = smov 16  }
  0x39   : > { %7134 = dma.hbm_to_vmem [thread:$0]  (!%p7661_p13), %s11819_s1, 512, %s206_s12, [#allocation7], %s7516_s14, %s7516_s14, %s7517_s15  }
  0x3a   : > { %s31_s21 = sadd.s32 1, %s7505_s26  ;;  %s34_s29 = sadd.s32 1, %s7509_s27 }
  0x3b   : > { %p32_p1 = scmp.ge.s32.totalorder %s31_s21, 2  ;;  %s6381_s30 = sshll.u32 %s7505_s26, 1 }
  0x3c   : > { %s39_s11 = ssub.s32 1, %s6381_s30  ;;  %s49_s9 = sadd.s32 1, %s7493_s23 }
  0x3d   : > { %s11846_s21 = smov (%p32_p1, %s31_s21), 0  ;;  %s11848_s29 = smov (!%p32_p1, %s34_s29), %s7509_s27 }
  0x3e   : > { %s40_s13 = smul.u32 %s7509_s27, %s39_s11  ;;  %s6382_s18 = sshll.u32 %s11846_s21, 1 }
  0x3f   : > { %p36_p4 = scmp.ge.s32.totalorder %s11848_s29, 2  ;;  %s43_s12 = ssub.s32 1, %s6382_s18 }
  0x40   : > { %s41_s14 = sadd.s32 %s7505_s26, %s40_s13  ;;  %p56_p6 = scmp.ne.s32.totalorder %s7493_s23, %s7489_s22 }
  0x41   : > { %s11850_s29 = smov (%p36_p4, %s11848_s29), 0  ;;  %p57_p10 = scmp.eq.s32.totalorder %s7513_s28, 0 }
  0x42   : > { %11820 = sst [smem:[#allocation17_spill]] %s11850_s29  ;;  %s169_s15 = sadd.s32 1, %s7481_s20 }
  0x43   : > { %s44_s16 = smul.u32 %s43_s12, %s11850_s29  ;;  %s164_s17 = ssub.s32 %s7509_s27, %s11850_s29 }
  0x44   : > { %p7700_p11 = por %p57_p10, %p56_p6  ;;  %p7144_p13 = scmp.lt.s32.totalorder %s7513_s28, 4 }
  0x45   : > { %s45_s18 = sadd.s32 %s44_s16, %s11846_s21  ;;  %s228_s11 = sand.u32 1, %s7493_s23  }
  0x46   : > { %s46_s13 = ssub.s32 %s41_s14, %s45_s18  ;;  %s6388_s26 = sshll.u32 %s228_s11, 7 }
  0x47   : > { %p47_p0 = scmp.eq.s32.totalorder %s46_s13, 0  ;;  %s166_s1 = sor.u32 %s164_s17, %s46_s13 }
  0x48   : > { %p167_p2 = scmp.eq.s32.totalorder %s166_s1, 0  ;;  %s6545_s12 = sshll.u32 %s41_s14, 11 }
  0x49   : > { %s7708_s5 = scalar_select %p47_p0, %s7493_s23, %s49_s9  }
  0x4a   : > { %s7711_s8 = scalar_select %p167_p2, %s7481_s20, %s169_s15  }
  0x4b   : > { %s7716_s4 = scalar_lea.hbm %s11784_s0, %s6545_s12  ;;  %s232_s16 = scalar_lea.vmem [#allocation3], %s6388_s26 }
  0x4c   : > { %s244_s18 = sshll.u32 %s232_s16, 4  ;;  %p7724_p3 = pnand %p7144_p13, %p7700_p11  ;;  %s7718_s18 = int_to_ptr.vmem [resolvable:$true] %s244_s18 }
  0x4d   : > { %s7728_s9 = scalar_lea.sflag [#allocation4], %s228_s11  ;;  %s7357_s27 = scalar_lea.hbm %s7716_s4, 2048 }
  0x4e   : > { %p7358_p5 = scmp.ne.s32.totalorder %s7716_s4, %s7357_s27  ;;  %p7359_p7 = pneg %p7724_p3 }
  0x4f   : > { %s7362_s14 = scalar_lea.hbm %s11784_s0, 4096  ;;  %p7363_p12 = scmp.lt.u32.totalorder %s7716_s4, %s11784_s0 }
  0x50   : > { %p7360_p8 = pnand %p7359_p7, %p7358_p5  ;;  %p7364_p1 = scmp.lt.u32.totalorder %s7362_s14, %s7357_s27 }
  0x51   : > { %p7366_p6 = scmp.lt.u32.totalorder %s7357_s27, %s7716_s4 }
  0x52   : > { %p7361_p9 = pneg %p7360_p8  ;;  %p7365_p4 = por %p7364_p1, %p7363_p12 }
  0x54   : > { %p7367_p10 = por %p7366_p6, %p7365_p4 }
  0x56   : > { %p7368_p11 = pnand %p7367_p10, %p7361_p9 }
  0x58   : > { %7371 = shalt.err (!%p7368_p11)
}
  0x59   : > { %s7372_s30 = scalar_lea.vmem %s7718_s18, 2048  ;;  %s7518_s11 = smov [#allocation3]  }
  0x5a   : > { %p7373_p13 = scmp.ne.s32.totalorder %s7718_s18, %s7372_s30  ;;  %s7377_s13 = sshll.u32 %s7518_s11, 4  ;;  %s7378_s13 = int_to_ptr.vmem [resolvable:$false] %s7377_s13 }
  0x5b   : > { %s7379_s12 = scalar_lea.vmem %s7378_s13, 4096  ;;  %p7380_p5 = scmp.lt.s32.totalorder %s7718_s18, %s7378_s13 }
  0x5c   : > { %p7375_p0 = pnand %p7373_p13, %p7359_p7  ;;  %p7381_p8 = scmp.lt.s32.totalorder %s7379_s12, %s7372_s30 }
  0x5e   : > { %p7376_p2 = pneg %p7375_p0  ;;  %p7382_p12 = por %p7381_p8, %p7380_p5 }
  0x60   : > { %p7383_p1 = pnand %p7382_p12, %p7376_p2 }
  0x62   : > { %7386 = shalt.err (!%p7383_p1)
}
  0x63   : > { %s7519_s16 = smov 512   ;;  %s7520_s27 = smov 32  }
  0x64   : > { %7138 = dma.hbm_to_vmem [thread:$0]  (!%p7724_p3), %s7716_s4, 2048, %s7718_s18, %s7728_s9, %s7519_s16, %s7519_s16, %s7520_s27  }
  0x65   : > { %p11823_p7 = scmp.ne.s32.totalorder %s11817_s10, 0 }
  0x66   : > { %s258_s26 = sand.u32 (!%p11823_p7), 1, %s7489_s22   ;;  %p11824_p9 = scmp.ne.s32.totalorder (!%p11823_p7), %s11812_s7, 0 }
  0x67   : > { %256 = sbr.rel (%p11823_p7) target bundleno = 6396 (0x18fc), region = 40  ;;  %s6394_s29 = sshll.u32 (!%p11823_p7), %s258_s26, 7 }
  0x68   : > { %s259_s14 = scalar_lea.sflag (!%p11823_p7), [#allocation4], %s258_s26  ;;  %s7759_s15 = scalar_lea.vmem (!%p11823_p7), [#allocation3], %s6394_s29 }
  0x6e   : > { %7460 = dma.done.wait (%p11824_p9), %s259_s14, 2048  }
  0x6f   : > { %7462 = vsyncadd (%p11824_p9), %s259_s14, 4294965248  ;;  %p11825_p4 = scmp.ne.s32.totalorder %s11811_s6, 0 }
  0x71   : > { %7464 = dma.done.wait (%p11825_p4), [#allocation7], 512  }
  0x72   : > { %7466 = vsyncadd (%p11825_p4), [#allocation7], 4294966784  ;;  %s290_s4 = sand.u32 1, %s7477_s19   ;;  %p6397_p3 = scmp.ne.s32.totalorder %s7497_s24, 0 }
  0x73   : > { %s6396_s10 = sshll.u32 %s290_s4, 7  ;;  %v7521_v0 = vmov (!%p6397_p3), 0.0  }
  0x74   : > { %s7772_s18 = scalar_lea.vmem [#allocation8], %s6396_s10  ;;  %306 = sbr.rel (%p6397_p3) target bundleno = 123 (0x7b), region = 52  ;;  %307 = vst [vmem:[#allocation2] sm:$0xff] (!%p6397_p3), %v7521_v0  ;;  %308 = vst [vmem:[#allocation2 + $0x8] sm:$0xff] (!%p6397_p3), %v7521_v0 }
  0x75   : > { %309 = vst [vmem:[#allocation2 + $0x10] sm:$0xff] (!%p6397_p3), %v7521_v0  ;;  %310 = vst [vmem:[#allocation2 + $0x18] sm:$0xff] (!%p6397_p3), %v7521_v0 }
  0x7b PF: > { %v7775_v1 = vld [vmem:[#allocation6] sm:$0xff]  ;;  %v7777_v2 = vld [vmem:[#allocation6 + $0x8] sm:$0xff]  ;;  %v7779_v3 = vld [vmem:[#allocation6 + $0x10] sm:$0xff]  ;;  %p6398_p6 = scmp.ne.s32.totalorder %s7501_s25, 0 }
  0x7c   : > { %v7781_v4 = vld [vmem:[#allocation6 + $0x18] sm:$0xff]  ;;  %v7786_v5 = vld [vmem:[%s11786_s2] sm:$0xff]  ;;  %v7791_v6 = vld [vmem:[%s11786_s2 + $0x8] sm:$0xff]  ;;  %s7522_s12 = smov (!%p6398_p6), 17   ;;  %s7523_s16 = smov (!%p6398_p6), 16   ;;  %v347_v17 = vlaneseq (!%p6398_p6)  ;;  %vm780_vm0 = vcmask (!%p6398_p6), 130048  }
  0x7d   : > { %v7796_v7 = vld [vmem:[%s11787_s3] sm:$0xff]  ;;  %v7801_v8 = vld [vmem:[%s11787_s3 + $0x8] sm:$0xff]  ;;  %322 = sbr.rel (%p6398_p6) target bundleno = 3245 (0xcad), region = 56  ;;  %v7823_v13 = vld [vmem:[%s7759_s15 + $0x10] sm:$0xff] (!%p6398_p6)  ;;  %s7524_s27 = smov (!%p6398_p6), 15   ;;  %6406 = vmatprep.mubr.msk.f32.mxu0 (!%p6398_p6), %vm780_vm0, %v7777_v2  ;;  %6408 = vmatprep.mubr.msk.f32.mxu1 (!%p6398_p6), %vm780_vm0, %v7777_v2 }
  0x7e   : > { %v7804_v9 = vld [vmem:[#allocation2 + $0x8] sm:$0xff] (!%p6398_p6)  ;;  %v7806_v10 = vld [vmem:[#allocation2] sm:$0xff] (!%p6398_p6)  ;;  %v7825_v14 = vld [vmem:[#allocation2 + $0x10] sm:$0xff] (!%p6398_p6)  ;;  %s7525_s26 = smov (!%p6398_p6), 1   ;;  %s7526_s29 = smov (!%p6398_p6), 127   ;;  %v361_v18 = vshrl.u32 (!%p6398_p6), %v347_v17, 7 }
  0x7f   : > { %335 = vrot.lane.b32.xlu1 (!%p6398_p6), %v7804_v9, %s7522_s12  ;;  %331 = vrot.lane.b32.xlu0 (!%p6398_p6), %v7806_v10, %s7522_s12  ;;  %v7813_v11 = vld [vmem:[%s7759_s15 + $0x8] sm:$0xff] (!%p6398_p6)  ;;  %v7816_v12 = vld [vmem:[%s7759_s15] sm:$0xff] (!%p6398_p6)  ;;  %v7834_v16 = vld [vmem:[#allocation2 + $0x18] sm:$0xff] (!%p6398_p6)  ;;  %s7527_s14 = smov (!%p6398_p6), 113   ;;  %s7528_s10 = smov (!%p6398_p6), 112   ;;  %v7936_v19 = vand.u32 (!%p6398_p6), 127, %v347_v17 }
  0x80   : > { %v7832_v15 = vld [vmem:[%s7759_s15 + $0x18] sm:$0xff] (!%p6398_p6)  ;;  %s7529_s6 = smov (!%p6398_p6), 111   ;;  %v7942_v20 = vsub.s32 (!%p6398_p6), 1, %v361_v18  ;;  %s11826_s9 = sld [smem:[#allocation19_spill]] (!%p6398_p6)  ;;  %v7959_v28 = vsub.s32 (!%p6398_p6), 2, %v361_v18  ;;  %v7967_v30 = vsub.s32 (!%p6398_p6), 0, %v361_v18 }
  0x81   : > { %vm349_vm1 = vcmp.lt.s32.totalorder (!%p6398_p6), %v7936_v19, 17  ;;  %v7969_v31 = vsub.s32 (!%p6398_p6), 3, %v361_v18  ;;  %vm404_vm2 = vcmp.lt.s32.totalorder (!%p6398_p6), %v7936_v19, 16  ;;  %vm460_vm3 = vcmp.lt.s32.totalorder (!%p6398_p6), %v7936_v19, 15 }
  0x82   : > { %vm516_vm4 = vcmp.lt.s32.totalorder (!%p6398_p6), %v7936_v19, 1  ;;  %vm572_vm5 = vcmp.lt.s32.totalorder (!%p6398_p6), %v7936_v19, 127  ;;  %vm628_vm6 = vcmp.lt.s32.totalorder (!%p6398_p6), %v7936_v19, 113  ;;  %vm684_vm7 = vcmp.lt.s32.totalorder (!%p6398_p6), %v7936_v19, 112 }
  0x83   : > { %337 = vrot.lane.b32.xlu1 (!%p6398_p6), %v7813_v11, %s7522_s12  ;;  %333 = vrot.lane.b32.xlu0 (!%p6398_p6), %v7816_v12, %s7522_s12  ;;  %vm740_vm8 = vcmp.lt.s32.totalorder (!%p6398_p6), %v7936_v19, 111 }
  0x86   : > { %v358_v21 = vld [vmem:[%s11826_s9] sm:$0xf]  ;;  %v6399_v54 = vld [vmem:[%s11826_s9 + $0x4] sm:$0xf] }
  0x87   : > { %341 = vrot.lane.b32.xlu1 %v7823_v13, %s7522_s12  ;;  %339 = vrot.lane.b32.xlu0 %v7825_v14, %s7522_s12  ;;  %v367_v24 = vrot.slane %v358_v21, %v7942_v20  ;;  %v371_v37 = vrot.slane %v358_v21, %v7959_v28  ;;  %v363_v40 = vrot.slane %v358_v21, %v7967_v30 }
  0x88   : > { %v375_v41 = vrot.slane %v358_v21, %v7969_v31  ;;  %v423_v60 = vrot.slane %v6399_v54, %v7942_v20  ;;  %v427_v21 = vrot.slane %v6399_v54, %v7959_v28 }
  0x8b   : > { %345 = vrot.lane.b32.xlu1 %v7832_v15, %s7522_s12  ;;  %343 = vrot.lane.b32.xlu0 %v7834_v16, %s7522_s12 }
  0x8f   : > { %390 = vrot.lane.b32.xlu1 %v7816_v12, %s7523_s16  ;;  %388 = vrot.lane.b32.xlu0 %v7806_v10, %s7523_s16 }
  0x93   : > { %394 = vrot.lane.b32.xlu1 %v7813_v11, %s7523_s16  ;;  %392 = vrot.lane.b32.xlu0 %v7804_v9, %s7523_s16 }
  0x97   : > { %398 = vrot.lane.b32.xlu1 %v7823_v13, %s7523_s16  ;;  %396 = vrot.lane.b32.xlu0 %v7825_v14, %s7523_s16 }
  0x9b   : > { %402 = vrot.lane.b32.xlu1 %v7832_v15, %s7523_s16  ;;  %400 = vrot.lane.b32.xlu0 %v7834_v16, %s7523_s16 }
  0x9f   : > { %446 = vrot.lane.b32.xlu1 %v7816_v12, %s7524_s27  ;;  %444 = vrot.lane.b32.xlu0 %v7806_v10, %s7524_s27 }
  0xa3   : > { %450 = vrot.lane.b32.xlu1 %v7813_v11, %s7524_s27  ;;  %448 = vrot.lane.b32.xlu0 %v7804_v9, %s7524_s27 }
  0xa7   : > { %454 = vrot.lane.b32.xlu1 %v7823_v13, %s7524_s27  ;;  %452 = vrot.lane.b32.xlu0 %v7825_v14, %s7524_s27 }
  0xab   : > { %458 = vrot.lane.b32.xlu1 %v7832_v15, %s7524_s27  ;;  %456 = vrot.lane.b32.xlu0 %v7834_v16, %s7524_s27 }
  0xaf   : > { %502 = vrot.lane.b32.xlu1 %v7816_v12, %s7525_s26  ;;  %500 = vrot.lane.b32.xlu0 %v7806_v10, %s7525_s26 }
  0xb3   : > { %506 = vrot.lane.b32.xlu1 %v7813_v11, %s7525_s26  ;;  %504 = vrot.lane.b32.xlu0 %v7804_v9, %s7525_s26 }
  0xb7   : > { %510 = vrot.lane.b32.xlu1 %v7823_v13, %s7525_s26  ;;  %508 = vrot.lane.b32.xlu0 %v7825_v14, %s7525_s26 }
  0xbb   : > { %514 = vrot.lane.b32.xlu1 %v7832_v15, %s7525_s26  ;;  %512 = vrot.lane.b32.xlu0 %v7834_v16, %s7525_s26 }
  0xbf   : > { %558 = vrot.lane.b32.xlu1 %v7816_v12, %s7526_s29  ;;  %556 = vrot.lane.b32.xlu0 %v7806_v10, %s7526_s29 }
  0xc3   : > { %562 = vrot.lane.b32.xlu1 %v7813_v11, %s7526_s29  ;;  %560 = vrot.lane.b32.xlu0 %v7804_v9, %s7526_s29 }
  0xc7   : > { %566 = vrot.lane.b32.xlu1 %v7823_v13, %s7526_s29  ;;  %564 = vrot.lane.b32.xlu0 %v7825_v14, %s7526_s29 }
  0xcb   : > { %570 = vrot.lane.b32.xlu1 %v7832_v15, %s7526_s29  ;;  %568 = vrot.lane.b32.xlu0 %v7834_v16, %s7526_s29 }
  0xcf   : > { %614 = vrot.lane.b32.xlu1 %v7816_v12, %s7527_s14  ;;  %612 = vrot.lane.b32.xlu0 %v7806_v10, %s7527_s14 }
  0xd3   : > { %618 = vrot.lane.b32.xlu1 %v7813_v11, %s7527_s14  ;;  %616 = vrot.lane.b32.xlu0 %v7804_v9, %s7527_s14 }
  0xd7   : > { %622 = vrot.lane.b32.xlu1 %v7823_v13, %s7527_s14  ;;  %620 = vrot.lane.b32.xlu0 %v7825_v14, %s7527_s14 }
  0xdb   : > { %626 = vrot.lane.b32.xlu1 %v7832_v15, %s7527_s14  ;;  %624 = vrot.lane.b32.xlu0 %v7834_v16, %s7527_s14 }
  0xdf   : > { %670 = vrot.lane.b32.xlu1 %v7816_v12, %s7528_s10  ;;  %668 = vrot.lane.b32.xlu0 %v7806_v10, %s7528_s10 }
  0xe3   : > { %674 = vrot.lane.b32.xlu1 %v7813_v11, %s7528_s10  ;;  %672 = vrot.lane.b32.xlu0 %v7804_v9, %s7528_s10 }
  0xe7   : > { %678 = vrot.lane.b32.xlu1 %v7823_v13, %s7528_s10  ;;  %676 = vrot.lane.b32.xlu0 %v7825_v14, %s7528_s10 }
  0xeb   : > { %682 = vrot.lane.b32.xlu1 %v7832_v15, %s7528_s10  ;;  %680 = vrot.lane.b32.xlu0 %v7834_v16, %s7528_s10 }
  0xef   : > { %726 = vrot.lane.b32.xlu1 %v7816_v12, %s7529_s6  ;;  %724 = vrot.lane.b32.xlu0 %v7806_v10, %s7529_s6 }
  0xf1   : > { %v336_v22 = vpop.permute.xlu1 %335  ;;  %v332_v23 = vpop.permute.xlu0 %331 }
  0xf2   : > { %v354_v25 = vsel %vm349_vm1, %v332_v23, %v336_v22 }
  0xf3   : > { %730 = vrot.lane.b32.xlu1 %v7813_v11, %s7529_s6  ;;  %728 = vrot.lane.b32.xlu0 %v7804_v9, %s7529_s6  ;;  %v381_v32 = vmul.f32 %v367_v24, %v354_v25 }
  0xf5   : > { %v338_v26 = vpop.permute.xlu1 %337  ;;  %v334_v27 = vpop.permute.xlu0 %333 }
  0xf6   : > { %v355_v29 = vsel %vm349_vm1, %v334_v27, %v338_v26 }
  0xf7   : > { %734 = vrot.lane.b32.xlu1 %v7823_v13, %s7529_s6  ;;  %732 = vrot.lane.b32.xlu0 %v7825_v14, %s7529_s6  ;;  %v385_v33 = vmul.f32 %v367_v24, %v355_v29  ;;  %v431_v29 = vrot.slane %v6399_v54, %v7969_v31 }
  0xf9   : > { %v342_v34 = vpop.permute.xlu1 %341  ;;  %v340_v35 = vpop.permute.xlu0 %339  ;;  %v6547_v36 = vpack.c.bf16 %v385_v33, %v381_v32 }
  0xfa   : > { %v353_v38 = vsel %vm349_vm1, %v338_v26, %v342_v34  ;;  %v352_v39 = vsel %vm349_vm1, %v336_v22, %v340_v35 }
  0xfb   : > { %738 = vrot.lane.b32.xlu1 %v7832_v15, %s7529_s6  ;;  %736 = vrot.lane.b32.xlu0 %v7834_v16, %s7529_s6  ;;  %v382_v44 = vmul.f32 %v371_v37, %v352_v39  ;;  %v386_v45 = vmul.f32 %v371_v37, %v353_v38 }
  0xfc   : > { %6548 = vmatprep.subr.bf16.mxu0 %v6547_v36 }
  0xfd   : > { %v346_v42 = vpop.permute.xlu1 %345  ;;  %v344_v43 = vpop.permute.xlu0 %343  ;;  %v6585_v59 = vpack.c.bf16 %v386_v45, %v382_v44  ;;  %v6400_v44 = vld [vmem:[%s11826_s9 + $0x8] sm:$0xf] }
  0xfe   : > { %v357_v46 = vsel %vm349_vm1, %v346_v42, %v334_v27  ;;  %v356_v47 = vsel %vm349_vm1, %v344_v43, %v332_v23  ;;  %v350_v48 = vsel %vm349_vm1, %v340_v35, %v344_v43  ;;  %v351_v49 = vsel %vm349_vm1, %v342_v34, %v346_v42 }
  0xff   : > { %v380_v50 = vmul.f32 %v363_v40, %v356_v47  ;;  %v384_v51 = vmul.f32 %v363_v40, %v357_v46  ;;  %v383_v52 = vmul.f32 %v375_v41, %v350_v48  ;;  %v387_v53 = vmul.f32 %v375_v41, %v351_v49 }
 0x100   : > { %v419_v27 = vrot.slane %v6399_v54, %v7967_v30 }
 0x101   : > { %v391_v55 = vpop.permute.xlu1 %390  ;;  %v389_v56 = vpop.permute.xlu0 %388  ;;  %v6549_v57 = vpack.c.bf16 %v384_v51, %v380_v50  ;;  %v6583_v58 = vpack.c.bf16 %v387_v53, %v383_v52  ;;  %v479_v50 = vrot.slane %v6400_v44, %v7942_v20 }
 0x103   : > { %6550 = vmatpush1.bf16.msra.mxu0 %v6549_v57  ;;  %6584 = vmatprep.subr.bf16.mxu1 %v6583_v58  ;;  %v483_v57 = vrot.slane %v6400_v44, %v7959_v28 }
 0x104   : > { %6586 = vmatpush1.bf16.msra.mxu1 %v6585_v59 }
 0x105   : > { %v395_v61 = vpop.permute.xlu1 %394  ;;  %v393_v62 = vpop.permute.xlu0 %392 }
 0x106   : > { %v410_v63 = vsel %vm404_vm2, %v391_v55, %v395_v61  ;;  %v409_v0 = vsel %vm404_vm2, %v389_v56, %v393_v62 }
 0x107   : > { %v441_v17 = vmul.f32 %v423_v60, %v410_v63  ;;  %v437_v18 = vmul.f32 %v423_v60, %v409_v0  ;;  %v475_v63 = vrot.slane %v6400_v44, %v7967_v30  ;;  %v487_v0 = vrot.slane %v6400_v44, %v7969_v31 }
 0x109   : > { %v399_v22 = vpop.permute.xlu1 %398  ;;  %v397_v23 = vpop.permute.xlu0 %396  ;;  %v6551_v24 = vpack.c.bf16 %v441_v17, %v437_v18 }
 0x10a   : > { %v408_v25 = vsel %vm404_vm2, %v395_v61, %v399_v22  ;;  %v407_v26 = vsel %vm404_vm2, %v393_v62, %v397_v23 }
 0x10b   : > { %6552 = vmatprep.subr.bf16.mxu0 %v6551_v24  ;;  %v442_v32 = vmul.f32 %v427_v21, %v408_v25  ;;  %v438_v33 = vmul.f32 %v427_v21, %v407_v26 }
 0x10d   : > { %v403_v34 = vpop.permute.xlu1 %402  ;;  %v401_v35 = vpop.permute.xlu0 %400  ;;  %v6589_v49 = vpack.c.bf16 %v442_v32, %v438_v33 }
 0x10e   : > { %v406_v36 = vsel %vm404_vm2, %v399_v22, %v403_v34  ;;  %v412_v37 = vsel %vm404_vm2, %v403_v34, %v391_v55  ;;  %v405_v38 = vsel %vm404_vm2, %v397_v23, %v401_v35  ;;  %v411_v39 = vsel %vm404_vm2, %v401_v35, %v389_v56  ;;  %v6401_v34 = vld [vmem:[%s11826_s9 + $0xc] sm:$0xf] }
 0x10f   : > { %v440_v40 = vmul.f32 %v419_v27, %v412_v37  ;;  %v443_v41 = vmul.f32 %v431_v29, %v406_v36  ;;  %v436_v42 = vmul.f32 %v419_v27, %v411_v39  ;;  %v439_v43 = vmul.f32 %v431_v29, %v405_v38 }
 0x111   : > { %v447_v45 = vpop.permute.xlu1 %446  ;;  %v445_v46 = vpop.permute.xlu0 %444  ;;  %v6553_v47 = vpack.c.bf16 %v440_v40, %v436_v42  ;;  %v6587_v48 = vpack.c.bf16 %v443_v41, %v439_v43  ;;  %v535_v40 = vrot.slane %v6401_v34, %v7942_v20 }
 0x113   : > { %6554 = vmatpush1.bf16.msra.mxu0 %v6553_v47  ;;  %6588 = vmatprep.subr.bf16.mxu1 %v6587_v48  ;;  %v539_v47 = vrot.slane %v6401_v34, %v7959_v28 }
 0x114   : > { %6590 = vmatpush1.bf16.msra.mxu1 %v6589_v49 }
 0x115   : > { %v451_v51 = vpop.permute.xlu1 %450  ;;  %v449_v52 = vpop.permute.xlu0 %448 }
 0x116   : > { %v466_v53 = vsel %vm460_vm3, %v447_v45, %v451_v51  ;;  %v465_v54 = vsel %vm460_vm3, %v445_v46, %v449_v52 }
 0x117   : > { %v497_v55 = vmul.f32 %v479_v50, %v466_v53  ;;  %v493_v56 = vmul.f32 %v479_v50, %v465_v54  ;;  %v531_v53 = vrot.slane %v6401_v34, %v7967_v30  ;;  %v543_v54 = vrot.slane %v6401_v34, %v7969_v31 }
 0x119   : > { %v455_v58 = vpop.permute.xlu1 %454  ;;  %v453_v59 = vpop.permute.xlu0 %452  ;;  %v6555_v60 = vpack.c.bf16 %v497_v55, %v493_v56 }
 0x11a   : > { %v464_v61 = vsel %vm460_vm3, %v451_v51, %v455_v58  ;;  %v463_v62 = vsel %vm460_vm3, %v449_v52, %v453_v59 }
 0x11b   : > { %6556 = vmatprep.subr.bf16.mxu0 %v6555_v60  ;;  %v498_v17 = vmul.f32 %v483_v57, %v464_v61  ;;  %v494_v18 = vmul.f32 %v483_v57, %v463_v62 }
 0x11d   : > { %v459_v21 = vpop.permute.xlu1 %458  ;;  %v457_v22 = vpop.permute.xlu0 %456  ;;  %v6593_v39 = vpack.c.bf16 %v498_v17, %v494_v18 }
 0x11e   : > { %v462_v23 = vsel %vm460_vm3, %v455_v58, %v459_v21  ;;  %v468_v24 = vsel %vm460_vm3, %v459_v21, %v447_v45  ;;  %v461_v25 = vsel %vm460_vm3, %v453_v59, %v457_v22  ;;  %v467_v26 = vsel %vm460_vm3, %v457_v22, %v445_v46 }
 0x11f   : > { %v496_v27 = vmul.f32 %v475_v63, %v468_v24  ;;  %v499_v29 = vmul.f32 %v487_v0, %v462_v23  ;;  %v492_v32 = vmul.f32 %v475_v63, %v467_v26  ;;  %v495_v33 = vmul.f32 %v487_v0, %v461_v25 }
 0x120   : > { %v6563_v21 = vpack.c.bf16 %v7813_v11, %v7804_v9  ;;  %v6599_v26 = vpack.c.bf16 %v7832_v15, %v7834_v16  ;;  %v6601_v9 = vpack.c.bf16 %v7823_v13, %v7825_v14 }
 0x121   : > { %v503_v35 = vpop.permute.xlu1 %502  ;;  %v501_v36 = vpop.permute.xlu0 %500  ;;  %v6557_v37 = vpack.c.bf16 %v496_v27, %v492_v32  ;;  %v6591_v38 = vpack.c.bf16 %v499_v29, %v495_v33  ;;  %v6402_v29 = vld [vmem:[%s11826_s9 + $0x14] sm:$0xf]  ;;  %v6565_v32 = vpack.c.bf16 %v7816_v12, %v7806_v10 }
 0x122   : > { %v587_v11 = vrot.slane %v6402_v29, %v7967_v30 }
 0x123   : > { %6558 = vmatpush1.bf16.msra.mxu0 %v6557_v37  ;;  %6592 = vmatprep.subr.bf16.mxu1 %v6591_v38 }
 0x124   : > { %6594 = vmatpush1.bf16.msra.mxu1 %v6593_v39 }
 0x125   : > { %v507_v41 = vpop.permute.xlu1 %506  ;;  %v505_v42 = vpop.permute.xlu0 %504 }
 0x126   : > { %v522_v43 = vsel %vm516_vm4, %v503_v35, %v507_v41  ;;  %v521_v44 = vsel %vm516_vm4, %v501_v36, %v505_v42 }
 0x127   : > { %v553_v45 = vmul.f32 %v535_v40, %v522_v43  ;;  %v549_v46 = vmul.f32 %v535_v40, %v521_v44  ;;  %v595_v40 = vrot.slane %v6402_v29, %v7959_v28 }
 0x129   : > { %v511_v48 = vpop.permute.xlu1 %510  ;;  %v509_v49 = vpop.permute.xlu0 %508  ;;  %v6559_v50 = vpack.c.bf16 %v553_v45, %v549_v46 }
 0x12a   : > { %v520_v51 = vsel %vm516_vm4, %v507_v41, %v511_v48  ;;  %v519_v52 = vsel %vm516_vm4, %v505_v42, %v509_v49  ;;  %v599_v41 = vrot.slane %v6402_v29, %v7969_v31 }
 0x12b   : > { %6560 = vmatprep.subr.bf16.mxu0 %v6559_v50  ;;  %v554_v55 = vmul.f32 %v539_v47, %v520_v51  ;;  %v550_v56 = vmul.f32 %v539_v47, %v519_v52 }
 0x12d   : > { %v515_v57 = vpop.permute.xlu1 %514  ;;  %v513_v58 = vpop.permute.xlu0 %512  ;;  %v6597_v27 = vpack.c.bf16 %v554_v55, %v550_v56 }
 0x12e   : > { %v518_v59 = vsel %vm516_vm4, %v511_v48, %v515_v57  ;;  %v524_v60 = vsel %vm516_vm4, %v515_v57, %v503_v35  ;;  %v517_v61 = vsel %vm516_vm4, %v509_v49, %v513_v58  ;;  %v523_v62 = vsel %vm516_vm4, %v513_v58, %v501_v36  ;;  %v6403_v58 = vld [vmem:[%s11826_s9 + $0x18] sm:$0xf] }
 0x12f   : > { %v552_v63 = vmul.f32 %v531_v53, %v524_v60  ;;  %v555_v0 = vmul.f32 %v543_v54, %v518_v59  ;;  %v548_v17 = vmul.f32 %v531_v53, %v523_v62  ;;  %v551_v18 = vmul.f32 %v543_v54, %v517_v61 }
 0x130   : > { %v591_v35 = vrot.slane %v6402_v29, %v7942_v20  ;;  %v643_v59 = vrot.slane %v6403_v58, %v7967_v30  ;;  %v655_v29 = vrot.slane %v6403_v58, %v7969_v31 }
 0x131   : > { %v559_v22 = vpop.permute.xlu1 %558  ;;  %v557_v23 = vpop.permute.xlu0 %556  ;;  %v6561_v24 = vpack.c.bf16 %v552_v63, %v548_v17  ;;  %v6595_v25 = vpack.c.bf16 %v555_v0, %v551_v18  ;;  %v647_v0 = vrot.slane %v6403_v58, %v7942_v20 }
 0x133   : > { %6562 = vmatpush1.bf16.msra.mxu0 %v6561_v24  ;;  %6596 = vmatprep.subr.bf16.mxu1 %v6595_v25 }
 0x134   : > { %6598 = vmatpush1.bf16.msra.mxu1 %v6597_v27  ;;  %6564 = vmatprep.subr.bf16.mxu0 %v6563_v21  ;;  %v651_v27 = vrot.slane %v6403_v58, %v7959_v28 }
 0x135   : > { %v563_v15 = vpop.permute.xlu1 %562  ;;  %v561_v16 = vpop.permute.xlu0 %560  ;;  %6600 = vmatprep.subr.bf16.mxu1 %v6599_v26 }
 0x136   : > { %v578_v33 = vsel %vm572_vm5, %v559_v22, %v563_v15  ;;  %v577_v34 = vsel %vm572_vm5, %v557_v23, %v561_v16 }
 0x137   : > { %6566 = vmatpush1.bf16.msra.mxu0 %v6565_v32  ;;  %v608_v10 = vmul.f32 %v587_v11, %v578_v33  ;;  %v604_v12 = vmul.f32 %v587_v11, %v577_v34 }
 0x138   : > { %6602 = vmatpush1.bf16.msra.mxu1 %v6601_v9 }
 0x139   : > { %v567_v36 = vpop.permute.xlu1 %566  ;;  %v565_v37 = vpop.permute.xlu0 %564  ;;  %v6569_v45 = vpack.c.bf16 %v608_v10, %v604_v12 }
 0x13a   : > { %v576_v13 = vsel %vm572_vm5, %v563_v15, %v567_v36  ;;  %v575_v14 = vsel %vm572_vm5, %v561_v16, %v565_v37 }
 0x13b   : > { %v609_v38 = vmul.f32 %v591_v35, %v576_v13  ;;  %v605_v39 = vmul.f32 %v591_v35, %v575_v14 }
 0x13d   : > { %v571_v42 = vpop.permute.xlu1 %570  ;;  %v569_v43 = vpop.permute.xlu0 %568  ;;  %v6567_v44 = vpack.c.bf16 %v609_v38, %v605_v39 }
 0x13e   : > { %v574_v46 = vsel %vm572_vm5, %v567_v36, %v571_v42  ;;  %v580_v47 = vsel %vm572_vm5, %v571_v42, %v559_v22  ;;  %v573_v48 = vsel %vm572_vm5, %v565_v37, %v569_v43  ;;  %v579_v49 = vsel %vm572_vm5, %v569_v43, %v557_v23 }
 0x13f   : > { %v610_v50 = vmul.f32 %v595_v40, %v574_v46  ;;  %v611_v51 = vmul.f32 %v599_v41, %v580_v47  ;;  %v606_v52 = vmul.f32 %v595_v40, %v573_v48  ;;  %v607_v53 = vmul.f32 %v599_v41, %v579_v49  ;;  %6568 = vmatprep.subr.bf16.mxu0 %v6567_v44  ;;  %v6404_v40 = vld [vmem:[%s11826_s9 + $0x1c] sm:$0xf] }
 0x140   : > { %6570 = vmatpush1.bf16.msra.mxu0 %v6569_v45  ;;  %v699_v41 = vrot.slane %v6404_v40, %v7967_v30  ;;  %v703_v46 = vrot.slane %v6404_v40, %v7942_v20 }
 0x141   : > { %v615_v54 = vpop.permute.xlu1 %614  ;;  %v613_v55 = vpop.permute.xlu0 %612  ;;  %v6603_v56 = vpack.c.bf16 %v611_v51, %v607_v53  ;;  %v6605_v57 = vpack.c.bf16 %v610_v50, %v606_v52 }
 0x143   : > { %6604 = vmatprep.subr.bf16.mxu1 %v6603_v56  ;;  %v711_v56 = vrot.slane %v6404_v40, %v7969_v31 }
 0x144   : > { %6606 = vmatpush1.bf16.msra.mxu1 %v6605_v57 }
 0x145   : > { %v619_v60 = vpop.permute.xlu1 %618  ;;  %v617_v61 = vpop.permute.xlu0 %616 }
 0x146   : > { %v634_v62 = vsel %vm628_vm6, %v615_v54, %v619_v60  ;;  %v633_v63 = vsel %vm628_vm6, %v613_v55, %v617_v61 }
 0x147   : > { %v664_v17 = vmul.f32 %v643_v59, %v634_v62  ;;  %v660_v18 = vmul.f32 %v643_v59, %v633_v63 }
 0x149   : > { %v623_v21 = vpop.permute.xlu1 %622  ;;  %v621_v22 = vpop.permute.xlu0 %620  ;;  %v6573_v15 = vpack.c.bf16 %v664_v17, %v660_v18 }
 0x14a   : > { %v632_v23 = vsel %vm628_vm6, %v619_v60, %v623_v21  ;;  %v631_v24 = vsel %vm628_vm6, %v617_v61, %v621_v22 }
 0x14b   : > { %v665_v25 = vmul.f32 %v647_v0, %v632_v23  ;;  %v661_v26 = vmul.f32 %v647_v0, %v631_v24 }
 0x14d   : > { %v627_v32 = vpop.permute.xlu1 %626  ;;  %v625_v9 = vpop.permute.xlu0 %624  ;;  %v6571_v11 = vpack.c.bf16 %v665_v25, %v661_v26 }
 0x14e   : > { %v630_v16 = vsel %vm628_vm6, %v623_v21, %v627_v32  ;;  %v636_v33 = vsel %vm628_vm6, %v627_v32, %v615_v54  ;;  %v629_v34 = vsel %vm628_vm6, %v621_v22, %v625_v9  ;;  %v635_v35 = vsel %vm628_vm6, %v625_v9, %v613_v55 }
 0x14f   : > { %v666_v10 = vmul.f32 %v651_v27, %v630_v16  ;;  %v667_v12 = vmul.f32 %v655_v29, %v636_v33  ;;  %v662_v36 = vmul.f32 %v651_v27, %v629_v34  ;;  %v663_v37 = vmul.f32 %v655_v29, %v635_v35  ;;  %6572 = vmatprep.subr.bf16.mxu0 %v6571_v11  ;;  %v6405_v27 = vld [vmem:[%s11826_s9 + $0x20] sm:$0xf] }
 0x150   : > { %6574 = vmatpush1.bf16.msra.mxu0 %v6573_v15  ;;  %v707_v55 = vrot.slane %v6404_v40, %v7959_v28  ;;  %v755_v29 = vrot.slane %v6405_v27, %v7967_v30  ;;  %v759_v16 = vrot.slane %v6405_v27, %v7942_v20 }
 0x151   : > { %v671_v13 = vpop.permute.xlu1 %670  ;;  %v669_v14 = vpop.permute.xlu0 %668  ;;  %v6607_v38 = vpack.c.bf16 %v667_v12, %v663_v37  ;;  %v6609_v39 = vpack.c.bf16 %v666_v10, %v662_v36 }
 0x153   : > { %6608 = vmatprep.subr.bf16.mxu1 %v6607_v38  ;;  %v767_v38 = vrot.slane %v6405_v27, %v7969_v31 }
 0x154   : > { %6610 = vmatpush1.bf16.msra.mxu1 %v6609_v39 }
 0x155   : > { %v675_v42 = vpop.permute.xlu1 %674  ;;  %v673_v43 = vpop.permute.xlu0 %672 }
 0x156   : > { %v690_v44 = vsel %vm684_vm7, %v671_v13, %v675_v42  ;;  %v689_v45 = vsel %vm684_vm7, %v669_v14, %v673_v43 }
 0x157   : > { %v720_v47 = vmul.f32 %v699_v41, %v690_v44  ;;  %v716_v48 = vmul.f32 %v699_v41, %v689_v45 }
 0x159   : > { %v679_v49 = vpop.permute.xlu1 %678  ;;  %v677_v50 = vpop.permute.xlu0 %676  ;;  %v6577_v60 = vpack.c.bf16 %v720_v47, %v716_v48 }
 0x15a   : > { %v688_v51 = vsel %vm684_vm7, %v675_v42, %v679_v49  ;;  %v687_v52 = vsel %vm684_vm7, %v673_v43, %v677_v50 }
 0x15b   : > { %v721_v53 = vmul.f32 %v703_v46, %v688_v51  ;;  %v717_v54 = vmul.f32 %v703_v46, %v687_v52 }
 0x15d   : > { %v683_v57 = vpop.permute.xlu1 %682  ;;  %v681_v58 = vpop.permute.xlu0 %680  ;;  %v6575_v59 = vpack.c.bf16 %v721_v53, %v717_v54 }
 0x15e   : > { %v686_v61 = vsel %vm684_vm7, %v679_v49, %v683_v57  ;;  %v692_v62 = vsel %vm684_vm7, %v683_v57, %v671_v13  ;;  %v685_v63 = vsel %vm684_vm7, %v677_v50, %v681_v58  ;;  %v691_v0 = vsel %vm684_vm7, %v681_v58, %v669_v14 }
 0x15f   : > { %v722_v17 = vmul.f32 %v707_v55, %v686_v61  ;;  %v723_v18 = vmul.f32 %v711_v56, %v692_v62  ;;  %v718_v21 = vmul.f32 %v707_v55, %v685_v63  ;;  %v719_v22 = vmul.f32 %v711_v56, %v691_v0  ;;  %6576 = vmatprep.subr.bf16.mxu0 %v6575_v59 }
 0x160   : > { %6578 = vmatpush1.bf16.msra.mxu0 %v6577_v60  ;;  %v763_v14 = vrot.slane %v6405_v27, %v7959_v28 }
 0x161   : > { %v727_v23 = vpop.permute.xlu1 %726  ;;  %v725_v24 = vpop.permute.xlu0 %724  ;;  %v6611_v25 = vpack.c.bf16 %v723_v18, %v719_v22  ;;  %v6613_v26 = vpack.c.bf16 %v722_v17, %v718_v21 }
 0x163   : > { %6612 = vmatprep.subr.bf16.mxu1 %v6611_v25 }
 0x164   : > { %6614 = vmatpush1.bf16.msra.mxu1 %v6613_v26 }
 0x165   : > { %v731_v32 = vpop.permute.xlu1 %730  ;;  %v729_v9 = vpop.permute.xlu0 %728 }
 0x166   : > { %v746_v11 = vsel %vm740_vm8, %v727_v23, %v731_v32  ;;  %v745_v15 = vsel %vm740_vm8, %v725_v24, %v729_v9 }
 0x167   : > { %v776_v33 = vmul.f32 %v755_v29, %v746_v11  ;;  %v772_v34 = vmul.f32 %v755_v29, %v745_v15  ;;  %v8219_v11 = vld [vmem:[%s7759_s15 + $0x20] sm:$0xff]  ;;  %v8224_v15 = vld [vmem:[%s7759_s15 + $0x28] sm:$0xff] }
 0x169   : > { %v735_v35 = vpop.permute.xlu1 %734  ;;  %v733_v10 = vpop.permute.xlu0 %732  ;;  %v6581_v42 = vpack.c.bf16 %v776_v33, %v772_v34  ;;  %v7530_v33 = vmov 0   ;;  %v8234_v34 = vld [vmem:[%s7759_s15 + $0x38] sm:$0xff] }
 0x16a   : > { %v744_v12 = vsel %vm740_vm8, %v731_v32, %v735_v35  ;;  %v743_v36 = vsel %vm740_vm8, %v729_v9, %v733_v10  ;;  %7262 = vset.pattern.permute.xlu0 %v7530_v33  ;;  %7261 = vset.pattern.permute.xlu1 %v7530_v33 }
 0x16b   : > { %v777_v37 = vmul.f32 %v759_v16, %v744_v12  ;;  %v773_v13 = vmul.f32 %v759_v16, %v743_v36  ;;  %v8229_v16 = vld [vmem:[%s7759_s15 + $0x30] sm:$0xff] }
 0x16d   : > { %v739_v39 = vpop.permute.xlu1 %738  ;;  %v737_v40 = vpop.permute.xlu0 %736  ;;  %v6579_v41 = vpack.c.bf16 %v777_v37, %v773_v13 }
 0x16e   : > { %v742_v43 = vsel %vm740_vm8, %v735_v35, %v739_v39  ;;  %v748_v44 = vsel %vm740_vm8, %v739_v39, %v727_v23  ;;  %v741_v45 = vsel %vm740_vm8, %v733_v10, %v737_v40  ;;  %v747_v46 = vsel %vm740_vm8, %v737_v40, %v725_v24 }
 0x16f   : > { %v778_v47 = vmul.f32 %v763_v14, %v742_v43  ;;  %v779_v48 = vmul.f32 %v767_v38, %v748_v44  ;;  %v774_v49 = vmul.f32 %v763_v14, %v741_v45  ;;  %v775_v50 = vmul.f32 %v767_v38, %v747_v46  ;;  %6580 = vmatprep.subr.bf16.mxu0 %v6579_v41 }
 0x170   : > { %6582 = vmatpush1.bf16.msra.mxu0 %v6581_v42 }
 0x171   : > { %v6615_v51 = vpack.c.bf16 %v779_v48, %v775_v50  ;;  %v6617_v52 = vpack.c.bf16 %v778_v47, %v774_v49 }
 0x173   : > { %852 = vmatmul.mubr.f32.vlgmr.msra.gmra.mrb[0].mxu0 %v7775_v1  ;;  %6616 = vmatprep.subr.bf16.mxu1 %v6615_v51 }
 0x174   : > { %6618 = vmatpush1.bf16.msra.mxu1 %v6617_v52  ;;  %6407 = vmatprep.mubr.msk.f32.mxu0 %vm780_vm0, %v7781_v4 }
 0x177   : > { %929 = vmatmul.mubr.f32.vlgmr.msra.gmra.mrb[0].mxu1 %v7775_v1  ;;  %858 = vmatmul.mubr.f32.gmra.mrb[2].mxu0 %v7779_v3 }
 0x178   : > { %6409 = vmatprep.mubr.msk.f32.mxu1 %vm780_vm0, %v7781_v4  ;;  %6421 = vmatprep.mubr.msk.f32.mxu0 %vm780_vm0, %v7777_v2 }
 0x17b   : > { %935 = vmatmul.mubr.f32.gmra.mrb[2].mxu1 %v7779_v3 }
 0x17c   : > { %6423 = vmatprep.mubr.msk.f32.mxu1 %vm780_vm0, %v7777_v2 }
 0x246   : > { %v8178_v53 = vpop.f32.mrb[0].mxu0 }
 0x247   : > { %v8180_v54 = vpop.f32.mrb[1].mxu0  ;;  %v949_v55 = vmul.f32 %v8178_v53, %v8178_v53 }
 0x248   : > { %v941_v56 = vadd.f32 %v8180_v54, %v8178_v53  ;;  %v950_v57 = vmul.f32 %v8180_v54, %v8180_v54 }
 0x24a   : > { %v8188_v58 = vpop.f32.mrb[0].mxu1  ;;  %942 = vadd.xlane.f32.xlu0 %v941_v56  ;;  %v953_v59 = vadd.f32 %v950_v57, %v949_v55  ;;  %v8190_v60 = vpop.f32.mrb[2].mxu0 }
 0x24b   : > { %v8192_v61 = vpop.f32.mrb[1].mxu1  ;;  %v8194_v62 = vpop.f32.mrb[3].mxu0  ;;  %v1015_v63 = vmul.f32 %v8188_v58, %v8188_v58  ;;  %v951_v0 = vmul.f32 %v8190_v60, %v8190_v60 }
 0x24c   : > { %954 = vadd.xlane.f32.xlu1 %v953_v59  ;;  %v1007_v17 = vadd.f32 %v8192_v61, %v8188_v58  ;;  %v944_v18 = vadd.f32 %v8194_v62, %v8190_v60  ;;  %v1016_v21 = vmul.f32 %v8192_v61, %v8192_v61  ;;  %v952_v22 = vmul.f32 %v8194_v62, %v8194_v62 }
 0x24e   : > { %v8208_v23 = vpop.f32.mrb[2].mxu1  ;;  %1008 = vadd.xlane.f32.xlu0 %v1007_v17  ;;  %v1019_v24 = vadd.f32 %v1016_v21, %v1015_v63  ;;  %v956_v25 = vadd.f32 %v952_v22, %v951_v0 }
 0x24f   : > { %v8210_v26 = vpop.f32.mrb[3].mxu1  ;;  %v1017_v27 = vmul.f32 %v8208_v23, %v8208_v23 }
 0x250   : > { %945 = vadd.xlane.f32.xlu1 %v944_v18  ;;  %v1010_v29 = vadd.f32 %v8210_v26, %v8208_v23  ;;  %v1018_v32 = vmul.f32 %v8210_v26, %v8210_v26 }
 0x252   : > { %1011 = vadd.xlane.f32.xlu0 %v1010_v29  ;;  %v1022_v9 = vadd.f32 %v1018_v32, %v1017_v27 }
 0x254   : > { %1020 = vadd.xlane.f32.xlu1 %v1019_v24 }
 0x256   : > { %957 = vadd.xlane.f32.xlu0 %v956_v25 }
 0x25a   : > { %1023 = vadd.xlane.f32.xlu0 %v1022_v9 }
 0x265   : > { %1092 = vrot.lane.b32.xlu1 %v8219_v11, %s7522_s12 }
 0x269   : > { %1096 = vrot.lane.b32.xlu1 %v8224_v15, %s7522_s12 }
 0x26d   : > { %1100 = vrot.lane.b32.xlu1 %v8229_v16, %s7522_s12 }
 0x271   : > { %1104 = vrot.lane.b32.xlu1 %v8234_v34, %s7522_s12 }
 0x275   : > { %1146 = vrot.lane.b32.xlu1 %v8219_v11, %s7523_s16 }
 0x2d7   : > { %v943_v35 = vpop.xlane.xlu0 %942 }
 0x2d8   : > { %v947_v10 = vmul.f32 0.00390625, %v943_v35 }
 0x2d9   : > { %v955_v12 = vpop.xlane.xlu1 %954 }
 0x2da   : > { %v961_v36 = vmul.f32 %v947_v10, %v947_v10  ;;  %v959_v37 = vmul.f32 0.00390625, %v955_v12 }
 0x2db   : > { %v1009_v13 = vpop.xlane.xlu0 %1008 }
 0x2dc   : > { %v963_v14 = vsub.f32 %v959_v37, %v961_v36  ;;  %v1013_v40 = vmul.f32 0.00390625, %v1009_v13 }
 0x2dd   : > { %v946_v38 = vpop.xlane.xlu1 %945 }
 0x2de   : > { %v965_v39 = vadd.f32 1e-05, %v963_v14  ;;  %v948_v42 = vmul.f32 0.00390625, %v946_v38  ;;  %v1027_v44 = vmul.f32 %v1013_v40, %v1013_v40 }
 0x2df   : > { %v1012_v41 = vpop.xlane.xlu0 %1011 }
 0x2e0   : > { %7263 = vrsqrt.f32 %v965_v39  ;;  %v962_v47 = vmul.f32 %v948_v42, %v948_v42  ;;  %v1014_v48 = vmul.f32 0.00390625, %v1012_v41 }
 0x2e1   : > { %v1021_v43 = vpop.xlane.xlu1 %1020 }
 0x2e2   : > { %v1025_v45 = vmul.f32 0.00390625, %v1021_v43  ;;  %v1028_v56 = vmul.f32 %v1014_v48, %v1014_v48 }
 0x2e3   : > { %v958_v46 = vpop.xlane.xlu0 %957 }
 0x2e4   : > { %v1029_v49 = vsub.f32 %v1025_v45, %v1027_v44  ;;  %v960_v50 = vmul.f32 0.00390625, %v958_v46 }
 0x2e6   : > { %v1031_v51 = vadd.f32 1e-05, %v1029_v49  ;;  %v964_v52 = vsub.f32 %v960_v50, %v962_v47 }
 0x2e7   : > { %v1024_v55 = vpop.xlane.xlu0 %1023 }
 0x2e8   : > { %7265 = vrsqrt.f32 %v1031_v51  ;;  %v966_v57 = vadd.f32 1e-05, %v964_v52  ;;  %v1026_v59 = vmul.f32 0.00390625, %v1024_v55 }
 0x2ea   : > { %v7264_v63 = vpop.eup %7263  ;;  %7267 = vrsqrt.f32 %v966_v57  ;;  %v1030_v0 = vsub.f32 %v1026_v59, %v1028_v56 }
 0x2eb   : > { %v969_v17 = vmul.f32 %v7264_v63, %v7786_v5 }
 0x2ec   : > { %v1032_v18 = vadd.f32 1e-05, %v1030_v0 }
 0x2ed   : > { %973 = vperm.xlu1 %7261, %v969_v17   ;;  %v985_v32 = vmul.f32 %v969_v17, %v947_v10  ;;  %v8286_v10 = vpop.permute.xlu1 %1092 }
 0x2ee   : > { %7269 = vrsqrt.f32 %v1032_v18 }
 0x2ef   : > { %v987_v9 = vsub.f32 %v7796_v7, %v985_v32 }
 0x2f1   : > { %v8288_v14 = vpop.permute.xlu1 %1096 }
 0x2f2   : > { %v7266_v21 = vpop.eup %7265 }
 0x2f3   : > { %v1035_v22 = vmul.f32 %v7266_v21, %v7786_v5 }
 0x2f4   : > { %v7268_v24 = vpop.eup %7267 }
 0x2f5   : > { %1039 = vperm.xlu1 %7261, %v1035_v22   ;;  %v970_v25 = vmul.f32 %v7268_v24, %v7791_v6  ;;  %v1051_v33 = vmul.f32 %v1035_v22, %v1013_v40  ;;  %v8290_v38 = vpop.permute.xlu1 %1100 }
 0x2f7   : > { %978 = vperm.xlu0 %7262, %v970_v25   ;;  %v1053_v35 = vsub.f32 %v7796_v7, %v1051_v33  ;;  %v986_v12 = vmul.f32 %v970_v25, %v948_v42 }
 0x2f8   : > { %v7270_v27 = vpop.eup %7269 }
 0x2f9   : > { %v1036_v29 = vmul.f32 %v7270_v27, %v7791_v6  ;;  %v988_v36 = vsub.f32 %v7801_v8, %v986_v12  ;;  %v8292_v39 = vpop.permute.xlu1 %1104 }
 0x2fb   : > { %1044 = vperm.xlu1 %7261, %v1036_v29   ;;  %v1052_v37 = vmul.f32 %v1036_v29, %v1014_v48 }
 0x2fd   : > { %v1054_v13 = vsub.f32 %v7801_v8, %v1052_v37  ;;  %v8294_v40 = vpop.permute.xlu1 %1146 }
 0x2ff   : > { %991 = vperm.xlu1 %7261, %v987_v9  }
 0x303   : > { %1057 = vperm.xlu1 %7261, %v1053_v35  }
 0x307   : > { %996 = vperm.xlu1 %7261, %v988_v36  }
 0x30b   : > { %1062 = vperm.xlu1 %7261, %v1054_v13  }
 0x30f   : > { %1150 = vrot.lane.b32.xlu1 %v8224_v15, %s7523_s16 }
 0x313   : > { %1154 = vrot.lane.b32.xlu1 %v8229_v16, %s7523_s16 }
 0x317   : > { %1158 = vrot.lane.b32.xlu1 %v8234_v34, %s7523_s16 }
 0x31b   : > { %1200 = vrot.lane.b32.xlu1 %v8219_v11, %s7524_s27 }
 0x31f   : > { %1204 = vrot.lane.b32.xlu1 %v8224_v15, %s7524_s27 }
 0x323   : > { %1208 = vrot.lane.b32.xlu1 %v8229_v16, %s7524_s27 }
 0x327   : > { %1212 = vrot.lane.b32.xlu1 %v8234_v34, %s7524_s27 }
 0x32b   : > { %1254 = vrot.lane.b32.xlu1 %v8219_v11, %s7525_s26 }
 0x32f   : > { %1258 = vrot.lane.b32.xlu1 %v8224_v15, %s7525_s26 }
 0x333   : > { %1262 = vrot.lane.b32.xlu1 %v8229_v16, %s7525_s26 }
 0x337   : > { %1266 = vrot.lane.b32.xlu1 %v8234_v34, %s7525_s26 }
 0x33b   : > { %1308 = vrot.lane.b32.xlu1 %v8219_v11, %s7526_s29 }
 0x33f   : > { %1312 = vrot.lane.b32.xlu1 %v8224_v15, %s7526_s29 }
 0x343   : > { %1316 = vrot.lane.b32.xlu1 %v8229_v16, %s7526_s29 }
 0x347   : > { %1320 = vrot.lane.b32.xlu1 %v8234_v34, %s7526_s29 }
 0x34b   : > { %1362 = vrot.lane.b32.xlu1 %v8219_v11, %s7527_s14 }
 0x34f   : > { %1366 = vrot.lane.b32.xlu1 %v8224_v15, %s7527_s14 }
 0x353   : > { %1370 = vrot.lane.b32.xlu1 %v8229_v16, %s7527_s14 }
 0x357   : > { %1374 = vrot.lane.b32.xlu1 %v8234_v34, %s7527_s14 }
 0x36c   : > { %v974_v41 = vpop.permute.xlu1 %973 }
 0x36d   : > { %v981_v47 = vmul.f32 %v974_v41, %v8178_v53  ;;  %v982_v48 = vmul.f32 %v974_v41, %v8180_v54 }
 0x374   : > { %v1040_v42 = vpop.permute.xlu1 %1039 }
 0x375   : > { %v1047_v59 = vmul.f32 %v1040_v42, %v8188_v58  ;;  %v1048_v63 = vmul.f32 %v1040_v42, %v8192_v61 }
 0x376   : > { %v979_v45 = vpop.permute.xlu0 %978 }
 0x377   : > { %v983_v49 = vmul.f32 %v979_v45, %v8190_v60  ;;  %v984_v50 = vmul.f32 %v979_v45, %v8194_v62 }
 0x37a   : > { %v1045_v43 = vpop.permute.xlu1 %1044 }
 0x37b   : > { %v1049_v0 = vmul.f32 %v1045_v43, %v8208_v23  ;;  %v1050_v53 = vmul.f32 %v1045_v43, %v8210_v26 }
 0x37e   : > { %v992_v44 = vpop.permute.xlu1 %991 }
 0x37f   : > { %v999_v52 = vadd.f32 %v992_v44, %v981_v47  ;;  %v1000_v55 = vadd.f32 %v992_v44, %v982_v48 }
 0x382   : > { %v1058_v46 = vpop.permute.xlu1 %1057 }
 0x383   : > { %v1065_v60 = vadd.f32 %v1058_v46, %v1047_v59  ;;  %v1066_v62 = vadd.f32 %v1058_v46, %v1048_v63 }
 0x386   : > { %v997_v51 = vpop.permute.xlu1 %996 }
 0x387   : > { %v1001_v56 = vadd.f32 %v997_v51, %v983_v49  ;;  %v1002_v57 = vadd.f32 %v997_v51, %v984_v50  ;;  %v1114_v50 = vld [vmem:[%s11826_s9] sm:$0xf] }
 0x388   : > { %v1123_v51 = vrot.slane %v1114_v50, %v7942_v20 }
 0x389   : > { %v1003_v54 = vadd.f32 %v1001_v56, %v999_v52  ;;  %v1004_v17 = vadd.f32 %v1002_v57, %v1000_v55  ;;  %v1111_v52 = vsel %vm349_vm1, %v8286_v10, %v8288_v14 }
 0x38a   : > { %v1063_v18 = vpop.permute.xlu1 %1062  ;;  %v1141_v59 = vmul.f32 %v1123_v51, %v1111_v52 }
 0x38b   : > { %v8304_v21 = vmax.f32 %v1003_v54, 0.0  ;;  %v8306_v22 = vmax.f32 %v1004_v17, 0.0  ;;  %v1067_v24 = vadd.f32 %v1063_v18, %v1049_v0  ;;  %v1068_v25 = vadd.f32 %v1063_v18, %v1050_v53 }
 0x38c   : > { %v1119_v54 = vrot.slane %v1114_v50, %v7967_v30  ;;  %v1131_v17 = vrot.slane %v1114_v50, %v7969_v31  ;;  %v1107_v18 = vsel %vm349_vm1, %v8290_v38, %v8292_v39 }
 0x38d   : > { %1077 = vst [vmem:[%s7772_s18] sm:$0xff] %v8304_v21  ;;  %1078 = vst [vmem:[%s7772_s18 + $0x8] sm:$0xff] %v8306_v22  ;;  %v1069_v58 = vadd.f32 %v1067_v24, %v1065_v60  ;;  %v1070_v61 = vadd.f32 %v1068_v25, %v1066_v62  ;;  %1094 = vrot.lane.b32.xlu0 %v8306_v22, %s7522_s12  ;;  %1090 = vrot.lane.b32.xlu1 %v8304_v21, %s7522_s12 }
 0x38e   : > { %v8320_v27 = vpop.permute.xlu1 %1150  ;;  %v1127_v62 = vrot.slane %v1114_v50, %v7959_v28  ;;  %v1113_v24 = vsel %vm349_vm1, %v8292_v39, %v8286_v10  ;;  %v1109_v25 = vsel %vm349_vm1, %v8288_v14, %v8290_v38  ;;  %v6414_v10 = vld [vmem:[%s11826_s9 + $0x4] sm:$0xf] }
 0x38f   : > { %v8316_v23 = vmax.f32 %v1069_v58, 0.0  ;;  %v8318_v26 = vmax.f32 %v1070_v61, 0.0  ;;  %v1140_v52 = vmul.f32 %v1119_v54, %v1113_v24 }
 0x391   : > { %1079 = vst [vmem:[%s7772_s18 + $0x10] sm:$0xff] %v8316_v23  ;;  %1080 = vst [vmem:[%s7772_s18 + $0x18] sm:$0xff] %v8318_v26  ;;  %1098 = vrot.lane.b32.xlu0 %v8316_v23, %s7522_s12  ;;  %1416 = vrot.lane.b32.xlu1 %v8219_v11, %s7528_s10 }
 0x392   : > { %v8330_v29 = vpop.permute.xlu1 %1154 }
 0x395   : > { %1102 = vrot.lane.b32.xlu0 %v8318_v26, %s7522_s12  ;;  %1420 = vrot.lane.b32.xlu1 %v8224_v15, %s7528_s10 }
 0x396   : > { %v8340_v32 = vpop.permute.xlu1 %1158 }
 0x399   : > { %1144 = vrot.lane.b32.xlu0 %v8304_v21, %s7523_s16  ;;  %1424 = vrot.lane.b32.xlu1 %v8229_v16, %s7528_s10 }
 0x39a   : > { %v8346_v9 = vpop.permute.xlu1 %1200 }
 0x39d   : > { %1148 = vrot.lane.b32.xlu0 %v8306_v22, %s7523_s16  ;;  %1428 = vrot.lane.b32.xlu1 %v8234_v34, %s7528_s10 }
 0x39e   : > { %v8354_v33 = vpop.permute.xlu1 %1204 }
 0x3a1   : > { %1152 = vrot.lane.b32.xlu0 %v8316_v23, %s7523_s16  ;;  %1470 = vrot.lane.b32.xlu1 %v8219_v11, %s7529_s6 }
 0x3a2   : > { %v8362_v35 = vpop.permute.xlu1 %1208 }
 0x3a5   : > { %1156 = vrot.lane.b32.xlu0 %v8318_v26, %s7523_s16  ;;  %1474 = vrot.lane.b32.xlu1 %v8224_v15, %s7529_s6 }
 0x3a6   : > { %v8370_v12 = vpop.permute.xlu1 %1212 }
 0x3a9   : > { %1198 = vrot.lane.b32.xlu0 %v8304_v21, %s7524_s27  ;;  %1478 = vrot.lane.b32.xlu1 %v8229_v16, %s7529_s6 }
 0x3aa   : > { %v8374_v36 = vpop.permute.xlu1 %1254 }
 0x3ad   : > { %1202 = vrot.lane.b32.xlu0 %v8306_v22, %s7524_s27  ;;  %1482 = vrot.lane.b32.xlu1 %v8234_v34, %s7529_s6 }
 0x3ae   : > { %v8380_v37 = vpop.permute.xlu1 %1258 }
 0x3b1   : > { %1206 = vrot.lane.b32.xlu0 %v8316_v23, %s7524_s27 }
 0x3b2   : > { %v8384_v13 = vpop.permute.xlu1 %1262 }
 0x3b5   : > { %1210 = vrot.lane.b32.xlu0 %v8318_v26, %s7524_s27 }
 0x3b6   : > { %v8390_v41 = vpop.permute.xlu1 %1266 }
 0x3b9   : > { %1252 = vrot.lane.b32.xlu0 %v8304_v21, %s7525_s26 }
 0x3ba   : > { %v8394_v42 = vpop.permute.xlu1 %1308 }
 0x3bd   : > { %1256 = vrot.lane.b32.xlu0 %v8306_v22, %s7525_s26 }
 0x3be   : > { %v8400_v43 = vpop.permute.xlu1 %1312 }
 0x3c1   : > { %1260 = vrot.lane.b32.xlu0 %v8316_v23, %s7525_s26 }
 0x3c2   : > { %v8404_v44 = vpop.permute.xlu1 %1316 }
 0x3c5   : > { %1264 = vrot.lane.b32.xlu0 %v8318_v26, %s7525_s26 }
 0x3c6   : > { %v8410_v45 = vpop.permute.xlu1 %1320 }
 0x3c9   : > { %1306 = vrot.lane.b32.xlu0 %v8304_v21, %s7526_s29 }
 0x3ca   : > { %v8414_v46 = vpop.permute.xlu1 %1362 }
 0x3cd   : > { %1310 = vrot.lane.b32.xlu0 %v8306_v22, %s7526_s29 }
 0x3ce   : > { %v8420_v47 = vpop.permute.xlu1 %1366 }
 0x3d1   : > { %1314 = vrot.lane.b32.xlu0 %v8316_v23, %s7526_s29 }
 0x3d2   : > { %v8424_v48 = vpop.permute.xlu1 %1370 }
 0x3d5   : > { %1318 = vrot.lane.b32.xlu0 %v8318_v26, %s7526_s29 }
 0x3d6   : > { %v8430_v49 = vpop.permute.xlu1 %1374 }
 0x3d9   : > { %1360 = vrot.lane.b32.xlu0 %v8304_v21, %s7527_s14 }
 0x3dd   : > { %1364 = vrot.lane.b32.xlu0 %v8306_v22, %s7527_s14 }
 0x3e1   : > { %1368 = vrot.lane.b32.xlu0 %v8316_v23, %s7527_s14 }
 0x3e5   : > { %1372 = vrot.lane.b32.xlu0 %v8318_v26, %s7527_s14 }
 0x3e9   : > { %1414 = vrot.lane.b32.xlu0 %v8304_v21, %s7528_s10 }
 0x3ed   : > { %1418 = vrot.lane.b32.xlu0 %v8306_v22, %s7528_s10 }
 0x3f1   : > { %1422 = vrot.lane.b32.xlu0 %v8316_v23, %s7528_s10 }
 0x3f5   : > { %1426 = vrot.lane.b32.xlu0 %v8318_v26, %s7528_s10 }
 0x3f9   : > { %1468 = vrot.lane.b32.xlu0 %v8304_v21, %s7529_s6 }
 0x3fd   : > { %1472 = vrot.lane.b32.xlu0 %v8306_v22, %s7529_s6 }
 0x3ff   : > { %v1095_v55 = vpop.permute.xlu0 %1094  ;;  %v1091_v56 = vpop.permute.xlu1 %1090 }
 0x400   : > { %v1110_v57 = vsel %vm349_vm1, %v1091_v56, %v1095_v55 }
 0x401   : > { %v1137_v63 = vmul.f32 %v1123_v51, %v1110_v57  ;;  %1476 = vrot.lane.b32.xlu0 %v8316_v23, %s7529_s6 }
 0x403   : > { %v1099_v0 = vpop.permute.xlu0 %1098  ;;  %v6619_v53 = vpack.c.bf16 %v1141_v59, %v1137_v63  ;;  %v1142_v63 = vmul.f32 %v1127_v62, %v1109_v25  ;;  %v1173_v25 = vrot.slane %v6414_v10, %v7967_v30 }
 0x404   : > { %v1108_v60 = vsel %vm349_vm1, %v1095_v55, %v1099_v0  ;;  %v1143_v55 = vmul.f32 %v1131_v17, %v1107_v18 }
 0x405   : > { %1480 = vrot.lane.b32.xlu0 %v8318_v26, %s7529_s6  ;;  %6620 = vmatprep.subr.bf16.mxu0 %v6619_v53  ;;  %v1138_v61 = vmul.f32 %v1127_v62, %v1108_v60  ;;  %v1177_v60 = vrot.slane %v6414_v10, %v7942_v20 }
 0x407   : > { %v1103_v58 = vpop.permute.xlu0 %1102  ;;  %v6657_v38 = vpack.c.bf16 %v1142_v63, %v1138_v61 }
 0x408   : > { %v1106_v50 = vsel %vm349_vm1, %v1099_v0, %v1103_v58  ;;  %v1112_v51 = vsel %vm349_vm1, %v1103_v58, %v1091_v56  ;;  %v1165_v56 = vsel %vm404_vm2, %v8294_v40, %v8320_v27  ;;  %v1185_v58 = vrot.slane %v6414_v10, %v7969_v31 }
 0x409   : > { %v1136_v57 = vmul.f32 %v1119_v54, %v1112_v51  ;;  %v1139_v59 = vmul.f32 %v1131_v17, %v1106_v50  ;;  %v1195_v17 = vmul.f32 %v1177_v60, %v1165_v56  ;;  %v1181_v50 = vrot.slane %v6414_v10, %v7959_v28 }
 0x40a   : > { %v1161_v51 = vsel %vm404_vm2, %v8330_v29, %v8340_v32 }
 0x40b   : > { %v6621_v39 = vpack.c.bf16 %v1140_v52, %v1136_v57  ;;  %v1145_v53 = vpop.permute.xlu0 %1144  ;;  %v6655_v14 = vpack.c.bf16 %v1143_v55, %v1139_v59  ;;  %v1167_v52 = vsel %vm404_vm2, %v8340_v32, %v8294_v40  ;;  %v1163_v55 = vsel %vm404_vm2, %v8320_v27, %v8330_v29  ;;  %v6415_v40 = vld [vmem:[%s11826_s9 + $0x8] sm:$0xf] }
 0x40c   : > { %v1196_v56 = vmul.f32 %v1181_v50, %v1163_v55  ;;  %v1215_v55 = vsel %vm460_vm3, %v8362_v35, %v8370_v12 }
 0x40d   : > { %6622 = vmatpush1.bf16.msra.mxu0 %v6621_v39  ;;  %6656 = vmatprep.subr.bf16.mxu1 %v6655_v14  ;;  %v1194_v39 = vmul.f32 %v1173_v25, %v1167_v52  ;;  %v1197_v14 = vmul.f32 %v1185_v58, %v1161_v51  ;;  %v1235_v52 = vrot.slane %v6415_v40, %v7959_v28 }
 0x40e   : > { %6658 = vmatpush1.bf16.msra.mxu1 %v6657_v38 }
 0x40f   : > { %v1149_v0 = vpop.permute.xlu0 %1148 }
 0x410   : > { %v1164_v54 = vsel %vm404_vm2, %v1145_v53, %v1149_v0 }
 0x411   : > { %v1191_v62 = vmul.f32 %v1177_v60, %v1164_v54  ;;  %v1231_v54 = vrot.slane %v6415_v40, %v7942_v20 }
 0x413   : > { %v1153_v18 = vpop.permute.xlu0 %1152  ;;  %v6623_v24 = vpack.c.bf16 %v1195_v17, %v1191_v62 }
 0x414   : > { %v1162_v61 = vsel %vm404_vm2, %v1149_v0, %v1153_v18 }
 0x415   : > { %6624 = vmatprep.subr.bf16.mxu0 %v6623_v24  ;;  %v1192_v59 = vmul.f32 %v1181_v50, %v1162_v61  ;;  %v1227_v61 = vrot.slane %v6415_v40, %v7967_v30  ;;  %v1239_v50 = vrot.slane %v6415_v40, %v7969_v31 }
 0x417   : > { %v1157_v57 = vpop.permute.xlu0 %1156  ;;  %v6661_v29 = vpack.c.bf16 %v1196_v56, %v1192_v59  ;;  %v1217_v59 = vsel %vm460_vm3, %v8354_v33, %v8362_v35 }
 0x418   : > { %v1160_v63 = vsel %vm404_vm2, %v1153_v18, %v1157_v57  ;;  %v1166_v10 = vsel %vm404_vm2, %v1157_v57, %v1145_v53  ;;  %v1219_v53 = vsel %vm460_vm3, %v8346_v9, %v8354_v33  ;;  %v1221_v57 = vsel %vm460_vm3, %v8370_v12, %v8346_v9  ;;  %v6416_v9 = vld [vmem:[%s11826_s9 + $0xc] sm:$0xf] }
 0x419   : > { %v1190_v38 = vmul.f32 %v1173_v25, %v1166_v10  ;;  %v1193_v60 = vmul.f32 %v1185_v58, %v1160_v63  ;;  %v1249_v18 = vmul.f32 %v1231_v54, %v1219_v53 }
 0x41b   : > { %v6625_v32 = vpack.c.bf16 %v1194_v39, %v1190_v38  ;;  %v1199_v0 = vpop.permute.xlu0 %1198  ;;  %v6659_v27 = vpack.c.bf16 %v1197_v14, %v1193_v60  ;;  %v1248_v38 = vmul.f32 %v1227_v61, %v1221_v57  ;;  %v1251_v60 = vmul.f32 %v1239_v50, %v1215_v55 }
 0x41c   : > { %v1271_v55 = vsel %vm516_vm4, %v8380_v37, %v8384_v13 }
 0x41d   : > { %6626 = vmatpush1.bf16.msra.mxu0 %v6625_v32  ;;  %6660 = vmatprep.subr.bf16.mxu1 %v6659_v27  ;;  %v1250_v32 = vmul.f32 %v1235_v52, %v1217_v59 }
 0x41e   : > { %6662 = vmatpush1.bf16.msra.mxu1 %v6661_v29  ;;  %v1285_v29 = vrot.slane %v6416_v9, %v7942_v20 }
 0x41f   : > { %v1203_v17 = vpop.permute.xlu0 %1202 }
 0x420   : > { %v1218_v62 = vsel %vm460_vm3, %v1199_v0, %v1203_v17 }
 0x421   : > { %v1245_v24 = vmul.f32 %v1231_v54, %v1218_v62 }
 0x423   : > { %v1207_v25 = vpop.permute.xlu0 %1206  ;;  %v6627_v58 = vpack.c.bf16 %v1249_v18, %v1245_v24 }
 0x424   : > { %v1216_v51 = vsel %vm460_vm3, %v1203_v17, %v1207_v25 }
 0x425   : > { %6628 = vmatprep.subr.bf16.mxu0 %v6627_v58  ;;  %v1246_v10 = vmul.f32 %v1235_v52, %v1216_v51  ;;  %v1293_v58 = vrot.slane %v6416_v9, %v7969_v31  ;;  %v1269_v51 = vsel %vm516_vm4, %v8384_v13, %v8390_v41  ;;  %v1275_v52 = vsel %vm516_vm4, %v8390_v41, %v8374_v36 }
 0x426   : > { %v6671_v13 = vpack.c.bf16 %v8234_v34, %v8318_v26  ;;  %v1325_v26 = vsel %vm572_vm5, %v8400_v43, %v8404_v44 }
 0x427   : > { %v1211_v63 = vpop.permute.xlu0 %1210  ;;  %v6665_v35 = vpack.c.bf16 %v1250_v32, %v1246_v10 }
 0x428   : > { %v1214_v39 = vsel %vm460_vm3, %v1207_v25, %v1211_v63  ;;  %v1220_v14 = vsel %vm460_vm3, %v1211_v63, %v1199_v0  ;;  %v1273_v0 = vsel %vm516_vm4, %v8374_v36, %v8380_v37  ;;  %v1281_v25 = vrot.slane %v6416_v9, %v7967_v30 }
 0x429   : > { %v1244_v56 = vmul.f32 %v1227_v61, %v1220_v14  ;;  %v1247_v40 = vmul.f32 %v1239_v50, %v1214_v39  ;;  %v1303_v17 = vmul.f32 %v1285_v29, %v1273_v0  ;;  %v1289_v50 = vrot.slane %v6416_v9, %v7959_v28  ;;  %v6417_v9 = vld [vmem:[%s11826_s9 + $0x14] sm:$0xf] }
 0x42a   : > { %v1302_v39 = vmul.f32 %v1281_v25, %v1275_v52  ;;  %v1305_v14 = vmul.f32 %v1293_v58, %v1269_v51  ;;  %v6635_v37 = vpack.c.bf16 %v8224_v15, %v8306_v22  ;;  %v1339_v15 = vrot.slane %v6417_v9, %v7942_v20 }
 0x42b   : > { %v6629_v12 = vpack.c.bf16 %v1248_v38, %v1244_v56  ;;  %v1253_v27 = vpop.permute.xlu0 %1252  ;;  %v6663_v33 = vpack.c.bf16 %v1251_v60, %v1247_v40  ;;  %v1304_v56 = vmul.f32 %v1289_v50, %v1271_v55  ;;  %v1335_v34 = vrot.slane %v6417_v9, %v7967_v30 }
 0x42c   : > { %v1347_v0 = vrot.slane %v6417_v9, %v7969_v31 }
 0x42d   : > { %6630 = vmatpush1.bf16.msra.mxu0 %v6629_v12  ;;  %6664 = vmatprep.subr.bf16.mxu1 %v6663_v33  ;;  %v6673_v33 = vpack.c.bf16 %v8229_v16, %v8316_v23 }
 0x42e   : > { %6666 = vmatpush1.bf16.msra.mxu1 %v6665_v35  ;;  %v1357_v35 = vmul.f32 %v1339_v15, %v1325_v26 }
 0x42f   : > { %v1257_v54 = vpop.permute.xlu0 %1256 }
 0x430   : > { %v1272_v53 = vsel %vm516_vm4, %v1253_v27, %v1257_v54 }
 0x431   : > { %v1299_v62 = vmul.f32 %v1285_v29, %v1272_v53  ;;  %v1343_v29 = vrot.slane %v6417_v9, %v7959_v28 }
 0x433   : > { %v1261_v18 = vpop.permute.xlu0 %1260  ;;  %v6631_v24 = vpack.c.bf16 %v1303_v17, %v1299_v62  ;;  %v1323_v17 = vsel %vm572_vm5, %v8404_v44, %v8410_v45  ;;  %v1417_v44 = vpop.permute.xlu1 %1416 }
 0x434   : > { %v1270_v61 = vsel %vm516_vm4, %v1257_v54, %v1261_v18 }
 0x435   : > { %6632 = vmatprep.subr.bf16.mxu0 %v6631_v24  ;;  %v1300_v59 = vmul.f32 %v1289_v50, %v1270_v61  ;;  %v1358_v61 = vmul.f32 %v1343_v29, %v1323_v17 }
 0x437   : > { %v1265_v57 = vpop.permute.xlu0 %1264  ;;  %v6669_v32 = vpack.c.bf16 %v1304_v56, %v1300_v59 }
 0x438   : > { %v1268_v63 = vsel %vm516_vm4, %v1261_v18, %v1265_v57  ;;  %v1274_v10 = vsel %vm516_vm4, %v1265_v57, %v1253_v27  ;;  %v6637_v27 = vpack.c.bf16 %v8219_v11, %v8304_v21  ;;  %v1327_v11 = vsel %vm572_vm5, %v8394_v42, %v8400_v43 }
 0x439   : > { %v1298_v38 = vmul.f32 %v1281_v25, %v1274_v10  ;;  %v1301_v60 = vmul.f32 %v1293_v58, %v1268_v63  ;;  %v1356_v53 = vmul.f32 %v1335_v34, %v1327_v11  ;;  %v1329_v43 = vsel %vm572_vm5, %v8410_v45, %v8394_v42  ;;  %v6418_v42 = vld [vmem:[%s11826_s9 + $0x18] sm:$0xf]  ;;  %v1421_v63 = vpop.permute.xlu1 %1420 }
 0x43a   : > { %v1359_v50 = vmul.f32 %v1347_v0, %v1329_v43  ;;  %v1393_v10 = vrot.slane %v6418_v42, %v7942_v20 }
 0x43b   : > { %v6633_v40 = vpack.c.bf16 %v1302_v39, %v1298_v38  ;;  %v1307_v36 = vpop.permute.xlu0 %1306  ;;  %v6667_v41 = vpack.c.bf16 %v1305_v14, %v1301_v60  ;;  %v1389_v14 = vrot.slane %v6418_v42, %v7967_v30  ;;  %v1379_v38 = vsel %vm628_vm6, %v8420_v47, %v8424_v48 }
 0x43c   : > { %v1381_v60 = vsel %vm628_vm6, %v8414_v46, %v8420_v47  ;;  %v1383_v47 = vsel %vm628_vm6, %v8430_v49, %v8414_v46  ;;  %v6419_v46 = vld [vmem:[%s11826_s9 + $0x1c] sm:$0xf] }
 0x43d   : > { %6634 = vmatpush1.bf16.msra.mxu0 %v6633_v40  ;;  %6668 = vmatprep.subr.bf16.mxu1 %v6667_v41  ;;  %v1411_v41 = vmul.f32 %v1393_v10, %v1379_v38  ;;  %v1425_v9 = vpop.permute.xlu1 %1424  ;;  %v1443_v43 = vrot.slane %v6419_v46, %v7967_v30 }
 0x43e   : > { %6636 = vmatprep.subr.bf16.mxu0 %v6635_v37  ;;  %6670 = vmatpush1.bf16.msra.mxu1 %v6669_v32  ;;  %v1397_v32 = vrot.slane %v6418_v42, %v7959_v28  ;;  %v1401_v37 = vrot.slane %v6418_v42, %v7969_v31 }
 0x43f   : > { %v1311_v12 = vpop.permute.xlu0 %1310  ;;  %6672 = vmatprep.subr.bf16.mxu1 %v6671_v13 }
 0x440   : > { %v1326_v22 = vsel %vm572_vm5, %v1307_v36, %v1311_v12 }
 0x441   : > { %6638 = vmatpush1.bf16.msra.mxu0 %v6637_v27  ;;  %v1352_v21 = vmul.f32 %v1335_v34, %v1326_v22  ;;  %v1377_v27 = vsel %vm628_vm6, %v8424_v48, %v8430_v49 }
 0x442   : > { %6674 = vmatpush1.bf16.msra.mxu1 %v6673_v33  ;;  %v1412_v11 = vmul.f32 %v1397_v32, %v1377_v27 }
 0x443   : > { %v1315_v16 = vpop.permute.xlu0 %1314  ;;  %v6641_v24 = vpack.c.bf16 %v1356_v53, %v1352_v21 }
 0x444   : > { %v1324_v23 = vsel %vm572_vm5, %v1311_v12, %v1315_v16  ;;  %v1410_v12 = vmul.f32 %v1389_v14, %v1381_v60 }
 0x445   : > { %v1353_v54 = vmul.f32 %v1339_v15, %v1324_v23 }
 0x447   : > { %v1319_v62 = vpop.permute.xlu0 %1318  ;;  %v6639_v18 = vpack.c.bf16 %v1357_v35, %v1353_v54  ;;  %v1447_v54 = vrot.slane %v6419_v46, %v7942_v20 }
 0x448   : > { %v1322_v25 = vsel %vm572_vm5, %v1315_v16, %v1319_v62  ;;  %v1328_v58 = vsel %vm572_vm5, %v1319_v62, %v1307_v36  ;;  %v1413_v16 = vmul.f32 %v1401_v37, %v1383_v47  ;;  %v1433_v62 = vsel %vm684_vm7, %v1421_v63, %v1425_v9 }
 0x449   : > { %v1354_v51 = vmul.f32 %v1343_v29, %v1322_v25  ;;  %v1355_v52 = vmul.f32 %v1347_v0, %v1328_v58  ;;  %6640 = vmatprep.subr.bf16.mxu0 %v6639_v18  ;;  %v1429_v29 = vpop.permute.xlu1 %1428  ;;  %v1435_v18 = vsel %vm684_vm7, %v1417_v44, %v1421_v63 }
 0x44a   : > { %6642 = vmatpush1.bf16.msra.mxu0 %v6641_v24 }
 0x44b   : > { %v6677_v55 = vpack.c.bf16 %v1358_v61, %v1354_v51  ;;  %v1361_v57 = vpop.permute.xlu0 %1360  ;;  %v6675_v59 = vpack.c.bf16 %v1359_v50, %v1355_v52  ;;  %v1465_v61 = vmul.f32 %v1447_v54, %v1433_v62  ;;  %v1451_v50 = vrot.slane %v6419_v46, %v7959_v28 }
 0x44c   : > { %v1455_v51 = vrot.slane %v6419_v46, %v7969_v31 }
 0x44d   : > { %6676 = vmatprep.subr.bf16.mxu1 %v6675_v59  ;;  %v1471_v17 = vpop.permute.xlu1 %1470  ;;  %v1437_v59 = vsel %vm684_vm7, %v1429_v29, %v1417_v44 }
 0x44e   : > { %6678 = vmatpush1.bf16.msra.mxu1 %v6677_v55  ;;  %v1464_v55 = vmul.f32 %v1443_v43, %v1435_v18  ;;  %v1467_v60 = vmul.f32 %v1455_v51, %v1437_v59 }
 0x44f   : > { %v1365_v45 = vpop.permute.xlu0 %1364 }
 0x450   : > { %v1380_v39 = vsel %vm628_vm6, %v1361_v57, %v1365_v45 }
 0x451   : > { %v1406_v40 = vmul.f32 %v1389_v14, %v1380_v39  ;;  %v1475_v42 = vpop.permute.xlu1 %1474 }
 0x453   : > { %v1369_v56 = vpop.permute.xlu0 %1368  ;;  %v6645_v22 = vpack.c.bf16 %v1410_v12, %v1406_v40 }
 0x454   : > { %v1378_v36 = vsel %vm628_vm6, %v1365_v45, %v1369_v56 }
 0x455   : > { %v1407_v13 = vmul.f32 %v1393_v10, %v1378_v36  ;;  %v1479_v44 = vpop.permute.xlu1 %1478 }
 0x456   : > { %v1487_v47 = vsel %vm740_vm8, %v1475_v42, %v1479_v44 }
 0x457   : > { %v1373_v33 = vpop.permute.xlu0 %1372  ;;  %v6643_v15 = vpack.c.bf16 %v1411_v41, %v1407_v13 }
 0x458   : > { %v1376_v34 = vsel %vm628_vm6, %v1369_v56, %v1373_v33  ;;  %v1382_v26 = vsel %vm628_vm6, %v1373_v33, %v1361_v57  ;;  %v1431_v57 = vsel %vm684_vm7, %v1425_v9, %v1429_v29  ;;  %v1489_v33 = vsel %vm740_vm8, %v1471_v17, %v1475_v42 }
 0x459   : > { %v1408_v21 = vmul.f32 %v1397_v32, %v1376_v34  ;;  %v1409_v23 = vmul.f32 %v1401_v37, %v1382_v26  ;;  %6644 = vmatprep.subr.bf16.mxu0 %v6643_v15  ;;  %v1466_v38 = vmul.f32 %v1451_v50, %v1431_v57  ;;  %v6420_v37 = vld [vmem:[%s11826_s9 + $0x20] sm:$0xf]  ;;  %v1483_v15 = vpop.permute.xlu1 %1482 }
 0x45a   : > { %6646 = vmatpush1.bf16.msra.mxu0 %v6645_v22  ;;  %v1501_v9 = vrot.slane %v6420_v37, %v7942_v20  ;;  %v1497_v27 = vrot.slane %v6420_v37, %v7967_v30  ;;  %v1491_v29 = vsel %vm740_vm8, %v1483_v15, %v1471_v17 }
 0x45b   : > { %v6681_v48 = vpack.c.bf16 %v1412_v11, %v1408_v21  ;;  %v1415_v35 = vpop.permute.xlu0 %1414  ;;  %v6679_v0 = vpack.c.bf16 %v1413_v16, %v1409_v23  ;;  %v1505_v16 = vrot.slane %v6420_v37, %v7959_v28  ;;  %v1509_v21 = vrot.slane %v6420_v37, %v7969_v31 }
 0x45c   : > { %v1519_v11 = vmul.f32 %v1501_v9, %v1487_v47  ;;  %v8746_v47 = vld [vmem:[%s7759_s15 + $0x58] sm:$0xff] }
 0x45d   : > { %6680 = vmatprep.subr.bf16.mxu1 %v6679_v0  ;;  %v1521_v62 = vmul.f32 %v1509_v21, %v1491_v29 }
 0x45e   : > { %6682 = vmatpush1.bf16.msra.mxu1 %v6681_v48  ;;  %v1518_v48 = vmul.f32 %v1497_v27, %v1489_v33 }
 0x45f   : > { %v1419_v49 = vpop.permute.xlu0 %1418 }
 0x460   : > { %v1434_v53 = vsel %vm684_vm7, %v1415_v35, %v1419_v49 }
 0x461   : > { %v1460_v25 = vmul.f32 %v1443_v43, %v1434_v53 }
 0x463   : > { %v1423_v24 = vpop.permute.xlu0 %1422  ;;  %v6649_v10 = vpack.c.bf16 %v1464_v55, %v1460_v25 }
 0x464   : > { %v1432_v58 = vsel %vm684_vm7, %v1419_v49, %v1423_v24 }
 0x465   : > { %v1461_v52 = vmul.f32 %v1447_v54, %v1432_v58 }
 0x467   : > { %v1427_v45 = vpop.permute.xlu0 %1426  ;;  %v6647_v63 = vpack.c.bf16 %v1465_v61, %v1461_v52 }
 0x468   : > { %v1430_v39 = vsel %vm684_vm7, %v1423_v24, %v1427_v45  ;;  %v1436_v14 = vsel %vm684_vm7, %v1427_v45, %v1415_v35  ;;  %v1485_v35 = vsel %vm740_vm8, %v1479_v44, %v1483_v15 }
 0x469   : > { %v1462_v56 = vmul.f32 %v1451_v50, %v1430_v39  ;;  %v1463_v40 = vmul.f32 %v1455_v51, %v1436_v14  ;;  %6648 = vmatprep.subr.bf16.mxu0 %v6647_v63  ;;  %v1520_v43 = vmul.f32 %v1505_v16, %v1485_v35 }
 0x46a   : > { %6650 = vmatpush1.bf16.msra.mxu0 %v6649_v10 }
 0x46b   : > { %v6685_v36 = vpack.c.bf16 %v1466_v38, %v1462_v56  ;;  %v1469_v41 = vpop.permute.xlu0 %1468  ;;  %v6683_v32 = vpack.c.bf16 %v1467_v60, %v1463_v40 }
 0x46d   : > { %6684 = vmatprep.subr.bf16.mxu1 %v6683_v32 }
 0x46e   : > { %6686 = vmatpush1.bf16.msra.mxu1 %v6685_v36 }
 0x46f   : > { %v1473_v13 = vpop.permute.xlu0 %1472 }
 0x470   : > { %v1488_v12 = vsel %vm740_vm8, %v1469_v41, %v1473_v13 }
 0x471   : > { %v1514_v34 = vmul.f32 %v1497_v27, %v1488_v12  ;;  %v8736_v12 = vld [vmem:[%s7759_s15 + $0x48] sm:$0xff]  ;;  %v8741_v27 = vld [vmem:[%s7759_s15 + $0x50] sm:$0xff] }
 0x473   : > { %v1477_v22 = vpop.permute.xlu0 %1476  ;;  %v6653_v49 = vpack.c.bf16 %v1518_v48, %v1514_v34 }
 0x474   : > { %v1486_v26 = vsel %vm740_vm8, %v1473_v13, %v1477_v22 }
 0x475   : > { %v1515_v23 = vmul.f32 %v1501_v9, %v1486_v26  ;;  %v8731_v9 = vld [vmem:[%s7759_s15 + $0x40] sm:$0xff] }
 0x477   : > { %v1481_v0 = vpop.permute.xlu0 %1480  ;;  %v6651_v46 = vpack.c.bf16 %v1519_v11, %v1515_v23 }
 0x478   : > { %v1484_v54 = vsel %vm740_vm8, %v1477_v22, %v1481_v0  ;;  %v1490_v53 = vsel %vm740_vm8, %v1481_v0, %v1469_v41 }
 0x479   : > { %v1516_v18 = vmul.f32 %v1505_v16, %v1484_v54  ;;  %v1517_v24 = vmul.f32 %v1509_v21, %v1490_v53  ;;  %6652 = vmatprep.subr.bf16.mxu0 %v6651_v46 }
 0x47a   : > { %6654 = vmatpush1.bf16.msra.mxu0 %v6653_v49 }
 0x47b   : > { %v6689_v25 = vpack.c.bf16 %v1520_v43, %v1516_v18  ;;  %v6687_v58 = vpack.c.bf16 %v1521_v62, %v1517_v24 }
 0x47d   : > { %1587 = vmatmul.mubr.f32.vlgmr.msra.gmra.mrb[4].mxu0 %v7775_v1  ;;  %6688 = vmatprep.subr.bf16.mxu1 %v6687_v58 }
 0x47e   : > { %6690 = vmatpush1.bf16.msra.mxu1 %v6689_v25  ;;  %6422 = vmatprep.mubr.msk.f32.mxu0 %vm780_vm0, %v7781_v4 }
 0x481   : > { %1664 = vmatmul.mubr.f32.vlgmr.msra.gmra.mrb[4].mxu1 %v7775_v1  ;;  %1593 = vmatmul.mubr.f32.gmra.mrb[6].mxu0 %v7779_v3 }
 0x482   : > { %6424 = vmatprep.mubr.msk.f32.mxu1 %vm780_vm0, %v7781_v4  ;;  %6440 = vmatprep.mubr.msk.f32.mxu0 %vm780_vm0, %v7777_v2 }
 0x485   : > { %1670 = vmatmul.mubr.f32.gmra.mrb[6].mxu1 %v7779_v3 }
 0x486   : > { %6442 = vmatprep.mubr.msk.f32.mxu1 %vm780_vm0, %v7777_v2 }
 0x550   : > { %v8690_v17 = vpop.f32.mrb[4].mxu0 }
 0x551   : > { %v1684_v61 = vmul.f32 %v8690_v17, %v8690_v17  ;;  %v8694_v50 = vpop.f32.mrb[5].mxu0 }
 0x552   : > { %v1676_v51 = vadd.f32 %v8694_v50, %v8690_v17  ;;  %v1685_v52 = vmul.f32 %v8694_v50, %v8694_v50 }
 0x554   : > { %1677 = vadd.xlane.f32.xlu0 %v1676_v51  ;;  %v8700_v55 = vpop.f32.mrb[4].mxu1  ;;  %v1688_v57 = vadd.f32 %v1685_v52, %v1684_v61  ;;  %v8702_v59 = vpop.f32.mrb[6].mxu0 }
 0x555   : > { %v1750_v42 = vmul.f32 %v8700_v55, %v8700_v55  ;;  %v8706_v45 = vpop.f32.mrb[5].mxu1  ;;  %v1686_v63 = vmul.f32 %v8702_v59, %v8702_v59  ;;  %v8710_v10 = vpop.f32.mrb[7].mxu0 }
 0x556   : > { %v1742_v39 = vadd.f32 %v8706_v45, %v8700_v55  ;;  %v1751_v14 = vmul.f32 %v8706_v45, %v8706_v45  ;;  %1689 = vadd.xlane.f32.xlu1 %v1688_v57  ;;  %v1679_v38 = vadd.f32 %v8710_v10, %v8702_v59  ;;  %v1687_v60 = vmul.f32 %v8710_v10, %v8710_v10 }
 0x558   : > { %1743 = vadd.xlane.f32.xlu0 %v1742_v39  ;;  %v8720_v56 = vpop.f32.mrb[6].mxu1  ;;  %v1754_v40 = vadd.f32 %v1751_v14, %v1750_v42  ;;  %v1691_v36 = vadd.f32 %v1687_v60, %v1686_v63 }
 0x559   : > { %v1752_v41 = vmul.f32 %v8720_v56, %v8720_v56  ;;  %v8724_v32 = vpop.f32.mrb[7].mxu1 }
 0x55a   : > { %v1745_v44 = vadd.f32 %v8724_v32, %v8720_v56  ;;  %v1753_v37 = vmul.f32 %v8724_v32, %v8724_v32  ;;  %1680 = vadd.xlane.f32.xlu1 %v1679_v38 }
 0x55c   : > { %1746 = vadd.xlane.f32.xlu0 %v1745_v44  ;;  %v1757_v13 = vadd.f32 %v1753_v37, %v1752_v41 }
 0x55e   : > { %1755 = vadd.xlane.f32.xlu1 %v1754_v40 }
 0x560   : > { %1692 = vadd.xlane.f32.xlu0 %v1691_v36 }
 0x564   : > { %1758 = vadd.xlane.f32.xlu0 %v1757_v13 }
 0x56f   : > { %1828 = vrot.lane.b32.xlu1 %v8731_v9, %s7522_s12 }
 0x573   : > { %1832 = vrot.lane.b32.xlu1 %v8736_v12, %s7522_s12 }
 0x577   : > { %1836 = vrot.lane.b32.xlu1 %v8741_v27, %s7522_s12 }
 0x57b   : > { %1840 = vrot.lane.b32.xlu1 %v8746_v47, %s7522_s12 }
 0x5e1   : > { %v1678_v33 = vpop.xlane.xlu0 %1677 }
 0x5e2   : > { %v1682_v15 = vmul.f32 0.00390625, %v1678_v33 }
 0x5e3   : > { %v1690_v22 = vpop.xlane.xlu1 %1689 }
 0x5e4   : > { %v1696_v34 = vmul.f32 %v1682_v15, %v1682_v15  ;;  %v1694_v26 = vmul.f32 0.00390625, %v1690_v22 }
 0x5e5   : > { %v1744_v11 = vpop.xlane.xlu0 %1743 }
 0x5e6   : > { %v1698_v16 = vsub.f32 %v1694_v26, %v1696_v34  ;;  %v1748_v48 = vmul.f32 0.00390625, %v1744_v11 }
 0x5e7   : > { %v1681_v21 = vpop.xlane.xlu1 %1680 }
 0x5e8   : > { %v1700_v23 = vadd.f32 1e-05, %v1698_v16  ;;  %v1683_v29 = vmul.f32 0.00390625, %v1681_v21  ;;  %v1762_v46 = vmul.f32 %v1748_v48, %v1748_v48 }
 0x5e9   : > { %v1747_v35 = vpop.xlane.xlu0 %1746 }
 0x5ea   : > { %7271 = vrsqrt.f32 %v1700_v23  ;;  %v1697_v53 = vmul.f32 %v1683_v29, %v1683_v29  ;;  %v1749_v43 = vmul.f32 0.00390625, %v1747_v35 }
 0x5eb   : > { %v1756_v0 = vpop.xlane.xlu1 %1755 }
 0x5ec   : > { %v1760_v49 = vmul.f32 0.00390625, %v1756_v0  ;;  %v1763_v61 = vmul.f32 %v1749_v43, %v1749_v43 }
 0x5ed   : > { %v1693_v54 = vpop.xlane.xlu0 %1692 }
 0x5ee   : > { %v1764_v62 = vsub.f32 %v1760_v49, %v1762_v46  ;;  %v1695_v18 = vmul.f32 0.00390625, %v1693_v54 }
 0x5f0   : > { %v1766_v24 = vadd.f32 1e-05, %v1764_v62  ;;  %v1699_v25 = vsub.f32 %v1695_v18, %v1697_v53 }
 0x5f1   : > { %v1759_v58 = vpop.xlane.xlu0 %1758 }
 0x5f2   : > { %7273 = vrsqrt.f32 %v1766_v24  ;;  %v1701_v51 = vadd.f32 1e-05, %v1699_v25  ;;  %v1761_v52 = vmul.f32 0.00390625, %v1759_v58 }
 0x5f4   : > { %v7272_v57 = vpop.eup %7271  ;;  %7275 = vrsqrt.f32 %v1701_v51  ;;  %v1765_v42 = vsub.f32 %v1761_v52, %v1763_v61 }
 0x5f5   : > { %v1704_v63 = vmul.f32 %v7272_v57, %v7786_v5 }
 0x5f6   : > { %v1767_v39 = vadd.f32 1e-05, %v1765_v42 }
 0x5f7   : > { %1708 = vperm.xlu1 %7261, %v1704_v63   ;;  %v1720_v36 = vmul.f32 %v1704_v63, %v1682_v15  ;;  %v8802_v15 = vpop.permute.xlu1 %1828 }
 0x5f8   : > { %7277 = vrsqrt.f32 %v1767_v39 }
 0x5f9   : > { %v1722_v44 = vsub.f32 %v7796_v7, %v1720_v36 }
 0x5fb   : > { %v8806_v16 = vpop.permute.xlu1 %1832 }
 0x5fc   : > { %v7274_v14 = vpop.eup %7273 }
 0x5fd   : > { %v1770_v38 = vmul.f32 %v7274_v14, %v7786_v5 }
 0x5fe   : > { %v7276_v60 = vpop.eup %7275 }
 0x5ff   : > { %1774 = vperm.xlu1 %7261, %v1770_v38   ;;  %v1705_v40 = vmul.f32 %v7276_v60, %v7791_v6  ;;  %v1786_v33 = vmul.f32 %v1770_v38, %v1748_v48  ;;  %v8812_v21 = vpop.permute.xlu1 %1836 }
 0x601   : > { %1713 = vperm.xlu0 %7262, %v1705_v40   ;;  %v1721_v13 = vmul.f32 %v1705_v40, %v1683_v29  ;;  %v1788_v34 = vsub.f32 %v7796_v7, %v1786_v33 }
 0x602   : > { %v7278_v41 = vpop.eup %7277 }
 0x603   : > { %v1771_v37 = vmul.f32 %v7278_v41, %v7791_v6  ;;  %v1723_v22 = vsub.f32 %v7801_v8, %v1721_v13  ;;  %v8816_v23 = vpop.permute.xlu1 %1840 }
 0x605   : > { %1726 = vperm.xlu0 %7262, %v1722_v44   ;;  %1779 = vperm.xlu1 %7261, %v1771_v37   ;;  %v1787_v26 = vmul.f32 %v1771_v37, %v1749_v43 }
 0x607   : > { %v1789_v11 = vsub.f32 %v7801_v8, %v1787_v26 }
 0x609   : > { %1731 = vperm.xlu1 %7261, %v1723_v22   ;;  %1792 = vperm.xlu0 %7262, %v1788_v34   ;;  %v1850_v22 = vld [vmem:[%s11826_s9] sm:$0xf] }
 0x60d   : > { %1797 = vperm.xlu1 %7261, %v1789_v11   ;;  %v1859_v11 = vrot.slane %v1850_v22, %v7942_v20 }
 0x611   : > { %1882 = vrot.lane.b32.xlu1 %v8731_v9, %s7523_s16 }
 0x615   : > { %1886 = vrot.lane.b32.xlu1 %v8736_v12, %s7523_s16 }
 0x619   : > { %1890 = vrot.lane.b32.xlu1 %v8741_v27, %s7523_s16 }
 0x61d   : > { %1894 = vrot.lane.b32.xlu1 %v8746_v47, %s7523_s16 }
 0x621   : > { %1936 = vrot.lane.b32.xlu1 %v8731_v9, %s7524_s27 }
 0x625   : > { %1940 = vrot.lane.b32.xlu1 %v8736_v12, %s7524_s27 }
 0x629   : > { %1944 = vrot.lane.b32.xlu1 %v8741_v27, %s7524_s27 }
 0x62d   : > { %1948 = vrot.lane.b32.xlu1 %v8746_v47, %s7524_s27 }
 0x631   : > { %1990 = vrot.lane.b32.xlu1 %v8731_v9, %s7525_s26 }
 0x635   : > { %1994 = vrot.lane.b32.xlu1 %v8736_v12, %s7525_s26 }
 0x639   : > { %1998 = vrot.lane.b32.xlu1 %v8741_v27, %s7525_s26 }
 0x63d   : > { %2002 = vrot.lane.b32.xlu1 %v8746_v47, %s7525_s26 }
 0x641   : > { %2044 = vrot.lane.b32.xlu1 %v8731_v9, %s7526_s29 }
 0x645   : > { %2048 = vrot.lane.b32.xlu1 %v8736_v12, %s7526_s29 }
 0x649   : > { %2052 = vrot.lane.b32.xlu1 %v8741_v27, %s7526_s29 }
 0x64d   : > { %2056 = vrot.lane.b32.xlu1 %v8746_v47, %s7526_s29 }
 0x651   : > { %2098 = vrot.lane.b32.xlu1 %v8731_v9, %s7527_s14 }
 0x655   : > { %2102 = vrot.lane.b32.xlu1 %v8736_v12, %s7527_s14 }
 0x659   : > { %2106 = vrot.lane.b32.xlu1 %v8741_v27, %s7527_s14 }
 0x65d   : > { %2110 = vrot.lane.b32.xlu1 %v8746_v47, %s7527_s14 }
 0x661   : > { %2152 = vrot.lane.b32.xlu1 %v8731_v9, %s7528_s10 }
 0x665   : > { %2156 = vrot.lane.b32.xlu1 %v8736_v12, %s7528_s10 }
 0x669   : > { %2160 = vrot.lane.b32.xlu1 %v8741_v27, %s7528_s10 }
 0x66d   : > { %2164 = vrot.lane.b32.xlu1 %v8746_v47, %s7528_s10 }
 0x671   : > { %2206 = vrot.lane.b32.xlu1 %v8731_v9, %s7529_s6 }
 0x675   : > { %2210 = vrot.lane.b32.xlu1 %v8736_v12, %s7529_s6 }
 0x676   : > { %v1709_v48 = vpop.permute.xlu1 %1708 }
 0x677   : > { %v1716_v49 = vmul.f32 %v1709_v48, %v8690_v17  ;;  %v1717_v54 = vmul.f32 %v1709_v48, %v8694_v50  ;;  %v1847_v48 = vsel %vm349_vm1, %v8802_v15, %v8806_v16 }
 0x679   : > { %2214 = vrot.lane.b32.xlu1 %v8741_v27, %s7529_s6 }
 0x67d   : > { %2218 = vrot.lane.b32.xlu1 %v8746_v47, %s7529_s6 }
 0x67e   : > { %v1775_v35 = vpop.permute.xlu1 %1774 }
 0x67f   : > { %v1782_v51 = vmul.f32 %v1775_v35, %v8700_v55  ;;  %v1783_v52 = vmul.f32 %v1775_v35, %v8706_v45 }
 0x680   : > { %v1714_v29 = vpop.permute.xlu0 %1713 }
 0x681   : > { %v1718_v53 = vmul.f32 %v1714_v29, %v8702_v59  ;;  %v1719_v43 = vmul.f32 %v1714_v29, %v8710_v10 }
 0x684   : > { %v1727_v0 = vpop.permute.xlu0 %1726  ;;  %v1780_v46 = vpop.permute.xlu1 %1779 }
 0x685   : > { %v1734_v18 = vadd.f32 %v1727_v0, %v1716_v49  ;;  %v1735_v24 = vadd.f32 %v1727_v0, %v1717_v54  ;;  %v1784_v17 = vmul.f32 %v1780_v46, %v8720_v56  ;;  %v1785_v50 = vmul.f32 %v1780_v46, %v8724_v32 }
 0x686   : > { %v1877_v0 = vmul.f32 %v1859_v11, %v1847_v48 }
 0x688   : > { %v1732_v62 = vpop.permute.xlu1 %1731  ;;  %v1793_v25 = vpop.permute.xlu0 %1792 }
 0x689   : > { %v1736_v58 = vadd.f32 %v1732_v62, %v1718_v53  ;;  %v1737_v61 = vadd.f32 %v1732_v62, %v1719_v43  ;;  %v1800_v10 = vadd.f32 %v1793_v25, %v1782_v51  ;;  %v1801_v42 = vadd.f32 %v1793_v25, %v1783_v52 }
 0x68a   : > { %v1855_v43 = vrot.slane %v1850_v22, %v7967_v30  ;;  %v1867_v62 = vrot.slane %v1850_v22, %v7969_v31  ;;  %v1843_v25 = vsel %vm349_vm1, %v8812_v21, %v8816_v23 }
 0x68b   : > { %v1738_v57 = vadd.f32 %v1736_v58, %v1734_v18  ;;  %v1739_v59 = vadd.f32 %v1737_v61, %v1735_v24  ;;  %v1863_v24 = vrot.slane %v1850_v22, %v7959_v28  ;;  %v1849_v58 = vsel %vm349_vm1, %v8816_v23, %v8802_v15  ;;  %v6433_v23 = vld [vmem:[%s11826_s9 + $0x4] sm:$0xf] }
 0x68c   : > { %v1798_v63 = vpop.permute.xlu1 %1797  ;;  %v1845_v61 = vsel %vm349_vm1, %v8806_v16, %v8812_v21 }
 0x68d   : > { %v8830_v39 = vmax.f32 %v1738_v57, 0.0  ;;  %v8832_v14 = vmax.f32 %v1739_v59, 0.0  ;;  %v1802_v38 = vadd.f32 %v1798_v63, %v1784_v17  ;;  %v1803_v60 = vadd.f32 %v1798_v63, %v1785_v50 }
 0x68e   : > { %v1876_v59 = vmul.f32 %v1855_v43, %v1849_v58  ;;  %v1878_v15 = vmul.f32 %v1863_v24, %v1845_v61 }
 0x68f   : > { %6425 = vst [vmem:[%s7772_s18 + $0x20] sm:$0xff] %v8830_v39  ;;  %6426 = vst [vmem:[%s7772_s18 + $0x28] sm:$0xff] %v8832_v14  ;;  %v1804_v55 = vadd.f32 %v1802_v38, %v1800_v10  ;;  %v1805_v45 = vadd.f32 %v1803_v60, %v1801_v42  ;;  %1826 = vrot.lane.b32.xlu0 %v8830_v39, %s7522_s12  ;;  %v1879_v10 = vmul.f32 %v1867_v62, %v1843_v25 }
 0x690   : > { %v8884_v40 = vpop.permute.xlu1 %1882 }
 0x691   : > { %v8840_v56 = vmax.f32 %v1804_v55, 0.0  ;;  %v8842_v32 = vmax.f32 %v1805_v45, 0.0  ;;  %v1913_v55 = vrot.slane %v6433_v23, %v7942_v20 }
 0x693   : > { %6427 = vst [vmem:[%s7772_s18 + $0x30] sm:$0xff] %v8840_v56  ;;  %6428 = vst [vmem:[%s7772_s18 + $0x38] sm:$0xff] %v8842_v32  ;;  %1830 = vrot.lane.b32.xlu0 %v8832_v14, %s7522_s12 }
 0x694   : > { %v8888_v36 = vpop.permute.xlu1 %1886 }
 0x695   : > { %v1901_v22 = vsel %vm404_vm2, %v8884_v40, %v8888_v36 }
 0x696   : > { %v1931_v48 = vmul.f32 %v1913_v55, %v1901_v22 }
 0x697   : > { %1834 = vrot.lane.b32.xlu0 %v8840_v56, %s7522_s12 }
 0x698   : > { %v8894_v41 = vpop.permute.xlu1 %1890 }
 0x699   : > { %v1899_v25 = vsel %vm404_vm2, %v8888_v36, %v8894_v41 }
 0x69b   : > { %1838 = vrot.lane.b32.xlu0 %v8842_v32, %s7522_s12 }
 0x69c   : > { %v8898_v44 = vpop.permute.xlu1 %1894 }
 0x69f   : > { %1880 = vrot.lane.b32.xlu0 %v8830_v39, %s7523_s16 }
 0x6a0   : > { %v8904_v37 = vpop.permute.xlu1 %1936 }
 0x6a3   : > { %1884 = vrot.lane.b32.xlu0 %v8832_v14, %s7523_s16 }
 0x6a4   : > { %v8908_v13 = vpop.permute.xlu1 %1940 }
 0x6a7   : > { %1888 = vrot.lane.b32.xlu0 %v8840_v56, %s7523_s16 }
 0x6a8   : > { %v8914_v33 = vpop.permute.xlu1 %1944 }
 0x6ab   : > { %1892 = vrot.lane.b32.xlu0 %v8842_v32, %s7523_s16 }
 0x6ac   : > { %v8921_v26 = vpop.permute.xlu1 %1948 }
 0x6af   : > { %1934 = vrot.lane.b32.xlu0 %v8830_v39, %s7524_s27 }
 0x6b0   : > { %v8934_v49 = vpop.permute.xlu1 %1990 }
 0x6b3   : > { %1938 = vrot.lane.b32.xlu0 %v8832_v14, %s7524_s27 }
 0x6b4   : > { %v8955_v52 = vpop.permute.xlu1 %1994 }
 0x6b7   : > { %1942 = vrot.lane.b32.xlu0 %v8840_v56, %s7524_s27 }
 0x6b8   : > { %v8965_v45 = vpop.permute.xlu1 %1998 }
 0x6bb   : > { %1946 = vrot.lane.b32.xlu0 %v8842_v32, %s7524_s27 }
 0x6bf   : > { %1988 = vrot.lane.b32.xlu0 %v8830_v39, %s7525_s26 }
 0x6c3   : > { %1992 = vrot.lane.b32.xlu0 %v8832_v14, %s7525_s26 }
 0x6c7   : > { %1996 = vrot.lane.b32.xlu0 %v8840_v56, %s7525_s26 }
 0x6cb   : > { %2000 = vrot.lane.b32.xlu0 %v8842_v32, %s7525_s26 }
 0x6cf   : > { %2042 = vrot.lane.b32.xlu0 %v8830_v39, %s7526_s29 }
 0x6d3   : > { %2046 = vrot.lane.b32.xlu0 %v8832_v14, %s7526_s29 }
 0x6d7   : > { %2050 = vrot.lane.b32.xlu0 %v8840_v56, %s7526_s29 }
 0x6db   : > { %2054 = vrot.lane.b32.xlu0 %v8842_v32, %s7526_s29 }
 0x6df   : > { %2096 = vrot.lane.b32.xlu0 %v8830_v39, %s7527_s14 }
 0x6e3   : > { %2100 = vrot.lane.b32.xlu0 %v8832_v14, %s7527_s14 }
 0x6e7   : > { %2104 = vrot.lane.b32.xlu0 %v8840_v56, %s7527_s14 }
 0x6eb   : > { %2108 = vrot.lane.b32.xlu0 %v8842_v32, %s7527_s14 }
 0x6ef   : > { %2150 = vrot.lane.b32.xlu0 %v8830_v39, %s7528_s10 }
 0x6f3   : > { %2154 = vrot.lane.b32.xlu0 %v8832_v14, %s7528_s10 }
 0x6f7   : > { %2158 = vrot.lane.b32.xlu0 %v8840_v56, %s7528_s10 }
 0x6fb   : > { %2162 = vrot.lane.b32.xlu0 %v8842_v32, %s7528_s10 }
 0x6ff   : > { %2204 = vrot.lane.b32.xlu0 %v8830_v39, %s7529_s6 }
 0x701   : > { %v1827_v34 = vpop.permute.xlu0 %1826 }
 0x703   : > { %2208 = vrot.lane.b32.xlu0 %v8832_v14, %s7529_s6 }
 0x705   : > { %v1831_v35 = vpop.permute.xlu0 %1830 }
 0x706   : > { %v1846_v29 = vsel %vm349_vm1, %v1827_v34, %v1831_v35 }
 0x707   : > { %v1873_v46 = vmul.f32 %v1859_v11, %v1846_v29  ;;  %2212 = vrot.lane.b32.xlu0 %v8840_v56, %s7529_s6 }
 0x709   : > { %v1835_v54 = vpop.permute.xlu0 %1834  ;;  %v6691_v53 = vpack.c.bf16 %v1877_v0, %v1873_v46  ;;  %v8973_v46 = vpop.permute.xlu1 %2002 }
 0x70a   : > { %v1844_v18 = vsel %vm349_vm1, %v1831_v35, %v1835_v54 }
 0x70b   : > { %6692 = vmatprep.subr.bf16.mxu0 %v6691_v53  ;;  %2216 = vrot.lane.b32.xlu0 %v8842_v32, %s7529_s6  ;;  %v1874_v17 = vmul.f32 %v1863_v24, %v1844_v18  ;;  %v1921_v53 = vrot.slane %v6433_v23, %v7969_v31  ;;  %v1897_v18 = vsel %vm404_vm2, %v8894_v41, %v8898_v44 }
 0x70c   : > { %v1903_v24 = vsel %vm404_vm2, %v8898_v44, %v8884_v40  ;;  %v6434_v44 = vld [vmem:[%s11826_s9 + $0x8] sm:$0xf] }
 0x70d   : > { %v1839_v51 = vpop.permute.xlu0 %1838  ;;  %v6729_v60 = vpack.c.bf16 %v1878_v15, %v1874_v17 }
 0x70e   : > { %v1842_v50 = vsel %vm349_vm1, %v1835_v54, %v1839_v51  ;;  %v1848_v57 = vsel %vm349_vm1, %v1839_v51, %v1827_v34  ;;  %v1909_v54 = vrot.slane %v6433_v23, %v7967_v30 }
 0x70f   : > { %v1872_v42 = vmul.f32 %v1855_v43, %v1848_v57  ;;  %v1875_v63 = vmul.f32 %v1867_v62, %v1842_v50  ;;  %v1917_v62 = vrot.slane %v6433_v23, %v7959_v28  ;;  %v1933_v57 = vmul.f32 %v1921_v53, %v1897_v18 }
 0x710   : > { %v1930_v50 = vmul.f32 %v1909_v54, %v1903_v24  ;;  %v1967_v23 = vrot.slane %v6434_v44, %v7942_v20 }
 0x711   : > { %v6693_v16 = vpack.c.bf16 %v1876_v59, %v1872_v42  ;;  %v1881_v21 = vpop.permute.xlu0 %1880  ;;  %v6727_v38 = vpack.c.bf16 %v1879_v10, %v1875_v63  ;;  %v8996_v42 = vpop.permute.xlu1 %2044  ;;  %v1932_v40 = vmul.f32 %v1917_v62, %v1899_v25 }
 0x713   : > { %6694 = vmatpush1.bf16.msra.mxu0 %v6693_v16  ;;  %6728 = vmatprep.subr.bf16.mxu1 %v6727_v38  ;;  %v1955_v16 = vsel %vm460_vm3, %v8904_v37, %v8908_v13 }
 0x714   : > { %6730 = vmatpush1.bf16.msra.mxu1 %v6729_v60 }
 0x715   : > { %v1885_v34 = vpop.permute.xlu0 %1884  ;;  %v9006_v38 = vpop.permute.xlu1 %2048 }
 0x716   : > { %v1900_v11 = vsel %vm404_vm2, %v1881_v21, %v1885_v34 }
 0x717   : > { %v1927_v35 = vmul.f32 %v1913_v55, %v1900_v11  ;;  %v1985_v55 = vmul.f32 %v1967_v23, %v1955_v16 }
 0x719   : > { %v1889_v29 = vpop.permute.xlu0 %1888  ;;  %v6695_v0 = vpack.c.bf16 %v1931_v48, %v1927_v35  ;;  %v1963_v48 = vrot.slane %v6434_v44, %v7967_v30  ;;  %v1975_v35 = vrot.slane %v6434_v44, %v7969_v31 }
 0x71a   : > { %v1898_v43 = vsel %vm404_vm2, %v1885_v34, %v1889_v29 }
 0x71b   : > { %6696 = vmatprep.subr.bf16.mxu0 %v6695_v0  ;;  %v1928_v61 = vmul.f32 %v1917_v62, %v1898_v43  ;;  %v9014_v0 = vpop.permute.xlu1 %2052  ;;  %v1957_v43 = vsel %vm460_vm3, %v8921_v26, %v8904_v37  ;;  %v1953_v62 = vsel %vm460_vm3, %v8908_v13, %v8914_v33  ;;  %v6435_v37 = vld [vmem:[%s11826_s9 + $0xc] sm:$0xf] }
 0x71d   : > { %v1893_v58 = vpop.permute.xlu0 %1892  ;;  %v6733_v15 = vpack.c.bf16 %v1932_v40, %v1928_v61  ;;  %v1984_v61 = vmul.f32 %v1963_v48, %v1957_v43  ;;  %v2021_v40 = vrot.slane %v6435_v37, %v7942_v20 }
 0x71e   : > { %v1896_v51 = vsel %vm404_vm2, %v1889_v29, %v1893_v58  ;;  %v1902_v17 = vsel %vm404_vm2, %v1893_v58, %v1881_v21 }
 0x71f   : > { %v1926_v59 = vmul.f32 %v1909_v54, %v1902_v17  ;;  %v1929_v10 = vmul.f32 %v1921_v53, %v1896_v51  ;;  %v1971_v54 = vrot.slane %v6434_v44, %v7959_v28  ;;  %v1951_v53 = vsel %vm460_vm3, %v8914_v33, %v8921_v26  ;;  %v9036_v33 = vpop.permute.xlu1 %2056 }
 0x720   : > { %v1987_v51 = vmul.f32 %v1975_v35, %v1951_v53  ;;  %v2009_v44 = vsel %vm516_vm4, %v8934_v49, %v8955_v52 }
 0x721   : > { %v6697_v36 = vpack.c.bf16 %v1930_v50, %v1926_v59  ;;  %v1935_v41 = vpop.permute.xlu0 %1934  ;;  %v6731_v63 = vpack.c.bf16 %v1933_v57, %v1929_v10  ;;  %v1986_v57 = vmul.f32 %v1971_v54, %v1953_v62 }
 0x723   : > { %6698 = vmatpush1.bf16.msra.mxu0 %v6697_v36  ;;  %6732 = vmatprep.subr.bf16.mxu1 %v6731_v63  ;;  %v2039_v63 = vmul.f32 %v2021_v40, %v2009_v44 }
 0x724   : > { %6734 = vmatpush1.bf16.msra.mxu1 %v6733_v15 }
 0x725   : > { %v1939_v21 = vpop.permute.xlu0 %1938 }
 0x726   : > { %v1954_v60 = vsel %vm460_vm3, %v1935_v41, %v1939_v21 }
 0x727   : > { %v1981_v22 = vmul.f32 %v1967_v23, %v1954_v60  ;;  %v9045_v23 = vpop.permute.xlu1 %2098  ;;  %v2017_v60 = vrot.slane %v6435_v37, %v7967_v30 }
 0x729   : > { %v1943_v34 = vpop.permute.xlu0 %1942  ;;  %v6699_v11 = vpack.c.bf16 %v1985_v55, %v1981_v22  ;;  %v2029_v55 = vrot.slane %v6435_v37, %v7969_v31 }
 0x72a   : > { %v1952_v29 = vsel %vm460_vm3, %v1939_v21, %v1943_v34 }
 0x72b   : > { %6700 = vmatprep.subr.bf16.mxu0 %v6699_v11  ;;  %v1982_v24 = vmul.f32 %v1971_v54, %v1952_v29  ;;  %v2005_v11 = vsel %vm516_vm4, %v8965_v45, %v8973_v46  ;;  %v9064_v54 = vpop.permute.xlu1 %2102 }
 0x72d   : > { %v1947_v18 = vpop.permute.xlu0 %1946  ;;  %v6737_v10 = vpack.c.bf16 %v1986_v57, %v1982_v24  ;;  %v2041_v24 = vmul.f32 %v2029_v55, %v2005_v11  ;;  %v6436_v57 = vld [vmem:[%s11826_s9 + $0x14] sm:$0xf] }
 0x72e   : > { %v1950_v25 = vsel %vm460_vm3, %v1943_v34, %v1947_v18  ;;  %v1956_v58 = vsel %vm460_vm3, %v1947_v18, %v1935_v41  ;;  %v2025_v34 = vrot.slane %v6435_v37, %v7959_v28  ;;  %v2083_v44 = vrot.slane %v6436_v57, %v7969_v31 }
 0x72f   : > { %v1980_v17 = vmul.f32 %v1963_v48, %v1956_v58  ;;  %v1983_v50 = vmul.f32 %v1975_v35, %v1950_v25  ;;  %v2011_v48 = vsel %vm516_vm4, %v8973_v46, %v8934_v49  ;;  %v2007_v35 = vsel %vm516_vm4, %v8955_v52, %v8965_v45 }
 0x730   : > { %v2038_v18 = vmul.f32 %v2017_v60, %v2011_v48  ;;  %v2040_v49 = vmul.f32 %v2025_v34, %v2007_v35  ;;  %v6707_v52 = vpack.c.bf16 %v8736_v12, %v8832_v14  ;;  %v6743_v45 = vpack.c.bf16 %v8746_v47, %v8842_v32 }
 0x731   : > { %v6701_v26 = vpack.c.bf16 %v1984_v61, %v1980_v17  ;;  %v1989_v59 = vpop.permute.xlu0 %1988  ;;  %v6735_v13 = vpack.c.bf16 %v1987_v51, %v1983_v50  ;;  %v2107_v50 = vpop.permute.xlu1 %2106  ;;  %v6745_v12 = vpack.c.bf16 %v8741_v27, %v8840_v56  ;;  %v2075_v14 = vrot.slane %v6436_v57, %v7942_v20 }
 0x732   : > { %v2071_v32 = vrot.slane %v6436_v57, %v7967_v30 }
 0x733   : > { %6702 = vmatpush1.bf16.msra.mxu0 %v6701_v26  ;;  %6736 = vmatprep.subr.bf16.mxu1 %v6735_v13  ;;  %v6709_v26 = vpack.c.bf16 %v8731_v9, %v8830_v39  ;;  %v2063_v9 = vsel %vm572_vm5, %v8996_v42, %v9006_v38 }
 0x734   : > { %6738 = vmatpush1.bf16.msra.mxu1 %v6737_v10 }
 0x735   : > { %v1993_v36 = vpop.permute.xlu0 %1992  ;;  %v2111_v39 = vpop.permute.xlu1 %2110 }
 0x736   : > { %v2008_v41 = vsel %vm516_vm4, %v1989_v59, %v1993_v36 }
 0x737   : > { %v2035_v15 = vmul.f32 %v2021_v40, %v2008_v41  ;;  %v2079_v40 = vrot.slane %v6436_v57, %v7959_v28  ;;  %v2092_v41 = vmul.f32 %v2071_v32, %v2063_v9 }
 0x739   : > { %v1997_v16 = vpop.permute.xlu0 %1996  ;;  %v6703_v21 = vpack.c.bf16 %v2039_v63, %v2035_v15  ;;  %v2059_v63 = vsel %vm572_vm5, %v9014_v0, %v9036_v33 }
 0x73a   : > { %v2006_v22 = vsel %vm516_vm4, %v1993_v36, %v1997_v16 }
 0x73b   : > { %6704 = vmatprep.subr.bf16.mxu0 %v6703_v21  ;;  %v2036_v53 = vmul.f32 %v2025_v34, %v2006_v22  ;;  %v2094_v22 = vmul.f32 %v2079_v40, %v2059_v63 }
 0x73d   : > { %v2001_v29 = vpop.permute.xlu0 %2000  ;;  %v6741_v17 = vpack.c.bf16 %v2040_v49, %v2036_v53 }
 0x73e   : > { %v2004_v43 = vsel %vm516_vm4, %v1997_v16, %v2001_v29  ;;  %v2010_v62 = vsel %vm516_vm4, %v2001_v29, %v1989_v59  ;;  %v2061_v59 = vsel %vm572_vm5, %v9006_v38, %v9014_v0  ;;  %v2065_v38 = vsel %vm572_vm5, %v9036_v33, %v8996_v42  ;;  %v2153_v0 = vpop.permute.xlu1 %2152  ;;  %v6437_v42 = vld [vmem:[%s11826_s9 + $0x18] sm:$0xf] }
 0x73f   : > { %v2034_v25 = vmul.f32 %v2017_v60, %v2010_v62  ;;  %v2037_v58 = vmul.f32 %v2029_v55, %v2004_v43  ;;  %v2093_v10 = vmul.f32 %v2075_v14, %v2061_v59  ;;  %v2095_v34 = vmul.f32 %v2083_v44, %v2065_v38 }
 0x740   : > { %v2129_v62 = vrot.slane %v6437_v42, %v7942_v20 }
 0x741   : > { %v6705_v46 = vpack.c.bf16 %v2038_v18, %v2034_v25  ;;  %v2043_v61 = vpop.permute.xlu0 %2042  ;;  %v6739_v51 = vpack.c.bf16 %v2041_v24, %v2037_v58  ;;  %v2125_v24 = vrot.slane %v6437_v42, %v7967_v30  ;;  %v2115_v25 = vsel %vm628_vm6, %v9064_v54, %v2107_v50 }
 0x742   : > { %v2157_v43 = vpop.permute.xlu1 %2156  ;;  %v2117_v58 = vsel %vm628_vm6, %v9045_v23, %v9064_v54  ;;  %v2119_v54 = vsel %vm628_vm6, %v2111_v39, %v9045_v23  ;;  %v6438_v23 = vld [vmem:[%s11826_s9 + $0x1c] sm:$0xf] }
 0x743   : > { %6706 = vmatpush1.bf16.msra.mxu0 %v6705_v46  ;;  %6740 = vmatprep.subr.bf16.mxu1 %v6739_v51  ;;  %v2147_v51 = vmul.f32 %v2129_v62, %v2115_v25  ;;  %v2179_v38 = vrot.slane %v6438_v23, %v7967_v30 }
 0x744   : > { %6708 = vmatprep.subr.bf16.mxu0 %v6707_v52  ;;  %6742 = vmatpush1.bf16.msra.mxu1 %v6741_v17  ;;  %v2133_v17 = vrot.slane %v6437_v42, %v7959_v28  ;;  %v2137_v52 = vrot.slane %v6437_v42, %v7969_v31 }
 0x745   : > { %v2047_v37 = vpop.permute.xlu0 %2046  ;;  %6744 = vmatprep.subr.bf16.mxu1 %v6743_v45 }
 0x746   : > { %v2062_v47 = vsel %vm572_vm5, %v2043_v61, %v2047_v37  ;;  %v2161_v57 = vpop.permute.xlu1 %2160 }
 0x747   : > { %6710 = vmatpush1.bf16.msra.mxu0 %v6709_v26  ;;  %v2088_v56 = vmul.f32 %v2071_v32, %v2062_v47  ;;  %v2113_v26 = vsel %vm628_vm6, %v2107_v50, %v2111_v39 }
 0x748   : > { %6746 = vmatpush1.bf16.msra.mxu1 %v6745_v12  ;;  %v2148_v9 = vmul.f32 %v2133_v17, %v2113_v26 }
 0x749   : > { %v2051_v27 = vpop.permute.xlu0 %2050  ;;  %v6713_v21 = vpack.c.bf16 %v2092_v41, %v2088_v56 }
 0x74a   : > { %v2060_v13 = vsel %vm572_vm5, %v2047_v37, %v2051_v27  ;;  %v2146_v37 = vmul.f32 %v2125_v24, %v2117_v58 }
 0x74b   : > { %v2089_v36 = vmul.f32 %v2075_v14, %v2060_v13 }
 0x74d   : > { %v2055_v15 = vpop.permute.xlu0 %2054  ;;  %v6711_v16 = vpack.c.bf16 %v2093_v10, %v2089_v36  ;;  %v2183_v36 = vrot.slane %v6438_v23, %v7942_v20 }
 0x74e   : > { %v2058_v60 = vsel %vm572_vm5, %v2051_v27, %v2055_v15  ;;  %v2064_v55 = vsel %vm572_vm5, %v2055_v15, %v2043_v61  ;;  %v2149_v27 = vmul.f32 %v2137_v52, %v2119_v54  ;;  %v2169_v15 = vsel %vm684_vm7, %v2157_v43, %v2161_v57 }
 0x74f   : > { %v2090_v11 = vmul.f32 %v2079_v40, %v2058_v60  ;;  %v2091_v48 = vmul.f32 %v2083_v44, %v2064_v55  ;;  %6712 = vmatprep.subr.bf16.mxu0 %v6711_v16  ;;  %v2165_v40 = vpop.permute.xlu1 %2164  ;;  %v2171_v16 = vsel %vm684_vm7, %v2153_v0, %v2157_v43 }
 0x750   : > { %6714 = vmatpush1.bf16.msra.mxu0 %v6713_v21 }
 0x751   : > { %v6749_v35 = vpack.c.bf16 %v2094_v22, %v2090_v11  ;;  %v2097_v29 = vpop.permute.xlu0 %2096  ;;  %v6747_v53 = vpack.c.bf16 %v2095_v34, %v2091_v48  ;;  %v2201_v22 = vmul.f32 %v2183_v36, %v2169_v15  ;;  %v2187_v34 = vrot.slane %v6438_v23, %v7959_v28 }
 0x752   : > { %v2191_v11 = vrot.slane %v6438_v23, %v7969_v31 }
 0x753   : > { %6748 = vmatprep.subr.bf16.mxu1 %v6747_v53  ;;  %v2207_v63 = vpop.permute.xlu1 %2206  ;;  %v2173_v53 = vsel %vm684_vm7, %v2165_v40, %v2153_v0 }
 0x754   : > { %6750 = vmatpush1.bf16.msra.mxu1 %v6749_v35  ;;  %v2200_v35 = vmul.f32 %v2179_v38, %v2171_v16  ;;  %v2203_v58 = vmul.f32 %v2191_v11, %v2173_v53 }
 0x755   : > { %v2101_v33 = vpop.permute.xlu0 %2100 }
 0x756   : > { %v2116_v18 = vsel %vm628_vm6, %v2097_v29, %v2101_v33 }
 0x757   : > { %v2142_v46 = vmul.f32 %v2125_v24, %v2116_v18  ;;  %v2211_v42 = vpop.permute.xlu1 %2210 }
 0x759   : > { %v2105_v49 = vpop.permute.xlu0 %2104  ;;  %v6717_v47 = vpack.c.bf16 %v2146_v37, %v2142_v46 }
 0x75a   : > { %v2114_v61 = vsel %vm628_vm6, %v2101_v33, %v2105_v49 }
 0x75b   : > { %v2143_v45 = vmul.f32 %v2129_v62, %v2114_v61  ;;  %v2215_v0 = vpop.permute.xlu1 %2214 }
 0x75c   : > { %v2223_v54 = vsel %vm740_vm8, %v2211_v42, %v2215_v0 }
 0x75d   : > { %v2109_v12 = vpop.permute.xlu0 %2108  ;;  %v6715_v14 = vpack.c.bf16 %v2147_v51, %v2143_v45 }
 0x75e   : > { %v2112_v32 = vsel %vm628_vm6, %v2105_v49, %v2109_v12  ;;  %v2118_v59 = vsel %vm628_vm6, %v2109_v12, %v2097_v29  ;;  %v2167_v29 = vsel %vm684_vm7, %v2161_v57, %v2165_v40  ;;  %v2225_v12 = vsel %vm740_vm8, %v2207_v63, %v2211_v42 }
 0x75f   : > { %v2144_v56 = vmul.f32 %v2133_v17, %v2112_v32  ;;  %v2145_v13 = vmul.f32 %v2137_v52, %v2118_v59  ;;  %6716 = vmatprep.subr.bf16.mxu0 %v6715_v14  ;;  %v2202_v25 = vmul.f32 %v2187_v34, %v2167_v29  ;;  %v6439_v52 = vld [vmem:[%s11826_s9 + $0x20] sm:$0xf]  ;;  %v2219_v14 = vpop.permute.xlu1 %2218 }
 0x760   : > { %6718 = vmatpush1.bf16.msra.mxu0 %v6717_v47  ;;  %v2237_v57 = vrot.slane %v6439_v52, %v7942_v20  ;;  %v2233_v26 = vrot.slane %v6439_v52, %v7967_v30  ;;  %v2227_v40 = vsel %vm740_vm8, %v2219_v14, %v2207_v63 }
 0x761   : > { %v6753_v50 = vpack.c.bf16 %v2148_v9, %v2144_v56  ;;  %v2151_v10 = vpop.permute.xlu0 %2150  ;;  %v6751_v44 = vpack.c.bf16 %v2149_v27, %v2145_v13  ;;  %v2241_v27 = vrot.slane %v6439_v52, %v7959_v28  ;;  %v2245_v56 = vrot.slane %v6439_v52, %v7969_v31 }
 0x762   : > { %v2255_v9 = vmul.f32 %v2237_v57, %v2223_v54  ;;  %v9250_v54 = vld [vmem:[%s7759_s15 + $0x78] sm:$0xff] }
 0x763   : > { %6752 = vmatprep.subr.bf16.mxu1 %v6751_v44  ;;  %v2257_v15 = vmul.f32 %v2245_v56, %v2227_v40 }
 0x764   : > { %6754 = vmatpush1.bf16.msra.mxu1 %v6753_v50  ;;  %v2254_v50 = vmul.f32 %v2233_v26, %v2225_v12 }
 0x765   : > { %v2155_v39 = vpop.permute.xlu0 %2154 }
 0x766   : > { %v2170_v41 = vsel %vm684_vm7, %v2151_v10, %v2155_v39 }
 0x767   : > { %v2196_v60 = vmul.f32 %v2179_v38, %v2170_v41 }
 0x769   : > { %v2159_v21 = vpop.permute.xlu0 %2158  ;;  %v6721_v62 = vpack.c.bf16 %v2200_v35, %v2196_v60 }
 0x76a   : > { %v2168_v55 = vsel %vm684_vm7, %v2155_v39, %v2159_v21 }
 0x76b   : > { %v2197_v48 = vmul.f32 %v2183_v36, %v2168_v55 }
 0x76d   : > { %v2163_v33 = vpop.permute.xlu0 %2162  ;;  %v6719_v43 = vpack.c.bf16 %v2201_v22, %v2197_v48 }
 0x76e   : > { %v2166_v18 = vsel %vm684_vm7, %v2159_v21, %v2163_v33  ;;  %v2172_v24 = vsel %vm684_vm7, %v2163_v33, %v2151_v10  ;;  %v2221_v10 = vsel %vm740_vm8, %v2215_v0, %v2219_v14 }
 0x76f   : > { %v2198_v49 = vmul.f32 %v2187_v34, %v2166_v18  ;;  %v2199_v46 = vmul.f32 %v2191_v11, %v2172_v24  ;;  %6720 = vmatprep.subr.bf16.mxu0 %v6719_v43  ;;  %v2256_v38 = vmul.f32 %v2241_v27, %v2221_v10 }
 0x770   : > { %6722 = vmatpush1.bf16.msra.mxu0 %v6721_v62 }
 0x771   : > { %v6757_v61 = vpack.c.bf16 %v2202_v25, %v2198_v49  ;;  %v2205_v51 = vpop.permute.xlu0 %2204  ;;  %v6755_v17 = vpack.c.bf16 %v2203_v58, %v2199_v46 }
 0x773   : > { %6756 = vmatprep.subr.bf16.mxu1 %v6755_v17 }
 0x774   : > { %6758 = vmatpush1.bf16.msra.mxu1 %v6757_v61 }
 0x775   : > { %v2209_v45 = vpop.permute.xlu0 %2208 }
 0x776   : > { %v2224_v37 = vsel %vm740_vm8, %v2205_v51, %v2209_v45 }
 0x777   : > { %v2250_v32 = vmul.f32 %v2233_v26, %v2224_v37  ;;  %v9240_v37 = vld [vmem:[%s7759_s15 + $0x68] sm:$0xff]  ;;  %v9245_v26 = vld [vmem:[%s7759_s15 + $0x70] sm:$0xff] }
 0x779   : > { %v2213_v47 = vpop.permute.xlu0 %2212  ;;  %v6725_v39 = vpack.c.bf16 %v2254_v50, %v2250_v32 }
 0x77a   : > { %v2222_v59 = vsel %vm740_vm8, %v2209_v45, %v2213_v47 }
 0x77b   : > { %v2251_v13 = vmul.f32 %v2237_v57, %v2222_v59  ;;  %v9235_v57 = vld [vmem:[%s7759_s15 + $0x60] sm:$0xff] }
 0x77d   : > { %v2217_v44 = vpop.permute.xlu0 %2216  ;;  %v6723_v23 = vpack.c.bf16 %v2255_v9, %v2251_v13 }
 0x77e   : > { %v2220_v36 = vsel %vm740_vm8, %v2213_v47, %v2217_v44  ;;  %v2226_v41 = vsel %vm740_vm8, %v2217_v44, %v2205_v51 }
 0x77f   : > { %v2252_v16 = vmul.f32 %v2241_v27, %v2220_v36  ;;  %v2253_v21 = vmul.f32 %v2245_v56, %v2226_v41  ;;  %6724 = vmatprep.subr.bf16.mxu0 %v6723_v23 }
 0x780   : > { %6726 = vmatpush1.bf16.msra.mxu0 %v6725_v39 }
 0x781   : > { %v6761_v60 = vpack.c.bf16 %v2256_v38, %v2252_v16  ;;  %v6759_v55 = vpack.c.bf16 %v2257_v15, %v2253_v21 }
 0x783   : > { %2323 = vmatmul.mubr.f32.vlgmr.msra.gmra.mrb[8].mxu0 %v7775_v1  ;;  %6760 = vmatprep.subr.bf16.mxu1 %v6759_v55 }
 0x784   : > { %6762 = vmatpush1.bf16.msra.mxu1 %v6761_v60  ;;  %6441 = vmatprep.mubr.msk.f32.mxu0 %vm780_vm0, %v7781_v4 }
 0x787   : > { %2400 = vmatmul.mubr.f32.vlgmr.msra.gmra.mrb[8].mxu1 %v7775_v1  ;;  %2329 = vmatmul.mubr.f32.gmra.mrb[10].mxu0 %v7779_v3 }
 0x788   : > { %6443 = vmatprep.mubr.msk.f32.mxu1 %vm780_vm0, %v7781_v4  ;;  %6459 = vmatprep.mubr.msk.f32.mxu0 %vm780_vm0, %v7777_v2 }
 0x78b   : > { %2406 = vmatmul.mubr.f32.gmra.mrb[10].mxu1 %v7779_v3 }
 0x78c   : > { %6461 = vmatprep.mubr.msk.f32.mxu1 %vm780_vm0, %v7777_v2 }
 0x856   : > { %v9194_v63 = vpop.f32.mrb[8].mxu0 }
 0x857   : > { %v2420_v22 = vmul.f32 %v9194_v63, %v9194_v63  ;;  %v9198_v34 = vpop.f32.mrb[9].mxu0 }
 0x858   : > { %v2412_v11 = vadd.f32 %v9198_v34, %v9194_v63  ;;  %v2421_v48 = vmul.f32 %v9198_v34, %v9198_v34 }
 0x85a   : > { %2413 = vadd.xlane.f32.xlu0 %v2412_v11  ;;  %v9204_v35 = vpop.f32.mrb[8].mxu1  ;;  %v2424_v29 = vadd.f32 %v2421_v48, %v2420_v22  ;;  %v9206_v53 = vpop.f32.mrb[10].mxu0 }
 0x85b   : > { %v2486_v42 = vmul.f32 %v9204_v35, %v9204_v35  ;;  %v9210_v33 = vpop.f32.mrb[9].mxu1  ;;  %v2422_v43 = vmul.f32 %v9206_v53, %v9206_v53  ;;  %v9214_v62 = vpop.f32.mrb[11].mxu0 }
 0x85c   : > { %v2478_v18 = vadd.f32 %v9210_v33, %v9204_v35  ;;  %v2487_v24 = vmul.f32 %v9210_v33, %v9210_v33  ;;  %2425 = vadd.xlane.f32.xlu1 %v2424_v29  ;;  %v2415_v25 = vadd.f32 %v9214_v62, %v9206_v53  ;;  %v2423_v58 = vmul.f32 %v9214_v62, %v9214_v62 }
 0x85e   : > { %2479 = vadd.xlane.f32.xlu0 %v2478_v18  ;;  %v9224_v49 = vpop.f32.mrb[10].mxu1  ;;  %v2490_v46 = vadd.f32 %v2487_v24, %v2486_v42  ;;  %v2427_v61 = vadd.f32 %v2423_v58, %v2422_v43 }
 0x85f   : > { %v2488_v51 = vmul.f32 %v9224_v49, %v9224_v49  ;;  %v9228_v17 = vpop.f32.mrb[11].mxu1 }
 0x860   : > { %v2481_v0 = vadd.f32 %v9228_v17, %v9224_v49  ;;  %v2489_v52 = vmul.f32 %v9228_v17, %v9228_v17  ;;  %2416 = vadd.xlane.f32.xlu1 %v2415_v25 }
 0x862   : > { %2482 = vadd.xlane.f32.xlu0 %v2481_v0  ;;  %v2493_v45 = vadd.f32 %v2489_v52, %v2488_v51 }
 0x864   : > { %2491 = vadd.xlane.f32.xlu1 %v2490_v46 }
 0x866   : > { %2428 = vadd.xlane.f32.xlu0 %v2427_v61 }
 0x86a   : > { %2494 = vadd.xlane.f32.xlu0 %v2493_v45 }
 0x875   : > { %2564 = vrot.lane.b32.xlu1 %v9235_v57, %s7522_s12 }
 0x879   : > { %2568 = vrot.lane.b32.xlu1 %v9240_v37, %s7522_s12 }
 0x87d   : > { %2572 = vrot.lane.b32.xlu1 %v9245_v26, %s7522_s12 }
 0x881   : > { %2576 = vrot.lane.b32.xlu1 %v9250_v54, %s7522_s12 }
 0x8e7   : > { %v2414_v12 = vpop.xlane.xlu0 %2413 }
 0x8e8   : > { %v2418_v14 = vmul.f32 0.00390625, %v2414_v12 }
 0x8e9   : > { %v2426_v47 = vpop.xlane.xlu1 %2425 }
 0x8ea   : > { %v2432_v32 = vmul.f32 %v2418_v14, %v2418_v14  ;;  %v2430_v59 = vmul.f32 0.00390625, %v2426_v47 }
 0x8eb   : > { %v2480_v9 = vpop.xlane.xlu0 %2479 }
 0x8ec   : > { %v2434_v27 = vsub.f32 %v2430_v59, %v2432_v32  ;;  %v2484_v50 = vmul.f32 0.00390625, %v2480_v9 }
 0x8ed   : > { %v2417_v56 = vpop.xlane.xlu1 %2416 }
 0x8ee   : > { %v2436_v13 = vadd.f32 1e-05, %v2434_v27  ;;  %v2419_v40 = vmul.f32 0.00390625, %v2417_v56  ;;  %v2498_v23 = vmul.f32 %v2484_v50, %v2484_v50 }
 0x8ef   : > { %v2483_v10 = vpop.xlane.xlu0 %2482 }
 0x8f0   : > { %7279 = vrsqrt.f32 %v2436_v13  ;;  %v2433_v41 = vmul.f32 %v2419_v40, %v2419_v40  ;;  %v2485_v38 = vmul.f32 0.00390625, %v2483_v10 }
 0x8f1   : > { %v2492_v44 = vpop.xlane.xlu1 %2491 }
 0x8f2   : > { %v2496_v39 = vmul.f32 0.00390625, %v2492_v44  ;;  %v2499_v11 = vmul.f32 %v2485_v38, %v2485_v38 }
 0x8f3   : > { %v2429_v36 = vpop.xlane.xlu0 %2428 }
 0x8f4   : > { %v2500_v15 = vsub.f32 %v2496_v39, %v2498_v23  ;;  %v2431_v16 = vmul.f32 0.00390625, %v2429_v36 }
 0x8f5   : > { %v9254_v21 = vpop.permute.xlu1 %2564 }
 0x8f6   : > { %v2502_v60 = vadd.f32 1e-05, %v2500_v15  ;;  %v2435_v55 = vsub.f32 %v2431_v16, %v2433_v41 }
 0x8f7   : > { %v2495_v22 = vpop.xlane.xlu0 %2494 }
 0x8f8   : > { %7281 = vrsqrt.f32 %v2502_v60  ;;  %v2437_v48 = vadd.f32 1e-05, %v2435_v55  ;;  %v2497_v29 = vmul.f32 0.00390625, %v2495_v22 }
 0x8f9   : > { %v2569_v42 = vpop.permute.xlu1 %2568 }
 0x8fa   : > { %v7280_v43 = vpop.eup %7279  ;;  %7283 = vrsqrt.f32 %v2437_v48  ;;  %v2501_v18 = vsub.f32 %v2497_v29, %v2499_v11  ;;  %v9259_v24 = vsel %vm349_vm1, %v9254_v21, %v2569_v42 }
 0x8fb   : > { %v2440_v25 = vmul.f32 %v7280_v43, %v7786_v5 }
 0x8fc   : > { %v2503_v58 = vadd.f32 1e-05, %v2501_v18 }
 0x8fd   : > { %2444 = vperm.xlu1 %7261, %v2440_v25   ;;  %v9262_v46 = vpop.permute.xlu1 %2572  ;;  %v2456_v12 = vmul.f32 %v2440_v25, %v2418_v14 }
 0x8fe   : > { %7285 = vrsqrt.f32 %v2503_v58  ;;  %v9267_v61 = vsel %vm349_vm1, %v2569_v42, %v9262_v46 }
 0x8ff   : > { %v2458_v59 = vsub.f32 %v7796_v7, %v2456_v12 }
 0x901   : > { %v9328_v14 = vpop.permute.xlu1 %2576 }
 0x902   : > { %v7282_v51 = vpop.eup %7281 }
 0x903   : > { %v2506_v0 = vmul.f32 %v7282_v51, %v7786_v5 }
 0x904   : > { %v7284_v52 = vpop.eup %7283 }
 0x905   : > { %v2441_v45 = vmul.f32 %v7284_v52, %v7791_v6  ;;  %2510 = vperm.xlu1 %7261, %v2506_v0   ;;  %v2522_v27 = vmul.f32 %v2506_v0, %v2484_v50 }
 0x907   : > { %2449 = vperm.xlu0 %7262, %v2441_v45   ;;  %v2457_v9 = vmul.f32 %v2441_v45, %v2419_v40  ;;  %v2524_v13 = vsub.f32 %v7796_v7, %v2522_v27 }
 0x908   : > { %v7286_v47 = vpop.eup %7285 }
 0x909   : > { %v2507_v32 = vmul.f32 %v7286_v47, %v7791_v6  ;;  %v2459_v56 = vsub.f32 %v7801_v8, %v2457_v9 }
 0x90b   : > { %2462 = vperm.xlu0 %7262, %v2458_v59   ;;  %2515 = vperm.xlu1 %7261, %v2507_v32   ;;  %v2523_v10 = vmul.f32 %v2507_v32, %v2485_v38 }
 0x90d   : > { %v2525_v44 = vsub.f32 %v7801_v8, %v2523_v10 }
 0x90f   : > { %2467 = vperm.xlu1 %7261, %v2459_v56   ;;  %2528 = vperm.xlu0 %7262, %v2524_v13   ;;  %v2586_v13 = vld [vmem:[%s11826_s9] sm:$0xf] }
 0x913   : > { %2533 = vperm.xlu1 %7261, %v2525_v44  }
 0x917   : > { %2618 = vrot.lane.b32.xlu1 %v9235_v57, %s7523_s16 }
 0x91b   : > { %2622 = vrot.lane.b32.xlu1 %v9240_v37, %s7523_s16 }
 0x91f   : > { %2626 = vrot.lane.b32.xlu1 %v9245_v26, %s7523_s16 }
 0x923   : > { %2630 = vrot.lane.b32.xlu1 %v9250_v54, %s7523_s16 }
 0x927   : > { %2672 = vrot.lane.b32.xlu1 %v9235_v57, %s7524_s27 }
 0x92b   : > { %2676 = vrot.lane.b32.xlu1 %v9240_v37, %s7524_s27 }
 0x92f   : > { %2680 = vrot.lane.b32.xlu1 %v9245_v26, %s7524_s27 }
 0x933   : > { %2684 = vrot.lane.b32.xlu1 %v9250_v54, %s7524_s27 }
 0x937   : > { %2726 = vrot.lane.b32.xlu1 %v9235_v57, %s7525_s26 }
 0x93b   : > { %2730 = vrot.lane.b32.xlu1 %v9240_v37, %s7525_s26 }
 0x93f   : > { %2734 = vrot.lane.b32.xlu1 %v9245_v26, %s7525_s26 }
 0x943   : > { %2738 = vrot.lane.b32.xlu1 %v9250_v54, %s7525_s26 }
 0x947   : > { %2780 = vrot.lane.b32.xlu1 %v9235_v57, %s7526_s29 }
 0x94b   : > { %2784 = vrot.lane.b32.xlu1 %v9240_v37, %s7526_s29 }
 0x94f   : > { %2788 = vrot.lane.b32.xlu1 %v9245_v26, %s7526_s29 }
 0x953   : > { %2792 = vrot.lane.b32.xlu1 %v9250_v54, %s7526_s29 }
 0x957   : > { %2834 = vrot.lane.b32.xlu1 %v9235_v57, %s7527_s14 }
 0x95b   : > { %2838 = vrot.lane.b32.xlu1 %v9240_v37, %s7527_s14 }
 0x95f   : > { %2842 = vrot.lane.b32.xlu1 %v9245_v26, %s7527_s14 }
 0x963   : > { %2846 = vrot.lane.b32.xlu1 %v9250_v54, %s7527_s14 }
 0x967   : > { %2888 = vrot.lane.b32.xlu1 %v9235_v57, %s7528_s10 }
 0x96b   : > { %2892 = vrot.lane.b32.xlu1 %v9240_v37, %s7528_s10 }
 0x96f   : > { %2896 = vrot.lane.b32.xlu1 %v9245_v26, %s7528_s10 }
 0x973   : > { %2900 = vrot.lane.b32.xlu1 %v9250_v54, %s7528_s10 }
 0x977   : > { %2942 = vrot.lane.b32.xlu1 %v9235_v57, %s7529_s6 }
 0x97b   : > { %2946 = vrot.lane.b32.xlu1 %v9240_v37, %s7529_s6 }
 0x97c   : > { %v2445_v50 = vpop.permute.xlu1 %2444 }
 0x97d   : > { %v2452_v41 = vmul.f32 %v2445_v50, %v9194_v63  ;;  %v2453_v38 = vmul.f32 %v2445_v50, %v9198_v34  ;;  %v2595_v50 = vrot.slane %v2586_v13, %v7942_v20 }
 0x97f   : > { %2950 = vrot.lane.b32.xlu1 %v9245_v26, %s7529_s6 }
 0x983   : > { %2954 = vrot.lane.b32.xlu1 %v9250_v54, %s7529_s6 }
 0x984   : > { %v2511_v40 = vpop.permute.xlu1 %2510 }
 0x985   : > { %v2518_v42 = vmul.f32 %v2511_v40, %v9204_v35  ;;  %v2519_v43 = vmul.f32 %v2511_v40, %v9210_v33 }
 0x986   : > { %v2450_v23 = vpop.permute.xlu0 %2449 }
 0x987   : > { %v2454_v15 = vmul.f32 %v2450_v23, %v9206_v53  ;;  %v2455_v16 = vmul.f32 %v2450_v23, %v9214_v62 }
 0x98a   : > { %v2463_v39 = vpop.permute.xlu0 %2462  ;;  %v2516_v36 = vpop.permute.xlu1 %2515 }
 0x98b   : > { %v2470_v55 = vadd.f32 %v2463_v39, %v2452_v41  ;;  %v2471_v22 = vadd.f32 %v2463_v39, %v2453_v38  ;;  %v2520_v63 = vmul.f32 %v2516_v36, %v9224_v49  ;;  %v2521_v34 = vmul.f32 %v2516_v36, %v9228_v17 }
 0x98c   : > { %v2613_v39 = vmul.f32 %v2595_v50, %v9259_v24  ;;  %v2599_v24 = vrot.slane %v2586_v13, %v7959_v28 }
 0x98e   : > { %v2468_v60 = vpop.permute.xlu1 %2467  ;;  %v2529_v11 = vpop.permute.xlu0 %2528 }
 0x98f   : > { %v2472_v48 = vadd.f32 %v2468_v60, %v2454_v15  ;;  %v2473_v29 = vadd.f32 %v2468_v60, %v2455_v16  ;;  %v2536_v62 = vadd.f32 %v2529_v11, %v2518_v42  ;;  %v2537_v25 = vadd.f32 %v2529_v11, %v2519_v43 }
 0x990   : > { %v2591_v16 = vrot.slane %v2586_v13, %v7967_v30  ;;  %v2603_v60 = vrot.slane %v2586_v13, %v7969_v31  ;;  %v2585_v11 = vsel %vm349_vm1, %v9328_v14, %v9254_v21  ;;  %v6452_v21 = vld [vmem:[%s11826_s9 + $0x4] sm:$0xf] }
 0x991   : > { %v2474_v18 = vadd.f32 %v2472_v48, %v2470_v55  ;;  %v2475_v53 = vadd.f32 %v2473_v29, %v2471_v22  ;;  %v2579_v22 = vsel %vm349_vm1, %v9262_v46, %v9328_v14  ;;  %v2614_v46 = vmul.f32 %v2599_v24, %v9267_v61 }
 0x992   : > { %v2534_v58 = vpop.permute.xlu1 %2533 }
 0x993   : > { %v9342_v51 = vmax.f32 %v2474_v18, 0.0  ;;  %v9344_v0 = vmax.f32 %v2475_v53, 0.0  ;;  %v2538_v52 = vadd.f32 %v2534_v58, %v2520_v63  ;;  %v2539_v45 = vadd.f32 %v2534_v58, %v2521_v34 }
 0x994   : > { %v2612_v34 = vmul.f32 %v2591_v16, %v2585_v11  ;;  %v2615_v18 = vmul.f32 %v2603_v60, %v2579_v22 }
 0x995   : > { %6444 = vst [vmem:[%s7772_s18 + $0x40] sm:$0xff] %v9342_v51  ;;  %6445 = vst [vmem:[%s7772_s18 + $0x48] sm:$0xff] %v9344_v0  ;;  %v2540_v35 = vadd.f32 %v2538_v52, %v2536_v62  ;;  %v2541_v33 = vadd.f32 %v2539_v45, %v2537_v25  ;;  %2562 = vrot.lane.b32.xlu0 %v9342_v51, %s7522_s12  ;;  %v2649_v45 = vrot.slane %v6452_v21, %v7942_v20 }
 0x996   : > { %v9396_v12 = vpop.permute.xlu1 %2618 }
 0x997   : > { %v9352_v49 = vmax.f32 %v2540_v35, 0.0  ;;  %v9354_v17 = vmax.f32 %v2541_v33, 0.0 }
 0x999   : > { %6446 = vst [vmem:[%s7772_s18 + $0x50] sm:$0xff] %v9352_v49  ;;  %6447 = vst [vmem:[%s7772_s18 + $0x58] sm:$0xff] %v9354_v17  ;;  %2566 = vrot.lane.b32.xlu0 %v9344_v0, %s7522_s12 }
 0x99a   : > { %v9400_v47 = vpop.permute.xlu1 %2622 }
 0x99b   : > { %v2637_v33 = vsel %vm404_vm2, %v9396_v12, %v9400_v47 }
 0x99d   : > { %2570 = vrot.lane.b32.xlu0 %v9352_v49, %s7522_s12 }
 0x99e   : > { %v9406_v32 = vpop.permute.xlu1 %2626 }
 0x9a1   : > { %2574 = vrot.lane.b32.xlu0 %v9354_v17, %s7522_s12 }
 0x9a2   : > { %v9410_v59 = vpop.permute.xlu1 %2630 }
 0x9a5   : > { %2616 = vrot.lane.b32.xlu0 %v9342_v51, %s7523_s16 }
 0x9a6   : > { %v9416_v9 = vpop.permute.xlu1 %2672 }
 0x9a9   : > { %2620 = vrot.lane.b32.xlu0 %v9344_v0, %s7523_s16 }
 0x9aa   : > { %v9420_v27 = vpop.permute.xlu1 %2676 }
 0x9ad   : > { %2624 = vrot.lane.b32.xlu0 %v9352_v49, %s7523_s16 }
 0x9ae   : > { %v9426_v56 = vpop.permute.xlu1 %2680 }
 0x9b1   : > { %2628 = vrot.lane.b32.xlu0 %v9354_v17, %s7523_s16 }
 0x9b2   : > { %v9433_v44 = vpop.permute.xlu1 %2684 }
 0x9b5   : > { %2670 = vrot.lane.b32.xlu0 %v9342_v51, %s7524_s27 }
 0x9b6   : > { %v9443_v41 = vpop.permute.xlu1 %2726 }
 0x9b9   : > { %2674 = vrot.lane.b32.xlu0 %v9344_v0, %s7524_s27 }
 0x9ba   : > { %v9460_v29 = vpop.permute.xlu1 %2730 }
 0x9bd   : > { %2678 = vrot.lane.b32.xlu0 %v9352_v49, %s7524_s27 }
 0x9be   : > { %v9471_v35 = vpop.permute.xlu1 %2734 }
 0x9c1   : > { %2682 = vrot.lane.b32.xlu0 %v9354_v17, %s7524_s27 }
 0x9c5   : > { %2724 = vrot.lane.b32.xlu0 %v9342_v51, %s7525_s26 }
 0x9c9   : > { %2728 = vrot.lane.b32.xlu0 %v9344_v0, %s7525_s26 }
 0x9cd   : > { %2732 = vrot.lane.b32.xlu0 %v9352_v49, %s7525_s26 }
 0x9d1   : > { %2736 = vrot.lane.b32.xlu0 %v9354_v17, %s7525_s26 }
 0x9d5   : > { %2778 = vrot.lane.b32.xlu0 %v9342_v51, %s7526_s29 }
 0x9d9   : > { %2782 = vrot.lane.b32.xlu0 %v9344_v0, %s7526_s29 }
 0x9dd   : > { %2786 = vrot.lane.b32.xlu0 %v9352_v49, %s7526_s29 }
 0x9e1   : > { %2790 = vrot.lane.b32.xlu0 %v9354_v17, %s7526_s29 }
 0x9e5   : > { %2832 = vrot.lane.b32.xlu0 %v9342_v51, %s7527_s14 }
 0x9e9   : > { %2836 = vrot.lane.b32.xlu0 %v9344_v0, %s7527_s14 }
 0x9ed   : > { %2840 = vrot.lane.b32.xlu0 %v9352_v49, %s7527_s14 }
 0x9f1   : > { %2844 = vrot.lane.b32.xlu0 %v9354_v17, %s7527_s14 }
 0x9f5   : > { %2886 = vrot.lane.b32.xlu0 %v9342_v51, %s7528_s10 }
 0x9f9   : > { %2890 = vrot.lane.b32.xlu0 %v9344_v0, %s7528_s10 }
 0x9fd   : > { %2894 = vrot.lane.b32.xlu0 %v9352_v49, %s7528_s10 }
 0xa01   : > { %2898 = vrot.lane.b32.xlu0 %v9354_v17, %s7528_s10 }
 0xa05   : > { %2940 = vrot.lane.b32.xlu0 %v9342_v51, %s7529_s6 }
 0xa07   : > { %v2563_v10 = vpop.permute.xlu0 %2562 }
 0xa09   : > { %2944 = vrot.lane.b32.xlu0 %v9344_v0, %s7529_s6 }
 0xa0b   : > { %v2567_v40 = vpop.permute.xlu0 %2566 }
 0xa0c   : > { %v2582_v23 = vsel %vm349_vm1, %v2563_v10, %v2567_v40 }
 0xa0d   : > { %v2609_v36 = vmul.f32 %v2595_v50, %v2582_v23  ;;  %2948 = vrot.lane.b32.xlu0 %v9352_v49, %s7529_s6 }
 0xa0f   : > { %v2571_v38 = vpop.permute.xlu0 %2570  ;;  %v6763_v15 = vpack.c.bf16 %v2613_v39, %v2609_v36  ;;  %v9479_v39 = vpop.permute.xlu1 %2738  ;;  %v2645_v36 = vrot.slane %v6452_v21, %v7967_v30 }
 0xa10   : > { %v2580_v55 = vsel %vm349_vm1, %v2567_v40, %v2571_v38 }
 0xa11   : > { %6764 = vmatprep.subr.bf16.mxu0 %v6763_v15  ;;  %2952 = vrot.lane.b32.xlu0 %v9354_v17, %s7529_s6  ;;  %v2610_v42 = vmul.f32 %v2599_v24, %v2580_v55  ;;  %v2639_v55 = vsel %vm404_vm2, %v9410_v59, %v9396_v12  ;;  %v2635_v24 = vsel %vm404_vm2, %v9400_v47, %v9406_v32 }
 0xa13   : > { %v2575_v48 = vpop.permute.xlu0 %2574  ;;  %v6801_v52 = vpack.c.bf16 %v2614_v46, %v2610_v42 }
 0xa14   : > { %v2578_v43 = vsel %vm349_vm1, %v2571_v38, %v2575_v48  ;;  %v2584_v63 = vsel %vm349_vm1, %v2575_v48, %v2563_v10  ;;  %v2667_v10 = vmul.f32 %v2649_v45, %v2637_v33  ;;  %v2657_v38 = vrot.slane %v6452_v21, %v7969_v31 }
 0xa15   : > { %v2608_v53 = vmul.f32 %v2591_v16, %v2584_v63  ;;  %v2611_v62 = vmul.f32 %v2603_v60, %v2578_v43  ;;  %v2653_v16 = vrot.slane %v6452_v21, %v7959_v28  ;;  %v2633_v60 = vsel %vm404_vm2, %v9406_v32, %v9410_v59  ;;  %v6453_v59 = vld [vmem:[%s11826_s9 + $0x8] sm:$0xf] }
 0xa16   : > { %v2666_v43 = vmul.f32 %v2645_v36, %v2639_v55  ;;  %v2669_v63 = vmul.f32 %v2657_v38, %v2633_v60  ;;  %v2703_v21 = vrot.slane %v6453_v59, %v7942_v20 }
 0xa17   : > { %v6765_v14 = vpack.c.bf16 %v2612_v34, %v2608_v53  ;;  %v2617_v25 = vpop.permute.xlu0 %2616  ;;  %v6799_v58 = vpack.c.bf16 %v2615_v18, %v2611_v62  ;;  %v9502_v53 = vpop.permute.xlu1 %2780  ;;  %v2668_v12 = vmul.f32 %v2653_v16, %v2635_v24 }
 0xa19   : > { %6766 = vmatpush1.bf16.msra.mxu0 %v6765_v14  ;;  %6800 = vmatprep.subr.bf16.mxu1 %v6799_v58  ;;  %v2691_v14 = vsel %vm460_vm3, %v9416_v9, %v9420_v27 }
 0xa1a   : > { %6802 = vmatpush1.bf16.msra.mxu1 %v6801_v52 }
 0xa1b   : > { %v2621_v61 = vpop.permute.xlu0 %2620  ;;  %v9512_v58 = vpop.permute.xlu1 %2784 }
 0xa1c   : > { %v2636_v13 = vsel %vm404_vm2, %v2617_v25, %v2621_v61 }
 0xa1d   : > { %v2663_v50 = vmul.f32 %v2649_v45, %v2636_v13  ;;  %v2721_v45 = vmul.f32 %v2703_v21, %v2691_v14 }
 0xa1f   : > { %v2625_v40 = vpop.permute.xlu0 %2624  ;;  %v6767_v23 = vpack.c.bf16 %v2667_v10, %v2663_v50  ;;  %v2699_v10 = vrot.slane %v6453_v59, %v7967_v30  ;;  %v2711_v50 = vrot.slane %v6453_v59, %v7969_v31 }
 0xa20   : > { %v2634_v15 = vsel %vm404_vm2, %v2621_v61, %v2625_v40 }
 0xa21   : > { %6768 = vmatprep.subr.bf16.mxu0 %v6767_v23  ;;  %v2664_v11 = vmul.f32 %v2653_v16, %v2634_v15  ;;  %v9520_v23 = vpop.permute.xlu1 %2788  ;;  %v2693_v15 = vsel %vm460_vm3, %v9433_v44, %v9416_v9  ;;  %v2689_v16 = vsel %vm460_vm3, %v9420_v27, %v9426_v56  ;;  %v6454_v9 = vld [vmem:[%s11826_s9 + $0xc] sm:$0xf] }
 0xa23   : > { %v2629_v22 = vpop.permute.xlu0 %2628  ;;  %v6805_v46 = vpack.c.bf16 %v2668_v12, %v2664_v11  ;;  %v2720_v11 = vmul.f32 %v2699_v10, %v2693_v15  ;;  %v2757_v12 = vrot.slane %v6454_v9, %v7942_v20 }
 0xa24   : > { %v2632_v48 = vsel %vm404_vm2, %v2625_v40, %v2629_v22  ;;  %v2638_v42 = vsel %vm404_vm2, %v2629_v22, %v2617_v25 }
 0xa25   : > { %v2662_v34 = vmul.f32 %v2645_v36, %v2638_v42  ;;  %v2665_v18 = vmul.f32 %v2657_v38, %v2632_v48  ;;  %v2707_v36 = vrot.slane %v6453_v59, %v7959_v28  ;;  %v2687_v38 = vsel %vm460_vm3, %v9426_v56, %v9433_v44  ;;  %v9542_v56 = vpop.permute.xlu1 %2792 }
 0xa26   : > { %v2723_v48 = vmul.f32 %v2711_v50, %v2687_v38  ;;  %v2745_v59 = vsel %vm516_vm4, %v9443_v41, %v9460_v29 }
 0xa27   : > { %v6769_v47 = vpack.c.bf16 %v2666_v43, %v2662_v34  ;;  %v2671_v32 = vpop.permute.xlu0 %2670  ;;  %v6803_v62 = vpack.c.bf16 %v2669_v63, %v2665_v18  ;;  %v2722_v63 = vmul.f32 %v2707_v36, %v2689_v16 }
 0xa29   : > { %6770 = vmatpush1.bf16.msra.mxu0 %v6769_v47  ;;  %6804 = vmatprep.subr.bf16.mxu1 %v6803_v62  ;;  %v2775_v62 = vmul.f32 %v2757_v12, %v2745_v59 }
 0xa2a   : > { %6806 = vmatpush1.bf16.msra.mxu1 %v6805_v46 }
 0xa2b   : > { %v2675_v25 = vpop.permute.xlu0 %2674 }
 0xa2c   : > { %v2690_v52 = vsel %vm460_vm3, %v2671_v32, %v2675_v25 }
 0xa2d   : > { %v2717_v33 = vmul.f32 %v2703_v21, %v2690_v52  ;;  %v9551_v21 = vpop.permute.xlu1 %2834  ;;  %v2753_v52 = vrot.slane %v6454_v9, %v7967_v30 }
 0xa2f   : > { %v2679_v61 = vpop.permute.xlu0 %2678  ;;  %v6771_v13 = vpack.c.bf16 %v2721_v45, %v2717_v33  ;;  %v2765_v45 = vrot.slane %v6454_v9, %v7969_v31 }
 0xa30   : > { %v2688_v40 = vsel %vm460_vm3, %v2675_v25, %v2679_v61 }
 0xa31   : > { %6772 = vmatprep.subr.bf16.mxu0 %v6771_v13  ;;  %v2718_v55 = vmul.f32 %v2707_v36, %v2688_v40  ;;  %v2741_v13 = vsel %vm516_vm4, %v9471_v35, %v9479_v39  ;;  %v9570_v36 = vpop.permute.xlu1 %2838 }
 0xa33   : > { %v2683_v60 = vpop.permute.xlu0 %2682  ;;  %v6809_v18 = vpack.c.bf16 %v2722_v63, %v2718_v55  ;;  %v2777_v55 = vmul.f32 %v2765_v45, %v2741_v13  ;;  %v6455_v63 = vld [vmem:[%s11826_s9 + $0x14] sm:$0xf] }
 0xa34   : > { %v2686_v24 = vsel %vm460_vm3, %v2679_v61, %v2683_v60  ;;  %v2692_v22 = vsel %vm460_vm3, %v2683_v60, %v2671_v32  ;;  %v2761_v61 = vrot.slane %v6454_v9, %v7959_v28  ;;  %v2819_v59 = vrot.slane %v6455_v63, %v7969_v31 }
 0xa35   : > { %v2716_v42 = vmul.f32 %v2699_v10, %v2692_v22  ;;  %v2719_v43 = vmul.f32 %v2711_v50, %v2686_v24  ;;  %v2747_v10 = vsel %vm516_vm4, %v9479_v39, %v9443_v41  ;;  %v2743_v50 = vsel %vm516_vm4, %v9460_v29, %v9471_v35 }
 0xa36   : > { %v2774_v60 = vmul.f32 %v2753_v52, %v2747_v10  ;;  %v2776_v41 = vmul.f32 %v2761_v61, %v2743_v50  ;;  %v6779_v29 = vpack.c.bf16 %v9240_v37, %v9344_v0  ;;  %v6815_v35 = vpack.c.bf16 %v9250_v54, %v9354_v17 }
 0xa37   : > { %v6773_v44 = vpack.c.bf16 %v2720_v11, %v2716_v42  ;;  %v2725_v34 = vpop.permute.xlu0 %2724  ;;  %v6807_v27 = vpack.c.bf16 %v2723_v48, %v2719_v43  ;;  %v2843_v43 = vpop.permute.xlu1 %2842  ;;  %v6817_v37 = vpack.c.bf16 %v9245_v26, %v9352_v49  ;;  %v2811_v0 = vrot.slane %v6455_v63, %v7942_v20 }
 0xa38   : > { %v2807_v17 = vrot.slane %v6455_v63, %v7967_v30 }
 0xa39   : > { %6774 = vmatpush1.bf16.msra.mxu0 %v6773_v44  ;;  %6808 = vmatprep.subr.bf16.mxu1 %v6807_v27  ;;  %v6781_v44 = vpack.c.bf16 %v9235_v57, %v9342_v51  ;;  %v2799_v57 = vsel %vm572_vm5, %v9502_v53, %v9512_v58 }
 0xa3a   : > { %6810 = vmatpush1.bf16.msra.mxu1 %v6809_v18 }
 0xa3b   : > { %v2729_v47 = vpop.permute.xlu0 %2728  ;;  %v2847_v51 = vpop.permute.xlu1 %2846 }
 0xa3c   : > { %v2744_v32 = vsel %vm516_vm4, %v2725_v34, %v2729_v47 }
 0xa3d   : > { %v2771_v46 = vmul.f32 %v2757_v12, %v2744_v32  ;;  %v2815_v12 = vrot.slane %v6455_v63, %v7959_v28  ;;  %v2828_v32 = vmul.f32 %v2807_v17, %v2799_v57 }
 0xa3f   : > { %v2733_v14 = vpop.permute.xlu0 %2732  ;;  %v6775_v25 = vpack.c.bf16 %v2775_v62, %v2771_v46  ;;  %v2795_v62 = vsel %vm572_vm5, %v9520_v23, %v9542_v56 }
 0xa40   : > { %v2742_v33 = vsel %vm516_vm4, %v2729_v47, %v2733_v14 }
 0xa41   : > { %6776 = vmatprep.subr.bf16.mxu0 %v6775_v25  ;;  %v2772_v38 = vmul.f32 %v2761_v61, %v2742_v33  ;;  %v2830_v33 = vmul.f32 %v2815_v12, %v2795_v62 }
 0xa43   : > { %v2737_v40 = vpop.permute.xlu0 %2736  ;;  %v6813_v42 = vpack.c.bf16 %v2776_v41, %v2772_v38 }
 0xa44   : > { %v2740_v15 = vsel %vm516_vm4, %v2733_v14, %v2737_v40  ;;  %v2746_v16 = vsel %vm516_vm4, %v2737_v40, %v2725_v34  ;;  %v2797_v34 = vsel %vm572_vm5, %v9512_v58, %v9520_v23  ;;  %v2801_v58 = vsel %vm572_vm5, %v9542_v56, %v9502_v53  ;;  %v2889_v23 = vpop.permute.xlu1 %2888  ;;  %v6456_v53 = vld [vmem:[%s11826_s9 + $0x18] sm:$0xf] }
 0xa45   : > { %v2770_v24 = vmul.f32 %v2753_v52, %v2746_v16  ;;  %v2773_v22 = vmul.f32 %v2765_v45, %v2740_v15  ;;  %v2829_v18 = vmul.f32 %v2811_v0, %v2797_v34  ;;  %v2831_v61 = vmul.f32 %v2819_v59, %v2801_v58 }
 0xa46   : > { %v2865_v16 = vrot.slane %v6456_v53, %v7942_v20 }
 0xa47   : > { %v6777_v39 = vpack.c.bf16 %v2774_v60, %v2770_v24  ;;  %v2779_v11 = vpop.permute.xlu0 %2778  ;;  %v6811_v48 = vpack.c.bf16 %v2777_v55, %v2773_v22  ;;  %v2861_v55 = vrot.slane %v6456_v53, %v7967_v30  ;;  %v2851_v24 = vsel %vm628_vm6, %v9570_v36, %v2843_v43 }
 0xa48   : > { %v2893_v15 = vpop.permute.xlu1 %2892  ;;  %v2853_v22 = vsel %vm628_vm6, %v9551_v21, %v9570_v36  ;;  %v2855_v36 = vsel %vm628_vm6, %v2847_v51, %v9551_v21  ;;  %v6457_v21 = vld [vmem:[%s11826_s9 + $0x1c] sm:$0xf] }
 0xa49   : > { %6778 = vmatpush1.bf16.msra.mxu0 %v6777_v39  ;;  %6812 = vmatprep.subr.bf16.mxu1 %v6811_v48  ;;  %v2883_v48 = vmul.f32 %v2865_v16, %v2851_v24  ;;  %v2915_v58 = vrot.slane %v6457_v21, %v7967_v30 }
 0xa4a   : > { %6780 = vmatprep.subr.bf16.mxu0 %v6779_v29  ;;  %6814 = vmatpush1.bf16.msra.mxu1 %v6813_v42  ;;  %v2869_v42 = vrot.slane %v6456_v53, %v7959_v28  ;;  %v2873_v29 = vrot.slane %v6456_v53, %v7969_v31 }
 0xa4b   : > { %v2783_v9 = vpop.permute.xlu0 %2782  ;;  %6816 = vmatprep.subr.bf16.mxu1 %v6815_v35 }
 0xa4c   : > { %v2798_v54 = vsel %vm572_vm5, %v2779_v11, %v2783_v9  ;;  %v2897_v63 = vpop.permute.xlu1 %2896 }
 0xa4d   : > { %6782 = vmatpush1.bf16.msra.mxu0 %v6781_v44  ;;  %v2824_v49 = vmul.f32 %v2807_v17, %v2798_v54  ;;  %v2849_v44 = vsel %vm628_vm6, %v2843_v43, %v2847_v51 }
 0xa4e   : > { %6818 = vmatpush1.bf16.msra.mxu1 %v6817_v37  ;;  %v2884_v57 = vmul.f32 %v2869_v42, %v2849_v44 }
 0xa4f   : > { %v2787_v26 = vpop.permute.xlu0 %2786  ;;  %v6785_v25 = vpack.c.bf16 %v2828_v32, %v2824_v49 }
 0xa50   : > { %v2796_v27 = vsel %vm572_vm5, %v2783_v9, %v2787_v26  ;;  %v2882_v9 = vmul.f32 %v2861_v55, %v2853_v22 }
 0xa51   : > { %v2825_v47 = vmul.f32 %v2811_v0, %v2796_v27 }
 0xa53   : > { %v2791_v46 = vpop.permute.xlu0 %2790  ;;  %v6783_v14 = vpack.c.bf16 %v2829_v18, %v2825_v47  ;;  %v2919_v47 = vrot.slane %v6457_v21, %v7942_v20 }
 0xa54   : > { %v2794_v52 = vsel %vm572_vm5, %v2787_v26, %v2791_v46  ;;  %v2800_v45 = vsel %vm572_vm5, %v2791_v46, %v2779_v11  ;;  %v2885_v26 = vmul.f32 %v2873_v29, %v2855_v36  ;;  %v2905_v46 = vsel %vm684_vm7, %v2893_v15, %v2897_v63 }
 0xa55   : > { %v2826_v13 = vmul.f32 %v2815_v12, %v2794_v52  ;;  %v2827_v10 = vmul.f32 %v2819_v59, %v2800_v45  ;;  %6784 = vmatprep.subr.bf16.mxu0 %v6783_v14  ;;  %v2901_v12 = vpop.permute.xlu1 %2900  ;;  %v2907_v14 = vsel %vm684_vm7, %v2889_v23, %v2893_v15 }
 0xa56   : > { %6786 = vmatpush1.bf16.msra.mxu0 %v6785_v25 }
 0xa57   : > { %v6821_v50 = vpack.c.bf16 %v2830_v33, %v2826_v13  ;;  %v2833_v40 = vpop.permute.xlu0 %2832  ;;  %v6819_v38 = vpack.c.bf16 %v2831_v61, %v2827_v10  ;;  %v2937_v33 = vmul.f32 %v2919_v47, %v2905_v46  ;;  %v2923_v61 = vrot.slane %v6457_v21, %v7959_v28 }
 0xa58   : > { %v2927_v13 = vrot.slane %v6457_v21, %v7969_v31 }
 0xa59   : > { %6820 = vmatprep.subr.bf16.mxu1 %v6819_v38  ;;  %v2943_v62 = vpop.permute.xlu1 %2942  ;;  %v2909_v38 = vsel %vm684_vm7, %v2901_v12, %v2889_v23 }
 0xa5a   : > { %6822 = vmatpush1.bf16.msra.mxu1 %v6821_v50  ;;  %v2936_v50 = vmul.f32 %v2915_v58, %v2907_v14  ;;  %v2939_v22 = vmul.f32 %v2927_v13, %v2909_v38 }
 0xa5b   : > { %v2837_v56 = vpop.permute.xlu0 %2836 }
 0xa5c   : > { %v2852_v60 = vsel %vm628_vm6, %v2833_v40, %v2837_v56 }
 0xa5d   : > { %v2878_v39 = vmul.f32 %v2861_v55, %v2852_v60  ;;  %v2947_v53 = vpop.permute.xlu1 %2946 }
 0xa5f   : > { %v2841_v41 = vpop.permute.xlu0 %2840  ;;  %v6789_v54 = vpack.c.bf16 %v2882_v9, %v2878_v39 }
 0xa60   : > { %v2850_v11 = vsel %vm628_vm6, %v2837_v56, %v2841_v41 }
 0xa61   : > { %v2879_v35 = vmul.f32 %v2865_v16, %v2850_v11  ;;  %v2951_v23 = vpop.permute.xlu1 %2950 }
 0xa62   : > { %v2959_v36 = vsel %vm740_vm8, %v2947_v53, %v2951_v23 }
 0xa63   : > { %v2845_v37 = vpop.permute.xlu0 %2844  ;;  %v6787_v0 = vpack.c.bf16 %v2883_v48, %v2879_v35 }
 0xa64   : > { %v2848_v17 = vsel %vm628_vm6, %v2841_v41, %v2845_v37  ;;  %v2854_v34 = vsel %vm628_vm6, %v2845_v37, %v2833_v40  ;;  %v2903_v40 = vsel %vm684_vm7, %v2897_v63, %v2901_v12  ;;  %v2961_v37 = vsel %vm740_vm8, %v2943_v62, %v2947_v53 }
 0xa65   : > { %v2880_v49 = vmul.f32 %v2869_v42, %v2848_v17  ;;  %v2881_v27 = vmul.f32 %v2873_v29, %v2854_v34  ;;  %6788 = vmatprep.subr.bf16.mxu0 %v6787_v0  ;;  %v2938_v24 = vmul.f32 %v2923_v61, %v2903_v40  ;;  %v6458_v29 = vld [vmem:[%s11826_s9 + $0x20] sm:$0xf]  ;;  %v2955_v0 = vpop.permute.xlu1 %2954 }
 0xa66   : > { %6790 = vmatpush1.bf16.msra.mxu0 %v6789_v54  ;;  %v2973_v63 = vrot.slane %v6458_v29, %v7942_v20  ;;  %v2969_v44 = vrot.slane %v6458_v29, %v7967_v30  ;;  %v2977_v20 = vrot.slane %v6458_v29, %v7959_v28  ;;  %v2957_v30 = vsel %vm740_vm8, %v2951_v23, %v2955_v0 }
 0xa67   : > { %v6825_v43 = vpack.c.bf16 %v2884_v57, %v2880_v49  ;;  %v2887_v18 = vpop.permute.xlu0 %2886  ;;  %v6823_v59 = vpack.c.bf16 %v2885_v26, %v2881_v27  ;;  %v2981_v26 = vrot.slane %v6458_v29, %v7969_v31 }
 0xa68   : > { %v2991_v57 = vmul.f32 %v2973_v63, %v2959_v36  ;;  %v2990_v27 = vmul.f32 %v2969_v44, %v2961_v37  ;;  %v2992_v28 = vmul.f32 %v2977_v20, %v2957_v30 }
 0xa69   : > { %6824 = vmatprep.subr.bf16.mxu1 %v6823_v59 }
 0xa6a   : > { %6826 = vmatpush1.bf16.msra.mxu1 %v6825_v43  ;;  %v2963_v43 = vsel %vm740_vm8, %v2955_v0, %v2943_v62 }
 0xa6b   : > { %v2891_v51 = vpop.permute.xlu0 %2890 }
 0xa6c   : > { %v2906_v32 = vsel %vm684_vm7, %v2887_v18, %v2891_v51 }
 0xa6d   : > { %v2932_v52 = vmul.f32 %v2915_v58, %v2906_v32 }
 0xa6f   : > { %v2895_v25 = vpop.permute.xlu0 %2894  ;;  %v6793_v16 = vpack.c.bf16 %v2936_v50, %v2932_v52 }
 0xa70   : > { %v2904_v45 = vsel %vm684_vm7, %v2891_v51, %v2895_v25 }
 0xa71   : > { %v2933_v10 = vmul.f32 %v2919_v47, %v2904_v45  ;;  %v2993_v47 = vmul.f32 %v2981_v26, %v2963_v43 }
 0xa73   : > { %v2899_v56 = vpop.permute.xlu0 %2898  ;;  %v6791_v15 = vpack.c.bf16 %v2937_v33, %v2933_v10 }
 0xa74   : > { %v2902_v60 = vsel %vm684_vm7, %v2895_v25, %v2899_v56  ;;  %v2908_v55 = vsel %vm684_vm7, %v2899_v56, %v2887_v18 }
 0xa75   : > { %v2934_v41 = vmul.f32 %v2923_v61, %v2902_v60  ;;  %v2935_v39 = vmul.f32 %v2927_v13, %v2908_v55  ;;  %6792 = vmatprep.subr.bf16.mxu0 %v6791_v15 }
 0xa76   : > { %6794 = vmatpush1.bf16.msra.mxu0 %v6793_v16 }
 0xa77   : > { %v6829_v11 = vpack.c.bf16 %v2938_v24, %v2934_v41  ;;  %v2941_v48 = vpop.permute.xlu0 %2940  ;;  %v6827_v42 = vpack.c.bf16 %v2939_v22, %v2935_v39 }
 0xa79   : > { %6828 = vmatprep.subr.bf16.mxu1 %v6827_v42 }
 0xa7a   : > { %6830 = vmatpush1.bf16.msra.mxu1 %v6829_v11 }
 0xa7b   : > { %v2945_v35 = vpop.permute.xlu0 %2944 }
 0xa7c   : > { %v2960_v9 = vsel %vm740_vm8, %v2941_v48, %v2945_v35 }
 0xa7d   : > { %v2986_v17 = vmul.f32 %v2969_v44, %v2960_v9 }
 0xa7f   : > { %v2949_v54 = vpop.permute.xlu0 %2948  ;;  %v6797_v59 = vpack.c.bf16 %v2990_v27, %v2986_v17 }
 0xa80   : > { %v2958_v34 = vsel %vm740_vm8, %v2945_v35, %v2949_v54 }
 0xa81   : > { %v2987_v49 = vmul.f32 %v2973_v63, %v2958_v34 }
 0xa83   : > { %v2953_v18 = vpop.permute.xlu0 %2952  ;;  %v6795_v12 = vpack.c.bf16 %v2991_v57, %v2987_v49 }
 0xa84   : > { %v2956_v21 = vsel %vm740_vm8, %v2949_v54, %v2953_v18  ;;  %v2962_v51 = vsel %vm740_vm8, %v2953_v18, %v2941_v48 }
 0xa85   : > { %v2988_v31 = vmul.f32 %v2977_v20, %v2956_v21  ;;  %v2989_v32 = vmul.f32 %v2981_v26, %v2962_v51  ;;  %6796 = vmatprep.subr.bf16.mxu0 %v6795_v12 }
 0xa86   : > { %6798 = vmatpush1.bf16.msra.mxu0 %v6797_v59 }
 0xa87   : > { %v6833_v58 = vpack.c.bf16 %v2992_v28, %v2988_v31  ;;  %v6831_v46 = vpack.c.bf16 %v2993_v47, %v2989_v32 }
 0xa89   : > { %3059 = vmatmul.mubr.f32.vlgmr.msra.gmra.mrb[12].mxu0 %v7775_v1  ;;  %6832 = vmatprep.subr.bf16.mxu1 %v6831_v46 }
 0xa8a   : > { %6834 = vmatpush1.bf16.msra.mxu1 %v6833_v58  ;;  %6460 = vmatprep.mubr.msk.f32.mxu0 %vm780_vm0, %v7781_v4 }
 0xa8d   : > { %3136 = vmatmul.mubr.f32.vlgmr.msra.gmra.mrb[12].mxu1 %v7775_v1  ;;  %3065 = vmatmul.mubr.f32.gmra.mrb[14].mxu0 %v7779_v3 }
 0xa8e   : > { %6462 = vmatprep.mubr.msk.f32.mxu1 %vm780_vm0, %v7781_v4 }
 0xa91   : > { %3142 = vmatmul.mubr.f32.gmra.mrb[14].mxu1 %v7779_v3 }
 0xb5c   : > { %v9696_v19 = vpop.f32.mrb[12].mxu0 }
 0xb5d   : > { %v3156_v62 = vmul.f32 %v9696_v19, %v9696_v19  ;;  %v9700_v14 = vpop.f32.mrb[13].mxu0 }
 0xb5e   : > { %v3148_v25 = vadd.f32 %v9700_v14, %v9696_v19  ;;  %v3157_v52 = vmul.f32 %v9700_v14, %v9700_v14 }
 0xb60   : > { %3149 = vadd.xlane.f32.xlu0 %v3148_v25  ;;  %v9706_v45 = vpop.f32.mrb[12].mxu1  ;;  %v3160_v33 = vadd.f32 %v3157_v52, %v3156_v62  ;;  %v9708_v61 = vpop.f32.mrb[14].mxu0 }
 0xb61   : > { %v3222_v13 = vmul.f32 %v9706_v45, %v9706_v45  ;;  %v9712_v10 = vpop.f32.mrb[13].mxu1  ;;  %v3158_v50 = vmul.f32 %v9708_v61, %v9708_v61  ;;  %v9716_v40 = vpop.f32.mrb[15].mxu0 }
 0xb62   : > { %v3214_v38 = vadd.f32 %v9712_v10, %v9706_v45  ;;  %v3223_v53 = vmul.f32 %v9712_v10, %v9712_v10  ;;  %v3151_v56 = vadd.f32 %v9716_v40, %v9708_v61  ;;  %v3159_v15 = vmul.f32 %v9716_v40, %v9716_v40 }
 0xb64   : > { %3161 = vadd.xlane.f32.xlu0 %v3160_v33  ;;  %v9726_v16 = vpop.f32.mrb[14].mxu1  ;;  %v3226_v60 = vadd.f32 %v3223_v53, %v3222_v13  ;;  %v3163_v55 = vadd.f32 %v3159_v15, %v3158_v50  ;;  %3152 = vadd.xlane.f32.xlu1 %v3151_v56 }
 0xb65   : > { %v3224_v24 = vmul.f32 %v9726_v16, %v9726_v16  ;;  %v9730_v22 = vpop.f32.mrb[15].mxu1 }
 0xb66   : > { %v3217_v41 = vadd.f32 %v9730_v22, %v9726_v16  ;;  %v3225_v39 = vmul.f32 %v9730_v22, %v9730_v22 }
 0xb68   : > { %3215 = vadd.xlane.f32.xlu0 %v3214_v38  ;;  %v3229_v11 = vadd.f32 %v3225_v39, %v3224_v24 }
 0xb6c   : > { %3227 = vadd.xlane.f32.xlu0 %v3226_v60 }
 0xb70   : > { %3218 = vadd.xlane.f32.xlu0 %v3217_v41 }
 0xb74   : > { %3164 = vadd.xlane.f32.xlu0 %v3163_v55 }
 0xb78   : > { %3230 = vadd.xlane.f32.xlu0 %v3229_v11 }
 0xbed   : > { %v3150_v48 = vpop.xlane.xlu0 %3149 }
 0xbee   : > { %v3154_v42 = vmul.f32 0.00390625, %v3150_v48 }
 0xbf0   : > { %v3168_v29 = vmul.f32 %v3154_v42, %v3154_v42 }
 0xbf1   : > { %v3162_v23 = vpop.xlane.xlu0 %3161  ;;  %v3153_v0 = vpop.xlane.xlu1 %3152 }
 0xbf2   : > { %v3166_v35 = vmul.f32 0.00390625, %v3162_v23  ;;  %v3155_v57 = vmul.f32 0.00390625, %v3153_v0 }
 0xbf4   : > { %v3170_v63 = vsub.f32 %v3166_v35, %v3168_v29  ;;  %v3169_v49 = vmul.f32 %v3155_v57, %v3155_v57 }
 0xbf5   : > { %v3216_v9 = vpop.xlane.xlu0 %3215 }
 0xbf6   : > { %v3172_v44 = vadd.f32 1e-05, %v3170_v63  ;;  %v3220_v36 = vmul.f32 0.00390625, %v3216_v9 }
 0xbf8   : > { %7287 = vrsqrt.f32 %v3172_v44  ;;  %v3234_v54 = vmul.f32 %v3220_v36, %v3220_v36 }
 0xbf9   : > { %v3228_v37 = vpop.xlane.xlu0 %3227 }
 0xbfa   : > { %v3232_v17 = vmul.f32 0.00390625, %v3228_v37 }
 0xbfc   : > { %v3236_v34 = vsub.f32 %v3232_v17, %v3234_v54 }
 0xbfd   : > { %v3219_v20 = vpop.xlane.xlu0 %3218 }
 0xbfe   : > { %v3238_v26 = vadd.f32 1e-05, %v3236_v34  ;;  %v3221_v43 = vmul.f32 0.00390625, %v3219_v20 }
 0xc00   : > { %7289 = vrsqrt.f32 %v3238_v26  ;;  %v3235_v51 = vmul.f32 %v3221_v43, %v3221_v43 }
 0xc01   : > { %v3165_v27 = vpop.xlane.xlu0 %3164 }
 0xc02   : > { %v7288_v30 = vpop.eup %7287  ;;  %v3167_v18 = vmul.f32 0.00390625, %v3165_v27 }
 0xc03   : > { %v3176_v12 = vmul.f32 %v7288_v30, %v7786_v5 }
 0xc04   : > { %v3171_v59 = vsub.f32 %v3167_v18, %v3169_v49 }
 0xc05   : > { %3180 = vperm.xlu1 %7261, %v3176_v12   ;;  %v3231_v21 = vpop.xlane.xlu0 %3230  ;;  %v3192_v62 = vmul.f32 %v3176_v12, %v3154_v42 }
 0xc06   : > { %v3173_v28 = vadd.f32 1e-05, %v3171_v59  ;;  %v3233_v47 = vmul.f32 0.00390625, %v3231_v21 }
 0xc07   : > { %v3194_v25 = vsub.f32 %v7796_v7, %v3192_v62 }
 0xc08   : > { %7291 = vrsqrt.f32 %v3173_v28  ;;  %v3237_v31 = vsub.f32 %v3233_v47, %v3235_v51 }
 0xc0a   : > { %v7290_v32 = vpop.eup %7289  ;;  %v3239_v58 = vadd.f32 1e-05, %v3237_v31 }
 0xc0b   : > { %v3242_v46 = vmul.f32 %v7290_v32, %v7786_v5 }
 0xc0c   : > { %7293 = vrsqrt.f32 %v3239_v58 }
 0xc0d   : > { %3246 = vperm.xlu1 %7261, %v3242_v46   ;;  %v3258_v38 = vmul.f32 %v3242_v46, %v3220_v36 }
 0xc0f   : > { %v3260_v53 = vsub.f32 %v7796_v7, %v3258_v38 }
 0xc11   : > { %3198 = vperm.xlu1 %7261, %v3194_v25  }
 0xc12   : > { %v7292_v52 = vpop.eup %7291 }
 0xc13   : > { %v3177_v33 = vmul.f32 %v7292_v52, %v7791_v6 }
 0xc15   : > { %3185 = vperm.xlu0 %7262, %v3177_v33   ;;  %v3193_v56 = vmul.f32 %v3177_v33, %v3155_v57 }
 0xc16   : > { %v7294_v13 = vpop.eup %7293 }
 0xc17   : > { %v3243_v50 = vmul.f32 %v7294_v13, %v7791_v6  ;;  %v3195_v15 = vsub.f32 %v7801_v8, %v3193_v56 }
 0xc19   : > { %3251 = vperm.xlu1 %7261, %v3243_v50   ;;  %v3259_v60 = vmul.f32 %v3243_v50, %v3221_v43 }
 0xc1b   : > { %v3261_v55 = vsub.f32 %v7801_v8, %v3259_v60 }
 0xc1d   : > { %3264 = vperm.xlu1 %7261, %v3260_v53  }
 0xc21   : > { %3203 = vperm.xlu1 %7261, %v3195_v15  }
 0xc25   : > { %3269 = vperm.xlu1 %7261, %v3261_v55  }
 0xc84   : > { %v3181_v24 = vpop.permute.xlu1 %3180 }
 0xc85   : > { %v3188_v23 = vmul.f32 %v3181_v24, %v9696_v19  ;;  %v3189_v29 = vmul.f32 %v3181_v24, %v9700_v14 }
 0xc8c   : > { %v3247_v41 = vpop.permute.xlu1 %3246 }
 0xc8d   : > { %v3254_v54 = vmul.f32 %v3247_v41, %v9706_v45  ;;  %v3255_v17 = vmul.f32 %v3247_v41, %v9712_v10 }
 0xc90   : > { %v3199_v39 = vpop.permute.xlu1 %3198 }
 0xc91   : > { %v3206_v44 = vadd.f32 %v3199_v39, %v3188_v23  ;;  %v3207_v36 = vadd.f32 %v3199_v39, %v3189_v29 }
 0xc94   : > { %v3186_v48 = vpop.permute.xlu0 %3185 }
 0xc95   : > { %v3190_v35 = vmul.f32 %v3186_v48, %v9708_v61  ;;  %v3191_v63 = vmul.f32 %v3186_v48, %v9716_v40 }
 0xc98   : > { %v3252_v11 = vpop.permute.xlu1 %3251 }
 0xc99   : > { %v3256_v34 = vmul.f32 %v3252_v11, %v9726_v16  ;;  %v3257_v19 = vmul.f32 %v3252_v11, %v9730_v22 }
 0xc9c   : > { %v3265_v42 = vpop.permute.xlu1 %3264 }
 0xc9d   : > { %v3272_v61 = vadd.f32 %v3265_v42, %v3254_v54  ;;  %v3273_v20 = vadd.f32 %v3265_v42, %v3255_v17 }
 0xca0   : > { %v3204_v9 = vpop.permute.xlu1 %3203 }
 0xca1   : > { %v3208_v37 = vadd.f32 %v3204_v9, %v3190_v35  ;;  %v3209_v0 = vadd.f32 %v3204_v9, %v3191_v63 }
 0xca3   : > { %v3210_v14 = vadd.f32 %v3208_v37, %v3206_v44  ;;  %v3211_v57 = vadd.f32 %v3209_v0, %v3207_v36 }
 0xca4   : > { %v3270_v40 = vpop.permute.xlu1 %3269 }
 0xca5   : > { %v3212_v26 = vmax.f32 %v3210_v14, 0.0  ;;  %v3213_v49 = vmax.f32 %v3211_v57, 0.0  ;;  %v3274_v27 = vadd.f32 %v3270_v40, %v3256_v34  ;;  %v3275_v30 = vadd.f32 %v3270_v40, %v3257_v19 }
 0xca7   : > { %3280 = vst [vmem:[#allocation2] sm:$0xff] %v3212_v26  ;;  %3281 = vst [vmem:[#allocation2 + $0x8] sm:$0xff] %v3213_v49  ;;  %v3276_v45 = vadd.f32 %v3274_v27, %v3272_v61  ;;  %v3277_v10 = vadd.f32 %v3275_v30, %v3273_v20 }
 0xca8   : > { %6463 = vst [vmem:[%s7772_s18 + $0x60] sm:$0xff] %v3212_v26  ;;  %6464 = vst [vmem:[%s7772_s18 + $0x68] sm:$0xff] %v3213_v49 }
 0xca9   : > { %v3278_v16 = vmax.f32 %v3276_v45, 0.0  ;;  %v3279_v43 = vmax.f32 %v3277_v10, 0.0 }
 0xcab   : > { %3282 = vst [vmem:[#allocation2 + $0x10] sm:$0xff] %v3278_v16  ;;  %3283 = vst [vmem:[#allocation2 + $0x18] sm:$0xff] %v3279_v43 }
 0xcac   : > { %6465 = vst [vmem:[%s7772_s18 + $0x70] sm:$0xff] %v3278_v16  ;;  %6466 = vst [vmem:[%s7772_s18 + $0x78] sm:$0xff] %v3279_v43 }
 0xcad PF: > { %p6467_p10 = scmp.ne.s32.totalorder %s7501_s25, 1 }
 0xcae   : > { %v9757_v22 = vld [vmem:[#allocation2 + $0x8] sm:$0xff] (!%p6467_p10)  ;;  %v9759_v18 = vld [vmem:[#allocation2] sm:$0xff] (!%p6467_p10)  ;;  %s7531_s9 = smov (!%p6467_p10), 17   ;;  %v9776_v21 = vld [vmem:[%s7759_s15 + $0x70] sm:$0xff] (!%p6467_p10)  ;;  %s7532_s27 = smov (!%p6467_p10), 16   ;;  %v3318_v31 = vlaneseq (!%p6467_p10)  ;;  %vm3751_vm9 = vcmask (!%p6467_p10), 130048  }
 0xcaf   : > { %3292 = sbr.rel (%p6467_p10) target bundleno = 6365 (0x18dd), region = 60  ;;  %3306 = vrot.lane.b32.xlu1 (!%p6467_p10), %v9757_v22, %s7531_s9  ;;  %3302 = vrot.lane.b32.xlu0 (!%p6467_p10), %v9759_v18, %s7531_s9  ;;  %v9766_v12 = vld [vmem:[%s7759_s15 + $0x68] sm:$0xff] (!%p6467_p10)  ;;  %v9769_v59 = vld [vmem:[%s7759_s15 + $0x60] sm:$0xff] (!%p6467_p10)  ;;  %s7533_s26 = smov (!%p6467_p10), 15  }
 0xcb0   : > { %v9785_v28 = vld [vmem:[%s7759_s15 + $0x78] sm:$0xff] (!%p6467_p10)  ;;  %s7534_s29 = smov (!%p6467_p10), 1   ;;  %s7535_s14 = smov (!%p6467_p10), 127   ;;  %v3332_v32 = vshrl.u32 (!%p6467_p10), %v3318_v31, 7  ;;  %v9889_v58 = vand.u32 (!%p6467_p10), 127, %v3318_v31  ;;  %6479 = vmatprep.mubr.msk.f32.mxu0 (!%p6467_p10), %vm3751_vm9, %v7777_v2  ;;  %6481 = vmatprep.mubr.msk.f32.mxu1 (!%p6467_p10), %vm3751_vm9, %v7777_v2 }
 0xcb1   : > { %s7536_s10 = smov (!%p6467_p10), 113   ;;  %s7537_s6 = smov (!%p6467_p10), 112  }
 0xcb2   : > { %v9778_v51 = vld [vmem:[#allocation2 + $0x10] sm:$0xff] (!%p6467_p10)  ;;  %v9787_v47 = vld [vmem:[#allocation2 + $0x18] sm:$0xff] (!%p6467_p10)  ;;  %s7538_s7 = smov (!%p6467_p10), 111   ;;  %v9895_v46 = vsub.s32 (!%p6467_p10), 1, %v3332_v32  ;;  %s11827_s30 = sld [smem:[#allocation19_spill]] (!%p6467_p10)  ;;  %vm3320_vm10 = vcmp.lt.s32.totalorder (!%p6467_p10), %v9889_v58, 17 }
 0xcb3   : > { %3308 = vrot.lane.b32.xlu1 (!%p6467_p10), %v9766_v12, %s7531_s9  ;;  %3304 = vrot.lane.b32.xlu0 (!%p6467_p10), %v9769_v59, %s7531_s9  ;;  %v9912_v53 = vsub.s32 (!%p6467_p10), 2, %v3332_v32  ;;  %v9920_v15 = vsub.s32 (!%p6467_p10), 0, %v3332_v32  ;;  %v9922_v60 = vsub.s32 (!%p6467_p10), 3, %v3332_v32  ;;  %vm3375_vm11 = vcmp.lt.s32.totalorder (!%p6467_p10), %v9889_v58, 16 }
 0xcb4   : > { %vm3431_vm12 = vcmp.lt.s32.totalorder (!%p6467_p10), %v9889_v58, 15  ;;  %vm3487_vm13 = vcmp.lt.s32.totalorder (!%p6467_p10), %v9889_v58, 1  ;;  %vm3543_vm14 = vcmp.lt.s32.totalorder (!%p6467_p10), %v9889_v58, 127  ;;  %vm3599_vm15 = vcmp.lt.s32.totalorder (!%p6467_p10), %v9889_v58, 113 }
 0xcb5   : > { %vm3655_vm0 = vcmp.lt.s32.totalorder (!%p6467_p10), %v9889_v58, 112  ;;  %vm3711_vm1 = vcmp.lt.s32.totalorder (!%p6467_p10), %v9889_v58, 111 }
 0xcb7   : > { %3312 = vrot.lane.b32.xlu1 %v9776_v21, %s7531_s9  ;;  %3310 = vrot.lane.b32.xlu0 %v9778_v51, %s7531_s9 }
 0xcb8   : > { %v3329_v62 = vld [vmem:[%s11827_s30] sm:$0xf]  ;;  %v6472_v61 = vld [vmem:[%s11827_s30 + $0x4] sm:$0xf] }
 0xcb9   : > { %v3338_v33 = vrot.slane %v3329_v62, %v9895_v46  ;;  %v3342_v48 = vrot.slane %v3329_v62, %v9912_v53  ;;  %v3334_v29 = vrot.slane %v3329_v62, %v9920_v15  ;;  %v3346_v35 = vrot.slane %v3329_v62, %v9922_v60 }
 0xcba   : > { %v3394_v30 = vrot.slane %v6472_v61, %v9895_v46  ;;  %v3398_v62 = vrot.slane %v6472_v61, %v9912_v53 }
 0xcbb   : > { %3316 = vrot.lane.b32.xlu1 %v9785_v28, %s7531_s9  ;;  %3314 = vrot.lane.b32.xlu0 %v9787_v47, %s7531_s9 }
 0xcbf   : > { %3361 = vrot.lane.b32.xlu1 %v9769_v59, %s7532_s27  ;;  %3359 = vrot.lane.b32.xlu0 %v9759_v18, %s7532_s27 }
 0xcc3   : > { %3365 = vrot.lane.b32.xlu1 %v9766_v12, %s7532_s27  ;;  %3363 = vrot.lane.b32.xlu0 %v9757_v22, %s7532_s27 }
 0xcc7   : > { %3369 = vrot.lane.b32.xlu1 %v9776_v21, %s7532_s27  ;;  %3367 = vrot.lane.b32.xlu0 %v9778_v51, %s7532_s27 }
 0xccb   : > { %3373 = vrot.lane.b32.xlu1 %v9785_v28, %s7532_s27  ;;  %3371 = vrot.lane.b32.xlu0 %v9787_v47, %s7532_s27 }
 0xccf   : > { %3417 = vrot.lane.b32.xlu1 %v9769_v59, %s7533_s26  ;;  %3415 = vrot.lane.b32.xlu0 %v9759_v18, %s7533_s26 }
 0xcd3   : > { %3421 = vrot.lane.b32.xlu1 %v9766_v12, %s7533_s26  ;;  %3419 = vrot.lane.b32.xlu0 %v9757_v22, %s7533_s26 }
 0xcd7   : > { %3425 = vrot.lane.b32.xlu1 %v9776_v21, %s7533_s26  ;;  %3423 = vrot.lane.b32.xlu0 %v9778_v51, %s7533_s26 }
 0xcdb   : > { %3429 = vrot.lane.b32.xlu1 %v9785_v28, %s7533_s26  ;;  %3427 = vrot.lane.b32.xlu0 %v9787_v47, %s7533_s26 }
 0xcdf   : > { %3473 = vrot.lane.b32.xlu1 %v9769_v59, %s7534_s29  ;;  %3471 = vrot.lane.b32.xlu0 %v9759_v18, %s7534_s29 }
 0xce3   : > { %3477 = vrot.lane.b32.xlu1 %v9766_v12, %s7534_s29  ;;  %3475 = vrot.lane.b32.xlu0 %v9757_v22, %s7534_s29 }
 0xce7   : > { %3481 = vrot.lane.b32.xlu1 %v9776_v21, %s7534_s29  ;;  %3479 = vrot.lane.b32.xlu0 %v9778_v51, %s7534_s29 }
 0xceb   : > { %3485 = vrot.lane.b32.xlu1 %v9785_v28, %s7534_s29  ;;  %3483 = vrot.lane.b32.xlu0 %v9787_v47, %s7534_s29 }
 0xcef   : > { %3529 = vrot.lane.b32.xlu1 %v9769_v59, %s7535_s14  ;;  %3527 = vrot.lane.b32.xlu0 %v9759_v18, %s7535_s14 }
 0xcf3   : > { %3533 = vrot.lane.b32.xlu1 %v9766_v12, %s7535_s14  ;;  %3531 = vrot.lane.b32.xlu0 %v9757_v22, %s7535_s14 }
 0xcf7   : > { %3537 = vrot.lane.b32.xlu1 %v9776_v21, %s7535_s14  ;;  %3535 = vrot.lane.b32.xlu0 %v9778_v51, %s7535_s14 }
 0xcfb   : > { %3541 = vrot.lane.b32.xlu1 %v9785_v28, %s7535_s14  ;;  %3539 = vrot.lane.b32.xlu0 %v9787_v47, %s7535_s14 }
 0xcff   : > { %3585 = vrot.lane.b32.xlu1 %v9769_v59, %s7536_s10  ;;  %3583 = vrot.lane.b32.xlu0 %v9759_v18, %s7536_s10 }
 0xd03   : > { %3589 = vrot.lane.b32.xlu1 %v9766_v12, %s7536_s10  ;;  %3587 = vrot.lane.b32.xlu0 %v9757_v22, %s7536_s10 }
 0xd07   : > { %3593 = vrot.lane.b32.xlu1 %v9776_v21, %s7536_s10  ;;  %3591 = vrot.lane.b32.xlu0 %v9778_v51, %s7536_s10 }
 0xd0b   : > { %3597 = vrot.lane.b32.xlu1 %v9785_v28, %s7536_s10  ;;  %3595 = vrot.lane.b32.xlu0 %v9787_v47, %s7536_s10 }
 0xd0f   : > { %3641 = vrot.lane.b32.xlu1 %v9769_v59, %s7537_s6  ;;  %3639 = vrot.lane.b32.xlu0 %v9759_v18, %s7537_s6 }
 0xd13   : > { %3645 = vrot.lane.b32.xlu1 %v9766_v12, %s7537_s6  ;;  %3643 = vrot.lane.b32.xlu0 %v9757_v22, %s7537_s6 }
 0xd17   : > { %3649 = vrot.lane.b32.xlu1 %v9776_v21, %s7537_s6  ;;  %3647 = vrot.lane.b32.xlu0 %v9778_v51, %s7537_s6 }
 0xd1b   : > { %3653 = vrot.lane.b32.xlu1 %v9785_v28, %s7537_s6  ;;  %3651 = vrot.lane.b32.xlu0 %v9787_v47, %s7537_s6 }
 0xd1f   : > { %3697 = vrot.lane.b32.xlu1 %v9769_v59, %s7538_s7  ;;  %3695 = vrot.lane.b32.xlu0 %v9759_v18, %s7538_s7 }
 0xd21   : > { %v3307_v25 = vpop.permute.xlu1 %3306  ;;  %v3303_v52 = vpop.permute.xlu0 %3302 }
 0xd22   : > { %v3325_v13 = vsel %vm3320_vm10, %v3303_v52, %v3307_v25 }
 0xd23   : > { %3701 = vrot.lane.b32.xlu1 %v9766_v12, %s7538_s7  ;;  %3699 = vrot.lane.b32.xlu0 %v9757_v22, %s7538_s7  ;;  %v3352_v55 = vmul.f32 %v3338_v33, %v3325_v13 }
 0xd25   : > { %v3309_v50 = vpop.permute.xlu1 %3308  ;;  %v3305_v38 = vpop.permute.xlu0 %3304 }
 0xd26   : > { %v3326_v56 = vsel %vm3320_vm10, %v3305_v38, %v3309_v50 }
 0xd27   : > { %3705 = vrot.lane.b32.xlu1 %v9776_v21, %s7538_s7  ;;  %3703 = vrot.lane.b32.xlu0 %v9778_v51, %s7538_s7  ;;  %v3356_v24 = vmul.f32 %v3338_v33, %v3326_v56  ;;  %v3402_v56 = vrot.slane %v6472_v61, %v9922_v60 }
 0xd29   : > { %v3313_v41 = vpop.permute.xlu1 %3312  ;;  %v3311_v39 = vpop.permute.xlu0 %3310  ;;  %v6835_v11 = vpack.c.bf16 %v3356_v24, %v3352_v55 }
 0xd2a   : > { %v3324_v42 = vsel %vm3320_vm10, %v3309_v50, %v3313_v41  ;;  %v3323_v23 = vsel %vm3320_vm10, %v3307_v25, %v3311_v39 }
 0xd2b   : > { %3709 = vrot.lane.b32.xlu1 %v9785_v28, %s7538_s7  ;;  %3707 = vrot.lane.b32.xlu0 %v9787_v47, %s7538_s7  ;;  %v3353_v44 = vmul.f32 %v3342_v48, %v3323_v23  ;;  %v3357_v36 = vmul.f32 %v3342_v48, %v3324_v42 }
 0xd2c   : > { %6836 = vmatprep.subr.bf16.mxu0 %v6835_v11 }
 0xd2d   : > { %v3317_v63 = vpop.permute.xlu1 %3316  ;;  %v3315_v9 = vpop.permute.xlu0 %3314  ;;  %v6873_v27 = vpack.c.bf16 %v3357_v36, %v3353_v44  ;;  %v6473_v44 = vld [vmem:[%s11827_s30 + $0x8] sm:$0xf] }
 0xd2e   : > { %v3328_v37 = vsel %vm3320_vm10, %v3317_v63, %v3305_v38  ;;  %v3327_v0 = vsel %vm3320_vm10, %v3315_v9, %v3303_v52  ;;  %v3321_v54 = vsel %vm3320_vm10, %v3311_v39, %v3315_v9  ;;  %v3322_v17 = vsel %vm3320_vm10, %v3313_v41, %v3317_v63 }
 0xd2f   : > { %v3351_v34 = vmul.f32 %v3334_v29, %v3327_v0  ;;  %v3355_v19 = vmul.f32 %v3334_v29, %v3328_v37  ;;  %v3354_v14 = vmul.f32 %v3346_v35, %v3321_v54  ;;  %v3358_v57 = vmul.f32 %v3346_v35, %v3322_v17 }
 0xd30   : > { %v3390_v38 = vrot.slane %v6472_v61, %v9920_v15 }
 0xd31   : > { %v3362_v20 = vpop.permute.xlu1 %3361  ;;  %v3360_v40 = vpop.permute.xlu0 %3359  ;;  %v6837_v26 = vpack.c.bf16 %v3355_v19, %v3351_v34  ;;  %v6871_v49 = vpack.c.bf16 %v3358_v57, %v3354_v14  ;;  %v3450_v34 = vrot.slane %v6473_v44, %v9895_v46 }
 0xd33   : > { %6838 = vmatpush1.bf16.msra.mxu0 %v6837_v26  ;;  %6872 = vmatprep.subr.bf16.mxu1 %v6871_v49  ;;  %v3454_v26 = vrot.slane %v6473_v44, %v9912_v53 }
 0xd34   : > { %6874 = vmatpush1.bf16.msra.mxu1 %v6873_v27 }
 0xd35   : > { %v3366_v45 = vpop.permute.xlu1 %3365  ;;  %v3364_v10 = vpop.permute.xlu0 %3363 }
 0xd36   : > { %v3381_v16 = vsel %vm3375_vm11, %v3362_v20, %v3366_v45  ;;  %v3380_v43 = vsel %vm3375_vm11, %v3360_v40, %v3364_v10 }
 0xd37   : > { %v3412_v31 = vmul.f32 %v3394_v30, %v3381_v16  ;;  %v3408_v32 = vmul.f32 %v3394_v30, %v3380_v43  ;;  %v3446_v16 = vrot.slane %v6473_v44, %v9920_v15  ;;  %v3458_v43 = vrot.slane %v6473_v44, %v9922_v60 }
 0xd39   : > { %v3370_v25 = vpop.permute.xlu1 %3369  ;;  %v3368_v52 = vpop.permute.xlu0 %3367  ;;  %v6839_v33 = vpack.c.bf16 %v3412_v31, %v3408_v32 }
 0xd3a   : > { %v3379_v13 = vsel %vm3375_vm11, %v3366_v45, %v3370_v25  ;;  %v3378_v50 = vsel %vm3375_vm11, %v3364_v10, %v3368_v52 }
 0xd3b   : > { %6840 = vmatprep.subr.bf16.mxu0 %v6839_v33  ;;  %v3413_v55 = vmul.f32 %v3398_v62, %v3379_v13  ;;  %v3409_v24 = vmul.f32 %v3398_v62, %v3378_v50 }
 0xd3d   : > { %v3374_v41 = vpop.permute.xlu1 %3373  ;;  %v3372_v39 = vpop.permute.xlu0 %3371  ;;  %v6877_v17 = vpack.c.bf16 %v3413_v55, %v3409_v24 }
 0xd3e   : > { %v3377_v11 = vsel %vm3375_vm11, %v3370_v25, %v3374_v41  ;;  %v3383_v48 = vsel %vm3375_vm11, %v3374_v41, %v3362_v20  ;;  %v3376_v42 = vsel %vm3375_vm11, %v3368_v52, %v3372_v39  ;;  %v3382_v23 = vsel %vm3375_vm11, %v3372_v39, %v3360_v40  ;;  %v6474_v41 = vld [vmem:[%s11827_s30 + $0xc] sm:$0xf] }
 0xd3f   : > { %v3411_v29 = vmul.f32 %v3390_v38, %v3383_v48  ;;  %v3414_v35 = vmul.f32 %v3402_v56, %v3377_v11  ;;  %v3407_v63 = vmul.f32 %v3390_v38, %v3382_v23  ;;  %v3410_v9 = vmul.f32 %v3402_v56, %v3376_v42 }
 0xd41   : > { %v3418_v36 = vpop.permute.xlu1 %3417  ;;  %v3416_v37 = vpop.permute.xlu0 %3415  ;;  %v6841_v0 = vpack.c.bf16 %v3411_v29, %v3407_v63  ;;  %v6875_v54 = vpack.c.bf16 %v3414_v35, %v3410_v9  ;;  %v3506_v29 = vrot.slane %v6474_v41, %v9895_v46 }
 0xd43   : > { %6842 = vmatpush1.bf16.msra.mxu0 %v6841_v0  ;;  %6876 = vmatprep.subr.bf16.mxu1 %v6875_v54  ;;  %v3510_v0 = vrot.slane %v6474_v41, %v9912_v53 }
 0xd44   : > { %6878 = vmatpush1.bf16.msra.mxu1 %v6877_v17 }
 0xd45   : > { %v3422_v19 = vpop.permute.xlu1 %3421  ;;  %v3420_v14 = vpop.permute.xlu0 %3419 }
 0xd46   : > { %v3437_v57 = vsel %vm3431_vm12, %v3418_v36, %v3422_v19  ;;  %v3436_v61 = vsel %vm3431_vm12, %v3416_v37, %v3420_v14 }
 0xd47   : > { %v3468_v20 = vmul.f32 %v3450_v34, %v3437_v57  ;;  %v3464_v40 = vmul.f32 %v3450_v34, %v3436_v61  ;;  %v3502_v57 = vrot.slane %v6474_v41, %v9920_v15  ;;  %v3514_v61 = vrot.slane %v6474_v41, %v9922_v60 }
 0xd49   : > { %v3426_v49 = vpop.permute.xlu1 %3425  ;;  %v3424_v27 = vpop.permute.xlu0 %3423  ;;  %v6843_v30 = vpack.c.bf16 %v3468_v20, %v3464_v40 }
 0xd4a   : > { %v3435_v45 = vsel %vm3431_vm12, %v3422_v19, %v3426_v49  ;;  %v3434_v10 = vsel %vm3431_vm12, %v3420_v14, %v3424_v27 }
 0xd4b   : > { %6844 = vmatprep.subr.bf16.mxu0 %v6843_v30  ;;  %v3469_v31 = vmul.f32 %v3454_v26, %v3435_v45  ;;  %v3465_v32 = vmul.f32 %v3454_v26, %v3434_v10 }
 0xd4d   : > { %v3430_v62 = vpop.permute.xlu1 %3429  ;;  %v3428_v25 = vpop.permute.xlu0 %3427  ;;  %v6881_v23 = vpack.c.bf16 %v3469_v31, %v3465_v32 }
 0xd4e   : > { %v3433_v52 = vsel %vm3431_vm12, %v3426_v49, %v3430_v62  ;;  %v3439_v33 = vsel %vm3431_vm12, %v3430_v62, %v3418_v36  ;;  %v3432_v13 = vsel %vm3431_vm12, %v3424_v27, %v3428_v25  ;;  %v3438_v50 = vsel %vm3431_vm12, %v3428_v25, %v3416_v37 }
 0xd4f   : > { %v3467_v38 = vmul.f32 %v3446_v16, %v3439_v33  ;;  %v3470_v56 = vmul.f32 %v3458_v43, %v3433_v52  ;;  %v3463_v55 = vmul.f32 %v3446_v16, %v3438_v50  ;;  %v3466_v24 = vmul.f32 %v3458_v43, %v3432_v13 }
 0xd50   : > { %v6851_v62 = vpack.c.bf16 %v9766_v12, %v9757_v22  ;;  %v6887_v50 = vpack.c.bf16 %v9785_v28, %v9787_v47  ;;  %v6889_v22 = vpack.c.bf16 %v9776_v21, %v9778_v51 }
 0xd51   : > { %v3474_v39 = vpop.permute.xlu1 %3473  ;;  %v3472_v11 = vpop.permute.xlu0 %3471  ;;  %v6845_v48 = vpack.c.bf16 %v3467_v38, %v3463_v55  ;;  %v6879_v42 = vpack.c.bf16 %v3470_v56, %v3466_v24  ;;  %v6475_v56 = vld [vmem:[%s11827_s30 + $0x14] sm:$0xf]  ;;  %v6853_v55 = vpack.c.bf16 %v9769_v59, %v9759_v18 }
 0xd52   : > { %v3558_v12 = vrot.slane %v6475_v56, %v9920_v15 }
 0xd53   : > { %6846 = vmatpush1.bf16.msra.mxu0 %v6845_v48  ;;  %6880 = vmatprep.subr.bf16.mxu1 %v6879_v42 }
 0xd54   : > { %6882 = vmatpush1.bf16.msra.mxu1 %v6881_v23 }
 0xd55   : > { %v3478_v35 = vpop.permute.xlu1 %3477  ;;  %v3476_v63 = vpop.permute.xlu0 %3475 }
 0xd56   : > { %v3493_v9 = vsel %vm3487_vm13, %v3474_v39, %v3478_v35  ;;  %v3492_v44 = vsel %vm3487_vm13, %v3472_v11, %v3476_v63 }
 0xd57   : > { %v3524_v36 = vmul.f32 %v3506_v29, %v3493_v9  ;;  %v3520_v37 = vmul.f32 %v3506_v29, %v3492_v44  ;;  %v3566_v29 = vrot.slane %v6475_v56, %v9912_v53 }
 0xd59   : > { %v3482_v54 = vpop.permute.xlu1 %3481  ;;  %v3480_v17 = vpop.permute.xlu0 %3479  ;;  %v6847_v34 = vpack.c.bf16 %v3524_v36, %v3520_v37 }
 0xd5a   : > { %v3491_v19 = vsel %vm3487_vm13, %v3478_v35, %v3482_v54  ;;  %v3490_v14 = vsel %vm3487_vm13, %v3476_v63, %v3480_v17  ;;  %v3570_v35 = vrot.slane %v6475_v56, %v9922_v60 }
 0xd5b   : > { %6848 = vmatprep.subr.bf16.mxu0 %v6847_v34  ;;  %v3525_v20 = vmul.f32 %v3510_v0, %v3491_v19  ;;  %v3521_v40 = vmul.f32 %v3510_v0, %v3490_v14 }
 0xd5d   : > { %v3486_v26 = vpop.permute.xlu1 %3485  ;;  %v3484_v49 = vpop.permute.xlu0 %3483  ;;  %v6885_v38 = vpack.c.bf16 %v3525_v20, %v3521_v40 }
 0xd5e   : > { %v3489_v27 = vsel %vm3487_vm13, %v3482_v54, %v3486_v26  ;;  %v3495_v30 = vsel %vm3487_vm13, %v3486_v26, %v3474_v39  ;;  %v3488_v45 = vsel %vm3487_vm13, %v3480_v17, %v3484_v49  ;;  %v3494_v10 = vsel %vm3487_vm13, %v3484_v49, %v3472_v11  ;;  %v6476_v49 = vld [vmem:[%s11827_s30 + $0x18] sm:$0xf] }
 0xd5f   : > { %v3523_v16 = vmul.f32 %v3502_v57, %v3495_v30  ;;  %v3526_v43 = vmul.f32 %v3514_v61, %v3489_v27  ;;  %v3519_v31 = vmul.f32 %v3502_v57, %v3494_v10  ;;  %v3522_v32 = vmul.f32 %v3514_v61, %v3488_v45 }
 0xd60   : > { %v3562_v39 = vrot.slane %v6475_v56, %v9895_v46  ;;  %v3614_v27 = vrot.slane %v6476_v49, %v9920_v15  ;;  %v3626_v56 = vrot.slane %v6476_v49, %v9922_v60 }
 0xd61   : > { %v3530_v25 = vpop.permute.xlu1 %3529  ;;  %v3528_v52 = vpop.permute.xlu0 %3527  ;;  %v6849_v33 = vpack.c.bf16 %v3523_v16, %v3519_v31  ;;  %v6883_v13 = vpack.c.bf16 %v3526_v43, %v3522_v32  ;;  %v3618_v43 = vrot.slane %v6476_v49, %v9895_v46 }
 0xd63   : > { %6850 = vmatpush1.bf16.msra.mxu0 %v6849_v33  ;;  %6884 = vmatprep.subr.bf16.mxu1 %v6883_v13 }
 0xd64   : > { %6886 = vmatpush1.bf16.msra.mxu1 %v6885_v38  ;;  %6852 = vmatprep.subr.bf16.mxu0 %v6851_v62  ;;  %v3622_v38 = vrot.slane %v6476_v49, %v9912_v53 }
 0xd65   : > { %v3534_v28 = vpop.permute.xlu1 %3533  ;;  %v3532_v47 = vpop.permute.xlu0 %3531  ;;  %6888 = vmatprep.subr.bf16.mxu1 %v6887_v50 }
 0xd66   : > { %v3549_v24 = vsel %vm3543_vm14, %v3530_v25, %v3534_v28  ;;  %v3548_v41 = vsel %vm3543_vm14, %v3528_v52, %v3532_v47 }
 0xd67   : > { %6854 = vmatpush1.bf16.msra.mxu0 %v6853_v55  ;;  %v3579_v18 = vmul.f32 %v3558_v12, %v3549_v24  ;;  %v3575_v59 = vmul.f32 %v3558_v12, %v3548_v41 }
 0xd68   : > { %6890 = vmatpush1.bf16.msra.mxu1 %v6889_v22 }
 0xd69   : > { %v3538_v11 = vpop.permute.xlu1 %3537  ;;  %v3536_v48 = vpop.permute.xlu0 %3535  ;;  %v6857_v36 = vpack.c.bf16 %v3579_v18, %v3575_v59 }
 0xd6a   : > { %v3547_v21 = vsel %vm3543_vm14, %v3534_v28, %v3538_v11  ;;  %v3546_v51 = vsel %vm3543_vm14, %v3532_v47, %v3536_v48 }
 0xd6b   : > { %v3580_v42 = vmul.f32 %v3562_v39, %v3547_v21  ;;  %v3576_v23 = vmul.f32 %v3562_v39, %v3546_v51 }
 0xd6d   : > { %v3542_v63 = vpop.permute.xlu1 %3541  ;;  %v3540_v9 = vpop.permute.xlu0 %3539  ;;  %v6855_v44 = vpack.c.bf16 %v3580_v42, %v3576_v23 }
 0xd6e   : > { %v3545_v37 = vsel %vm3543_vm14, %v3538_v11, %v3542_v63  ;;  %v3551_v0 = vsel %vm3543_vm14, %v3542_v63, %v3530_v25  ;;  %v3544_v54 = vsel %vm3543_vm14, %v3536_v48, %v3540_v9  ;;  %v3550_v17 = vsel %vm3543_vm14, %v3540_v9, %v3528_v52 }
 0xd6f   : > { %v3581_v34 = vmul.f32 %v3566_v29, %v3545_v37  ;;  %v3582_v19 = vmul.f32 %v3570_v35, %v3551_v0  ;;  %v3577_v14 = vmul.f32 %v3566_v29, %v3544_v54  ;;  %v3578_v57 = vmul.f32 %v3570_v35, %v3550_v17  ;;  %6856 = vmatprep.subr.bf16.mxu0 %v6855_v44  ;;  %v6477_v29 = vld [vmem:[%s11827_s30 + $0x1c] sm:$0xf] }
 0xd70   : > { %6858 = vmatpush1.bf16.msra.mxu0 %v6857_v36  ;;  %v3670_v35 = vrot.slane %v6477_v29, %v9920_v15  ;;  %v3674_v37 = vrot.slane %v6477_v29, %v9895_v46 }
 0xd71   : > { %v3586_v61 = vpop.permute.xlu1 %3585  ;;  %v3584_v20 = vpop.permute.xlu0 %3583  ;;  %v6891_v40 = vpack.c.bf16 %v3582_v19, %v3578_v57  ;;  %v6893_v26 = vpack.c.bf16 %v3581_v34, %v3577_v14 }
 0xd73   : > { %6892 = vmatprep.subr.bf16.mxu1 %v6891_v40  ;;  %v3682_v40 = vrot.slane %v6477_v29, %v9922_v60 }
 0xd74   : > { %6894 = vmatpush1.bf16.msra.mxu1 %v6893_v26 }
 0xd75   : > { %v3590_v30 = vpop.permute.xlu1 %3589  ;;  %v3588_v45 = vpop.permute.xlu0 %3587 }
 0xd76   : > { %v3605_v10 = vsel %vm3599_vm15, %v3586_v61, %v3590_v30  ;;  %v3604_v16 = vsel %vm3599_vm15, %v3584_v20, %v3588_v45 }
 0xd77   : > { %v3635_v31 = vmul.f32 %v3614_v27, %v3605_v10  ;;  %v3631_v32 = vmul.f32 %v3614_v27, %v3604_v16 }
 0xd79   : > { %v3594_v62 = vpop.permute.xlu1 %3593  ;;  %v3592_v25 = vpop.permute.xlu0 %3591  ;;  %v6861_v28 = vpack.c.bf16 %v3635_v31, %v3631_v32 }
 0xd7a   : > { %v3603_v52 = vsel %vm3599_vm15, %v3590_v30, %v3594_v62  ;;  %v3602_v33 = vsel %vm3599_vm15, %v3588_v45, %v3592_v25 }
 0xd7b   : > { %v3636_v13 = vmul.f32 %v3618_v43, %v3603_v52  ;;  %v3632_v50 = vmul.f32 %v3618_v43, %v3602_v33 }
 0xd7d   : > { %v3598_v55 = vpop.permute.xlu1 %3597  ;;  %v3596_v22 = vpop.permute.xlu0 %3595  ;;  %v6859_v12 = vpack.c.bf16 %v3636_v13, %v3632_v50 }
 0xd7e   : > { %v3601_v47 = vsel %vm3599_vm15, %v3594_v62, %v3598_v55  ;;  %v3607_v24 = vsel %vm3599_vm15, %v3598_v55, %v3586_v61  ;;  %v3600_v41 = vsel %vm3599_vm15, %v3592_v25, %v3596_v22  ;;  %v3606_v39 = vsel %vm3599_vm15, %v3596_v22, %v3584_v20 }
 0xd7f   : > { %v3637_v18 = vmul.f32 %v3622_v38, %v3601_v47  ;;  %v3638_v59 = vmul.f32 %v3626_v56, %v3607_v24  ;;  %v3633_v11 = vmul.f32 %v3622_v38, %v3600_v41  ;;  %v3634_v48 = vmul.f32 %v3626_v56, %v3606_v39  ;;  %6860 = vmatprep.subr.bf16.mxu0 %v6859_v12  ;;  %v6478_v38 = vld [vmem:[%s11827_s30 + $0x20] sm:$0xf] }
 0xd80   : > { %6862 = vmatpush1.bf16.msra.mxu0 %v6861_v28  ;;  %v3678_v20 = vrot.slane %v6477_v29, %v9912_v53  ;;  %v3726_v56 = vrot.slane %v6478_v38, %v9920_v15  ;;  %v3730_v47 = vrot.slane %v6478_v38, %v9895_v46 }
 0xd81   : > { %v3642_v21 = vpop.permute.xlu1 %3641  ;;  %v3640_v51 = vpop.permute.xlu0 %3639  ;;  %v6895_v42 = vpack.c.bf16 %v3638_v59, %v3634_v48  ;;  %v6897_v23 = vpack.c.bf16 %v3637_v18, %v3633_v11 }
 0xd83   : > { %6896 = vmatprep.subr.bf16.mxu1 %v6895_v42  ;;  %v3738_v42 = vrot.slane %v6478_v38, %v9922_v60 }
 0xd84   : > { %6898 = vmatpush1.bf16.msra.mxu1 %v6897_v23 }
 0xd85   : > { %v3646_v63 = vpop.permute.xlu1 %3645  ;;  %v3644_v9 = vpop.permute.xlu0 %3643 }
 0xd86   : > { %v3661_v44 = vsel %vm3655_vm0, %v3642_v21, %v3646_v63  ;;  %v3660_v36 = vsel %vm3655_vm0, %v3640_v51, %v3644_v9 }
 0xd87   : > { %v3691_v0 = vmul.f32 %v3670_v35, %v3661_v44  ;;  %v3687_v54 = vmul.f32 %v3670_v35, %v3660_v36 }
 0xd89   : > { %v3650_v17 = vpop.permute.xlu1 %3649  ;;  %v3648_v34 = vpop.permute.xlu0 %3647  ;;  %v6865_v30 = vpack.c.bf16 %v3691_v0, %v3687_v54 }
 0xd8a   : > { %v3659_v19 = vsel %vm3655_vm0, %v3646_v63, %v3650_v17  ;;  %v3658_v14 = vsel %vm3655_vm0, %v3644_v9, %v3648_v34 }
 0xd8b   : > { %v3692_v57 = vmul.f32 %v3674_v37, %v3659_v19  ;;  %v3688_v61 = vmul.f32 %v3674_v37, %v3658_v14 }
 0xd8d   : > { %v3654_v26 = vpop.permute.xlu1 %3653  ;;  %v3652_v49 = vpop.permute.xlu0 %3651  ;;  %v6863_v27 = vpack.c.bf16 %v3692_v57, %v3688_v61 }
 0xd8e   : > { %v3657_v45 = vsel %vm3655_vm0, %v3650_v17, %v3654_v26  ;;  %v3663_v10 = vsel %vm3655_vm0, %v3654_v26, %v3642_v21  ;;  %v3656_v16 = vsel %vm3655_vm0, %v3648_v34, %v3652_v49  ;;  %v3662_v43 = vsel %vm3655_vm0, %v3652_v49, %v3640_v51 }
 0xd8f   : > { %v3693_v31 = vmul.f32 %v3678_v20, %v3657_v45  ;;  %v3694_v32 = vmul.f32 %v3682_v40, %v3663_v10  ;;  %v3689_v62 = vmul.f32 %v3678_v20, %v3656_v16  ;;  %v3690_v25 = vmul.f32 %v3682_v40, %v3662_v43  ;;  %6864 = vmatprep.subr.bf16.mxu0 %v6863_v27 }
 0xd90   : > { %6866 = vmatpush1.bf16.msra.mxu0 %v6865_v30  ;;  %v3734_v51 = vrot.slane %v6478_v38, %v9912_v53 }
 0xd91   : > { %v3698_v52 = vpop.permute.xlu1 %3697  ;;  %v3696_v33 = vpop.permute.xlu0 %3695  ;;  %v6899_v13 = vpack.c.bf16 %v3694_v32, %v3690_v25  ;;  %v6901_v50 = vpack.c.bf16 %v3693_v31, %v3689_v62 }
 0xd93   : > { %6900 = vmatprep.subr.bf16.mxu1 %v6899_v13 }
 0xd94   : > { %6902 = vmatpush1.bf16.msra.mxu1 %v6901_v50 }
 0xd95   : > { %v3702_v55 = vpop.permute.xlu1 %3701  ;;  %v3700_v22 = vpop.permute.xlu0 %3699 }
 0xd96   : > { %v3717_v12 = vsel %vm3711_vm1, %v3698_v52, %v3702_v55  ;;  %v3716_v28 = vsel %vm3711_vm1, %v3696_v33, %v3700_v22 }
 0xd97   : > { %v3747_v24 = vmul.f32 %v3726_v56, %v3717_v12  ;;  %v3743_v41 = vmul.f32 %v3726_v56, %v3716_v28  ;;  %v10172_v12 = vld [vmem:[%s7759_s15 + $0x40] sm:$0xff]  ;;  %v10177_v28 = vld [vmem:[%s7759_s15 + $0x48] sm:$0xff] }
 0xd99   : > { %v3706_v39 = vpop.permute.xlu1 %3705  ;;  %v3704_v18 = vpop.permute.xlu0 %3703  ;;  %v6869_v63 = vpack.c.bf16 %v3747_v24, %v3743_v41  ;;  %v7539_v24 = vmov 0   ;;  %v10187_v41 = vld [vmem:[%s7759_s15 + $0x58] sm:$0xff] }
 0xd9a   : > { %v3715_v59 = vsel %vm3711_vm1, %v3702_v55, %v3706_v39  ;;  %v3714_v11 = vsel %vm3711_vm1, %v3700_v22, %v3704_v18  ;;  %7296 = vset.pattern.permute.xlu0 %v7539_v24  ;;  %7295 = vset.pattern.permute.xlu1 %v7539_v24 }
 0xd9b   : > { %v3748_v48 = vmul.f32 %v3730_v47, %v3715_v59  ;;  %v3744_v21 = vmul.f32 %v3730_v47, %v3714_v11  ;;  %v10182_v47 = vld [vmem:[%s7759_s15 + $0x50] sm:$0xff] }
 0xd9d   : > { %v3710_v23 = vpop.permute.xlu1 %3709  ;;  %v3708_v29 = vpop.permute.xlu0 %3707  ;;  %v6867_v35 = vpack.c.bf16 %v3748_v48, %v3744_v21 }
 0xd9e   : > { %v3713_v9 = vsel %vm3711_vm1, %v3706_v39, %v3710_v23  ;;  %v3719_v44 = vsel %vm3711_vm1, %v3710_v23, %v3698_v52  ;;  %v3712_v36 = vsel %vm3711_vm1, %v3704_v18, %v3708_v29  ;;  %v3718_v37 = vsel %vm3711_vm1, %v3708_v29, %v3696_v33 }
 0xd9f   : > { %v3749_v0 = vmul.f32 %v3734_v51, %v3713_v9  ;;  %v3750_v54 = vmul.f32 %v3738_v42, %v3719_v44  ;;  %v3745_v17 = vmul.f32 %v3734_v51, %v3712_v36  ;;  %v3746_v34 = vmul.f32 %v3738_v42, %v3718_v37  ;;  %6868 = vmatprep.subr.bf16.mxu0 %v6867_v35 }
 0xda0   : > { %6870 = vmatpush1.bf16.msra.mxu0 %v6869_v63 }
 0xda1   : > { %v6903_v19 = vpack.c.bf16 %v3750_v54, %v3746_v34  ;;  %v6905_v14 = vpack.c.bf16 %v3749_v0, %v3745_v17 }
 0xda3   : > { %3823 = vmatmul.mubr.f32.vlgmr.msra.gmra.mrb[0].mxu0 %v7775_v1  ;;  %6904 = vmatprep.subr.bf16.mxu1 %v6903_v19 }
 0xda4   : > { %6906 = vmatpush1.bf16.msra.mxu1 %v6905_v14  ;;  %6480 = vmatprep.mubr.msk.f32.mxu0 %vm3751_vm9, %v7781_v4 }
 0xda7   : > { %3900 = vmatmul.mubr.f32.vlgmr.msra.gmra.mrb[0].mxu1 %v7775_v1  ;;  %3829 = vmatmul.mubr.f32.gmra.mrb[2].mxu0 %v7779_v3 }
 0xda8   : > { %6482 = vmatprep.mubr.msk.f32.mxu1 %vm3751_vm9, %v7781_v4  ;;  %6498 = vmatprep.mubr.msk.f32.mxu0 %vm3751_vm9, %v7777_v2 }
 0xdab   : > { %3906 = vmatmul.mubr.f32.gmra.mrb[2].mxu1 %v7779_v3 }
 0xdac   : > { %6500 = vmatprep.mubr.msk.f32.mxu1 %vm3751_vm9, %v7777_v2 }
 0xe76   : > { %v10131_v57 = vpop.f32.mrb[0].mxu0 }
 0xe77   : > { %v10133_v61 = vpop.f32.mrb[1].mxu0  ;;  %v3920_v20 = vmul.f32 %v10131_v57, %v10131_v57 }
 0xe78   : > { %v3912_v40 = vadd.f32 %v10133_v61, %v10131_v57  ;;  %v3921_v26 = vmul.f32 %v10133_v61, %v10133_v61 }
 0xe7a   : > { %v10141_v49 = vpop.f32.mrb[0].mxu1  ;;  %3913 = vadd.xlane.f32.xlu0 %v3912_v40  ;;  %v3924_v27 = vadd.f32 %v3921_v26, %v3920_v20  ;;  %v10143_v30 = vpop.f32.mrb[2].mxu0 }
 0xe7b   : > { %v10145_v45 = vpop.f32.mrb[1].mxu1  ;;  %v10147_v10 = vpop.f32.mrb[3].mxu0  ;;  %v3986_v16 = vmul.f32 %v10141_v49, %v10141_v49  ;;  %v3922_v43 = vmul.f32 %v10143_v30, %v10143_v30 }
 0xe7c   : > { %3925 = vadd.xlane.f32.xlu1 %v3924_v27  ;;  %v3978_v31 = vadd.f32 %v10145_v45, %v10141_v49  ;;  %v3915_v32 = vadd.f32 %v10147_v10, %v10143_v30  ;;  %v3987_v62 = vmul.f32 %v10145_v45, %v10145_v45  ;;  %v3923_v25 = vmul.f32 %v10147_v10, %v10147_v10 }
 0xe7e   : > { %v10161_v52 = vpop.f32.mrb[2].mxu1  ;;  %3979 = vadd.xlane.f32.xlu0 %v3978_v31  ;;  %v3990_v33 = vadd.f32 %v3987_v62, %v3986_v16  ;;  %v3927_v13 = vadd.f32 %v3923_v25, %v3922_v43 }
 0xe7f   : > { %v10163_v50 = vpop.f32.mrb[3].mxu1  ;;  %v3988_v38 = vmul.f32 %v10161_v52, %v10161_v52 }
 0xe80   : > { %3916 = vadd.xlane.f32.xlu1 %v3915_v32  ;;  %v3981_v56 = vadd.f32 %v10163_v50, %v10161_v52  ;;  %v3989_v55 = vmul.f32 %v10163_v50, %v10163_v50 }
 0xe82   : > { %3982 = vadd.xlane.f32.xlu0 %v3981_v56  ;;  %v3993_v22 = vadd.f32 %v3989_v55, %v3988_v38 }
 0xe84   : > { %3991 = vadd.xlane.f32.xlu1 %v3990_v33 }
 0xe86   : > { %3928 = vadd.xlane.f32.xlu0 %v3927_v13 }
 0xe8a   : > { %3994 = vadd.xlane.f32.xlu0 %v3993_v22 }
 0xe95   : > { %4064 = vrot.lane.b32.xlu1 %v10172_v12, %s7531_s9 }
 0xe99   : > { %4068 = vrot.lane.b32.xlu1 %v10177_v28, %s7531_s9 }
 0xe9d   : > { %4072 = vrot.lane.b32.xlu1 %v10182_v47, %s7531_s9 }
 0xea1   : > { %4076 = vrot.lane.b32.xlu1 %v10187_v41, %s7531_s9 }
 0xea5   : > { %4118 = vrot.lane.b32.xlu1 %v10172_v12, %s7532_s27 }
 0xf07   : > { %v3914_v39 = vpop.xlane.xlu0 %3913 }
 0xf08   : > { %v3918_v18 = vmul.f32 0.00390625, %v3914_v39 }
 0xf09   : > { %v3926_v59 = vpop.xlane.xlu1 %3925 }
 0xf0a   : > { %v3932_v11 = vmul.f32 %v3918_v18, %v3918_v18  ;;  %v3930_v48 = vmul.f32 0.00390625, %v3926_v59 }
 0xf0b   : > { %v3980_v21 = vpop.xlane.xlu0 %3979 }
 0xf0c   : > { %v3934_v51 = vsub.f32 %v3930_v48, %v3932_v11  ;;  %v3984_v29 = vmul.f32 0.00390625, %v3980_v21 }
 0xf0d   : > { %v3917_v42 = vpop.xlane.xlu1 %3916 }
 0xf0e   : > { %v3936_v23 = vadd.f32 1e-05, %v3934_v51  ;;  %v3919_v63 = vmul.f32 0.00390625, %v3917_v42  ;;  %v3998_v44 = vmul.f32 %v3984_v29, %v3984_v29 }
 0xf0f   : > { %v3983_v35 = vpop.xlane.xlu0 %3982 }
 0xf10   : > { %7297 = vrsqrt.f32 %v3936_v23  ;;  %v3933_v0 = vmul.f32 %v3919_v63, %v3919_v63  ;;  %v3985_v54 = vmul.f32 0.00390625, %v3983_v35 }
 0xf11   : > { %v3992_v9 = vpop.xlane.xlu1 %3991 }
 0xf12   : > { %v3996_v36 = vmul.f32 0.00390625, %v3992_v9  ;;  %v3999_v40 = vmul.f32 %v3985_v54, %v3985_v54 }
 0xf13   : > { %v3929_v37 = vpop.xlane.xlu0 %3928 }
 0xf14   : > { %v4000_v17 = vsub.f32 %v3996_v36, %v3998_v44  ;;  %v3931_v34 = vmul.f32 0.00390625, %v3929_v37 }
 0xf16   : > { %v4002_v19 = vadd.f32 1e-05, %v4000_v17  ;;  %v3935_v14 = vsub.f32 %v3931_v34, %v3933_v0 }
 0xf17   : > { %v3995_v20 = vpop.xlane.xlu0 %3994 }
 0xf18   : > { %7299 = vrsqrt.f32 %v4002_v19  ;;  %v3937_v26 = vadd.f32 1e-05, %v3935_v14  ;;  %v3997_v27 = vmul.f32 0.00390625, %v3995_v20 }
 0xf1a   : > { %v7298_v16 = vpop.eup %7297  ;;  %7301 = vrsqrt.f32 %v3937_v26  ;;  %v4001_v43 = vsub.f32 %v3997_v27, %v3999_v40 }
 0xf1b   : > { %v3940_v31 = vmul.f32 %v7298_v16, %v7786_v5 }
 0xf1c   : > { %v4003_v32 = vadd.f32 1e-05, %v4001_v43 }
 0xf1d   : > { %3944 = vperm.xlu1 %7295, %v3940_v31   ;;  %v3956_v55 = vmul.f32 %v3940_v31, %v3918_v18  ;;  %v10239_v18 = vpop.permute.xlu1 %4064 }
 0xf1e   : > { %7303 = vrsqrt.f32 %v4003_v32 }
 0xf1f   : > { %v3958_v22 = vsub.f32 %v7796_v7, %v3956_v55 }
 0xf21   : > { %v10241_v51 = vpop.permute.xlu1 %4068 }
 0xf22   : > { %v7300_v62 = vpop.eup %7299 }
 0xf23   : > { %v4006_v25 = vmul.f32 %v7300_v62, %v7786_v5 }
 0xf24   : > { %v7302_v33 = vpop.eup %7301 }
 0xf25   : > { %4010 = vperm.xlu1 %7295, %v4006_v25   ;;  %v3941_v13 = vmul.f32 %v7302_v33, %v7791_v6  ;;  %v4022_v24 = vmul.f32 %v4006_v25, %v3984_v29  ;;  %v10243_v42 = vpop.permute.xlu1 %4072 }
 0xf27   : > { %3949 = vperm.xlu0 %7296, %v3941_v13   ;;  %v4024_v39 = vsub.f32 %v7796_v7, %v4022_v24  ;;  %v3957_v59 = vmul.f32 %v3941_v13, %v3919_v63 }
 0xf28   : > { %v7304_v38 = vpop.eup %7303 }
 0xf29   : > { %v4007_v56 = vmul.f32 %v7304_v38, %v7791_v6  ;;  %v3959_v11 = vsub.f32 %v7801_v8, %v3957_v59  ;;  %v10245_v23 = vpop.permute.xlu1 %4076 }
 0xf2b   : > { %4015 = vperm.xlu1 %7295, %v4007_v56   ;;  %v4023_v48 = vmul.f32 %v4007_v56, %v3985_v54 }
 0xf2d   : > { %v4025_v21 = vsub.f32 %v7801_v8, %v4023_v48  ;;  %v10247_v29 = vpop.permute.xlu1 %4118 }
 0xf2f   : > { %3962 = vperm.xlu1 %7295, %v3958_v22  }
 0xf33   : > { %4028 = vperm.xlu1 %7295, %v4024_v39  }
 0xf37   : > { %3967 = vperm.xlu1 %7295, %v3959_v11  }
 0xf3b   : > { %4033 = vperm.xlu1 %7295, %v4025_v21  }
 0xf3f   : > { %4122 = vrot.lane.b32.xlu1 %v10177_v28, %s7532_s27 }
 0xf43   : > { %4126 = vrot.lane.b32.xlu1 %v10182_v47, %s7532_s27 }
 0xf47   : > { %4130 = vrot.lane.b32.xlu1 %v10187_v41, %s7532_s27 }
 0xf4b   : > { %4172 = vrot.lane.b32.xlu1 %v10172_v12, %s7533_s26 }
 0xf4f   : > { %4176 = vrot.lane.b32.xlu1 %v10177_v28, %s7533_s26 }
 0xf53   : > { %4180 = vrot.lane.b32.xlu1 %v10182_v47, %s7533_s26 }
 0xf57   : > { %4184 = vrot.lane.b32.xlu1 %v10187_v41, %s7533_s26 }
 0xf5b   : > { %4226 = vrot.lane.b32.xlu1 %v10172_v12, %s7534_s29 }
 0xf5f   : > { %4230 = vrot.lane.b32.xlu1 %v10177_v28, %s7534_s29 }
 0xf63   : > { %4234 = vrot.lane.b32.xlu1 %v10182_v47, %s7534_s29 }
 0xf67   : > { %4238 = vrot.lane.b32.xlu1 %v10187_v41, %s7534_s29 }
 0xf6b   : > { %4280 = vrot.lane.b32.xlu1 %v10172_v12, %s7535_s14 }
 0xf6f   : > { %4284 = vrot.lane.b32.xlu1 %v10177_v28, %s7535_s14 }
 0xf73   : > { %4288 = vrot.lane.b32.xlu1 %v10182_v47, %s7535_s14 }
 0xf77   : > { %4292 = vrot.lane.b32.xlu1 %v10187_v41, %s7535_s14 }
 0xf7b   : > { %4334 = vrot.lane.b32.xlu1 %v10172_v12, %s7536_s10 }
 0xf7f   : > { %4338 = vrot.lane.b32.xlu1 %v10177_v28, %s7536_s10 }
 0xf83   : > { %4342 = vrot.lane.b32.xlu1 %v10182_v47, %s7536_s10 }
 0xf87   : > { %4346 = vrot.lane.b32.xlu1 %v10187_v41, %s7536_s10 }
 0xf9c   : > { %v3945_v35 = vpop.permute.xlu1 %3944 }
 0xf9d   : > { %v3952_v0 = vmul.f32 %v3945_v35, %v10131_v57  ;;  %v3953_v54 = vmul.f32 %v3945_v35, %v10133_v61 }
 0xfa4   : > { %v4011_v63 = vpop.permute.xlu1 %4010 }
 0xfa5   : > { %v4018_v27 = vmul.f32 %v4011_v63, %v10141_v49  ;;  %v4019_v16 = vmul.f32 %v4011_v63, %v10145_v45 }
 0xfa6   : > { %v3950_v36 = vpop.permute.xlu0 %3949 }
 0xfa7   : > { %v3954_v17 = vmul.f32 %v3950_v36, %v10143_v30  ;;  %v3955_v34 = vmul.f32 %v3950_v36, %v10147_v10 }
 0xfaa   : > { %v4016_v9 = vpop.permute.xlu1 %4015 }
 0xfab   : > { %v4020_v43 = vmul.f32 %v4016_v9, %v10161_v52  ;;  %v4021_v57 = vmul.f32 %v4016_v9, %v10163_v50 }
 0xfae   : > { %v3963_v44 = vpop.permute.xlu1 %3962 }
 0xfaf   : > { %v3970_v14 = vadd.f32 %v3963_v44, %v3952_v0  ;;  %v3971_v20 = vadd.f32 %v3963_v44, %v3953_v54 }
 0xfb2   : > { %v4029_v37 = vpop.permute.xlu1 %4028 }
 0xfb3   : > { %v4036_v30 = vadd.f32 %v4029_v37, %v4018_v27  ;;  %v4037_v10 = vadd.f32 %v4029_v37, %v4019_v16 }
 0xfb6   : > { %v3968_v19 = vpop.permute.xlu1 %3967 }
 0xfb7   : > { %v3972_v40 = vadd.f32 %v3968_v19, %v3954_v17  ;;  %v3973_v26 = vadd.f32 %v3968_v19, %v3955_v34  ;;  %v4086_v34 = vld [vmem:[%s11827_s30] sm:$0xf] }
 0xfb8   : > { %v4095_v19 = vrot.slane %v4086_v34, %v9895_v46 }
 0xfb9   : > { %v3974_v61 = vadd.f32 %v3972_v40, %v3970_v14  ;;  %v3975_v31 = vadd.f32 %v3973_v26, %v3971_v20  ;;  %v4083_v14 = vsel %vm3320_vm10, %v10239_v18, %v10241_v51 }
 0xfba   : > { %v4034_v32 = vpop.permute.xlu1 %4033  ;;  %v4113_v27 = vmul.f32 %v4095_v19, %v4083_v14 }
 0xfbb   : > { %v10257_v62 = vmax.f32 %v3974_v61, 0.0  ;;  %v10259_v25 = vmax.f32 %v3975_v31, 0.0  ;;  %v4038_v33 = vadd.f32 %v4034_v32, %v4020_v43  ;;  %v4039_v13 = vadd.f32 %v4034_v32, %v4021_v57 }
 0xfbc   : > { %v4091_v61 = vrot.slane %v4086_v34, %v9920_v15  ;;  %v4103_v31 = vrot.slane %v4086_v34, %v9922_v60  ;;  %v4079_v32 = vsel %vm3320_vm10, %v10243_v42, %v10245_v23 }
 0xfbd   : > { %6483 = vst [vmem:[%s7772_s18 + $0x60] sm:$0xff] %v10257_v62  ;;  %6484 = vst [vmem:[%s7772_s18 + $0x68] sm:$0xff] %v10259_v25  ;;  %v4040_v49 = vadd.f32 %v4038_v33, %v4036_v30  ;;  %v4041_v45 = vadd.f32 %v4039_v13, %v4037_v10  ;;  %4066 = vrot.lane.b32.xlu0 %v10259_v25, %s7531_s9  ;;  %4062 = vrot.lane.b32.xlu1 %v10257_v62, %s7531_s9 }
 0xfbe   : > { %v10273_v38 = vpop.permute.xlu1 %4122  ;;  %v4099_v10 = vrot.slane %v4086_v34, %v9912_v53  ;;  %v4085_v33 = vsel %vm3320_vm10, %v10245_v23, %v10239_v18  ;;  %v4081_v13 = vsel %vm3320_vm10, %v10241_v51, %v10243_v42  ;;  %v6491_v18 = vld [vmem:[%s11827_s30 + $0x4] sm:$0xf] }
 0xfbf   : > { %v10269_v52 = vmax.f32 %v4040_v49, 0.0  ;;  %v10271_v50 = vmax.f32 %v4041_v45, 0.0  ;;  %v4112_v14 = vmul.f32 %v4091_v61, %v4085_v33 }
 0xfc1   : > { %6485 = vst [vmem:[%s7772_s18 + $0x70] sm:$0xff] %v10269_v52  ;;  %6486 = vst [vmem:[%s7772_s18 + $0x78] sm:$0xff] %v10271_v50  ;;  %4070 = vrot.lane.b32.xlu0 %v10269_v52, %s7531_s9  ;;  %4388 = vrot.lane.b32.xlu1 %v10172_v12, %s7537_s6 }
 0xfc2   : > { %v10283_v56 = vpop.permute.xlu1 %4126 }
 0xfc5   : > { %4074 = vrot.lane.b32.xlu0 %v10271_v50, %s7531_s9  ;;  %4392 = vrot.lane.b32.xlu1 %v10177_v28, %s7537_s6 }
 0xfc6   : > { %v10293_v55 = vpop.permute.xlu1 %4130 }
 0xfc9   : > { %4116 = vrot.lane.b32.xlu0 %v10257_v62, %s7532_s27  ;;  %4396 = vrot.lane.b32.xlu1 %v10182_v47, %s7537_s6 }
 0xfca   : > { %v10299_v22 = vpop.permute.xlu1 %4172 }
 0xfcd   : > { %4120 = vrot.lane.b32.xlu0 %v10259_v25, %s7532_s27  ;;  %4400 = vrot.lane.b32.xlu1 %v10187_v41, %s7537_s6 }
 0xfce   : > { %v10307_v24 = vpop.permute.xlu1 %4176 }
 0xfd1   : > { %4124 = vrot.lane.b32.xlu0 %v10269_v52, %s7532_s27  ;;  %4442 = vrot.lane.b32.xlu1 %v10172_v12, %s7538_s7 }
 0xfd2   : > { %v10315_v39 = vpop.permute.xlu1 %4180 }
 0xfd5   : > { %4128 = vrot.lane.b32.xlu0 %v10271_v50, %s7532_s27  ;;  %4446 = vrot.lane.b32.xlu1 %v10177_v28, %s7538_s7 }
 0xfd6   : > { %v10323_v59 = vpop.permute.xlu1 %4184 }
 0xfd9   : > { %4170 = vrot.lane.b32.xlu0 %v10257_v62, %s7533_s26  ;;  %4450 = vrot.lane.b32.xlu1 %v10182_v47, %s7538_s7 }
 0xfda   : > { %v10327_v11 = vpop.permute.xlu1 %4226 }
 0xfdd   : > { %4174 = vrot.lane.b32.xlu0 %v10259_v25, %s7533_s26  ;;  %4454 = vrot.lane.b32.xlu1 %v10187_v41, %s7538_s7 }
 0xfde   : > { %v10333_v48 = vpop.permute.xlu1 %4230 }
 0xfe1   : > { %4178 = vrot.lane.b32.xlu0 %v10269_v52, %s7533_s26 }
 0xfe2   : > { %v10337_v21 = vpop.permute.xlu1 %4234 }
 0xfe5   : > { %4182 = vrot.lane.b32.xlu0 %v10271_v50, %s7533_s26 }
 0xfe6   : > { %v10343_v35 = vpop.permute.xlu1 %4238 }
 0xfe9   : > { %4224 = vrot.lane.b32.xlu0 %v10257_v62, %s7534_s29 }
 0xfea   : > { %v10347_v63 = vpop.permute.xlu1 %4280 }
 0xfed   : > { %4228 = vrot.lane.b32.xlu0 %v10259_v25, %s7534_s29 }
 0xfee   : > { %v10353_v9 = vpop.permute.xlu1 %4284 }
 0xff1   : > { %4232 = vrot.lane.b32.xlu0 %v10269_v52, %s7534_s29 }
 0xff2   : > { %v10357_v44 = vpop.permute.xlu1 %4288 }
 0xff5   : > { %4236 = vrot.lane.b32.xlu0 %v10271_v50, %s7534_s29 }
 0xff6   : > { %v10363_v36 = vpop.permute.xlu1 %4292 }
 0xff9   : > { %4278 = vrot.lane.b32.xlu0 %v10257_v62, %s7535_s14 }
 0xffa   : > { %v10367_v37 = vpop.permute.xlu1 %4334 }
 0xffd   : > { %4282 = vrot.lane.b32.xlu0 %v10259_v25, %s7535_s14 }
 0xffe   : > { %v10373_v0 = vpop.permute.xlu1 %4338 }
0x1001   : > { %4286 = vrot.lane.b32.xlu0 %v10269_v52, %s7535_s14 }
0x1002   : > { %v10377_v54 = vpop.permute.xlu1 %4342 }
0x1005   : > { %4290 = vrot.lane.b32.xlu0 %v10271_v50, %s7535_s14 }
0x1006   : > { %v10383_v17 = vpop.permute.xlu1 %4346 }
0x1009   : > { %4332 = vrot.lane.b32.xlu0 %v10257_v62, %s7536_s10 }
0x100d   : > { %4336 = vrot.lane.b32.xlu0 %v10259_v25, %s7536_s10 }
0x1011   : > { %4340 = vrot.lane.b32.xlu0 %v10269_v52, %s7536_s10 }
0x1015   : > { %4344 = vrot.lane.b32.xlu0 %v10271_v50, %s7536_s10 }
0x1019   : > { %4386 = vrot.lane.b32.xlu0 %v10257_v62, %s7537_s6 }
0x101d   : > { %4390 = vrot.lane.b32.xlu0 %v10259_v25, %s7537_s6 }
0x1021   : > { %4394 = vrot.lane.b32.xlu0 %v10269_v52, %s7537_s6 }
0x1025   : > { %4398 = vrot.lane.b32.xlu0 %v10271_v50, %s7537_s6 }
0x1029   : > { %4440 = vrot.lane.b32.xlu0 %v10257_v62, %s7538_s7 }
0x102d   : > { %4444 = vrot.lane.b32.xlu0 %v10259_v25, %s7538_s7 }
0x102f   : > { %v4067_v20 = vpop.permute.xlu0 %4066  ;;  %v4063_v40 = vpop.permute.xlu1 %4062 }
0x1030   : > { %v4082_v26 = vsel %vm3320_vm10, %v4063_v40, %v4067_v20 }
0x1031   : > { %v4109_v16 = vmul.f32 %v4095_v19, %v4082_v26  ;;  %4448 = vrot.lane.b32.xlu0 %v10269_v52, %s7538_s7 }
0x1033   : > { %v4071_v43 = vpop.permute.xlu0 %4070  ;;  %v6907_v57 = vpack.c.bf16 %v4113_v27, %v4109_v16  ;;  %v4114_v16 = vmul.f32 %v4099_v10, %v4081_v13  ;;  %v4145_v13 = vrot.slane %v6491_v18, %v9920_v15 }
0x1034   : > { %v4080_v30 = vsel %vm3320_vm10, %v4067_v20, %v4071_v43  ;;  %v4115_v20 = vmul.f32 %v4103_v31, %v4079_v32 }
0x1035   : > { %4452 = vrot.lane.b32.xlu0 %v10271_v50, %s7538_s7  ;;  %6908 = vmatprep.subr.bf16.mxu0 %v6907_v57  ;;  %v4110_v45 = vmul.f32 %v4099_v10, %v4080_v30  ;;  %v4149_v30 = vrot.slane %v6491_v18, %v9895_v46 }
0x1037   : > { %v4075_v49 = vpop.permute.xlu0 %4074  ;;  %v6945_v42 = vpack.c.bf16 %v4114_v16, %v4110_v45 }
0x1038   : > { %v4078_v34 = vsel %vm3320_vm10, %v4071_v43, %v4075_v49  ;;  %v4084_v19 = vsel %vm3320_vm10, %v4075_v49, %v4063_v40  ;;  %v4137_v40 = vsel %vm3375_vm11, %v10247_v29, %v10273_v38  ;;  %v4157_v49 = vrot.slane %v6491_v18, %v9922_v60 }
0x1039   : > { %v4108_v26 = vmul.f32 %v4091_v61, %v4084_v19  ;;  %v4111_v27 = vmul.f32 %v4103_v31, %v4078_v34  ;;  %v4167_v31 = vmul.f32 %v4149_v30, %v4137_v40  ;;  %v4153_v34 = vrot.slane %v6491_v18, %v9912_v53 }
0x103a   : > { %v4133_v19 = vsel %vm3375_vm11, %v10283_v56, %v10293_v55 }
0x103b   : > { %v6909_v23 = vpack.c.bf16 %v4112_v14, %v4108_v26  ;;  %v4117_v57 = vpop.permute.xlu0 %4116  ;;  %v6943_v51 = vpack.c.bf16 %v4115_v20, %v4111_v27  ;;  %v4139_v14 = vsel %vm3375_vm11, %v10293_v55, %v10247_v29  ;;  %v4135_v20 = vsel %vm3375_vm11, %v10273_v38, %v10283_v56  ;;  %v6492_v29 = vld [vmem:[%s11827_s30 + $0x8] sm:$0xf] }
0x103c   : > { %v4168_v40 = vmul.f32 %v4153_v34, %v4135_v20  ;;  %v4187_v20 = vsel %vm3431_vm12, %v10315_v39, %v10323_v59 }
0x103d   : > { %6910 = vmatpush1.bf16.msra.mxu0 %v6909_v23  ;;  %6944 = vmatprep.subr.bf16.mxu1 %v6943_v51  ;;  %v4166_v23 = vmul.f32 %v4145_v13, %v4139_v14  ;;  %v4169_v51 = vmul.f32 %v4157_v49, %v4133_v19  ;;  %v4207_v14 = vrot.slane %v6492_v29, %v9912_v53 }
0x103e   : > { %6946 = vmatpush1.bf16.msra.mxu1 %v6945_v42 }
0x103f   : > { %v4121_v43 = vpop.permute.xlu0 %4120 }
0x1040   : > { %v4136_v61 = vsel %vm3375_vm11, %v4117_v57, %v4121_v43 }
0x1041   : > { %v4163_v10 = vmul.f32 %v4149_v30, %v4136_v61  ;;  %v4203_v61 = vrot.slane %v6492_v29, %v9895_v46 }
0x1043   : > { %v4125_v32 = vpop.permute.xlu0 %4124  ;;  %v6911_v33 = vpack.c.bf16 %v4167_v31, %v4163_v10 }
0x1044   : > { %v4134_v45 = vsel %vm3375_vm11, %v4121_v43, %v4125_v32 }
0x1045   : > { %6912 = vmatprep.subr.bf16.mxu0 %v6911_v33  ;;  %v4164_v27 = vmul.f32 %v4153_v34, %v4134_v45  ;;  %v4199_v45 = vrot.slane %v6492_v29, %v9920_v15  ;;  %v4211_v34 = vrot.slane %v6492_v29, %v9922_v60 }
0x1047   : > { %v4129_v26 = vpop.permute.xlu0 %4128  ;;  %v6949_v56 = vpack.c.bf16 %v4168_v40, %v4164_v27  ;;  %v4189_v27 = vsel %vm3431_vm12, %v10307_v24, %v10315_v39 }
0x1048   : > { %v4132_v16 = vsel %vm3375_vm11, %v4125_v32, %v4129_v26  ;;  %v4138_v18 = vsel %vm3375_vm11, %v4129_v26, %v4117_v57  ;;  %v4191_v57 = vsel %vm3431_vm12, %v10299_v22, %v10307_v24  ;;  %v4193_v26 = vsel %vm3431_vm12, %v10323_v59, %v10299_v22  ;;  %v6493_v22 = vld [vmem:[%s11827_s30 + $0xc] sm:$0xf] }
0x1049   : > { %v4162_v42 = vmul.f32 %v4145_v13, %v4138_v18  ;;  %v4165_v30 = vmul.f32 %v4157_v49, %v4132_v16  ;;  %v4221_v32 = vmul.f32 %v4203_v61, %v4191_v57 }
0x104b   : > { %v6913_v55 = vpack.c.bf16 %v4166_v23, %v4162_v42  ;;  %v4171_v43 = vpop.permute.xlu0 %4170  ;;  %v6947_v38 = vpack.c.bf16 %v4169_v51, %v4165_v30  ;;  %v4220_v42 = vmul.f32 %v4199_v45, %v4193_v26  ;;  %v4223_v30 = vmul.f32 %v4211_v34, %v4187_v20 }
0x104c   : > { %v4243_v20 = vsel %vm3487_vm13, %v10333_v48, %v10337_v21 }
0x104d   : > { %6914 = vmatpush1.bf16.msra.mxu0 %v6913_v55  ;;  %6948 = vmatprep.subr.bf16.mxu1 %v6947_v38  ;;  %v4222_v55 = vmul.f32 %v4207_v14, %v4189_v27 }
0x104e   : > { %6950 = vmatpush1.bf16.msra.mxu1 %v6949_v56  ;;  %v4257_v56 = vrot.slane %v6493_v22, %v9895_v46 }
0x104f   : > { %v4175_v31 = vpop.permute.xlu0 %4174 }
0x1050   : > { %v4190_v10 = vsel %vm3431_vm12, %v4171_v43, %v4175_v31 }
0x1051   : > { %v4217_v33 = vmul.f32 %v4203_v61, %v4190_v10 }
0x1053   : > { %v4179_v13 = vpop.permute.xlu0 %4178  ;;  %v6915_v49 = vpack.c.bf16 %v4221_v32, %v4217_v33 }
0x1054   : > { %v4188_v19 = vsel %vm3431_vm12, %v4175_v31, %v4179_v13 }
0x1055   : > { %6916 = vmatprep.subr.bf16.mxu0 %v6915_v49  ;;  %v4218_v18 = vmul.f32 %v4207_v14, %v4188_v19  ;;  %v4265_v49 = vrot.slane %v6493_v22, %v9922_v60  ;;  %v4241_v19 = vsel %vm3487_vm13, %v10337_v21, %v10343_v35  ;;  %v4247_v14 = vsel %vm3487_vm13, %v10343_v35, %v10327_v11 }
0x1056   : > { %v6959_v21 = vpack.c.bf16 %v10187_v41, %v10271_v50  ;;  %v4297_v50 = vsel %vm3543_vm14, %v10353_v9, %v10357_v44 }
0x1057   : > { %v4183_v16 = vpop.permute.xlu0 %4182  ;;  %v6953_v39 = vpack.c.bf16 %v4222_v55, %v4218_v18 }
0x1058   : > { %v4186_v23 = vsel %vm3431_vm12, %v4179_v13, %v4183_v16  ;;  %v4192_v51 = vsel %vm3431_vm12, %v4183_v16, %v4171_v43  ;;  %v4245_v43 = vsel %vm3487_vm13, %v10327_v11, %v10333_v48  ;;  %v4253_v13 = vrot.slane %v6493_v22, %v9920_v15 }
0x1059   : > { %v4216_v40 = vmul.f32 %v4199_v45, %v4192_v51  ;;  %v4219_v29 = vmul.f32 %v4211_v34, %v4186_v23  ;;  %v4275_v31 = vmul.f32 %v4257_v56, %v4245_v43  ;;  %v4261_v34 = vrot.slane %v6493_v22, %v9912_v53  ;;  %v6494_v22 = vld [vmem:[%s11827_s30 + $0x14] sm:$0xf] }
0x105a   : > { %v4274_v23 = vmul.f32 %v4253_v13, %v4247_v14  ;;  %v4277_v51 = vmul.f32 %v4265_v49, %v4241_v19  ;;  %v6923_v48 = vpack.c.bf16 %v10177_v28, %v10259_v25  ;;  %v4311_v28 = vrot.slane %v6494_v22, %v9895_v46 }
0x105b   : > { %v6917_v59 = vpack.c.bf16 %v4220_v42, %v4216_v40  ;;  %v4225_v38 = vpop.permute.xlu0 %4224  ;;  %v6951_v24 = vpack.c.bf16 %v4223_v30, %v4219_v29  ;;  %v4276_v40 = vmul.f32 %v4261_v34, %v4243_v20  ;;  %v4307_v41 = vrot.slane %v6494_v22, %v9920_v15 }
0x105c   : > { %v4319_v43 = vrot.slane %v6494_v22, %v9922_v60 }
0x105d   : > { %6918 = vmatpush1.bf16.msra.mxu0 %v6917_v59  ;;  %6952 = vmatprep.subr.bf16.mxu1 %v6951_v24  ;;  %v6961_v24 = vpack.c.bf16 %v10182_v47, %v10269_v52 }
0x105e   : > { %6954 = vmatpush1.bf16.msra.mxu1 %v6953_v39  ;;  %v4329_v39 = vmul.f32 %v4311_v28, %v4297_v50 }
0x105f   : > { %v4229_v61 = vpop.permute.xlu0 %4228 }
0x1060   : > { %v4244_v57 = vsel %vm3487_vm13, %v4225_v38, %v4229_v61 }
0x1061   : > { %v4271_v10 = vmul.f32 %v4257_v56, %v4244_v57  ;;  %v4315_v56 = vrot.slane %v6494_v22, %v9912_v53 }
0x1063   : > { %v4233_v32 = vpop.permute.xlu0 %4232  ;;  %v6919_v33 = vpack.c.bf16 %v4275_v31, %v4271_v10  ;;  %v4295_v31 = vsel %vm3543_vm14, %v10357_v44, %v10363_v36  ;;  %v4389_v44 = vpop.permute.xlu1 %4388 }
0x1064   : > { %v4242_v45 = vsel %vm3487_vm13, %v4229_v61, %v4233_v32 }
0x1065   : > { %6920 = vmatprep.subr.bf16.mxu0 %v6919_v33  ;;  %v4272_v27 = vmul.f32 %v4261_v34, %v4242_v45  ;;  %v4330_v45 = vmul.f32 %v4315_v56, %v4295_v31 }
0x1067   : > { %v4237_v26 = vpop.permute.xlu0 %4236  ;;  %v6957_v55 = vpack.c.bf16 %v4276_v40, %v4272_v27 }
0x1068   : > { %v4240_v16 = vsel %vm3487_vm13, %v4233_v32, %v4237_v26  ;;  %v4246_v18 = vsel %vm3487_vm13, %v4237_v26, %v4225_v38  ;;  %v6925_v38 = vpack.c.bf16 %v10172_v12, %v10257_v62  ;;  %v4299_v12 = vsel %vm3543_vm14, %v10347_v63, %v10353_v9 }
0x1069   : > { %v4270_v42 = vmul.f32 %v4253_v13, %v4246_v18  ;;  %v4273_v30 = vmul.f32 %v4265_v49, %v4240_v16  ;;  %v4328_v57 = vmul.f32 %v4307_v41, %v4299_v12  ;;  %v4301_v9 = vsel %vm3543_vm14, %v10363_v36, %v10347_v63  ;;  %v6495_v63 = vld [vmem:[%s11827_s30 + $0x18] sm:$0xf]  ;;  %v4393_v16 = vpop.permute.xlu1 %4392 }
0x106a   : > { %v4331_v34 = vmul.f32 %v4319_v43, %v4301_v9  ;;  %v4365_v18 = vrot.slane %v6495_v63, %v9895_v46 }
0x106b   : > { %v6921_v29 = vpack.c.bf16 %v4274_v23, %v4270_v42  ;;  %v4279_v11 = vpop.permute.xlu0 %4278  ;;  %v6955_v35 = vpack.c.bf16 %v4277_v51, %v4273_v30  ;;  %v4361_v51 = vrot.slane %v6495_v63, %v9920_v15  ;;  %v4351_v42 = vsel %vm3599_vm15, %v10373_v0, %v10377_v54 }
0x106c   : > { %v4353_v30 = vsel %vm3599_vm15, %v10367_v37, %v10373_v0  ;;  %v4355_v0 = vsel %vm3599_vm15, %v10383_v17, %v10367_v37  ;;  %v6496_v37 = vld [vmem:[%s11827_s30 + $0x1c] sm:$0xf] }
0x106d   : > { %6922 = vmatpush1.bf16.msra.mxu0 %v6921_v29  ;;  %6956 = vmatprep.subr.bf16.mxu1 %v6955_v35  ;;  %v4383_v35 = vmul.f32 %v4365_v18, %v4351_v42  ;;  %v4397_v22 = vpop.permute.xlu1 %4396  ;;  %v4415_v9 = vrot.slane %v6496_v37, %v9920_v15 }
0x106e   : > { %6924 = vmatprep.subr.bf16.mxu0 %v6923_v48  ;;  %6958 = vmatpush1.bf16.msra.mxu1 %v6957_v55  ;;  %v4369_v55 = vrot.slane %v6495_v63, %v9912_v53  ;;  %v4373_v48 = vrot.slane %v6495_v63, %v9922_v60 }
0x106f   : > { %v4283_v59 = vpop.permute.xlu0 %4282  ;;  %6960 = vmatprep.subr.bf16.mxu1 %v6959_v21 }
0x1070   : > { %v4298_v25 = vsel %vm3543_vm14, %v4279_v11, %v4283_v59 }
0x1071   : > { %6926 = vmatpush1.bf16.msra.mxu0 %v6925_v38  ;;  %v4324_v62 = vmul.f32 %v4307_v41, %v4298_v25  ;;  %v4349_v38 = vsel %vm3599_vm15, %v10377_v54, %v10383_v17 }
0x1072   : > { %6962 = vmatpush1.bf16.msra.mxu1 %v6961_v24  ;;  %v4384_v12 = vmul.f32 %v4369_v55, %v4349_v38 }
0x1073   : > { %v4287_v47 = vpop.permute.xlu0 %4286  ;;  %v6929_v33 = vpack.c.bf16 %v4328_v57, %v4324_v62 }
0x1074   : > { %v4296_v52 = vsel %vm3543_vm14, %v4283_v59, %v4287_v47  ;;  %v4382_v59 = vmul.f32 %v4361_v51, %v4353_v30 }
0x1075   : > { %v4325_v61 = vmul.f32 %v4311_v28, %v4296_v52 }
0x1077   : > { %v4291_v10 = vpop.permute.xlu0 %4290  ;;  %v6927_v32 = vpack.c.bf16 %v4329_v39, %v4325_v61  ;;  %v4419_v61 = vrot.slane %v6496_v37, %v9895_v46 }
0x1078   : > { %v4294_v13 = vsel %vm3543_vm14, %v4287_v47, %v4291_v10  ;;  %v4300_v49 = vsel %vm3543_vm14, %v4291_v10, %v4279_v11  ;;  %v4385_v47 = vmul.f32 %v4373_v48, %v4355_v0  ;;  %v4405_v10 = vsel %vm3655_vm0, %v4393_v16, %v4397_v22 }
0x1079   : > { %v4326_v19 = vmul.f32 %v4315_v56, %v4294_v13  ;;  %v4327_v14 = vmul.f32 %v4319_v43, %v4300_v49  ;;  %6928 = vmatprep.subr.bf16.mxu0 %v6927_v32  ;;  %v4401_v56 = vpop.permute.xlu1 %4400  ;;  %v4407_v32 = vsel %vm3655_vm0, %v4389_v44, %v4393_v16 }
0x107a   : > { %6930 = vmatpush1.bf16.msra.mxu0 %v6929_v33 }
0x107b   : > { %v6965_v20 = vpack.c.bf16 %v4330_v45, %v4326_v19  ;;  %v4333_v26 = vpop.permute.xlu0 %4332  ;;  %v6963_v27 = vpack.c.bf16 %v4331_v34, %v4327_v14  ;;  %v4437_v45 = vmul.f32 %v4419_v61, %v4405_v10  ;;  %v4423_v34 = vrot.slane %v6496_v37, %v9912_v53 }
0x107c   : > { %v4427_v19 = vrot.slane %v6496_v37, %v9922_v60 }
0x107d   : > { %6964 = vmatprep.subr.bf16.mxu1 %v6963_v27  ;;  %v4443_v31 = vpop.permute.xlu1 %4442  ;;  %v4409_v27 = vsel %vm3655_vm0, %v4401_v56, %v4389_v44 }
0x107e   : > { %6966 = vmatpush1.bf16.msra.mxu1 %v6965_v20  ;;  %v4436_v20 = vmul.f32 %v4415_v9, %v4407_v32  ;;  %v4439_v30 = vmul.f32 %v4427_v19, %v4409_v27 }
0x107f   : > { %v4337_v36 = vpop.permute.xlu0 %4336 }
0x1080   : > { %v4352_v23 = vsel %vm3599_vm15, %v4333_v26, %v4337_v36 }
0x1081   : > { %v4378_v29 = vmul.f32 %v4361_v51, %v4352_v23  ;;  %v4447_v63 = vpop.permute.xlu1 %4446 }
0x1083   : > { %v4341_v40 = vpop.permute.xlu0 %4340  ;;  %v6933_v25 = vpack.c.bf16 %v4382_v59, %v4378_v29 }
0x1084   : > { %v4350_v11 = vsel %vm3599_vm15, %v4337_v36, %v4341_v40 }
0x1085   : > { %v4379_v21 = vmul.f32 %v4365_v18, %v4350_v11  ;;  %v4451_v44 = vpop.permute.xlu1 %4450 }
0x1086   : > { %v4459_v0 = vsel %vm3711_vm1, %v4447_v63, %v4451_v44 }
0x1087   : > { %v4345_v24 = vpop.permute.xlu0 %4344  ;;  %v6931_v28 = vpack.c.bf16 %v4383_v35, %v4379_v21 }
0x1088   : > { %v4348_v41 = vsel %vm3599_vm15, %v4341_v40, %v4345_v24  ;;  %v4354_v50 = vsel %vm3599_vm15, %v4345_v24, %v4333_v26  ;;  %v4403_v26 = vsel %vm3655_vm0, %v4397_v22, %v4401_v56  ;;  %v4461_v24 = vsel %vm3711_vm1, %v4443_v31, %v4447_v63 }
0x1089   : > { %v4380_v62 = vmul.f32 %v4369_v55, %v4348_v41  ;;  %v4381_v52 = vmul.f32 %v4373_v48, %v4354_v50  ;;  %6932 = vmatprep.subr.bf16.mxu0 %v6931_v28  ;;  %v4438_v42 = vmul.f32 %v4423_v34, %v4403_v26  ;;  %v6497_v48 = vld [vmem:[%s11827_s30 + $0x20] sm:$0xf]  ;;  %v4455_v28 = vpop.permute.xlu1 %4454 }
0x108a   : > { %6934 = vmatpush1.bf16.msra.mxu0 %v6933_v25  ;;  %v4473_v22 = vrot.slane %v6497_v48, %v9895_v46  ;;  %v4469_v38 = vrot.slane %v6497_v48, %v9920_v15  ;;  %v4463_v56 = vsel %vm3711_vm1, %v4455_v28, %v4443_v31 }
0x108b   : > { %v6969_v54 = vpack.c.bf16 %v4384_v12, %v4380_v62  ;;  %v4387_v39 = vpop.permute.xlu0 %4386  ;;  %v6967_v43 = vpack.c.bf16 %v4385_v47, %v4381_v52  ;;  %v4477_v47 = vrot.slane %v6497_v48, %v9912_v53  ;;  %v4481_v62 = vrot.slane %v6497_v48, %v9922_v60 }
0x108c   : > { %v4491_v12 = vmul.f32 %v4473_v22, %v4459_v0  ;;  %v10699_v0 = vld [vmem:[%s7759_s15 + $0x38] sm:$0xff] }
0x108d   : > { %6968 = vmatprep.subr.bf16.mxu1 %v6967_v43  ;;  %v4493_v10 = vmul.f32 %v4481_v62, %v4463_v56 }
0x108e   : > { %6970 = vmatpush1.bf16.msra.mxu1 %v6969_v54  ;;  %v4490_v54 = vmul.f32 %v4469_v38, %v4461_v24 }
0x108f   : > { %v4391_v17 = vpop.permute.xlu0 %4390 }
0x1090   : > { %v4406_v57 = vsel %vm3655_vm0, %v4387_v39, %v4391_v17 }
0x1091   : > { %v4432_v13 = vmul.f32 %v4415_v9, %v4406_v57 }
0x1093   : > { %v4395_v33 = vpop.permute.xlu0 %4394  ;;  %v6937_v18 = vpack.c.bf16 %v4436_v20, %v4432_v13 }
0x1094   : > { %v4404_v49 = vsel %vm3655_vm0, %v4391_v17, %v4395_v33 }
0x1095   : > { %v4433_v14 = vmul.f32 %v4419_v61, %v4404_v49 }
0x1097   : > { %v4399_v36 = vpop.permute.xlu0 %4398  ;;  %v6935_v16 = vpack.c.bf16 %v4437_v45, %v4433_v14 }
0x1098   : > { %v4402_v23 = vsel %vm3655_vm0, %v4395_v33, %v4399_v36  ;;  %v4408_v51 = vsel %vm3655_vm0, %v4399_v36, %v4387_v39  ;;  %v4457_v39 = vsel %vm3711_vm1, %v4451_v44, %v4455_v28 }
0x1099   : > { %v4434_v40 = vmul.f32 %v4423_v34, %v4402_v23  ;;  %v4435_v29 = vmul.f32 %v4427_v19, %v4408_v51  ;;  %6936 = vmatprep.subr.bf16.mxu0 %v6935_v16  ;;  %v4492_v9 = vmul.f32 %v4477_v47, %v4457_v39 }
0x109a   : > { %6938 = vmatpush1.bf16.msra.mxu0 %v6937_v18 }
0x109b   : > { %v6973_v11 = vpack.c.bf16 %v4438_v42, %v4434_v40  ;;  %v4441_v35 = vpop.permute.xlu0 %4440  ;;  %v6971_v55 = vpack.c.bf16 %v4439_v30, %v4435_v29 }
0x109d   : > { %6972 = vmatprep.subr.bf16.mxu1 %v6971_v55 }
0x109e   : > { %6974 = vmatpush1.bf16.msra.mxu1 %v6973_v11 }
0x109f   : > { %v4445_v21 = vpop.permute.xlu0 %4444 }
0x10a0   : > { %v4460_v59 = vsel %vm3711_vm1, %v4441_v35, %v4445_v21 }
0x10a1   : > { %v4486_v41 = vmul.f32 %v4469_v38, %v4460_v59  ;;  %v10689_v59 = vld [vmem:[%s7759_s15 + $0x28] sm:$0xff]  ;;  %v10694_v38 = vld [vmem:[%s7759_s15 + $0x30] sm:$0xff] }
0x10a3   : > { %v4449_v25 = vpop.permute.xlu0 %4448  ;;  %v6941_v17 = vpack.c.bf16 %v4490_v54, %v4486_v41 }
0x10a4   : > { %v4458_v50 = vsel %vm3711_vm1, %v4445_v21, %v4449_v25 }
0x10a5   : > { %v4487_v52 = vmul.f32 %v4473_v22, %v4458_v50  ;;  %v10684_v22 = vld [vmem:[%s7759_s15 + $0x20] sm:$0xff] }
0x10a7   : > { %v4453_v43 = vpop.permute.xlu0 %4452  ;;  %v6939_v37 = vpack.c.bf16 %v4491_v12, %v4487_v52 }
0x10a8   : > { %v4456_v61 = vsel %vm3711_vm1, %v4449_v25, %v4453_v43  ;;  %v4462_v57 = vsel %vm3711_vm1, %v4453_v43, %v4441_v35 }
0x10a9   : > { %v4488_v32 = vmul.f32 %v4477_v47, %v4456_v61  ;;  %v4489_v33 = vmul.f32 %v4481_v62, %v4462_v57  ;;  %6940 = vmatprep.subr.bf16.mxu0 %v6939_v37 }
0x10aa   : > { %6942 = vmatpush1.bf16.msra.mxu0 %v6941_v17 }
0x10ab   : > { %v6977_v13 = vpack.c.bf16 %v4492_v9, %v4488_v32  ;;  %v6975_v49 = vpack.c.bf16 %v4493_v10, %v4489_v33 }
0x10ad   : > { %4559 = vmatmul.mubr.f32.vlgmr.msra.gmra.mrb[4].mxu0 %v7775_v1  ;;  %6976 = vmatprep.subr.bf16.mxu1 %v6975_v49 }
0x10ae   : > { %6978 = vmatpush1.bf16.msra.mxu1 %v6977_v13  ;;  %6499 = vmatprep.mubr.msk.f32.mxu0 %vm3751_vm9, %v7781_v4 }
0x10b1   : > { %4636 = vmatmul.mubr.f32.vlgmr.msra.gmra.mrb[4].mxu1 %v7775_v1  ;;  %4565 = vmatmul.mubr.f32.gmra.mrb[6].mxu0 %v7779_v3 }
0x10b2   : > { %6501 = vmatprep.mubr.msk.f32.mxu1 %vm3751_vm9, %v7781_v4  ;;  %6517 = vmatprep.mubr.msk.f32.mxu0 %vm3751_vm9, %v7777_v2 }
0x10b5   : > { %4642 = vmatmul.mubr.f32.gmra.mrb[6].mxu1 %v7779_v3 }
0x10b6   : > { %6519 = vmatprep.mubr.msk.f32.mxu1 %vm3751_vm9, %v7777_v2 }
0x1180   : > { %v10643_v31 = vpop.f32.mrb[4].mxu0 }
0x1181   : > { %v4656_v45 = vmul.f32 %v10643_v31, %v10643_v31  ;;  %v10647_v34 = vpop.f32.mrb[5].mxu0 }
0x1182   : > { %v4648_v19 = vadd.f32 %v10647_v34, %v10643_v31  ;;  %v4657_v14 = vmul.f32 %v10647_v34, %v10647_v34 }
0x1184   : > { %4649 = vadd.xlane.f32.xlu0 %v4648_v19  ;;  %v10653_v20 = vpop.f32.mrb[4].mxu1  ;;  %v4660_v26 = vadd.f32 %v4657_v14, %v4656_v45  ;;  %v10655_v27 = vpop.f32.mrb[6].mxu0 }
0x1185   : > { %v4722_v63 = vmul.f32 %v10653_v20, %v10653_v20  ;;  %v10659_v36 = vpop.f32.mrb[5].mxu1  ;;  %v4658_v16 = vmul.f32 %v10655_v27, %v10655_v27  ;;  %v10663_v18 = vpop.f32.mrb[7].mxu0 }
0x1186   : > { %v4714_v23 = vadd.f32 %v10659_v36, %v10653_v20  ;;  %v4723_v51 = vmul.f32 %v10659_v36, %v10659_v36  ;;  %4661 = vadd.xlane.f32.xlu1 %v4660_v26  ;;  %v4651_v42 = vadd.f32 %v10663_v18, %v10655_v27  ;;  %v4659_v30 = vmul.f32 %v10663_v18, %v10663_v18 }
0x1188   : > { %4715 = vadd.xlane.f32.xlu0 %v4714_v23  ;;  %v10673_v40 = vpop.f32.mrb[6].mxu1  ;;  %v4726_v29 = vadd.f32 %v4723_v51, %v4722_v63  ;;  %v4663_v11 = vadd.f32 %v4659_v30, %v4658_v16 }
0x1189   : > { %v4724_v35 = vmul.f32 %v10673_v40, %v10673_v40  ;;  %v10677_v55 = vpop.f32.mrb[7].mxu1 }
0x118a   : > { %v4717_v44 = vadd.f32 %v10677_v55, %v10673_v40  ;;  %v4725_v48 = vmul.f32 %v10677_v55, %v10677_v55  ;;  %4652 = vadd.xlane.f32.xlu1 %v4651_v42 }
0x118c   : > { %4718 = vadd.xlane.f32.xlu0 %v4717_v44  ;;  %v4729_v21 = vadd.f32 %v4725_v48, %v4724_v35 }
0x118e   : > { %4727 = vadd.xlane.f32.xlu1 %v4726_v29 }
0x1190   : > { %4664 = vadd.xlane.f32.xlu0 %v4663_v11 }
0x1194   : > { %4730 = vadd.xlane.f32.xlu0 %v4729_v21 }
0x119f   : > { %4800 = vrot.lane.b32.xlu1 %v10684_v22, %s7531_s9 }
0x11a3   : > { %4804 = vrot.lane.b32.xlu1 %v10689_v59, %s7531_s9 }
0x11a7   : > { %4808 = vrot.lane.b32.xlu1 %v10694_v38, %s7531_s9 }
0x11ab   : > { %4812 = vrot.lane.b32.xlu1 %v10699_v0, %s7531_s9 }
0x1211   : > { %v4650_v24 = vpop.xlane.xlu0 %4649 }
0x1212   : > { %v4654_v28 = vmul.f32 0.00390625, %v4650_v24 }
0x1213   : > { %v4662_v25 = vpop.xlane.xlu1 %4661 }
0x1214   : > { %v4668_v41 = vmul.f32 %v4654_v28, %v4654_v28  ;;  %v4666_v50 = vmul.f32 0.00390625, %v4662_v25 }
0x1215   : > { %v4716_v12 = vpop.xlane.xlu0 %4715 }
0x1216   : > { %v4670_v47 = vsub.f32 %v4666_v50, %v4668_v41  ;;  %v4720_v54 = vmul.f32 0.00390625, %v4716_v12 }
0x1217   : > { %v4653_v62 = vpop.xlane.xlu1 %4652 }
0x1218   : > { %v4672_v52 = vadd.f32 1e-05, %v4670_v47  ;;  %v4655_v56 = vmul.f32 0.00390625, %v4653_v62  ;;  %v4734_v37 = vmul.f32 %v4720_v54, %v4720_v54 }
0x1219   : > { %v4719_v39 = vpop.xlane.xlu0 %4718 }
0x121a   : > { %7305 = vrsqrt.f32 %v4672_v52  ;;  %v4669_v57 = vmul.f32 %v4655_v56, %v4655_v56  ;;  %v4721_v9 = vmul.f32 0.00390625, %v4719_v39 }
0x121b   : > { %v4728_v43 = vpop.xlane.xlu1 %4727 }
0x121c   : > { %v4732_v17 = vmul.f32 0.00390625, %v4728_v43  ;;  %v4735_v45 = vmul.f32 %v4721_v9, %v4721_v9 }
0x121d   : > { %v4665_v61 = vpop.xlane.xlu0 %4664 }
0x121e   : > { %v4736_v10 = vsub.f32 %v4732_v17, %v4734_v37  ;;  %v4667_v32 = vmul.f32 0.00390625, %v4665_v61 }
0x1220   : > { %v4738_v33 = vadd.f32 1e-05, %v4736_v10  ;;  %v4671_v13 = vsub.f32 %v4667_v32, %v4669_v57 }
0x1221   : > { %v4731_v49 = vpop.xlane.xlu0 %4730 }
0x1222   : > { %7307 = vrsqrt.f32 %v4738_v33  ;;  %v4673_v19 = vadd.f32 1e-05, %v4671_v13  ;;  %v4733_v14 = vmul.f32 0.00390625, %v4731_v49 }
0x1224   : > { %v7306_v26 = vpop.eup %7305  ;;  %7309 = vrsqrt.f32 %v4673_v19  ;;  %v4737_v63 = vsub.f32 %v4733_v14, %v4735_v45 }
0x1225   : > { %v4676_v16 = vmul.f32 %v7306_v26, %v7786_v5 }
0x1226   : > { %v4739_v23 = vadd.f32 1e-05, %v4737_v63 }
0x1227   : > { %4680 = vperm.xlu1 %7295, %v4676_v16   ;;  %v4692_v11 = vmul.f32 %v4676_v16, %v4654_v28  ;;  %v10755_v28 = vpop.permute.xlu1 %4800 }
0x1228   : > { %7311 = vrsqrt.f32 %v4739_v23 }
0x1229   : > { %v4694_v44 = vsub.f32 %v7796_v7, %v4692_v11 }
0x122b   : > { %v10759_v47 = vpop.permute.xlu1 %4804 }
0x122c   : > { %v7308_v51 = vpop.eup %7307 }
0x122d   : > { %v4742_v42 = vmul.f32 %v7308_v51, %v7786_v5 }
0x122e   : > { %v7310_v30 = vpop.eup %7309 }
0x122f   : > { %4746 = vperm.xlu1 %7295, %v4742_v42   ;;  %v4677_v29 = vmul.f32 %v7310_v30, %v7791_v6  ;;  %v4758_v24 = vmul.f32 %v4742_v42, %v4720_v54  ;;  %v10765_v62 = vpop.permute.xlu1 %4808 }
0x1231   : > { %4685 = vperm.xlu0 %7296, %v4677_v29   ;;  %v4693_v21 = vmul.f32 %v4677_v29, %v4655_v56  ;;  %v4760_v41 = vsub.f32 %v7796_v7, %v4758_v24 }
0x1232   : > { %v7312_v35 = vpop.eup %7311 }
0x1233   : > { %v4743_v48 = vmul.f32 %v7312_v35, %v7791_v6  ;;  %v4695_v25 = vsub.f32 %v7801_v8, %v4693_v21  ;;  %v10769_v52 = vpop.permute.xlu1 %4812 }
0x1235   : > { %4698 = vperm.xlu0 %7296, %v4694_v44   ;;  %4751 = vperm.xlu1 %7295, %v4743_v48   ;;  %v4759_v50 = vmul.f32 %v4743_v48, %v4721_v9 }
0x1237   : > { %v4761_v12 = vsub.f32 %v7801_v8, %v4759_v50 }
0x1239   : > { %4703 = vperm.xlu1 %7295, %v4695_v25   ;;  %4764 = vperm.xlu0 %7296, %v4760_v41   ;;  %v4822_v25 = vld [vmem:[%s11827_s30] sm:$0xf] }
0x123d   : > { %4769 = vperm.xlu1 %7295, %v4761_v12   ;;  %v4831_v12 = vrot.slane %v4822_v25, %v9895_v46 }
0x1241   : > { %4854 = vrot.lane.b32.xlu1 %v10684_v22, %s7532_s27 }
0x1245   : > { %4858 = vrot.lane.b32.xlu1 %v10689_v59, %s7532_s27 }
0x1249   : > { %4862 = vrot.lane.b32.xlu1 %v10694_v38, %s7532_s27 }
0x124d   : > { %4866 = vrot.lane.b32.xlu1 %v10699_v0, %s7532_s27 }
0x1251   : > { %4908 = vrot.lane.b32.xlu1 %v10684_v22, %s7533_s26 }
0x1255   : > { %4912 = vrot.lane.b32.xlu1 %v10689_v59, %s7533_s26 }
0x1259   : > { %4916 = vrot.lane.b32.xlu1 %v10694_v38, %s7533_s26 }
0x125d   : > { %4920 = vrot.lane.b32.xlu1 %v10699_v0, %s7533_s26 }
0x1261   : > { %4962 = vrot.lane.b32.xlu1 %v10684_v22, %s7534_s29 }
0x1265   : > { %4966 = vrot.lane.b32.xlu1 %v10689_v59, %s7534_s29 }
0x1269   : > { %4970 = vrot.lane.b32.xlu1 %v10694_v38, %s7534_s29 }
0x126d   : > { %4974 = vrot.lane.b32.xlu1 %v10699_v0, %s7534_s29 }
0x1271   : > { %5016 = vrot.lane.b32.xlu1 %v10684_v22, %s7535_s14 }
0x1275   : > { %5020 = vrot.lane.b32.xlu1 %v10689_v59, %s7535_s14 }
0x1279   : > { %5024 = vrot.lane.b32.xlu1 %v10694_v38, %s7535_s14 }
0x127d   : > { %5028 = vrot.lane.b32.xlu1 %v10699_v0, %s7535_s14 }
0x1281   : > { %5070 = vrot.lane.b32.xlu1 %v10684_v22, %s7536_s10 }
0x1285   : > { %5074 = vrot.lane.b32.xlu1 %v10689_v59, %s7536_s10 }
0x1289   : > { %5078 = vrot.lane.b32.xlu1 %v10694_v38, %s7536_s10 }
0x128d   : > { %5082 = vrot.lane.b32.xlu1 %v10699_v0, %s7536_s10 }
0x1291   : > { %5124 = vrot.lane.b32.xlu1 %v10684_v22, %s7537_s6 }
0x1295   : > { %5128 = vrot.lane.b32.xlu1 %v10689_v59, %s7537_s6 }
0x1299   : > { %5132 = vrot.lane.b32.xlu1 %v10694_v38, %s7537_s6 }
0x129d   : > { %5136 = vrot.lane.b32.xlu1 %v10699_v0, %s7537_s6 }
0x12a1   : > { %5178 = vrot.lane.b32.xlu1 %v10684_v22, %s7538_s7 }
0x12a5   : > { %5182 = vrot.lane.b32.xlu1 %v10689_v59, %s7538_s7 }
0x12a6   : > { %v4681_v54 = vpop.permute.xlu1 %4680 }
0x12a7   : > { %v4688_v17 = vmul.f32 %v4681_v54, %v10643_v31  ;;  %v4689_v61 = vmul.f32 %v4681_v54, %v10647_v34  ;;  %v4819_v54 = vsel %vm3320_vm10, %v10755_v28, %v10759_v47 }
0x12a9   : > { %5186 = vrot.lane.b32.xlu1 %v10694_v38, %s7538_s7 }
0x12ad   : > { %5190 = vrot.lane.b32.xlu1 %v10699_v0, %s7538_s7 }
0x12ae   : > { %v4747_v39 = vpop.permute.xlu1 %4746 }
0x12af   : > { %v4754_v19 = vmul.f32 %v4747_v39, %v10653_v20  ;;  %v4755_v14 = vmul.f32 %v4747_v39, %v10659_v36 }
0x12b0   : > { %v4686_v56 = vpop.permute.xlu0 %4685 }
0x12b1   : > { %v4690_v57 = vmul.f32 %v4686_v56, %v10655_v27  ;;  %v4691_v9 = vmul.f32 %v4686_v56, %v10663_v18 }
0x12b4   : > { %v4699_v43 = vpop.permute.xlu0 %4698  ;;  %v4752_v37 = vpop.permute.xlu1 %4751 }
0x12b5   : > { %v4706_v32 = vadd.f32 %v4699_v43, %v4688_v17  ;;  %v4707_v33 = vadd.f32 %v4699_v43, %v4689_v61  ;;  %v4756_v31 = vmul.f32 %v4752_v37, %v10673_v40  ;;  %v4757_v34 = vmul.f32 %v4752_v37, %v10677_v55 }
0x12b6   : > { %v4849_v43 = vmul.f32 %v4831_v12, %v4819_v54 }
0x12b8   : > { %v4704_v10 = vpop.permute.xlu1 %4703  ;;  %v4765_v13 = vpop.permute.xlu0 %4764 }
0x12b9   : > { %v4708_v49 = vadd.f32 %v4704_v10, %v4690_v57  ;;  %v4709_v45 = vadd.f32 %v4704_v10, %v4691_v9  ;;  %v4772_v18 = vadd.f32 %v4765_v13, %v4754_v19  ;;  %v4773_v63 = vadd.f32 %v4765_v13, %v4755_v14 }
0x12ba   : > { %v4827_v9 = vrot.slane %v4822_v25, %v9920_v15  ;;  %v4839_v10 = vrot.slane %v4822_v25, %v9922_v60  ;;  %v4815_v13 = vsel %vm3320_vm10, %v10765_v62, %v10769_v52 }
0x12bb   : > { %v4710_v26 = vadd.f32 %v4708_v49, %v4706_v32  ;;  %v4711_v27 = vadd.f32 %v4709_v45, %v4707_v33  ;;  %v4835_v33 = vrot.slane %v4822_v25, %v9912_v53  ;;  %v4821_v49 = vsel %vm3320_vm10, %v10769_v52, %v10755_v28  ;;  %v6510_v52 = vld [vmem:[%s11827_s30 + $0x4] sm:$0xf] }
0x12bc   : > { %v4770_v16 = vpop.permute.xlu1 %4769  ;;  %v4817_v45 = vsel %vm3320_vm10, %v10759_v47, %v10765_v62 }
0x12bd   : > { %v10783_v23 = vmax.f32 %v4710_v26, 0.0  ;;  %v10785_v51 = vmax.f32 %v4711_v27, 0.0  ;;  %v4774_v42 = vadd.f32 %v4770_v16, %v4756_v31  ;;  %v4775_v30 = vadd.f32 %v4770_v16, %v4757_v34 }
0x12be   : > { %v4848_v27 = vmul.f32 %v4827_v9, %v4821_v49  ;;  %v4850_v28 = vmul.f32 %v4835_v33, %v4817_v45 }
0x12bf   : > { %6502 = vst [vmem:[%s7772_s18 + $0x40] sm:$0xff] %v10783_v23  ;;  %6503 = vst [vmem:[%s7772_s18 + $0x48] sm:$0xff] %v10785_v51  ;;  %v4776_v20 = vadd.f32 %v4774_v42, %v4772_v18  ;;  %v4777_v36 = vadd.f32 %v4775_v30, %v4773_v63  ;;  %4798 = vrot.lane.b32.xlu0 %v10783_v23, %s7531_s9  ;;  %v4851_v18 = vmul.f32 %v4839_v10, %v4815_v13 }
0x12c0   : > { %v10837_v29 = vpop.permute.xlu1 %4854 }
0x12c1   : > { %v10793_v40 = vmax.f32 %v4776_v20, 0.0  ;;  %v10795_v55 = vmax.f32 %v4777_v36, 0.0  ;;  %v4885_v20 = vrot.slane %v6510_v52, %v9895_v46 }
0x12c3   : > { %6504 = vst [vmem:[%s7772_s18 + $0x50] sm:$0xff] %v10793_v40  ;;  %6505 = vst [vmem:[%s7772_s18 + $0x58] sm:$0xff] %v10795_v55  ;;  %4802 = vrot.lane.b32.xlu0 %v10785_v51, %s7531_s9 }
0x12c4   : > { %v10841_v11 = vpop.permute.xlu1 %4858 }
0x12c5   : > { %v4873_v25 = vsel %vm3375_vm11, %v10837_v29, %v10841_v11 }
0x12c6   : > { %v4903_v54 = vmul.f32 %v4885_v20, %v4873_v25 }
0x12c7   : > { %4806 = vrot.lane.b32.xlu0 %v10793_v40, %s7531_s9 }
0x12c8   : > { %v10847_v35 = vpop.permute.xlu1 %4862 }
0x12c9   : > { %v4871_v13 = vsel %vm3375_vm11, %v10841_v11, %v10847_v35 }
0x12cb   : > { %4810 = vrot.lane.b32.xlu0 %v10795_v55, %s7531_s9 }
0x12cc   : > { %v10851_v44 = vpop.permute.xlu1 %4866 }
0x12cf   : > { %4852 = vrot.lane.b32.xlu0 %v10783_v23, %s7532_s27 }
0x12d0   : > { %v10857_v48 = vpop.permute.xlu1 %4908 }
0x12d3   : > { %4856 = vrot.lane.b32.xlu0 %v10785_v51, %s7532_s27 }
0x12d4   : > { %v10861_v21 = vpop.permute.xlu1 %4912 }
0x12d7   : > { %4860 = vrot.lane.b32.xlu0 %v10793_v40, %s7532_s27 }
0x12d8   : > { %v10867_v24 = vpop.permute.xlu1 %4916 }
0x12db   : > { %4864 = vrot.lane.b32.xlu0 %v10795_v55, %s7532_s27 }
0x12dc   : > { %v10874_v50 = vpop.permute.xlu1 %4920 }
0x12df   : > { %4906 = vrot.lane.b32.xlu0 %v10783_v23, %s7533_s26 }
0x12e0   : > { %v10887_v17 = vpop.permute.xlu1 %4962 }
0x12e3   : > { %4910 = vrot.lane.b32.xlu0 %v10785_v51, %s7533_s26 }
0x12e4   : > { %v10908_v14 = vpop.permute.xlu1 %4966 }
0x12e7   : > { %4914 = vrot.lane.b32.xlu0 %v10793_v40, %s7533_s26 }
0x12e8   : > { %v10918_v36 = vpop.permute.xlu1 %4970 }
0x12eb   : > { %4918 = vrot.lane.b32.xlu0 %v10795_v55, %s7533_s26 }
0x12ef   : > { %4960 = vrot.lane.b32.xlu0 %v10783_v23, %s7534_s29 }
0x12f3   : > { %4964 = vrot.lane.b32.xlu0 %v10785_v51, %s7534_s29 }
0x12f7   : > { %4968 = vrot.lane.b32.xlu0 %v10793_v40, %s7534_s29 }
0x12fb   : > { %4972 = vrot.lane.b32.xlu0 %v10795_v55, %s7534_s29 }
0x12ff   : > { %5014 = vrot.lane.b32.xlu0 %v10783_v23, %s7535_s14 }
0x1303   : > { %5018 = vrot.lane.b32.xlu0 %v10785_v51, %s7535_s14 }
0x1307   : > { %5022 = vrot.lane.b32.xlu0 %v10793_v40, %s7535_s14 }
0x130b   : > { %5026 = vrot.lane.b32.xlu0 %v10795_v55, %s7535_s14 }
0x130f   : > { %5068 = vrot.lane.b32.xlu0 %v10783_v23, %s7536_s10 }
0x1313   : > { %5072 = vrot.lane.b32.xlu0 %v10785_v51, %s7536_s10 }
0x1317   : > { %5076 = vrot.lane.b32.xlu0 %v10793_v40, %s7536_s10 }
0x131b   : > { %5080 = vrot.lane.b32.xlu0 %v10795_v55, %s7536_s10 }
0x131f   : > { %5122 = vrot.lane.b32.xlu0 %v10783_v23, %s7537_s6 }
0x1323   : > { %5126 = vrot.lane.b32.xlu0 %v10785_v51, %s7537_s6 }
0x1327   : > { %5130 = vrot.lane.b32.xlu0 %v10793_v40, %s7537_s6 }
0x132b   : > { %5134 = vrot.lane.b32.xlu0 %v10795_v55, %s7537_s6 }
0x132f   : > { %5176 = vrot.lane.b32.xlu0 %v10783_v23, %s7538_s7 }
0x1331   : > { %v4799_v41 = vpop.permute.xlu0 %4798 }
0x1333   : > { %5180 = vrot.lane.b32.xlu0 %v10785_v51, %s7538_s7 }
0x1335   : > { %v4803_v39 = vpop.permute.xlu0 %4802 }
0x1336   : > { %v4818_v56 = vsel %vm3320_vm10, %v4799_v41, %v4803_v39 }
0x1337   : > { %v4845_v37 = vmul.f32 %v4831_v12, %v4818_v56  ;;  %5184 = vrot.lane.b32.xlu0 %v10793_v40, %s7538_s7 }
0x1339   : > { %v4807_v61 = vpop.permute.xlu0 %4806  ;;  %v6979_v57 = vpack.c.bf16 %v4849_v43, %v4845_v37  ;;  %v10926_v37 = vpop.permute.xlu1 %4974 }
0x133a   : > { %v4816_v32 = vsel %vm3320_vm10, %v4803_v39, %v4807_v61 }
0x133b   : > { %6980 = vmatprep.subr.bf16.mxu0 %v6979_v57  ;;  %5188 = vrot.lane.b32.xlu0 %v10795_v55, %s7538_s7  ;;  %v4846_v31 = vmul.f32 %v4835_v33, %v4816_v32  ;;  %v4893_v57 = vrot.slane %v6510_v52, %v9922_v60  ;;  %v4869_v32 = vsel %vm3375_vm11, %v10847_v35, %v10851_v44 }
0x133c   : > { %v4875_v33 = vsel %vm3375_vm11, %v10851_v44, %v10837_v29  ;;  %v6511_v44 = vld [vmem:[%s11827_s30 + $0x8] sm:$0xf] }
0x133d   : > { %v4811_v19 = vpop.permute.xlu0 %4810  ;;  %v7017_v30 = vpack.c.bf16 %v4850_v28, %v4846_v31 }
0x133e   : > { %v4814_v34 = vsel %vm3320_vm10, %v4807_v61, %v4811_v19  ;;  %v4820_v26 = vsel %vm3320_vm10, %v4811_v19, %v4799_v41  ;;  %v4881_v61 = vrot.slane %v6510_v52, %v9920_v15 }
0x133f   : > { %v4844_v63 = vmul.f32 %v4827_v9, %v4820_v26  ;;  %v4847_v16 = vmul.f32 %v4839_v10, %v4814_v34  ;;  %v4889_v10 = vrot.slane %v6510_v52, %v9912_v53  ;;  %v4905_v26 = vmul.f32 %v4893_v57, %v4869_v32 }
0x1340   : > { %v4902_v34 = vmul.f32 %v4881_v61, %v4875_v33  ;;  %v4939_v52 = vrot.slane %v6511_v44, %v9895_v46 }
0x1341   : > { %v6981_v47 = vpack.c.bf16 %v4848_v27, %v4844_v63  ;;  %v4853_v62 = vpop.permute.xlu0 %4852  ;;  %v7015_v42 = vpack.c.bf16 %v4851_v18, %v4847_v16  ;;  %v10949_v63 = vpop.permute.xlu1 %5016  ;;  %v4904_v29 = vmul.f32 %v4889_v10, %v4871_v13 }
0x1343   : > { %6982 = vmatpush1.bf16.msra.mxu0 %v6981_v47  ;;  %7016 = vmatprep.subr.bf16.mxu1 %v7015_v42  ;;  %v4927_v47 = vsel %vm3431_vm12, %v10857_v48, %v10861_v21 }
0x1344   : > { %7018 = vmatpush1.bf16.msra.mxu1 %v7017_v30 }
0x1345   : > { %v4857_v41 = vpop.permute.xlu0 %4856  ;;  %v10959_v42 = vpop.permute.xlu1 %5020 }
0x1346   : > { %v4872_v12 = vsel %vm3375_vm11, %v4853_v62, %v4857_v41 }
0x1347   : > { %v4899_v39 = vmul.f32 %v4885_v20, %v4872_v12  ;;  %v4957_v20 = vmul.f32 %v4939_v52, %v4927_v47 }
0x1349   : > { %v4861_v56 = vpop.permute.xlu0 %4860  ;;  %v6983_v43 = vpack.c.bf16 %v4903_v54, %v4899_v39  ;;  %v4935_v54 = vrot.slane %v6511_v44, %v9920_v15  ;;  %v4947_v39 = vrot.slane %v6511_v44, %v9922_v60 }
0x134a   : > { %v4870_v9 = vsel %vm3375_vm11, %v4857_v41, %v4861_v56 }
0x134b   : > { %6984 = vmatprep.subr.bf16.mxu0 %v6983_v43  ;;  %v4900_v45 = vmul.f32 %v4889_v10, %v4870_v9  ;;  %v10967_v43 = vpop.permute.xlu1 %5024  ;;  %v4929_v9 = vsel %vm3431_vm12, %v10874_v50, %v10857_v48  ;;  %v4925_v10 = vsel %vm3431_vm12, %v10861_v21, %v10867_v24  ;;  %v6512_v48 = vld [vmem:[%s11827_s30 + $0xc] sm:$0xf] }
0x134d   : > { %v4865_v49 = vpop.permute.xlu0 %4864  ;;  %v7021_v28 = vpack.c.bf16 %v4904_v29, %v4900_v45  ;;  %v4956_v45 = vmul.f32 %v4935_v54, %v4929_v9  ;;  %v4993_v29 = vrot.slane %v6512_v48, %v9895_v46 }
0x134e   : > { %v4868_v19 = vsel %vm3375_vm11, %v4861_v56, %v4865_v49  ;;  %v4874_v31 = vsel %vm3375_vm11, %v4865_v49, %v4853_v62 }
0x134f   : > { %v4898_v27 = vmul.f32 %v4881_v61, %v4874_v31  ;;  %v4901_v18 = vmul.f32 %v4893_v57, %v4868_v19  ;;  %v4943_v61 = vrot.slane %v6511_v44, %v9912_v53  ;;  %v4923_v57 = vsel %vm3431_vm12, %v10867_v24, %v10874_v50  ;;  %v10989_v24 = vpop.permute.xlu1 %5028 }
0x1350   : > { %v4959_v19 = vmul.f32 %v4947_v39, %v4923_v57  ;;  %v4981_v44 = vsel %vm3487_vm13, %v10887_v17, %v10908_v14 }
0x1351   : > { %v6985_v11 = vpack.c.bf16 %v4902_v34, %v4898_v27  ;;  %v4907_v35 = vpop.permute.xlu0 %4906  ;;  %v7019_v16 = vpack.c.bf16 %v4905_v26, %v4901_v18  ;;  %v4958_v26 = vmul.f32 %v4943_v61, %v4925_v10 }
0x1353   : > { %6986 = vmatpush1.bf16.msra.mxu0 %v6985_v11  ;;  %7020 = vmatprep.subr.bf16.mxu1 %v7019_v16  ;;  %v5011_v16 = vmul.f32 %v4993_v29, %v4981_v44 }
0x1354   : > { %7022 = vmatpush1.bf16.msra.mxu1 %v7021_v28 }
0x1355   : > { %v4911_v62 = vpop.permute.xlu0 %4910 }
0x1356   : > { %v4926_v30 = vsel %vm3431_vm12, %v4907_v35, %v4911_v62 }
0x1357   : > { %v4953_v25 = vmul.f32 %v4939_v52, %v4926_v30  ;;  %v10998_v52 = vpop.permute.xlu1 %5070  ;;  %v4989_v30 = vrot.slane %v6512_v48, %v9920_v15 }
0x1359   : > { %v4915_v41 = vpop.permute.xlu0 %4914  ;;  %v6987_v12 = vpack.c.bf16 %v4957_v20, %v4953_v25  ;;  %v5001_v20 = vrot.slane %v6512_v48, %v9922_v60 }
0x135a   : > { %v4924_v56 = vsel %vm3431_vm12, %v4911_v62, %v4915_v41 }
0x135b   : > { %6988 = vmatprep.subr.bf16.mxu0 %v6987_v12  ;;  %v4954_v33 = vmul.f32 %v4943_v61, %v4924_v56  ;;  %v4977_v12 = vsel %vm3487_vm13, %v10918_v36, %v10926_v37  ;;  %v11017_v61 = vpop.permute.xlu1 %5074 }
0x135d   : > { %v4919_v32 = vpop.permute.xlu0 %4918  ;;  %v7025_v18 = vpack.c.bf16 %v4958_v26, %v4954_v33  ;;  %v5013_v33 = vmul.f32 %v5001_v20, %v4977_v12  ;;  %v6513_v26 = vld [vmem:[%s11827_s30 + $0x14] sm:$0xf] }
0x135e   : > { %v4922_v13 = vsel %vm3431_vm12, %v4915_v41, %v4919_v32  ;;  %v4928_v49 = vsel %vm3431_vm12, %v4919_v32, %v4907_v35  ;;  %v4997_v41 = vrot.slane %v6512_v48, %v9912_v53  ;;  %v5055_v44 = vrot.slane %v6513_v26, %v9922_v60 }
0x135f   : > { %v4952_v31 = vmul.f32 %v4935_v54, %v4928_v49  ;;  %v4955_v34 = vmul.f32 %v4947_v39, %v4922_v13  ;;  %v4983_v54 = vsel %vm3487_vm13, %v10926_v37, %v10887_v17  ;;  %v4979_v39 = vsel %vm3487_vm13, %v10908_v14, %v10918_v36 }
0x1360   : > { %v5010_v32 = vmul.f32 %v4989_v30, %v4983_v54  ;;  %v5012_v17 = vmul.f32 %v4997_v41, %v4979_v39  ;;  %v6995_v14 = vpack.c.bf16 %v10689_v59, %v10785_v51  ;;  %v7031_v36 = vpack.c.bf16 %v10699_v0, %v10795_v55 }
0x1361   : > { %v6989_v50 = vpack.c.bf16 %v4956_v45, %v4952_v31  ;;  %v4961_v27 = vpop.permute.xlu0 %4960  ;;  %v7023_v21 = vpack.c.bf16 %v4959_v19, %v4955_v34  ;;  %v5079_v34 = vpop.permute.xlu1 %5078  ;;  %v7033_v59 = vpack.c.bf16 %v10694_v38, %v10793_v40  ;;  %v5047_v51 = vrot.slane %v6513_v26, %v9895_v46 }
0x1362   : > { %v5043_v55 = vrot.slane %v6513_v26, %v9920_v15 }
0x1363   : > { %6990 = vmatpush1.bf16.msra.mxu0 %v6989_v50  ;;  %7024 = vmatprep.subr.bf16.mxu1 %v7023_v21  ;;  %v6997_v50 = vpack.c.bf16 %v10684_v22, %v10783_v23  ;;  %v5035_v22 = vsel %vm3543_vm14, %v10949_v63, %v10959_v42 }
0x1364   : > { %7026 = vmatpush1.bf16.msra.mxu1 %v7025_v18 }
0x1365   : > { %v4965_v11 = vpop.permute.xlu0 %4964  ;;  %v5083_v23 = vpop.permute.xlu1 %5082 }
0x1366   : > { %v4980_v35 = vsel %vm3487_vm13, %v4961_v27, %v4965_v11 }
0x1367   : > { %v5007_v28 = vmul.f32 %v4993_v29, %v4980_v35  ;;  %v5051_v29 = vrot.slane %v6513_v26, %v9912_v53  ;;  %v5064_v35 = vmul.f32 %v5043_v55, %v5035_v22 }
0x1369   : > { %v4969_v47 = vpop.permute.xlu0 %4968  ;;  %v6991_v62 = vpack.c.bf16 %v5011_v16, %v5007_v28  ;;  %v5031_v16 = vsel %vm3543_vm14, %v10967_v43, %v10989_v24 }
0x136a   : > { %v4978_v25 = vsel %vm3487_vm13, %v4965_v11, %v4969_v47 }
0x136b   : > { %6992 = vmatprep.subr.bf16.mxu0 %v6991_v62  ;;  %v5008_v57 = vmul.f32 %v4997_v41, %v4978_v25  ;;  %v5066_v25 = vmul.f32 %v5051_v29, %v5031_v16 }
0x136d   : > { %v4973_v56 = vpop.permute.xlu0 %4972  ;;  %v7029_v31 = vpack.c.bf16 %v5012_v17, %v5008_v57 }
0x136e   : > { %v4976_v9 = vsel %vm3487_vm13, %v4969_v47, %v4973_v56  ;;  %v4982_v10 = vsel %vm3487_vm13, %v4973_v56, %v4961_v27  ;;  %v5033_v27 = vsel %vm3543_vm14, %v10959_v42, %v10967_v43  ;;  %v5037_v42 = vsel %vm3543_vm14, %v10989_v24, %v10949_v63  ;;  %v5125_v43 = vpop.permute.xlu1 %5124  ;;  %v6514_v63 = vld [vmem:[%s11827_s30 + $0x18] sm:$0xf] }
0x136f   : > { %v5006_v13 = vmul.f32 %v4989_v30, %v4982_v10  ;;  %v5009_v49 = vmul.f32 %v5001_v20, %v4976_v9  ;;  %v5065_v18 = vmul.f32 %v5047_v51, %v5033_v27  ;;  %v5067_v41 = vmul.f32 %v5055_v44, %v5037_v42 }
0x1370   : > { %v5101_v10 = vrot.slane %v6514_v63, %v9895_v46 }
0x1371   : > { %v6993_v37 = vpack.c.bf16 %v5010_v32, %v5006_v13  ;;  %v5015_v45 = vpop.permute.xlu0 %5014  ;;  %v7027_v19 = vpack.c.bf16 %v5013_v33, %v5009_v49  ;;  %v5097_v33 = vrot.slane %v6514_v63, %v9920_v15  ;;  %v5087_v13 = vsel %vm3599_vm15, %v11017_v61, %v5079_v34 }
0x1372   : > { %v5129_v9 = vpop.permute.xlu1 %5128  ;;  %v5089_v49 = vsel %vm3599_vm15, %v10998_v52, %v11017_v61  ;;  %v5091_v61 = vsel %vm3599_vm15, %v5083_v23, %v10998_v52  ;;  %v6515_v52 = vld [vmem:[%s11827_s30 + $0x1c] sm:$0xf] }
0x1373   : > { %6994 = vmatpush1.bf16.msra.mxu0 %v6993_v37  ;;  %7028 = vmatprep.subr.bf16.mxu1 %v7027_v19  ;;  %v5119_v19 = vmul.f32 %v5101_v10, %v5087_v13  ;;  %v5151_v42 = vrot.slane %v6515_v52, %v9920_v15 }
0x1374   : > { %6996 = vmatprep.subr.bf16.mxu0 %v6995_v14  ;;  %7030 = vmatpush1.bf16.msra.mxu1 %v7029_v31  ;;  %v5105_v31 = vrot.slane %v6514_v63, %v9912_v53  ;;  %v5109_v14 = vrot.slane %v6514_v63, %v9922_v60 }
0x1375   : > { %v5019_v48 = vpop.permute.xlu0 %5018  ;;  %7032 = vmatprep.subr.bf16.mxu1 %v7031_v36 }
0x1376   : > { %v5034_v0 = vsel %vm3543_vm14, %v5015_v45, %v5019_v48  ;;  %v5133_v26 = vpop.permute.xlu1 %5132 }
0x1377   : > { %6998 = vmatpush1.bf16.msra.mxu0 %v6997_v50  ;;  %v5060_v40 = vmul.f32 %v5043_v55, %v5034_v0  ;;  %v5085_v50 = vsel %vm3599_vm15, %v5079_v34, %v5083_v23 }
0x1378   : > { %7034 = vmatpush1.bf16.msra.mxu1 %v7033_v59  ;;  %v5120_v22 = vmul.f32 %v5105_v31, %v5085_v50 }
0x1379   : > { %v5023_v38 = vpop.permute.xlu0 %5022  ;;  %v7001_v62 = vpack.c.bf16 %v5064_v35, %v5060_v40 }
0x137a   : > { %v5032_v21 = vsel %vm3543_vm14, %v5019_v48, %v5023_v38  ;;  %v5118_v48 = vmul.f32 %v5097_v33, %v5089_v49 }
0x137b   : > { %v5061_v11 = vmul.f32 %v5047_v51, %v5032_v21 }
0x137d   : > { %v5027_v28 = vpop.permute.xlu0 %5026  ;;  %v6999_v47 = vpack.c.bf16 %v5065_v18, %v5061_v11  ;;  %v5155_v11 = vrot.slane %v6515_v52, %v9895_v46 }
0x137e   : > { %v5030_v30 = vsel %vm3543_vm14, %v5023_v38, %v5027_v28  ;;  %v5036_v20 = vsel %vm3543_vm14, %v5027_v28, %v5015_v45  ;;  %v5121_v38 = vmul.f32 %v5109_v14, %v5091_v61  ;;  %v5141_v28 = vsel %vm3655_vm0, %v5129_v9, %v5133_v26 }
0x137f   : > { %v5062_v12 = vmul.f32 %v5051_v29, %v5030_v30  ;;  %v5063_v54 = vmul.f32 %v5055_v44, %v5036_v20  ;;  %7000 = vmatprep.subr.bf16.mxu0 %v6999_v47  ;;  %v5137_v29 = vpop.permute.xlu1 %5136  ;;  %v5143_v47 = vsel %vm3655_vm0, %v5125_v43, %v5129_v9 }
0x1380   : > { %7002 = vmatpush1.bf16.msra.mxu0 %v7001_v62 }
0x1381   : > { %v7037_v39 = vpack.c.bf16 %v5066_v25, %v5062_v12  ;;  %v5069_v56 = vpop.permute.xlu0 %5068  ;;  %v7035_v57 = vpack.c.bf16 %v5067_v41, %v5063_v54  ;;  %v5173_v25 = vmul.f32 %v5155_v11, %v5141_v28  ;;  %v5159_v41 = vrot.slane %v6515_v52, %v9912_v53 }
0x1382   : > { %v5163_v12 = vrot.slane %v6515_v52, %v9922_v60 }
0x1383   : > { %7036 = vmatprep.subr.bf16.mxu1 %v7035_v57  ;;  %v5179_v16 = vpop.permute.xlu1 %5178  ;;  %v5145_v57 = vsel %vm3655_vm0, %v5137_v29, %v5125_v43 }
0x1384   : > { %7038 = vmatpush1.bf16.msra.mxu1 %v7037_v39  ;;  %v5172_v39 = vmul.f32 %v5151_v42, %v5143_v47  ;;  %v5175_v49 = vmul.f32 %v5163_v12, %v5145_v57 }
0x1385   : > { %v5073_v24 = vpop.permute.xlu0 %5072 }
0x1386   : > { %v5088_v32 = vsel %vm3599_vm15, %v5069_v56, %v5073_v24 }
0x1387   : > { %v5114_v37 = vmul.f32 %v5097_v33, %v5088_v32  ;;  %v5183_v63 = vpop.permute.xlu1 %5182 }
0x1389   : > { %v5077_v17 = vpop.permute.xlu0 %5076  ;;  %v7005_v0 = vpack.c.bf16 %v5118_v48, %v5114_v37 }
0x138a   : > { %v5086_v45 = vsel %vm3599_vm15, %v5073_v24, %v5077_v17 }
0x138b   : > { %v5115_v36 = vmul.f32 %v5101_v10, %v5086_v45  ;;  %v5187_v43 = vpop.permute.xlu1 %5186 }
0x138c   : > { %v5195_v61 = vsel %vm3711_vm1, %v5183_v63, %v5187_v43 }
0x138d   : > { %v5081_v59 = vpop.permute.xlu0 %5080  ;;  %v7003_v51 = vpack.c.bf16 %v5119_v19, %v5115_v36 }
0x138e   : > { %v5084_v55 = vsel %vm3599_vm15, %v5077_v17, %v5081_v59  ;;  %v5090_v27 = vsel %vm3599_vm15, %v5081_v59, %v5069_v56  ;;  %v5139_v56 = vsel %vm3655_vm0, %v5133_v26, %v5137_v29  ;;  %v5197_v59 = vsel %vm3711_vm1, %v5179_v16, %v5183_v63 }
0x138f   : > { %v5116_v40 = vmul.f32 %v5105_v31, %v5084_v55  ;;  %v5117_v21 = vmul.f32 %v5109_v14, %v5090_v27  ;;  %7004 = vmatprep.subr.bf16.mxu0 %v7003_v51  ;;  %v5174_v13 = vmul.f32 %v5159_v41, %v5139_v56  ;;  %v6516_v14 = vld [vmem:[%s11827_s30 + $0x20] sm:$0xf]  ;;  %v5191_v51 = vpop.permute.xlu1 %5190 }
0x1390   : > { %7006 = vmatpush1.bf16.msra.mxu0 %v7005_v0  ;;  %v5209_v26 = vrot.slane %v6516_v14, %v9895_v46  ;;  %v5205_v50 = vrot.slane %v6516_v14, %v9920_v15  ;;  %v5199_v29 = vsel %vm3711_vm1, %v5191_v51, %v5179_v16 }
0x1391   : > { %v7041_v34 = vpack.c.bf16 %v5120_v22, %v5116_v40  ;;  %v5123_v18 = vpop.permute.xlu0 %5122  ;;  %v7039_v44 = vpack.c.bf16 %v5121_v38, %v5117_v21  ;;  %v5213_v38 = vrot.slane %v6516_v14, %v9912_v53  ;;  %v5217_v40 = vrot.slane %v6516_v14, %v9922_v60 }
0x1392   : > { %v5227_v22 = vmul.f32 %v5209_v26, %v5195_v61 }
0x1393   : > { %7040 = vmatprep.subr.bf16.mxu1 %v7039_v44  ;;  %v5229_v28 = vmul.f32 %v5217_v40, %v5199_v29 }
0x1394   : > { %7042 = vmatpush1.bf16.msra.mxu1 %v7041_v34  ;;  %v5226_v34 = vmul.f32 %v5205_v50, %v5197_v59 }
0x1395   : > { %v5127_v23 = vpop.permute.xlu0 %5126 }
0x1396   : > { %v5142_v35 = vsel %vm3655_vm0, %v5123_v18, %v5127_v23 }
0x1397   : > { %v5168_v30 = vmul.f32 %v5151_v42, %v5142_v35 }
0x1399   : > { %v5131_v62 = vpop.permute.xlu0 %5130  ;;  %v7009_v10 = vpack.c.bf16 %v5172_v39, %v5168_v30 }
0x139a   : > { %v5140_v20 = vsel %vm3655_vm0, %v5127_v23, %v5131_v62 }
0x139b   : > { %v5169_v54 = vmul.f32 %v5155_v11, %v5140_v20 }
0x139d   : > { %v5135_v24 = vpop.permute.xlu0 %5134  ;;  %v7007_v9 = vpack.c.bf16 %v5173_v25, %v5169_v54 }
0x139e   : > { %v5138_v32 = vsel %vm3655_vm0, %v5131_v62, %v5135_v24  ;;  %v5144_v33 = vsel %vm3655_vm0, %v5135_v24, %v5123_v18  ;;  %v5193_v18 = vsel %vm3711_vm1, %v5187_v43, %v5191_v51 }
0x139f   : > { %v5170_v17 = vmul.f32 %v5159_v41, %v5138_v32  ;;  %v5171_v37 = vmul.f32 %v5163_v12, %v5144_v33  ;;  %7008 = vmatprep.subr.bf16.mxu0 %v7007_v9  ;;  %v5228_v42 = vmul.f32 %v5213_v38, %v5193_v18 }
0x13a0   : > { %7010 = vmatpush1.bf16.msra.mxu0 %v7009_v10 }
0x13a1   : > { %v7045_v45 = vpack.c.bf16 %v5174_v13, %v5170_v17  ;;  %v5177_v19 = vpop.permute.xlu0 %5176  ;;  %v7043_v31 = vpack.c.bf16 %v5175_v49, %v5171_v37 }
0x13a3   : > { %7044 = vmatprep.subr.bf16.mxu1 %v7043_v31 }
0x13a4   : > { %7046 = vmatpush1.bf16.msra.mxu1 %v7045_v45 }
0x13a5   : > { %v5181_v36 = vpop.permute.xlu0 %5180 }
0x13a6   : > { %v5196_v48 = vsel %vm3711_vm1, %v5177_v19, %v5181_v36 }
0x13a7   : > { %v5222_v55 = vmul.f32 %v5205_v50, %v5196_v48  ;;  %v11198_v48 = vld [vmem:[%s7759_s15 + $0x10] sm:$0xff]  ;;  %v11203_v50 = vld [vmem:[%s7759_s15 + $0x18] sm:$0xff] }
0x13a9   : > { %v5185_v0 = vpop.permute.xlu0 %5184  ;;  %v7013_v23 = vpack.c.bf16 %v5226_v34, %v5222_v55 }
0x13aa   : > { %v5194_v27 = vsel %vm3711_vm1, %v5181_v36, %v5185_v0  ;;  %v11188_v36 = vld [vmem:[%s7759_s15] sm:$0xff] }
0x13ab   : > { %v5223_v21 = vmul.f32 %v5209_v26, %v5194_v27  ;;  %v11193_v26 = vld [vmem:[%s7759_s15 + $0x8] sm:$0xff] }
0x13ad   : > { %v5189_v44 = vpop.permute.xlu0 %5188  ;;  %v7011_v52 = vpack.c.bf16 %v5227_v22, %v5223_v21 }
0x13ae   : > { %v5192_v11 = vsel %vm3711_vm1, %v5185_v0, %v5189_v44  ;;  %v5198_v35 = vsel %vm3711_vm1, %v5189_v44, %v5177_v19 }
0x13af   : > { %v5224_v47 = vmul.f32 %v5213_v38, %v5192_v11  ;;  %v5225_v62 = vmul.f32 %v5217_v40, %v5198_v35  ;;  %7012 = vmatprep.subr.bf16.mxu0 %v7011_v52 }
0x13b0   : > { %7014 = vmatpush1.bf16.msra.mxu0 %v7013_v23 }
0x13b1   : > { %v7049_v30 = vpack.c.bf16 %v5228_v42, %v5224_v47  ;;  %v7047_v20 = vpack.c.bf16 %v5229_v28, %v5225_v62 }
0x13b3   : > { %5295 = vmatmul.mubr.f32.vlgmr.msra.gmra.mrb[8].mxu0 %v7775_v1  ;;  %7048 = vmatprep.subr.bf16.mxu1 %v7047_v20 }
0x13b4   : > { %7050 = vmatpush1.bf16.msra.mxu1 %v7049_v30  ;;  %6518 = vmatprep.mubr.msk.f32.mxu0 %vm3751_vm9, %v7781_v4 }
0x13b7   : > { %5372 = vmatmul.mubr.f32.vlgmr.msra.gmra.mrb[8].mxu1 %v7775_v1  ;;  %5301 = vmatmul.mubr.f32.gmra.mrb[10].mxu0 %v7779_v3 }
0x13b8   : > { %6520 = vmatprep.mubr.msk.f32.mxu1 %vm3751_vm9, %v7781_v4  ;;  %6532 = vmatprep.mubr.msk.f32.mxu0 %vm3751_vm9, %v7777_v2 }
0x13bb   : > { %5378 = vmatmul.mubr.f32.gmra.mrb[10].mxu1 %v7779_v3 }
0x13bc   : > { %6534 = vmatprep.mubr.msk.f32.mxu1 %vm3751_vm9, %v7777_v2 }
0x1486   : > { %v11147_v16 = vpop.f32.mrb[8].mxu0 }
0x1487   : > { %v5392_v25 = vmul.f32 %v11147_v16, %v11147_v16  ;;  %v11151_v41 = vpop.f32.mrb[9].mxu0 }
0x1488   : > { %v5384_v12 = vadd.f32 %v11151_v41, %v11147_v16  ;;  %v5393_v54 = vmul.f32 %v11151_v41, %v11151_v41 }
0x148a   : > { %5385 = vadd.xlane.f32.xlu0 %v5384_v12  ;;  %v11157_v39 = vpop.f32.mrb[8].mxu1  ;;  %v5396_v56 = vadd.f32 %v5393_v54, %v5392_v25  ;;  %v11159_v57 = vpop.f32.mrb[10].mxu0 }
0x148b   : > { %v5458_v2 = vmul.f32 %v11157_v39, %v11157_v39  ;;  %v11163_v63 = vpop.f32.mrb[9].mxu1  ;;  %v5394_v24 = vmul.f32 %v11159_v57, %v11159_v57  ;;  %v11167_v9 = vpop.f32.mrb[11].mxu0 }
0x148c   : > { %v5450_v10 = vadd.f32 %v11163_v63, %v11157_v39  ;;  %v5459_v32 = vmul.f32 %v11163_v63, %v11163_v63  ;;  %5397 = vadd.xlane.f32.xlu1 %v5396_v56  ;;  %v5387_v33 = vadd.f32 %v11167_v9, %v11159_v57  ;;  %v5395_v13 = vmul.f32 %v11167_v9, %v11167_v9 }
0x148e   : > { %5451 = vadd.xlane.f32.xlu0 %v5450_v10  ;;  %v11177_v49 = vpop.f32.mrb[10].mxu1  ;;  %v5462_v17 = vadd.f32 %v5459_v32, %v5458_v2  ;;  %v5399_v37 = vadd.f32 %v5395_v13, %v5394_v24 }
0x148f   : > { %v5460_v45 = vmul.f32 %v11177_v49, %v11177_v49  ;;  %v11181_v19 = vpop.f32.mrb[11].mxu1 }
0x1490   : > { %v5453_v31 = vadd.f32 %v11181_v19, %v11177_v49  ;;  %v5461_v43 = vmul.f32 %v11181_v19, %v11181_v19  ;;  %5388 = vadd.xlane.f32.xlu1 %v5387_v33 }
0x1492   : > { %5454 = vadd.xlane.f32.xlu0 %v5453_v31  ;;  %v5465_v14 = vadd.f32 %v5461_v43, %v5460_v45 }
0x1494   : > { %5463 = vadd.xlane.f32.xlu1 %v5462_v17 }
0x1496   : > { %5400 = vadd.xlane.f32.xlu0 %v5399_v37 }
0x149a   : > { %5466 = vadd.xlane.f32.xlu0 %v5465_v14 }
0x14a5   : > { %5535 = vrot.lane.b32.xlu1 %v11188_v36, %s7531_s9 }
0x14a9   : > { %5539 = vrot.lane.b32.xlu1 %v11193_v26, %s7531_s9 }
0x14ad   : > { %5543 = vrot.lane.b32.xlu1 %v11198_v48, %s7531_s9 }
0x14b1   : > { %5547 = vrot.lane.b32.xlu1 %v11203_v50, %s7531_s9 }
0x1517   : > { %v5386_v61 = vpop.xlane.xlu0 %5385 }
0x1518   : > { %v5390_v59 = vmul.f32 0.00390625, %v5386_v61 }
0x1519   : > { %v5398_v51 = vpop.xlane.xlu1 %5397 }
0x151a   : > { %v5404_v0 = vmul.f32 %v5390_v59, %v5390_v59  ;;  %v5402_v55 = vmul.f32 0.00390625, %v5398_v51 }
0x151b   : > { %v5452_v27 = vpop.xlane.xlu0 %5451 }
0x151c   : > { %v5406_v22 = vsub.f32 %v5402_v55, %v5404_v0  ;;  %v5456_v21 = vmul.f32 0.00390625, %v5452_v27 }
0x151d   : > { %v5389_v38 = vpop.xlane.xlu1 %5388 }
0x151e   : > { %v5408_v40 = vadd.f32 1e-05, %v5406_v22  ;;  %v5391_v18 = vmul.f32 0.00390625, %v5389_v38  ;;  %v5470_v44 = vmul.f32 %v5456_v21, %v5456_v21 }
0x151f   : > { %v5455_v34 = vpop.xlane.xlu0 %5454 }
0x1520   : > { %7313 = vrsqrt.f32 %v5408_v40  ;;  %v5405_v11 = vmul.f32 %v5391_v18, %v5391_v18  ;;  %v5457_v35 = vmul.f32 0.00390625, %v5455_v34 }
0x1521   : > { %v5464_v29 = vpop.xlane.xlu1 %5463 }
0x1522   : > { %v5468_v52 = vmul.f32 0.00390625, %v5464_v29  ;;  %v5471_v25 = vmul.f32 %v5457_v35, %v5457_v35 }
0x1523   : > { %v5401_v23 = vpop.xlane.xlu0 %5400 }
0x1524   : > { %v5472_v42 = vsub.f32 %v5468_v52, %v5470_v44  ;;  %v5403_v28 = vmul.f32 0.00390625, %v5401_v23 }
0x1525   : > { %v11207_v47 = vpop.permute.xlu1 %5535 }
0x1526   : > { %v5474_v62 = vadd.f32 1e-05, %v5472_v42  ;;  %v5407_v30 = vsub.f32 %v5403_v28, %v5405_v11 }
0x1527   : > { %v5467_v20 = vpop.xlane.xlu0 %5466 }
0x1528   : > { %7315 = vrsqrt.f32 %v5474_v62  ;;  %v5409_v12 = vadd.f32 1e-05, %v5407_v30  ;;  %v5469_v54 = vmul.f32 0.00390625, %v5467_v20 }
0x1529   : > { %v5540_v56 = vpop.permute.xlu1 %5539 }
0x152a   : > { %v7314_v2 = vpop.eup %7313  ;;  %7317 = vrsqrt.f32 %v5409_v12  ;;  %v5473_v24 = vsub.f32 %v5469_v54, %v5471_v25  ;;  %v11212_v10 = vsel %vm3320_vm10, %v11207_v47, %v5540_v56 }
0x152b   : > { %v5412_v32 = vmul.f32 %v7314_v2, %v7786_v5 }
0x152c   : > { %v5475_v33 = vadd.f32 1e-05, %v5473_v24 }
0x152d   : > { %5416 = vperm.xlu1 %7295, %v5412_v32   ;;  %v11215_v13 = vpop.permute.xlu1 %5543  ;;  %v5428_v14 = vmul.f32 %v5412_v32, %v5390_v59 }
0x152e   : > { %7319 = vrsqrt.f32 %v5475_v33  ;;  %v11220_v17 = vsel %vm3320_vm10, %v5540_v56, %v11215_v13 }
0x152f   : > { %v5430_v0 = vsub.f32 %v7796_v7, %v5428_v14 }
0x1531   : > { %v11281_v59 = vpop.permute.xlu1 %5547 }
0x1532   : > { %v7316_v37 = vpop.eup %7315 }
0x1533   : > { %v5478_v45 = vmul.f32 %v7316_v37, %v7786_v5 }
0x1534   : > { %v7318_v31 = vpop.eup %7317 }
0x1535   : > { %v5413_v43 = vmul.f32 %v7318_v31, %v7791_v6  ;;  %5482 = vperm.xlu1 %7295, %v5478_v45   ;;  %v5494_v27 = vmul.f32 %v5478_v45, %v5456_v21 }
0x1537   : > { %5421 = vperm.xlu0 %7296, %v5413_v43   ;;  %v5429_v55 = vmul.f32 %v5413_v43, %v5391_v18  ;;  %v5496_v38 = vsub.f32 %v7796_v7, %v5494_v27 }
0x1538   : > { %v7320_v61 = vpop.eup %7319 }
0x1539   : > { %v5479_v51 = vmul.f32 %v7320_v61, %v7791_v6  ;;  %v5431_v22 = vsub.f32 %v7801_v8, %v5429_v55 }
0x153b   : > { %5434 = vperm.xlu0 %7296, %v5430_v0   ;;  %5487 = vperm.xlu1 %7295, %v5479_v51   ;;  %v5495_v40 = vmul.f32 %v5479_v51, %v5457_v35 }
0x153d   : > { %v5497_v34 = vsub.f32 %v7801_v8, %v5495_v40 }
0x153f   : > { %5439 = vperm.xlu1 %7295, %v5431_v22   ;;  %5500 = vperm.xlu0 %7296, %v5496_v38   ;;  %v5557_v22 = vld [vmem:[%s11827_s30] sm:$0xf] }
0x1543   : > { %5505 = vperm.xlu1 %7295, %v5497_v34   ;;  %v5566_v34 = vrot.slane %v5557_v22, %v9895_v46 }
0x1547   : > { %5589 = vrot.lane.b32.xlu1 %v11188_v36, %s7532_s27 }
0x154b   : > { %5593 = vrot.lane.b32.xlu1 %v11193_v26, %s7532_s27 }
0x154f   : > { %5597 = vrot.lane.b32.xlu1 %v11198_v48, %s7532_s27 }
0x1553   : > { %5601 = vrot.lane.b32.xlu1 %v11203_v50, %s7532_s27 }
0x1557   : > { %5643 = vrot.lane.b32.xlu1 %v11188_v36, %s7533_s26 }
0x155b   : > { %5647 = vrot.lane.b32.xlu1 %v11193_v26, %s7533_s26 }
0x155f   : > { %5651 = vrot.lane.b32.xlu1 %v11198_v48, %s7533_s26 }
0x1563   : > { %5655 = vrot.lane.b32.xlu1 %v11203_v50, %s7533_s26 }
0x1567   : > { %5697 = vrot.lane.b32.xlu1 %v11188_v36, %s7534_s29 }
0x156b   : > { %5701 = vrot.lane.b32.xlu1 %v11193_v26, %s7534_s29 }
0x156f   : > { %5705 = vrot.lane.b32.xlu1 %v11198_v48, %s7534_s29 }
0x1573   : > { %5709 = vrot.lane.b32.xlu1 %v11203_v50, %s7534_s29 }
0x1577   : > { %5751 = vrot.lane.b32.xlu1 %v11188_v36, %s7535_s14 }
0x157b   : > { %5755 = vrot.lane.b32.xlu1 %v11193_v26, %s7535_s14 }
0x157f   : > { %5759 = vrot.lane.b32.xlu1 %v11198_v48, %s7535_s14 }
0x1583   : > { %5763 = vrot.lane.b32.xlu1 %v11203_v50, %s7535_s14 }
0x1587   : > { %5805 = vrot.lane.b32.xlu1 %v11188_v36, %s7536_s10 }
0x158b   : > { %5809 = vrot.lane.b32.xlu1 %v11193_v26, %s7536_s10 }
0x158f   : > { %5813 = vrot.lane.b32.xlu1 %v11198_v48, %s7536_s10 }
0x1593   : > { %5817 = vrot.lane.b32.xlu1 %v11203_v50, %s7536_s10 }
0x1597   : > { %5859 = vrot.lane.b32.xlu1 %v11188_v36, %s7537_s6 }
0x159b   : > { %5863 = vrot.lane.b32.xlu1 %v11193_v26, %s7537_s6 }
0x159f   : > { %5867 = vrot.lane.b32.xlu1 %v11198_v48, %s7537_s6 }
0x15a3   : > { %5871 = vrot.lane.b32.xlu1 %v11203_v50, %s7537_s6 }
0x15a7   : > { %5913 = vrot.lane.b32.xlu1 %v11188_v36, %s7538_s7 }
0x15ab   : > { %5917 = vrot.lane.b32.xlu1 %v11193_v26, %s7538_s7 }
0x15ac   : > { %v5417_v21 = vpop.permute.xlu1 %5416 }
0x15ad   : > { %v5424_v23 = vmul.f32 %v5417_v21, %v11147_v16  ;;  %v5425_v11 = vmul.f32 %v5417_v21, %v11151_v41 }
0x15af   : > { %5921 = vrot.lane.b32.xlu1 %v11198_v48, %s7538_s7 }
0x15b3   : > { %5925 = vrot.lane.b32.xlu1 %v11203_v50, %s7538_s7 }
0x15b4   : > { %v5483_v18 = vpop.permute.xlu1 %5482 }
0x15b5   : > { %v5490_v54 = vmul.f32 %v5483_v18, %v11157_v39  ;;  %v5491_v56 = vmul.f32 %v5483_v18, %v11163_v63 }
0x15b6   : > { %v5422_v29 = vpop.permute.xlu0 %5421 }
0x15b7   : > { %v5426_v35 = vmul.f32 %v5422_v29, %v11159_v57  ;;  %v5427_v42 = vmul.f32 %v5422_v29, %v11167_v9  ;;  %v5584_v29 = vmul.f32 %v5566_v34, %v11212_v10  ;;  %v5570_v10 = vrot.slane %v5557_v22, %v9912_v53 }
0x15ba   : > { %v5435_v44 = vpop.permute.xlu0 %5434  ;;  %v5488_v52 = vpop.permute.xlu1 %5487 }
0x15bb   : > { %v5442_v62 = vadd.f32 %v5435_v44, %v5424_v23  ;;  %v5443_v30 = vadd.f32 %v5435_v44, %v5425_v11  ;;  %v5492_v16 = vmul.f32 %v5488_v52, %v11177_v49  ;;  %v5493_v41 = vmul.f32 %v5488_v52, %v11181_v19 }
0x15be   : > { %v5440_v28 = vpop.permute.xlu1 %5439  ;;  %v5501_v20 = vpop.permute.xlu0 %5500 }
0x15bf   : > { %v5444_v25 = vadd.f32 %v5440_v28, %v5426_v35  ;;  %v5445_v12 = vadd.f32 %v5440_v28, %v5427_v42  ;;  %v5508_v9 = vadd.f32 %v5501_v20, %v5490_v54  ;;  %v5509_v24 = vadd.f32 %v5501_v20, %v5491_v56 }
0x15c0   : > { %v5562_v35 = vrot.slane %v5557_v22, %v9920_v15  ;;  %v5574_v42 = vrot.slane %v5557_v22, %v9922_v60 }
0x15c1   : > { %v5446_v2 = vadd.f32 %v5444_v25, %v5442_v62  ;;  %v5447_v57 = vadd.f32 %v5445_v12, %v5443_v30  ;;  %v5550_v62 = vsel %vm3320_vm10, %v11215_v13, %v11281_v59  ;;  %v5556_v30 = vsel %vm3320_vm10, %v11281_v59, %v11207_v47  ;;  %v6525_v47 = vld [vmem:[%s11827_s30 + $0x4] sm:$0xf] }
0x15c2   : > { %v5506_v32 = vpop.permute.xlu1 %5505  ;;  %v5585_v13 = vmul.f32 %v5570_v10, %v11220_v17 }
0x15c3   : > { %v11295_v33 = vmax.f32 %v5446_v2, 0.0  ;;  %v11297_v37 = vmax.f32 %v5447_v57, 0.0  ;;  %v5510_v45 = vadd.f32 %v5506_v32, %v5492_v16  ;;  %v5511_v31 = vadd.f32 %v5506_v32, %v5493_v41 }
0x15c4   : > { %v5583_v16 = vmul.f32 %v5562_v35, %v5556_v30  ;;  %v5586_v41 = vmul.f32 %v5574_v42, %v5550_v62 }
0x15c5   : > { %6521 = vst [vmem:[%s7772_s18 + $0x20] sm:$0xff] %v11295_v33  ;;  %6522 = vst [vmem:[%s7772_s18 + $0x28] sm:$0xff] %v11297_v37  ;;  %v5512_v39 = vadd.f32 %v5510_v45, %v5508_v9  ;;  %v5513_v63 = vadd.f32 %v5511_v31, %v5509_v24  ;;  %5533 = vrot.lane.b32.xlu0 %v11295_v33, %s7531_s9  ;;  %v5620_v45 = vrot.slane %v6525_v47, %v9895_v46 }
0x15c6   : > { %v11349_v43 = vpop.permute.xlu1 %5589 }
0x15c7   : > { %v11305_v49 = vmax.f32 %v5512_v39, 0.0  ;;  %v11307_v19 = vmax.f32 %v5513_v63, 0.0 }
0x15c9   : > { %6523 = vst [vmem:[%s7772_s18 + $0x30] sm:$0xff] %v11305_v49  ;;  %6524 = vst [vmem:[%s7772_s18 + $0x38] sm:$0xff] %v11307_v19  ;;  %5537 = vrot.lane.b32.xlu0 %v11297_v37, %s7531_s9 }
0x15ca   : > { %v11353_v14 = vpop.permute.xlu1 %5593 }
0x15cb   : > { %v5608_v39 = vsel %vm3375_vm11, %v11349_v43, %v11353_v14 }
0x15cc   : > { %v5638_v22 = vmul.f32 %v5620_v45, %v5608_v39 }
0x15cd   : > { %5541 = vrot.lane.b32.xlu0 %v11305_v49, %s7531_s9 }
0x15ce   : > { %v11359_v61 = vpop.permute.xlu1 %5597 }
0x15d1   : > { %5545 = vrot.lane.b32.xlu0 %v11307_v19, %s7531_s9 }
0x15d2   : > { %v11363_v51 = vpop.permute.xlu1 %5601 }
0x15d5   : > { %5587 = vrot.lane.b32.xlu0 %v11295_v33, %s7532_s27 }
0x15d6   : > { %v11369_v0 = vpop.permute.xlu1 %5643 }
0x15d9   : > { %5591 = vrot.lane.b32.xlu0 %v11297_v37, %s7532_s27 }
0x15da   : > { %v11373_v55 = vpop.permute.xlu1 %5647 }
0x15dd   : > { %5595 = vrot.lane.b32.xlu0 %v11305_v49, %s7532_s27 }
0x15de   : > { %v11379_v27 = vpop.permute.xlu1 %5651 }
0x15e1   : > { %5599 = vrot.lane.b32.xlu0 %v11307_v19, %s7532_s27 }
0x15e2   : > { %v11386_v40 = vpop.permute.xlu1 %5655 }
0x15e5   : > { %5641 = vrot.lane.b32.xlu0 %v11295_v33, %s7533_s26 }
0x15e6   : > { %v11396_v52 = vpop.permute.xlu1 %5697 }
0x15e9   : > { %5645 = vrot.lane.b32.xlu0 %v11297_v37, %s7533_s26 }
0x15ea   : > { %v11413_v25 = vpop.permute.xlu1 %5701 }
0x15ed   : > { %5649 = vrot.lane.b32.xlu0 %v11305_v49, %s7533_s26 }
0x15ee   : > { %v11424_v31 = vpop.permute.xlu1 %5705 }
0x15f1   : > { %5653 = vrot.lane.b32.xlu0 %v11307_v19, %s7533_s26 }
0x15f5   : > { %5695 = vrot.lane.b32.xlu0 %v11295_v33, %s7534_s29 }
0x15f9   : > { %5699 = vrot.lane.b32.xlu0 %v11297_v37, %s7534_s29 }
0x15fd   : > { %5703 = vrot.lane.b32.xlu0 %v11305_v49, %s7534_s29 }
0x1601   : > { %5707 = vrot.lane.b32.xlu0 %v11307_v19, %s7534_s29 }
0x1605   : > { %5749 = vrot.lane.b32.xlu0 %v11295_v33, %s7535_s14 }
0x1609   : > { %5753 = vrot.lane.b32.xlu0 %v11297_v37, %s7535_s14 }
0x160d   : > { %5757 = vrot.lane.b32.xlu0 %v11305_v49, %s7535_s14 }
0x1611   : > { %5761 = vrot.lane.b32.xlu0 %v11307_v19, %s7535_s14 }
0x1615   : > { %5803 = vrot.lane.b32.xlu0 %v11295_v33, %s7536_s10 }
0x1619   : > { %5807 = vrot.lane.b32.xlu0 %v11297_v37, %s7536_s10 }
0x161d   : > { %5811 = vrot.lane.b32.xlu0 %v11305_v49, %s7536_s10 }
0x1621   : > { %5815 = vrot.lane.b32.xlu0 %v11307_v19, %s7536_s10 }
0x1625   : > { %5857 = vrot.lane.b32.xlu0 %v11295_v33, %s7537_s6 }
0x1629   : > { %5861 = vrot.lane.b32.xlu0 %v11297_v37, %s7537_s6 }
0x162d   : > { %5865 = vrot.lane.b32.xlu0 %v11305_v49, %s7537_s6 }
0x1631   : > { %5869 = vrot.lane.b32.xlu0 %v11307_v19, %s7537_s6 }
0x1635   : > { %5911 = vrot.lane.b32.xlu0 %v11295_v33, %s7538_s7 }
0x1637   : > { %v5534_v38 = vpop.permute.xlu0 %5533 }
0x1639   : > { %5915 = vrot.lane.b32.xlu0 %v11297_v37, %s7538_s7 }
0x163b   : > { %v5538_v21 = vpop.permute.xlu0 %5537 }
0x163c   : > { %v5553_v18 = vsel %vm3320_vm10, %v5534_v38, %v5538_v21 }
0x163d   : > { %v5580_v44 = vmul.f32 %v5566_v34, %v5553_v18  ;;  %5919 = vrot.lane.b32.xlu0 %v11305_v49, %s7538_s7  ;;  %v11432_v18 = vpop.permute.xlu1 %5709 }
0x163f   : > { %v5542_v23 = vpop.permute.xlu0 %5541  ;;  %v7051_v11 = vpack.c.bf16 %v5584_v29, %v5580_v44  ;;  %v5616_v29 = vrot.slane %v6525_v47, %v9920_v15  ;;  %v5628_v44 = vrot.slane %v6525_v47, %v9922_v60 }
0x1640   : > { %v5551_v28 = vsel %vm3320_vm10, %v5538_v21, %v5542_v23 }
0x1641   : > { %7052 = vmatprep.subr.bf16.mxu0 %v7051_v11  ;;  %5923 = vrot.lane.b32.xlu0 %v11307_v19, %s7538_s7  ;;  %v5581_v12 = vmul.f32 %v5570_v10, %v5551_v28  ;;  %v5624_v11 = vrot.slane %v6525_v47, %v9912_v53  ;;  %v5606_v28 = vsel %vm3375_vm11, %v11353_v14, %v11359_v61 }
0x1642   : > { %v5662_v47 = vsel %vm3431_vm12, %v11369_v0, %v11373_v55 }
0x1643   : > { %v5546_v20 = vpop.permute.xlu0 %5545  ;;  %v7089_v32 = vpack.c.bf16 %v5585_v13, %v5581_v12 }
0x1644   : > { %v5549_v54 = vsel %vm3320_vm10, %v5542_v23, %v5546_v20  ;;  %v5555_v56 = vsel %vm3320_vm10, %v5546_v20, %v5534_v38 }
0x1645   : > { %v5579_v2 = vmul.f32 %v5562_v35, %v5555_v56  ;;  %v5582_v57 = vmul.f32 %v5574_v42, %v5549_v54  ;;  %v5604_v35 = vsel %vm3375_vm11, %v11359_v61, %v11363_v51  ;;  %v5610_v42 = vsel %vm3375_vm11, %v11363_v51, %v11349_v43  ;;  %v6526_v51 = vld [vmem:[%s11827_s30 + $0x8] sm:$0xf] }
0x1646   : > { %v5637_v12 = vmul.f32 %v5616_v29, %v5610_v42  ;;  %v5640_v54 = vmul.f32 %v5628_v44, %v5604_v35  ;;  %v5639_v43 = vmul.f32 %v5624_v11, %v5606_v28  ;;  %v5674_v13 = vrot.slane %v6526_v51, %v9895_v46 }
0x1647   : > { %v7053_v59 = vpack.c.bf16 %v5583_v16, %v5579_v2  ;;  %v5588_v9 = vpop.permute.xlu0 %5587  ;;  %v7087_v24 = vpack.c.bf16 %v5586_v41, %v5582_v57  ;;  %v11455_v41 = vpop.permute.xlu1 %5751 }
0x1649   : > { %7054 = vmatpush1.bf16.msra.mxu0 %v7053_v59  ;;  %7088 = vmatprep.subr.bf16.mxu1 %v7087_v24 }
0x164a   : > { %7090 = vmatpush1.bf16.msra.mxu1 %v7089_v32  ;;  %v5692_v32 = vmul.f32 %v5674_v13, %v5662_v47 }
0x164b   : > { %v5592_v17 = vpop.permute.xlu0 %5591 }
0x164c   : > { %v5607_v63 = vsel %vm3375_vm11, %v5588_v9, %v5592_v17 }
0x164d   : > { %v5634_v38 = vmul.f32 %v5620_v45, %v5607_v63  ;;  %v5670_v63 = vrot.slane %v6526_v51, %v9920_v15 }
0x164f   : > { %v5596_v34 = vpop.permute.xlu0 %5595  ;;  %v7055_v21 = vpack.c.bf16 %v5638_v22, %v5634_v38  ;;  %v5682_v22 = vrot.slane %v6526_v51, %v9922_v60 }
0x1650   : > { %v5605_v23 = vsel %vm3375_vm11, %v5592_v17, %v5596_v34 }
0x1651   : > { %7056 = vmatprep.subr.bf16.mxu0 %v7055_v21  ;;  %v5635_v62 = vmul.f32 %v5624_v11, %v5605_v23  ;;  %v5678_v21 = vrot.slane %v6526_v51, %v9912_v53  ;;  %v5660_v23 = vsel %vm3431_vm12, %v11373_v55, %v11379_v27 }
0x1653   : > { %v5600_v10 = vpop.permute.xlu0 %5599  ;;  %v7093_v57 = vpack.c.bf16 %v5639_v43, %v5635_v62  ;;  %v5716_v43 = vsel %vm3487_vm13, %v11396_v52, %v11413_v25 }
0x1654   : > { %v5603_v30 = vsel %vm3375_vm11, %v5596_v34, %v5600_v10  ;;  %v5609_v20 = vsel %vm3375_vm11, %v5600_v10, %v5588_v9  ;;  %v11465_v9 = vpop.permute.xlu1 %5755 }
0x1655   : > { %v5633_v56 = vmul.f32 %v5616_v29, %v5609_v20  ;;  %v5636_v16 = vmul.f32 %v5628_v44, %v5603_v30  ;;  %v5658_v29 = vsel %vm3431_vm12, %v11379_v27, %v11386_v40  ;;  %v5664_v44 = vsel %vm3431_vm12, %v11386_v40, %v11369_v0  ;;  %v6527_v0 = vld [vmem:[%s11827_s30 + $0xc] sm:$0xf] }
0x1656   : > { %v5691_v10 = vmul.f32 %v5670_v63, %v5664_v44  ;;  %v5694_v62 = vmul.f32 %v5682_v22, %v5658_v29 }
0x1657   : > { %v7057_v14 = vpack.c.bf16 %v5637_v12, %v5633_v56  ;;  %v5642_v61 = vpop.permute.xlu0 %5641  ;;  %v7091_v2 = vpack.c.bf16 %v5640_v54, %v5636_v16  ;;  %v5693_v12 = vmul.f32 %v5678_v21, %v5660_v23  ;;  %v5728_v16 = vrot.slane %v6527_v0, %v9895_v46 }
0x1658   : > { %v11473_v34 = vpop.permute.xlu1 %5759 }
0x1659   : > { %7058 = vmatpush1.bf16.msra.mxu0 %v7057_v14  ;;  %7092 = vmatprep.subr.bf16.mxu1 %v7091_v2 }
0x165a   : > { %7094 = vmatpush1.bf16.msra.mxu1 %v7093_v57 }
0x165b   : > { %v5646_v59 = vpop.permute.xlu0 %5645 }
0x165c   : > { %v5661_v24 = vsel %vm3431_vm12, %v5642_v61, %v5646_v59  ;;  %v11495_v27 = vpop.permute.xlu1 %5763 }
0x165d   : > { %v5688_v45 = vmul.f32 %v5674_v13, %v5661_v24  ;;  %v5736_v24 = vrot.slane %v6527_v0, %v9922_v60 }
0x165f   : > { %v5650_v39 = vpop.permute.xlu0 %5649  ;;  %v7059_v17 = vpack.c.bf16 %v5692_v32, %v5688_v45  ;;  %v5732_v45 = vrot.slane %v6527_v0, %v9912_v53 }
0x1660   : > { %v5659_v38 = vsel %vm3431_vm12, %v5646_v59, %v5650_v39  ;;  %v11504_v57 = vpop.permute.xlu1 %5805  ;;  %v5724_v59 = vrot.slane %v6527_v0, %v9920_v15  ;;  %v7069_v0 = vpack.c.bf16 %v11188_v36, %v11295_v33  ;;  %v5770_v36 = vsel %vm3543_vm14, %v11455_v41, %v11465_v9 }
0x1661   : > { %7060 = vmatprep.subr.bf16.mxu0 %v7059_v17  ;;  %v5689_v35 = vmul.f32 %v5678_v21, %v5659_v38  ;;  %v5718_v17 = vsel %vm3487_vm13, %v11432_v18, %v11396_v52 }
0x1662   : > { %v5745_v23 = vmul.f32 %v5724_v59, %v5718_v17 }
0x1663   : > { %v5654_v11 = vpop.permute.xlu0 %5653  ;;  %v7097_v56 = vpack.c.bf16 %v5693_v12, %v5689_v35 }
0x1664   : > { %v5657_v42 = vsel %vm3431_vm12, %v5650_v39, %v5654_v11  ;;  %v5663_v28 = vsel %vm3431_vm12, %v5654_v11, %v5642_v61  ;;  %v5746_v61 = vmul.f32 %v5728_v16, %v5716_v43  ;;  %v5712_v39 = vsel %vm3487_vm13, %v11424_v31, %v11432_v18  ;;  %v11523_v38 = vpop.permute.xlu1 %5809 }
0x1665   : > { %v5687_v30 = vmul.f32 %v5670_v63, %v5663_v28  ;;  %v5690_v20 = vmul.f32 %v5682_v22, %v5657_v42  ;;  %v5714_v63 = vsel %vm3487_vm13, %v11413_v25, %v11424_v31  ;;  %v5748_v11 = vmul.f32 %v5736_v24, %v5712_v39 }
0x1666   : > { %v5747_v52 = vmul.f32 %v5732_v45, %v5714_v63  ;;  %v7067_v25 = vpack.c.bf16 %v11193_v26, %v11297_v37  ;;  %v7103_v31 = vpack.c.bf16 %v11203_v50, %v11307_v19  ;;  %v7105_v26 = vpack.c.bf16 %v11198_v48, %v11305_v49 }
0x1667   : > { %v7061_v40 = vpack.c.bf16 %v5691_v10, %v5687_v30  ;;  %v5696_v54 = vpop.permute.xlu0 %5695  ;;  %v7095_v55 = vpack.c.bf16 %v5694_v62, %v5690_v20  ;;  %v6528_v20 = vld [vmem:[%s11827_s30 + $0x14] sm:$0xf] }
0x1668   : > { %v5814_v30 = vpop.permute.xlu1 %5813  ;;  %v5782_v37 = vrot.slane %v6528_v20, %v9895_v46  ;;  %v5778_v19 = vrot.slane %v6528_v20, %v9920_v15 }
0x1669   : > { %7062 = vmatpush1.bf16.msra.mxu0 %v7061_v40  ;;  %7096 = vmatprep.subr.bf16.mxu1 %v7095_v55  ;;  %v5768_v40 = vsel %vm3543_vm14, %v11465_v9, %v11473_v34  ;;  %v5772_v9 = vsel %vm3543_vm14, %v11495_v27, %v11455_v41  ;;  %v6529_v41 = vld [vmem:[%s11827_s30 + $0x18] sm:$0xf] }
0x166a   : > { %7098 = vmatpush1.bf16.msra.mxu1 %v7097_v56  ;;  %v5800_v55 = vmul.f32 %v5782_v37, %v5768_v40  ;;  %v5786_v56 = vrot.slane %v6528_v20, %v9912_v53 }
0x166b   : > { %v5700_v51 = vpop.permute.xlu0 %5699 }
0x166c   : > { %v5715_v14 = vsel %vm3487_vm13, %v5696_v54, %v5700_v51  ;;  %v5818_v33 = vpop.permute.xlu1 %5817 }
0x166d   : > { %v5742_v2 = vmul.f32 %v5728_v16, %v5715_v14  ;;  %v5790_v16 = vrot.slane %v6528_v20, %v9922_v60  ;;  %v5766_v14 = vsel %vm3543_vm14, %v11473_v34, %v11495_v27 }
0x166f   : > { %v5704_v13 = vpop.permute.xlu0 %5703  ;;  %v7063_v47 = vpack.c.bf16 %v5746_v61, %v5742_v2 }
0x1670   : > { %v5713_v32 = vsel %vm3487_vm13, %v5700_v51, %v5704_v13  ;;  %v5799_v51 = vmul.f32 %v5778_v19, %v5770_v36  ;;  %v5860_v34 = vpop.permute.xlu1 %5859 }
0x1671   : > { %7064 = vmatprep.subr.bf16.mxu0 %v7063_v47  ;;  %v5743_v21 = vmul.f32 %v5732_v45, %v5713_v32  ;;  %v5802_v32 = vmul.f32 %v5790_v16, %v5772_v9 }
0x1673   : > { %v5708_v22 = vpop.permute.xlu0 %5707  ;;  %v7101_v62 = vpack.c.bf16 %v5747_v52, %v5743_v21 }
0x1674   : > { %v5711_v29 = vsel %vm3487_vm13, %v5704_v13, %v5708_v22  ;;  %v5717_v44 = vsel %vm3487_vm13, %v5708_v22, %v5696_v54  ;;  %v5864_v21 = vpop.permute.xlu1 %5863 }
0x1675   : > { %v5741_v35 = vmul.f32 %v5724_v59, %v5717_v44  ;;  %v5744_v42 = vmul.f32 %v5736_v24, %v5711_v29  ;;  %v5801_v24 = vmul.f32 %v5786_v56, %v5766_v14  ;;  %v5836_v29 = vrot.slane %v6529_v41, %v9895_v46 }
0x1677   : > { %v7065_v18 = vpack.c.bf16 %v5745_v23, %v5741_v35  ;;  %v5750_v28 = vpop.permute.xlu0 %5749  ;;  %v7099_v10 = vpack.c.bf16 %v5748_v11, %v5744_v42  ;;  %v5832_v23 = vrot.slane %v6529_v41, %v9920_v15  ;;  %v5822_v11 = vsel %vm3599_vm15, %v11523_v38, %v5814_v30 }
0x1678   : > { %v5824_v35 = vsel %vm3599_vm15, %v11504_v57, %v11523_v38  ;;  %v5826_v38 = vsel %vm3599_vm15, %v5818_v33, %v11504_v57  ;;  %v6530_v57 = vld [vmem:[%s11827_s30 + $0x1c] sm:$0xf] }
0x1679   : > { %7066 = vmatpush1.bf16.msra.mxu0 %v7065_v18  ;;  %7100 = vmatprep.subr.bf16.mxu1 %v7099_v10  ;;  %v5840_v10 = vrot.slane %v6529_v41, %v9912_v53  ;;  %v5853_v20 = vmul.f32 %v5832_v23, %v5824_v35  ;;  %v5886_v14 = vrot.slane %v6530_v57, %v9920_v15 }
0x167a   : > { %7068 = vmatprep.subr.bf16.mxu0 %v7067_v25  ;;  %7102 = vmatpush1.bf16.msra.mxu1 %v7101_v62  ;;  %v5844_v62 = vrot.slane %v6529_v41, %v9922_v60 }
0x167b   : > { %v5754_v12 = vpop.permute.xlu0 %5753  ;;  %7104 = vmatprep.subr.bf16.mxu1 %v7103_v31  ;;  %v5868_v31 = vpop.permute.xlu1 %5867 }
0x167c   : > { %v5769_v50 = vsel %vm3543_vm14, %v5750_v28, %v5754_v12  ;;  %v5856_v36 = vmul.f32 %v5844_v62, %v5826_v38  ;;  %v5876_v9 = vsel %vm3655_vm0, %v5864_v21, %v5868_v31 }
0x167d   : > { %7070 = vmatpush1.bf16.msra.mxu0 %v7069_v0  ;;  %v5795_v49 = vmul.f32 %v5778_v19, %v5769_v50 }
0x167e   : > { %7106 = vmatpush1.bf16.msra.mxu1 %v7105_v26 }
0x167f   : > { %v5758_v48 = vpop.permute.xlu0 %5757  ;;  %v7073_v13 = vpack.c.bf16 %v5799_v51, %v5795_v49 }
0x1680   : > { %v5767_v54 = vsel %vm3543_vm14, %v5754_v12, %v5758_v48  ;;  %v5820_v12 = vsel %vm3599_vm15, %v5814_v30, %v5818_v33 }
0x1681   : > { %v5796_v43 = vmul.f32 %v5782_v37, %v5767_v54  ;;  %v5855_v40 = vmul.f32 %v5840_v10, %v5820_v12 }
0x1683   : > { %v5762_v61 = vpop.permute.xlu0 %5761  ;;  %v7071_v2 = vpack.c.bf16 %v5800_v55, %v5796_v43  ;;  %v5872_v55 = vpop.permute.xlu1 %5871 }
0x1684   : > { %v5765_v47 = vsel %vm3543_vm14, %v5758_v48, %v5762_v61  ;;  %v5771_v59 = vsel %vm3543_vm14, %v5762_v61, %v5750_v28  ;;  %v5854_v28 = vmul.f32 %v5836_v29, %v5822_v11  ;;  %v5878_v61 = vsel %vm3655_vm0, %v5860_v34, %v5864_v21 }
0x1685   : > { %v5797_v45 = vmul.f32 %v5786_v56, %v5765_v47  ;;  %v5798_v39 = vmul.f32 %v5790_v16, %v5771_v59  ;;  %7072 = vmatprep.subr.bf16.mxu0 %v7071_v2  ;;  %v5890_v16 = vrot.slane %v6530_v57, %v9895_v46 }
0x1686   : > { %7074 = vmatpush1.bf16.msra.mxu0 %v7073_v13 }
0x1687   : > { %v7109_v17 = vpack.c.bf16 %v5801_v24, %v5797_v45  ;;  %v5804_v63 = vpop.permute.xlu0 %5803  ;;  %v7107_v22 = vpack.c.bf16 %v5802_v32, %v5798_v39  ;;  %v5914_v51 = vpop.permute.xlu1 %5913  ;;  %v5908_v59 = vmul.f32 %v5890_v16, %v5876_v9  ;;  %v5894_v24 = vrot.slane %v6530_v57, %v9912_v53 }
0x1688   : > { %v5898_v32 = vrot.slane %v6530_v57, %v9922_v60  ;;  %v5907_v39 = vmul.f32 %v5886_v14, %v5878_v61 }
0x1689   : > { %7108 = vmatprep.subr.bf16.mxu1 %v7107_v22 }
0x168a   : > { %7110 = vmatpush1.bf16.msra.mxu1 %v7109_v17  ;;  %v5874_v17 = vsel %vm3655_vm0, %v5868_v31, %v5872_v55 }
0x168b   : > { %v5808_v27 = vpop.permute.xlu0 %5807  ;;  %v5918_v22 = vpop.permute.xlu1 %5917 }
0x168c   : > { %v5823_v44 = vsel %vm3599_vm15, %v5804_v63, %v5808_v27  ;;  %v5932_v38 = vsel %vm3711_vm1, %v5914_v51, %v5918_v22 }
0x168d   : > { %v5849_v52 = vmul.f32 %v5832_v23, %v5823_v44  ;;  %v5909_v23 = vmul.f32 %v5894_v24, %v5874_v17 }
0x168f   : > { %v5812_v42 = vpop.permute.xlu0 %5811  ;;  %v7077_v37 = vpack.c.bf16 %v5853_v20, %v5849_v52 }
0x1690   : > { %v5821_v18 = vsel %vm3599_vm15, %v5808_v27, %v5812_v42 }
0x1691   : > { %v5850_v25 = vmul.f32 %v5836_v29, %v5821_v18 }
0x1693   : > { %v5816_v0 = vpop.permute.xlu0 %5815  ;;  %v7075_v26 = vpack.c.bf16 %v5854_v28, %v5850_v25 }
0x1694   : > { %v5819_v50 = vsel %vm3599_vm15, %v5812_v42, %v5816_v0  ;;  %v5825_v19 = vsel %vm3599_vm15, %v5816_v0, %v5804_v63  ;;  %v5880_v63 = vsel %vm3655_vm0, %v5872_v55, %v5860_v34  ;;  %v5922_v34 = vpop.permute.xlu1 %5921 }
0x1695   : > { %v5851_v48 = vmul.f32 %v5840_v10, %v5819_v50  ;;  %v5852_v49 = vmul.f32 %v5844_v62, %v5825_v19  ;;  %7076 = vmatprep.subr.bf16.mxu0 %v7075_v26  ;;  %v5910_v11 = vmul.f32 %v5898_v32, %v5880_v63  ;;  %v6531_v10 = vld [vmem:[%s11827_s30 + $0x20] sm:$0xf]  ;;  %v5930_v12 = vsel %vm3711_vm1, %v5918_v22, %v5922_v34 }
0x1696   : > { %7078 = vmatpush1.bf16.msra.mxu0 %v7077_v37  ;;  %v5944_v25 = vrot.slane %v6531_v10, %v9895_v46  ;;  %v5940_v20 = vrot.slane %v6531_v10, %v9920_v15  ;;  %v5948_v46 = vrot.slane %v6531_v10, %v9912_v53 }
0x1697   : > { %v7113_v30 = vpack.c.bf16 %v5855_v40, %v5851_v48  ;;  %v5858_v54 = vpop.permute.xlu0 %5857  ;;  %v7111_v56 = vpack.c.bf16 %v5856_v36, %v5852_v49  ;;  %v5952_v40 = vrot.slane %v6531_v10, %v9922_v60 }
0x1698   : > { %v5926_v0 = vpop.permute.xlu1 %5925  ;;  %v5962_v19 = vmul.f32 %v5944_v25, %v5930_v12  ;;  %v5961_v48 = vmul.f32 %v5940_v20, %v5932_v38 }
0x1699   : > { %7112 = vmatprep.subr.bf16.mxu1 %v7111_v56  ;;  %v5928_v15 = vsel %vm3711_vm1, %v5922_v34, %v5926_v0  ;;  %v5934_v49 = vsel %vm3711_vm1, %v5926_v0, %v5914_v51 }
0x169a   : > { %7114 = vmatpush1.bf16.msra.mxu1 %v7113_v30  ;;  %v5963_v53 = vmul.f32 %v5948_v46, %v5928_v15 }
0x169b   : > { %v5862_v33 = vpop.permute.xlu0 %5861 }
0x169c   : > { %v5877_v43 = vsel %vm3655_vm0, %v5858_v54, %v5862_v33 }
0x169d   : > { %v5903_v13 = vmul.f32 %v5886_v14, %v5877_v43 }
0x169f   : > { %v5866_v2 = vpop.permute.xlu0 %5865  ;;  %v7081_v21 = vpack.c.bf16 %v5907_v39, %v5903_v13 }
0x16a0   : > { %v5875_v47 = vsel %vm3655_vm0, %v5862_v33, %v5866_v2  ;;  %v5964_v33 = vmul.f32 %v5952_v40, %v5934_v49 }
0x16a1   : > { %v5904_v45 = vmul.f32 %v5890_v16, %v5875_v47 }
0x16a3   : > { %v5870_v41 = vpop.permute.xlu0 %5869  ;;  %v7079_v27 = vpack.c.bf16 %v5908_v59, %v5904_v45 }
0x16a4   : > { %v5873_v29 = vsel %vm3655_vm0, %v5866_v2, %v5870_v41  ;;  %v5879_v44 = vsel %vm3655_vm0, %v5870_v41, %v5858_v54 }
0x16a5   : > { %v5905_v35 = vmul.f32 %v5894_v24, %v5873_v29  ;;  %v5906_v42 = vmul.f32 %v5898_v32, %v5879_v44  ;;  %7080 = vmatprep.subr.bf16.mxu0 %v7079_v27 }
0x16a6   : > { %7082 = vmatpush1.bf16.msra.mxu0 %v7081_v21 }
0x16a7   : > { %v7117_v52 = vpack.c.bf16 %v5909_v23, %v5905_v35  ;;  %v5912_v18 = vpop.permute.xlu0 %5911  ;;  %v7115_v28 = vpack.c.bf16 %v5910_v11, %v5906_v42 }
0x16a9   : > { %7116 = vmatprep.subr.bf16.mxu1 %v7115_v28 }
0x16aa   : > { %7118 = vmatpush1.bf16.msra.mxu1 %v7117_v52 }
0x16ab   : > { %v5916_v62 = vpop.permute.xlu0 %5915 }
0x16ac   : > { %v5931_v31 = vsel %vm3711_vm1, %v5912_v18, %v5916_v62 }
0x16ad   : > { %v5957_v37 = vmul.f32 %v5940_v20, %v5931_v31 }
0x16af   : > { %v5920_v26 = vpop.permute.xlu0 %5919  ;;  %v7085_v55 = vpack.c.bf16 %v5961_v48, %v5957_v37 }
0x16b0   : > { %v5929_v50 = vsel %vm3711_vm1, %v5916_v62, %v5920_v26 }
0x16b1   : > { %v5958_v36 = vmul.f32 %v5944_v25, %v5929_v50 }
0x16b3   : > { %v5924_v30 = vpop.permute.xlu0 %5923  ;;  %v7083_v54 = vpack.c.bf16 %v5962_v19, %v5958_v36 }
0x16b4   : > { %v5927_v56 = vsel %vm3711_vm1, %v5920_v26, %v5924_v30  ;;  %v5933_v57 = vsel %vm3711_vm1, %v5924_v30, %v5912_v18 }
0x16b5   : > { %v5959_v60 = vmul.f32 %v5948_v46, %v5927_v56  ;;  %v5960_v16 = vmul.f32 %v5952_v40, %v5933_v57  ;;  %7084 = vmatprep.subr.bf16.mxu0 %v7083_v54 }
0x16b6   : > { %7086 = vmatpush1.bf16.msra.mxu0 %v7085_v55 }
0x16b7   : > { %v7121_v43 = vpack.c.bf16 %v5963_v53, %v5959_v60  ;;  %v7119_v14 = vpack.c.bf16 %v5964_v33, %v5960_v16 }
0x16b9   : > { %6030 = vmatmul.mubr.f32.vlgmr.msra.gmra.mrb[12].mxu0 %v7775_v1  ;;  %7120 = vmatprep.subr.bf16.mxu1 %v7119_v14 }
0x16ba   : > { %7122 = vmatpush1.bf16.msra.mxu1 %v7121_v43  ;;  %6533 = vmatprep.mubr.msk.f32.mxu0 %vm3751_vm9, %v7781_v4 }
0x16bd   : > { %6107 = vmatmul.mubr.f32.vlgmr.msra.gmra.mrb[12].mxu1 %v7775_v1  ;;  %6036 = vmatmul.mubr.f32.gmra.mrb[14].mxu0 %v7779_v3 }
0x16be   : > { %6535 = vmatprep.mubr.msk.f32.mxu1 %vm3751_vm9, %v7781_v4 }
0x16c1   : > { %6113 = vmatmul.mubr.f32.gmra.mrb[14].mxu1 %v7779_v3 }
0x178c   : > { %v11649_v58 = vpop.f32.mrb[12].mxu0 }
0x178d   : > { %v6127_v51 = vmul.f32 %v11649_v58, %v11649_v58  ;;  %v11653_v9 = vpop.f32.mrb[13].mxu0 }
0x178e   : > { %v6119_v61 = vadd.f32 %v11653_v9, %v11649_v58  ;;  %v6128_v1 = vmul.f32 %v11653_v9, %v11653_v9 }
0x1790   : > { %6120 = vadd.xlane.f32.xlu0 %v6119_v61  ;;  %v11659_v2 = vpop.f32.mrb[12].mxu1  ;;  %v6131_v13 = vadd.f32 %v6128_v1, %v6127_v51  ;;  %v11661_v4 = vpop.f32.mrb[14].mxu0 }
0x1791   : > { %v6193_v3 = vmul.f32 %v11659_v2, %v11659_v2  ;;  %v11665_v47 = vpop.f32.mrb[13].mxu1  ;;  %v6129_v59 = vmul.f32 %v11661_v4, %v11661_v4  ;;  %v11669_v24 = vpop.f32.mrb[15].mxu0 }
0x1792   : > { %v6185_v32 = vadd.f32 %v11665_v47, %v11659_v2  ;;  %v6194_v45 = vmul.f32 %v11665_v47, %v11665_v47  ;;  %v6122_v39 = vadd.f32 %v11669_v24, %v11661_v4  ;;  %v6130_v17 = vmul.f32 %v11669_v24, %v11669_v24 }
0x1794   : > { %6132 = vadd.xlane.f32.xlu0 %v6131_v13  ;;  %v11679_v63 = vpop.f32.mrb[14].mxu1  ;;  %v6197_v22 = vadd.f32 %v6194_v45, %v6193_v3  ;;  %v6134_v41 = vadd.f32 %v6130_v17, %v6129_v59  ;;  %6123 = vadd.xlane.f32.xlu1 %v6122_v39 }
0x1795   : > { %v6195_v27 = vmul.f32 %v11679_v63, %v11679_v63  ;;  %v11683_v21 = vpop.f32.mrb[15].mxu1 }
0x1796   : > { %v6188_v29 = vadd.f32 %v11683_v21, %v11679_v63  ;;  %v6196_v44 = vmul.f32 %v11683_v21, %v11683_v21 }
0x1798   : > { %6186 = vadd.xlane.f32.xlu0 %v6185_v32  ;;  %v6200_v23 = vadd.f32 %v6196_v44, %v6195_v27 }
0x179c   : > { %6198 = vadd.xlane.f32.xlu0 %v6197_v22 }
0x17a0   : > { %6189 = vadd.xlane.f32.xlu0 %v6188_v29 }
0x17a4   : > { %6135 = vadd.xlane.f32.xlu0 %v6134_v41 }
0x17a8   : > { %6201 = vadd.xlane.f32.xlu0 %v6200_v23 }
0x181d   : > { %v6121_v11 = vpop.xlane.xlu0 %6120 }
0x181e   : > { %v6125_v35 = vmul.f32 0.00390625, %v6121_v11 }
0x1820   : > { %v6139_v52 = vmul.f32 %v6125_v35, %v6125_v35 }
0x1821   : > { %v6133_v42 = vpop.xlane.xlu0 %6132  ;;  %v6124_v31 = vpop.xlane.xlu1 %6123 }
0x1822   : > { %v6137_v18 = vmul.f32 0.00390625, %v6133_v42  ;;  %v6126_v0 = vmul.f32 0.00390625, %v6124_v31 }
0x1824   : > { %v6141_v28 = vsub.f32 %v6137_v18, %v6139_v52  ;;  %v6140_v50 = vmul.f32 %v6126_v0, %v6126_v0 }
0x1825   : > { %v6187_v34 = vpop.xlane.xlu0 %6186 }
0x1826   : > { %v6143_v10 = vadd.f32 1e-05, %v6141_v28  ;;  %v6191_v62 = vmul.f32 0.00390625, %v6187_v34 }
0x1828   : > { %7321 = vrsqrt.f32 %v6143_v10  ;;  %v6205_v20 = vmul.f32 %v6191_v62, %v6191_v62 }
0x1829   : > { %v6199_v25 = vpop.xlane.xlu0 %6198 }
0x182a   : > { %v6203_v12 = vmul.f32 0.00390625, %v6199_v25 }
0x182c   : > { %v6207_v38 = vsub.f32 %v6203_v12, %v6205_v20 }
0x182d   : > { %v6190_v26 = vpop.xlane.xlu0 %6189 }
0x182e   : > { %v6209_v37 = vadd.f32 1e-05, %v6207_v38  ;;  %v6192_v40 = vmul.f32 0.00390625, %v6190_v26 }
0x1830   : > { %7323 = vrsqrt.f32 %v6209_v37  ;;  %v6206_v30 = vmul.f32 %v6192_v40, %v6192_v40 }
0x1831   : > { %v6136_v19 = vpop.xlane.xlu0 %6135 }
0x1832   : > { %v7322_v46 = vpop.eup %7321  ;;  %v6138_v36 = vmul.f32 0.00390625, %v6136_v19 }
0x1833   : > { %v6147_v48 = vmul.f32 %v7322_v46, %v7786_v5 }
0x1834   : > { %v6142_v15 = vsub.f32 %v6138_v36, %v6140_v50 }
0x1835   : > { %6151 = vperm.xlu1 %7295, %v6147_v48   ;;  %v6202_v49 = vpop.xlane.xlu0 %6201  ;;  %v6163_v60 = vmul.f32 %v6147_v48, %v6125_v35 }
0x1836   : > { %v6144_v54 = vadd.f32 1e-05, %v6142_v15  ;;  %v6204_v55 = vmul.f32 0.00390625, %v6202_v49 }
0x1837   : > { %v6165_v16 = vsub.f32 %v7796_v7, %v6163_v60 }
0x1838   : > { %7325 = vrsqrt.f32 %v6144_v54  ;;  %v6208_v56 = vsub.f32 %v6204_v55, %v6206_v30 }
0x183a   : > { %v7324_v57 = vpop.eup %7323  ;;  %v6210_v53 = vadd.f32 1e-05, %v6208_v56 }
0x183b   : > { %v6213_v33 = vmul.f32 %v7324_v57, %v7786_v5 }
0x183c   : > { %7327 = vrsqrt.f32 %v6210_v53 }
0x183d   : > { %6217 = vperm.xlu1 %7295, %v6213_v33   ;;  %v6229_v1 = vmul.f32 %v6213_v33, %v6191_v62 }
0x183f   : > { %v6231_v13 = vsub.f32 %v7796_v7, %v6229_v1 }
0x1841   : > { %6169 = vperm.xlu1 %7295, %v6165_v16  }
0x1842   : > { %v7326_v43 = vpop.eup %7325 }
0x1843   : > { %v6148_v14 = vmul.f32 %v7326_v43, %v7791_v6 }
0x1845   : > { %6156 = vperm.xlu0 %7296, %v6148_v14   ;;  %v6164_v3 = vmul.f32 %v6148_v14, %v6126_v0 }
0x1846   : > { %v7328_v51 = vpop.eup %7327 }
0x1847   : > { %v6214_v61 = vmul.f32 %v7328_v51, %v7791_v6  ;;  %v6166_v5 = vsub.f32 %v7801_v8, %v6164_v3 }
0x1849   : > { %6222 = vperm.xlu1 %7295, %v6214_v61   ;;  %v6230_v59 = vmul.f32 %v6214_v61, %v6192_v40 }
0x184b   : > { %v6232_v32 = vsub.f32 %v7801_v8, %v6230_v59 }
0x184d   : > { %6235 = vperm.xlu1 %7295, %v6231_v13  }
0x1851   : > { %6174 = vperm.xlu1 %7295, %v6166_v5  }
0x1855   : > { %6240 = vperm.xlu1 %7295, %v6232_v32  }
0x18b4   : > { %v6152_v45 = vpop.permute.xlu1 %6151 }
0x18b5   : > { %v6159_v6 = vmul.f32 %v6152_v45, %v11649_v58  ;;  %v6160_v29 = vmul.f32 %v6152_v45, %v11653_v9 }
0x18bc   : > { %v6218_v39 = vpop.permute.xlu1 %6217 }
0x18bd   : > { %v6225_v52 = vmul.f32 %v6218_v39, %v11659_v2  ;;  %v6226_v18 = vmul.f32 %v6218_v39, %v11665_v47 }
0x18c0   : > { %v6170_v17 = vpop.permute.xlu1 %6169 }
0x18c1   : > { %v6177_v11 = vadd.f32 %v6170_v17, %v6159_v6  ;;  %v6178_v35 = vadd.f32 %v6170_v17, %v6160_v29 }
0x18c4   : > { %v6157_v41 = vpop.permute.xlu0 %6156 }
0x18c5   : > { %v6161_v7 = vmul.f32 %v6157_v41, %v11661_v4  ;;  %v6162_v44 = vmul.f32 %v6157_v41, %v11669_v24 }
0x18c8   : > { %v6223_v22 = vpop.permute.xlu1 %6222 }
0x18c9   : > { %v6227_v28 = vmul.f32 %v6223_v22, %v11679_v63  ;;  %v6228_v58 = vmul.f32 %v6223_v22, %v11683_v21 }
0x18cc   : > { %v6236_v27 = vpop.permute.xlu1 %6235 }
0x18cd   : > { %v6243_v4 = vadd.f32 %v6236_v27, %v6225_v52  ;;  %v6244_v10 = vadd.f32 %v6236_v27, %v6226_v18 }
0x18d0   : > { %v6175_v23 = vpop.permute.xlu1 %6174 }
0x18d1   : > { %v6179_v42 = vadd.f32 %v6175_v23, %v6161_v7  ;;  %v6180_v8 = vadd.f32 %v6175_v23, %v6162_v44 }
0x18d3   : > { %v6181_v9 = vadd.f32 %v6179_v42, %v6177_v11  ;;  %v6182_v34 = vadd.f32 %v6180_v8, %v6178_v35 }
0x18d4   : > { %v6241_v24 = vpop.permute.xlu1 %6240 }
0x18d5   : > { %v6183_v62 = vmax.f32 %v6181_v9, 0.0  ;;  %v6184_v25 = vmax.f32 %v6182_v34, 0.0  ;;  %v6245_v31 = vadd.f32 %v6241_v24, %v6227_v28  ;;  %v6246_v20 = vadd.f32 %v6241_v24, %v6228_v58 }
0x18d7   : > { %6251 = vst [vmem:[#allocation2] sm:$0xff] %v6183_v62  ;;  %6252 = vst [vmem:[#allocation2 + $0x8] sm:$0xff] %v6184_v25  ;;  %v6247_v2 = vadd.f32 %v6245_v31, %v6243_v4  ;;  %v6248_v47 = vadd.f32 %v6246_v20, %v6244_v10 }
0x18d8   : > { %6255 = vst [vmem:[%s7772_s18] sm:$0xff] %v6183_v62  ;;  %6256 = vst [vmem:[%s7772_s18 + $0x8] sm:$0xff] %v6184_v25 }
0x18d9   : > { %v6249_v63 = vmax.f32 %v6247_v2, 0.0  ;;  %v6250_v12 = vmax.f32 %v6248_v47, 0.0 }
0x18db   : > { %6253 = vst [vmem:[#allocation2 + $0x10] sm:$0xff] %v6249_v63  ;;  %6254 = vst [vmem:[#allocation2 + $0x18] sm:$0xff] %v6250_v12 }
0x18dc   : > { %6257 = vst [vmem:[%s7772_s18 + $0x10] sm:$0xff] %v6249_v63  ;;  %6258 = vst [vmem:[%s7772_s18 + $0x18] sm:$0xff] %v6250_v12 }
0x18dd PF: > { %s11828_s30 = sld [smem:[#allocation15_spill]]  ;;  %s6537_s9 = sshll.u32 %s7497_s24, 1 }
0x18de   : > { %s6268_s27 = ssub.s32 1, %s6537_s9  ;;  %s6280_s29 = sshll.u32 %s7772_s18, 4  ;;  %s11714_s29 = int_to_ptr.vmem [resolvable:$true] %s6280_s29 }
0x18df   : > { %s6269_s26 = smul.u32 %s7501_s25, %s6268_s27  ;;  %s6540_s14 = sshll.u32 %s7501_s25, 5 }
0x18e0   : > { %s11829_s13 = sld [smem:[#allocation20_spill]]  ;;  %s11723_s16 = scalar_lea.sflag [#allocation5], %s290_s4 }
0x18e1   : > { %s6270_s10 = sadd.s32 %s7497_s24, %s6269_s26  ;;  %s7387_s15 = scalar_lea.vmem %s11714_s29, 2048 }
0x18e2   : > { %s6546_s6 = sshll.u32 %s6270_s10, 4  ;;  %p7388_p11 = scmp.ne.s32.totalorder %s11714_s29, %s7387_s15 }
0x18e3   : > { %s6277_s7 = sadd.s32 %s6546_s6, %s6540_s14  ;;  %p11830_p13 = scmp.ne.s32.totalorder %s11828_s30, 0 }
0x18e4   : > { %s6541_s1 = sshll.u32 %s6277_s7, 7  ;;  %s7540_s24 = smov [#allocation8]  }
0x18e5   : > { %p7389_p0 = pnand %p7388_p11, %p11830_p13  ;;  %s7391_s25 = sshll.u32 %s7540_s24, 4  ;;  %s7392_s25 = int_to_ptr.vmem [resolvable:$false] %s7391_s25 }
0x18e6   : > { %s11719_s12 = scalar_lea.hbm %s11829_s13, %s6541_s1  ;;  %s7393_s18 = scalar_lea.vmem %s7392_s25, 4096 }
0x18e7   : > { %p7390_p2 = pneg %p7389_p0  ;;  %p7394_p5 = scmp.lt.s32.totalorder %s11714_s29, %s7392_s25 }
0x18e8   : > { %p7395_p8 = scmp.lt.s32.totalorder %s7393_s18, %s7387_s15 }
0x18ea   : > { %p7396_p12 = por %p7395_p8, %p7394_p5 }
0x18ec   : > { %p7397_p1 = pnand %p7396_p12, %p7390_p2 }
0x18ee   : > { %7400 = shalt.err (!%p7397_p1)
}
0x18ef   : > { %s7401_s4 = scalar_lea.hbm %s11719_s12, 2048  ;;  %s7405_s26 = scalar_lea.hbm %s11829_s13, 8192 }
0x18f0   : > { %p7402_p7 = scmp.ne.s32.totalorder %s11719_s12, %s7401_s4  ;;  %p7406_p3 = scmp.lt.u32.totalorder %s11719_s12, %s11829_s13 }
0x18f1   : > { %p7407_p6 = scmp.lt.u32.totalorder %s7405_s26, %s7401_s4  ;;  %p7409_p11 = scmp.lt.u32.totalorder %s7401_s4, %s11719_s12 }
0x18f2   : > { %p7403_p9 = pnand %p7402_p7, %p11830_p13 }
0x18f3   : > { %p7408_p10 = por %p7407_p6, %p7406_p3 }
0x18f4   : > { %p7404_p4 = pneg %p7403_p9 }
0x18f5   : > { %p7410_p0 = por %p7409_p11, %p7408_p10 }
0x18f7   : > { %p7411_p2 = pnand %p7410_p0, %p7404_p4 }
0x18f9   : > { %7414 = shalt.err (!%p7411_p2)
}
0x18fa   : > { %s7541_s6 = smov 512   ;;  %s7542_s7 = smov 32  }
0x18fb   : > { %7129 = dma.vmem_to_hbm [thread:$0]  (%p11830_p13), %s11714_s29, 2048, %s11719_s12, %s11723_s16, %s7541_s6, %s7541_s6, %s7542_s7  }
0x18fc PF: > { %s11831_s1 = sld [smem:[#allocation12_spill]]  ;;  %s11832_s17 = sld [smem:[#allocation16_spill]] }
0x18fd   : > { %p7146_p5 = scmp.ge.s32.totalorder %s7513_s28, 2 }
0x1902   : > { %s6295_s11 = sand.u32 1, %s11831_s1   ;;  %p11833_p8 = scmp.ne.s32.totalorder %s11832_s17, 0 }
0x1903   : > { %s6296_s15 = scalar_lea.sflag [#allocation5], %s6295_s11 }
0x1904   : > { %p7140_p12 = pnand %p7146_p5, %p11833_p8 }
0x1906   : > { %7468 = dma.done.wait (!%p7140_p12), %s6296_s15, 2048  }
0x1907   : > { %7470 = vsyncadd (!%p7140_p12), %s6296_s15, 4294965248  ;;  %s22_s28 = sadd.s32 1, %s7513_s28   ;;  %s11834_s24 = sld [smem:[#allocation13_spill]] }
0x1908   : > { %p19_p1 = scmp.ge.s32.totalorder %s22_s28, 6   ;;  %s11835_s25 = sld [smem:[#allocation14_spill]] }
0x1909   : > { %s11836_s30 = smov %s11846_s21  ;;  %s11837_s27 = sld [smem:[#allocation17_spill]] }
0x190a   : > { %s11838_s18 = smov %s7477_s19  ;;  %s11839_s19 = smov %s7481_s20 }
0x190b   : > { %s11840_s20 = smov %s7711_s8  ;;  %s11841_s21 = smov %s7489_s22 }
0x190c   : > { %s11842_s22 = smov %s7493_s23  ;;  %s11843_s23 = smov %s7708_s5 }
0x190d   : > { %s11844_s26 = smov %s11836_s30  ;;  %21 = sbr.rel (!%p19_p1) target bundleno = 14 (0xe), region = 127 }
0x1914   :  { %6301 = vsyncpa [#allocation4], 1 }
0x1915   :  { %6303 = vsyncpa [#allocation4 + $0x1], 1 }
0x1916   :  { %6304 = vsyncpa [#allocation7], 1 }
0x1917   :  { %6305 = vsyncpa [#allocation5], 1 }
0x1918   :  { %6307 = vsyncpa [#allocation5 + $0x1], 1 }

</bundles_post_ra>
